<compile_context>
chip_gen: v7x
topology: tpu7x:2x2x1
jax: 0.10.0
libtpu: 0.0.40
codegen_flags: <defaults>
</compile_context>

<pallas_src>
import functools
import math

import jax
import jax.numpy as jnp
from jax import lax
from jax.experimental import pallas as pl
from jax.experimental.pallas import tpu as pltpu

NEG = -1e30                       # stand-in for -inf used by masked_fill_
BF16 = jnp.bfloat16
VMEM_LIMIT = 32 * 1024 * 1024     # explicit scoped-VMEM limit (fits all gens)

_VMEM = pl.BlockSpec(memory_space=pltpu.MemorySpace.VMEM)
_SMEM = pl.BlockSpec(memory_space=pltpu.MemorySpace.SMEM)


# --------------------------------------------------------------------------
# helpers usable both inside and outside kernels (all stats kept in f32)
# --------------------------------------------------------------------------
def layer_norm(x, g, b, eps=1e-12):
    mu = jnp.mean(x, axis=-1, keepdims=True)
    var = jnp.mean((x - mu) ** 2, axis=-1, keepdims=True)
    return (x - mu) * jax.lax.rsqrt(var + eps) * g + b


def _gelu(x):
    # TODO(synk): HF BERT uses exact erf-GELU; tanh approximation keeps the
    # Mosaic lowering simple (encoder weights are synthetic anyway).
    c = math.sqrt(2.0 / math.pi)
    return 0.5 * x * (1.0 + jnp.tanh(c * (x + 0.044715 * x * x * x)))


def _softmax_last(x):
    x = x - jnp.max(x, axis=-1, keepdims=True)
    e = jnp.exp(x)
    return e * pl.reciprocal(jnp.sum(e, axis=-1, keepdims=True), approx=True)


# --------------------------------------------------------------------------
# generic nn.Linear kernel (NER head + fused loop-invariant projection)
# --------------------------------------------------------------------------
def _linear_kernel(x_ref, w_ref, b_ref, o_ref):
    o_ref[...] = (jnp.dot(x_ref[...], w_ref[...],
                          preferred_element_type=jnp.float32) + b_ref[...])


def plinear(x, w, b):
    """nn.Linear: x @ w + b (bf16 MXU inputs, f32 accumulate), row-tiled grid."""
    lead, k, n = x.shape[:-1], x.shape[-1], w.shape[-1]
    x2 = x.reshape(-1, k).astype(BF16)
    rows = x2.shape[0]
    tile = 8 if rows % 8 == 0 else rows
    # TODO(synk): at real dims also tile the output columns ((8,128)-aligned).
    out = pl.pallas_call(
        _linear_kernel,
        out_shape=jax.ShapeDtypeStruct((rows, n), jnp.float32),
        grid=(rows // tile,),
        in_specs=[pl.BlockSpec((tile, k), lambda i: (i, 0)), _VMEM, _VMEM],
        out_specs=pl.BlockSpec((tile, n), lambda i: (i, 0)),
        compiler_params=pltpu.CompilerParams(
            dimension_semantics=("parallel",), vmem_limit_bytes=VMEM_LIMIT),
    )(x2, w.astype(BF16), b.reshape(1, n).astype(jnp.float32))
    return out.reshape(lead + (n,))


# --------------------------------------------------------------------------
# fused BertLayer kernel: QKV + per-head SDPA + attn-out + LN + FFN(GELU) + LN
# grid over batch; mask passed as [B,1,S] (encoder) or [B,S,S] (span layer)
# --------------------------------------------------------------------------
def _bert_layer_kernel(hs_ref, mask_ref, qkvw_ref, qkvb_ref, aow_ref, aob_ref,
                       alng_ref, alnb_ref, iw_ref, ib_ref, ow_ref, ob_ref,
                       olng_ref, olnb_ref, o_ref, *, nh):
    x = hs_ref[0]                          # [S, H] f32 (current batch element)
    mask_add = mask_ref[0]                 # [1,S] or [S,S] additive, bcast below
    s, h = x.shape
    dh = h // nh
    scale = 1.0 / math.sqrt(dh)

    # fused Q/K/V projection: one [S,H] x [H,3H] bf16 matmul
    qkv = (jnp.dot(x.astype(BF16), qkvw_ref[...],
                   preferred_element_type=jnp.float32) + qkvb_ref[...])
    qkv16 = qkv.astype(BF16)

    # Per-head SDPA via lane slices (contraction depth identical to a batched
    # einsum; the MXU-relevant fix is the single K=H output projection below
    # instead of nh K=dh matmuls).
    ctx_heads = []
    for hi in range(nh):
        q = qkv16[:, hi * dh:(hi + 1) * dh]
        k = qkv16[:, h + hi * dh:h + (hi + 1) * dh]
        v = qkv16[:, 2 * h + hi * dh:2 * h + (hi + 1) * dh]
        sc = jnp.einsum('qd,kd->qk', q, k,
                        preferred_element_type=jnp.float32) * scale + mask_add
        p = _softmax_last(sc)
        ctx_heads.append(jnp.dot(p.astype(BF16), v,
                                 preferred_element_type=jnp.float32))
    ctx = jnp.concatenate(ctx_heads, axis=-1)                      # [S, H]
    attn = (jnp.dot(ctx.astype(BF16), aow_ref[...],
                    preferred_element_type=jnp.float32) + aob_ref[...])

    hs1 = layer_norm(attn + x, alng_ref[...], alnb_ref[...])
    inter = _gelu(jnp.dot(hs1.astype(BF16), iw_ref[...],
                          preferred_element_type=jnp.float32) + ib_ref[...])
    out = (jnp.dot(inter.astype(BF16), ow_ref[...],
                   preferred_element_type=jnp.float32) + ob_ref[...] + hs1)
    o_ref[0] = layer_norm(out, olng_ref[...], olnb_ref[...])


def bert_layer_fused(hs, mask_add, p, nh):
    b, s, h = hs.shape
    mrows = mask_add.shape[1]
    ff = p["i_w"].shape[1]
    return pl.pallas_call(
        functools.partial(_bert_layer_kernel, nh=nh),
        out_shape=jax.ShapeDtypeStruct((b, s, h), jnp.float32),
        grid=(b,),
        in_specs=[pl.BlockSpec((1, s, h), lambda bi: (bi, 0, 0)),
                  pl.BlockSpec((1, mrows, s), lambda bi: (bi, 0, 0))]
                 + [_VMEM] * 12,
        out_specs=pl.BlockSpec((1, s, h), lambda bi: (bi, 0, 0)),
        compiler_params=pltpu.CompilerParams(
            dimension_semantics=("parallel",), vmem_limit_bytes=VMEM_LIMIT),
    )(hs, mask_add,
      p["qkv_w"].astype(BF16), p["qkv_b"].reshape(1, 3 * h),
      p["ao_w"].astype(BF16), p["ao_b"].reshape(1, h),
      p["aln_g"].reshape(1, h), p["aln_b"].reshape(1, h),
      p["i_w"].astype(BF16), p["i_b"].reshape(1, ff),
      p["o_w"].astype(BF16), p["o_b"].reshape(1, h),
      p["oln_g"].reshape(1, h), p["oln_b"].reshape(1, h))


# --------------------------------------------------------------------------
# fused decoder kernel: the WHOLE greedy decode loop, grid=(trg_rel_cnt,)
# --------------------------------------------------------------------------
def _decoder_kernel(uh_ref, enc_ref, xp1f_ref, xp1b_ref, xp2f_ref, xp2b_ref,
                    maskb_ref, relemb_ref,
                    ww_ref, wb_ref, aqw_ref, aqb_ref, avw_ref, avb_ref,
                    ihw_ref, hhw_ref, lb_ref,
                    wih_hid_ref, whh_ref, wih_e1_ref,
                    ptrw_ref, ptrb_ref, relw_ref, relb_ref,
                    out_ref,
                    prev_scr, h_scr, c_scr, arg1_scr, arg2_scr, dinp_scr,
                    f1_scr, b1_scr, f2_scr, b2_scr):
    step = pl.program_id(0)
    bnum, seq, hd = uh_ref.shape
    rel_size = relemb_ref.shape[0]

    # ---- carried decoder state lives in VMEM scratch across grid steps ----
    @pl.when(step == 0)
    def _():
        prev_scr[...] = jnp.zeros_like(prev_scr)
        h_scr[...] = jnp.zeros_like(h_scr)
        c_scr[...] = jnp.zeros_like(c_scr)
        arg1_scr[...] = jnp.zeros_like(arg1_scr)
        arg2_scr[...] = jnp.zeros_like(arg2_scr)
        dinp_scr[...] = jnp.zeros_like(dinp_scr)

    @pl.when(step != 0)
    def _():
        prev_scr[...] = prev_scr[...] + jnp.concatenate(
            [arg1_scr[...], arg2_scr[...], dinp_scr[...]], axis=-1)

    prev = prev_scr[...]                                   # [B, 9H]
    prev16 = prev.astype(BF16)
    mask_bs = maskb_ref[...]                               # [B, S] 1.0 = pad
    mask_sb = jnp.transpose(mask_bs)                       # [S, B]

    # ---- reduce_prev_tuples (self.w) + Bahdanau attention (uh precomputed) --
    red = (jnp.dot(prev16, ww_ref[...],
                   preferred_element_type=jnp.float32) + wb_ref[...])
    wq = (jnp.dot(red.astype(BF16), aqw_ref[...],
                  preferred_element_type=jnp.float32) + aqb_ref[...])
    tq = jnp.tanh(uh_ref[...] + wq[:, None, :])            # [B, S, H]
    sc = jnp.sum(tq * avw_ref[...][None], axis=-1) + avb_ref[0, 0]
    sc = jnp.where(mask_bs > 0.5, NEG, sc)
    p_att = _softmax_last(sc)
    ctx = jnp.sum(p_att[:, :, None] * enc_ref[...], axis=1)  # [B, H]

    # ---- main LSTMCell on cat(prev_tuples, ctx); gate order (i,f,o,g) ----
    gates = (jnp.dot(prev16, ihw_ref[:9 * hd, :],
                     preferred_element_type=jnp.float32)
             + jnp.dot(ctx.astype(BF16), ihw_ref[9 * hd:, :],
                       preferred_element_type=jnp.float32)
             + jnp.dot(h_scr[...].astype(BF16), hhw_ref[...],
                       preferred_element_type=jnp.float32)
             + lb_ref[...])
    sig = jax.nn.sigmoid(gates[:, :3 * hd])
    c_new = (sig[:, hd:2 * hd] * c_scr[...]
             + sig[:, :hd] * jnp.tanh(gates[:, 3 * hd:]))
    hidden = sig[:, 2 * hd:3 * hd] * jnp.tanh(c_new)
    h_scr[...] = hidden
    c_scr[...] = c_new
    h16 = hidden.astype(BF16)

    # ---- pointer biLSTMs: fori_loop recurrence -> time-major VMEM scratch ----
    def run_lstm(gate_fn, whh16, out_scr, reverse):
        def body(i, carry):
            hh, cc = carry
            tt = (seq - 1 - i) if reverse else i
            g = gate_fn(tt) + jnp.dot(hh.astype(BF16), whh16,
                                      preferred_element_type=jnp.float32)
            sg = jax.nn.sigmoid(g[:, :3 * hd])
            cc = sg[:, hd:2 * hd] * cc + sg[:, :hd] * jnp.tanh(g[:, 3 * hd:])
            hh = sg[:, 2 * hd:3 * hd] * jnp.tanh(cc)
            out_scr[tt] = hh
            return hh, cc
        zero = jnp.zeros((bnum, hd), jnp.float32)
        lax.fori_loop(0, seq, body, (zero, zero))

    hid1f = jnp.dot(h16, wih_hid_ref[0], preferred_element_type=jnp.float32)
    hid1b = jnp.dot(h16, wih_hid_ref[1], preferred_element_type=jnp.float32)
    hid2f = jnp.dot(h16, wih_hid_ref[2], preferred_element_type=jnp.float32)
    hid2b = jnp.dot(h16, wih_hid_ref[3], preferred_element_type=jnp.float32)

    run_lstm(lambda tt: xp1f_ref[tt] + hid1f, whh_ref[0], f1_scr, False)
    run_lstm(lambda tt: xp1b_ref[tt] + hid1b, whh_ref[1], b1_scr, True)

    w2f_f = wih_e1_ref[0, :hd, :]
    w2f_b = wih_e1_ref[0, hd:, :]
    w2b_f = wih_e1_ref[1, :hd, :]
    w2b_b = wih_e1_ref[1, hd:, :]

    def g2f(tt):
        return (xp2f_ref[tt] + hid2f
                + jnp.dot(f1_scr[tt].astype(BF16), w2f_f,
                          preferred_element_type=jnp.float32)
                + jnp.dot(b1_scr[tt].astype(BF16), w2f_b,
                          preferred_element_type=jnp.float32))

    def g2b(tt):
        return (xp2b_ref[tt] + hid2b
                + jnp.dot(f1_scr[tt].astype(BF16), w2b_f,
                          preferred_element_type=jnp.float32)
                + jnp.dot(b1_scr[tt].astype(BF16), w2b_b,
                          preferred_element_type=jnp.float32))

    run_lstm(g2f, whh_ref[2], f2_scr, False)
    run_lstm(g2b, whh_ref[3], b2_scr, True)

    # ---- pointer heads over the VMEM scratch (vectorised, no O(S^2) trick) --
    # TODO(synk): at real S express these as [S*B,2H]@[2H,2] MXU matmuls.
    e1cat = jnp.concatenate([f1_scr[...], b1_scr[...]], axis=-1)   # [S, B, 2H]
    e2cat = jnp.concatenate([f2_scr[...], b2_scr[...]], axis=-1)

    def head(ecat, row):
        wv = ptrw_ref[row:row + 1, :]                              # [1, 2H]
        s_ = jnp.sum(ecat * wv[None], axis=-1) + ptrb_ref[0, row]  # [S, B]
        s_ = jnp.where(mask_sb > 0.5, NEG, s_)
        m = jnp.max(s_, axis=0, keepdims=True)
        e = jnp.exp(s_ - m)
        return e * pl.reciprocal(jnp.sum(e, axis=0, keepdims=True), approx=True)

    p1s, p1e = head(e1cat, 0), head(e1cat, 1)
    p2s, p2e = head(e2cat, 2), head(e2cat, 3)

    # attention-weighted argument vectors (NOTE: matches the PyTorch reference
    # exactly: arg*sv uses the END-pointer weights, arg*ev the START weights).
    def wsum(pw, ecat):
        return jnp.sum(pw[:, :, None] * ecat, axis=0)              # [B, 2H]

    arg1 = jnp.concatenate([wsum(p1e, e1cat), wsum(p1s, e1cat)], axis=-1)
    arg2 = jnp.concatenate([wsum(p2e, e2cat), wsum(p2s, e2cat)], axis=-1)
    arg1_scr[...] = arg1
    arg2_scr[...] = arg2

    # ---- relation softmax ----
    rel_in = jnp.concatenate([hidden, arg1, arg2], axis=-1)        # [B, 9H]
    logits = (jnp.dot(rel_in.astype(BF16), relw_ref[...],
                      preferred_element_type=jnp.float32) + relb_ref[...])
    rel = _softmax_last(logits)                                    # [B, rel_size]

    # ---- greedy next relation (topk(1)+1) + embedding for the next step ----
    ids = lax.broadcasted_iota(jnp.int32, (bnum, rel_size), 1)
    masked = jnp.where(ids >= 1, rel, -1.0)
    mmax = jnp.max(masked, axis=-1, keepdims=True)
    topi = jnp.min(jnp.where((masked >= mmax) & (ids >= 1), ids, rel_size),
                   axis=-1, keepdims=True)                         # [B, 1]
    onehot = (ids == topi).astype(jnp.float32)
    dinp_scr[...] = jnp.dot(onehot, relemb_ref[...],
                            preferred_element_type=jnp.float32)

    # ---- lane-packed output slab for this step: [rel | a1s | a1e | a2s | a2e]
    out_ref[0] = jnp.concatenate(
        [rel, jnp.transpose(p1s), jnp.transpose(p1e),
         jnp.transpose(p2s), jnp.transpose(p2e)], axis=-1)


def decoder_run(uh, enc_hs, xp1f, xp1b, xp2f, xp2b, mask_f, rel_emb, dp,
                trg_rel_cnt):
    b, s, hd = enc_hs.shape
    rel_size = rel_emb.shape[0]
    width = rel_size + 4 * s

    e1f, e1b = dp["e1"]["fwd"], dp["e1"]["bwd"]
    e2f, e2b = dp["e2"]["fwd"], dp["e2"]["bwd"]
    wih_hid = jnp.stack([e1f["w_ih"][hd:2 * hd], e1b["w_ih"][hd:2 * hd],
                         e2f["w_ih"][hd:2 * hd], e2b["w_ih"][hd:2 * hd]]
                        ).astype(BF16)                              # [4, H, 4H]
    whh_all = jnp.stack([e1f["w_hh"], e1b["w_hh"],
                         e2f["w_hh"], e2b["w_hh"]]).astype(BF16)    # [4, H, 4H]
    wih_e1 = jnp.stack([e2f["w_ih"][2 * hd:4 * hd],
                        e2b["w_ih"][2 * hd:4 * hd]]).astype(BF16)   # [2, 2H, 4H]
    ptrw = jnp.stack([dp["a1s_w"], dp["a1e_w"],
                      dp["a2s_w"], dp["a2e_w"]], axis=0)            # [4, 2H] f32
    ptrb = jnp.concatenate([dp["a1s_b"], dp["a1e_b"],
                            dp["a2s_b"], dp["a2e_b"]]).reshape(1, 4)
    lstm_b = (dp["lstm"]["b_ih"] + dp["lstm"]["b_hh"]).reshape(1, 4 * hd)

    return pl.pallas_call(
        _decoder_kernel,
        out_shape=jax.ShapeDtypeStruct((trg_rel_cnt, b, width), jnp.float32),
        grid=(trg_rel_cnt,),
        in_specs=[_VMEM] * 13 + [_SMEM] + [_VMEM] * 7 + [_SMEM] + [_VMEM] * 2,
        out_specs=pl.BlockSpec((1, b, width), lambda t: (t, 0, 0)),
        scratch_shapes=[
            pltpu.VMEM((b, 9 * hd), jnp.float32),   # prev_tuples
            pltpu.VMEM((b, hd), jnp.float32),       # h
            pltpu.VMEM((b, hd), jnp.float32),       # c
            pltpu.VMEM((b, 4 * hd), jnp.float32),   # arg1
            pltpu.VMEM((b, 4 * hd), jnp.float32),   # arg2
            pltpu.VMEM((b, hd), jnp.float32),       # next-step dec_inp
            pltpu.VMEM((s, b, hd), jnp.float32),    # e1 fwd outputs
            pltpu.VMEM((s, b, hd), jnp.float32),    # e1 bwd outputs
            pltpu.VMEM((s, b, hd), jnp.float32),    # e2 fwd outputs
            pltpu.VMEM((s, b, hd), jnp.float32),    # e2 bwd outputs
        ],
        compiler_params=pltpu.CompilerParams(
            dimension_semantics=("arbitrary",), vmem_limit_bytes=VMEM_LIMIT),
    )(uh, enc_hs, xp1f, xp1b, xp2f, xp2b, mask_f, rel_emb,
      dp["w_w"].astype(BF16), dp["w_b"].reshape(1, hd),
      dp["att_q_w"].astype(BF16), dp["att_q_b"].reshape(1, hd),
      dp["att_v_w"].reshape(1, hd), dp["att_v_b"].reshape(1, 1),
      dp["lstm"]["w_ih"].astype(BF16), dp["lstm"]["w_hh"].astype(BF16), lstm_b,
      wih_hid, whh_all, wih_e1, ptrw, ptrb,
      dp["rel_w"].astype(BF16), dp["rel_b"].reshape(1, rel_size))


# --------------------------------------------------------------------------
# full model forward (eval path, att_type == 1)
# --------------------------------------------------------------------------
def model_forward(params, src_words_seq, src_mask, ori_src_words_mask,
                  src_segment, input_span_mask, *, trg_rel_cnt,
                  dec_hidden_size, nh):
    b, s = src_words_seq.shape
    hd = dec_hidden_size

    # ---- synthetic BERT encoder (emb + LN, 1 fused transformer layer) ----
    pe = params["bert"]
    emb = (pe["word_emb"][src_words_seq]
           + pe["pos_emb"][None, :s, :]
           + pe["type_emb"][src_segment])
    hs = layer_norm(emb, pe["emb_ln_g"], pe["emb_ln_b"])
    enc_mask_add = ((1.0 - src_mask) * -10000.0)[:, None, :]       # [B,1,S]
    bert_out = bert_layer_fused(hs, enc_mask_add, pe["layer"], nh)
    # (BERT pooled output is never used by the returned tensors -> removed)

    # NER head on the BERT output, padded to a lane-dense 128-wide output.
    nv = params["ner_b"].shape[0]
    npad = ((nv + 127) // 128) * 128
    ner_w = jnp.zeros((hd, npad), jnp.float32).at[:, :nv].set(params["ner_w"])
    ner_b = jnp.zeros((npad,), jnp.float32).at[:nv].set(params["ner_b"])
    ner_logits = plinear(bert_out, ner_w, ner_b)[..., :nv]

    span_mask_add = (1.0 - input_span_mask) * -10000.0             # [B,S,S]
    span_out = bert_layer_fused(bert_out, span_mask_add,
                                params["span_layer"], nh)
    wmix = jax.nn.softmax(params["w"])
    enc_hs = params["gamma"][0] * (wmix[0] * bert_out + wmix[1] * span_out)

    # ---- loop-invariant decoder precompute: ONE fused lane-dense matmul and
    #      ONE transpose to time-major (shared by all decode steps) ----
    dp = params["decoder"]
    w_pre = jnp.concatenate(
        [dp["att_ctx_w"],
         dp["e1"]["fwd"]["w_ih"][:hd, :], dp["e1"]["bwd"]["w_ih"][:hd, :],
         dp["e2"]["fwd"]["w_ih"][:hd, :], dp["e2"]["bwd"]["w_ih"][:hd, :]],
        axis=1)
    b_pre = jnp.concatenate(
        [jnp.zeros((hd,), jnp.float32),
         dp["e1"]["fwd"]["b_ih"] + dp["e1"]["fwd"]["b_hh"],
         dp["e1"]["bwd"]["b_ih"] + dp["e1"]["bwd"]["b_hh"],
         dp["e2"]["fwd"]["b_ih"] + dp["e2"]["fwd"]["b_hh"],
         dp["e2"]["bwd"]["b_ih"] + dp["e2"]["bwd"]["b_hh"]], axis=0)
    pre = plinear(enc_hs, w_pre, b_pre)                    # [B, S, 17H]
    uh = pre[..., :hd]                                     # linear_ctx(enc_hs)
    pre_t = jnp.transpose(pre[..., hd:], (1, 0, 2))        # [S, B, 16H]
    h4 = 4 * hd
    xp1f = pre_t[..., 0 * h4:1 * h4]
    xp1b = pre_t[..., 1 * h4:2 * h4]
    xp2f = pre_t[..., 2 * h4:3 * h4]
    xp2b = pre_t[..., 3 * h4:4 * h4]

    dec_out = decoder_run(uh, enc_hs, xp1f, xp1b, xp2f, xp2b,
                          ori_src_words_mask, params["rel_emb"], dp,
                          trg_rel_cnt)                     # [T, B, W]

    rel_size = params["rel_emb"].shape[0]
    a = rel_size
    rel = jnp.transpose(dec_out[:, :, :a], (1, 0, 2))
    arg1s = jnp.transpose(dec_out[:, :, a:a + s], (1, 0, 2))
    arg1e = jnp.transpose(dec_out[:, :, a + s:a + 2 * s], (1, 0, 2))
    arg2s = jnp.transpose(dec_out[:, :, a + 2 * s:a + 3 * s], (1, 0, 2))
    arg2e = jnp.transpose(dec_out[:, :, a + 3 * s:a + 4 * s], (1, 0, 2))
    return rel, arg1s, arg1e, arg2s, arg2e, ner_logits


# --------------------------------------------------------------------------
# Deterministic parameter initialization
# --------------------------------------------------------------------------
def init_params(H, FF, bert_vocab, type_vocab, max_pos, ner_vocab, rel_size):
    base = jax.random.PRNGKey(0)
    cnt = [0]

    def rnd(shape, scale=0.02):
        cnt[0] += 1
        return (scale * jax.random.normal(jax.random.fold_in(base, cnt[0]),
                                          shape)).astype(jnp.float32)

    zeros = lambda *sh: jnp.zeros(sh, jnp.float32)
    ones = lambda *sh: jnp.ones(sh, jnp.float32)

    def bert_layer_p():
        return dict(qkv_w=rnd((H, 3 * H)), qkv_b=zeros(3 * H),
                    ao_w=rnd((H, H)), ao_b=zeros(H),
                    aln_g=ones(H), aln_b=zeros(H),
                    i_w=rnd((H, FF)), i_b=zeros(FF),
                    o_w=rnd((FF, H)), o_b=zeros(H),
                    oln_g=ones(H), oln_b=zeros(H))

    def lstm_p(in_dim):
        return dict(w_ih=rnd((in_dim, 4 * H)), b_ih=zeros(4 * H),
                    w_hh=rnd((H, 4 * H)), b_hh=zeros(4 * H))

    return dict(
        bert=dict(word_emb=rnd((bert_vocab, H)), pos_emb=rnd((max_pos, H)),
                  type_emb=rnd((type_vocab, H)),
                  emb_ln_g=ones(H), emb_ln_b=zeros(H),
                  layer=bert_layer_p()),
        ner_w=rnd((H, ner_vocab)), ner_b=zeros(ner_vocab),
        span_layer=bert_layer_p(),
        w=jnp.array([0.5, 0.5], jnp.float32),
        gamma=jnp.ones((1,), jnp.float32),
        rel_emb=rnd((rel_size, H)),
        decoder=dict(
            att_ctx_w=rnd((H, H)),
            att_q_w=rnd((H, H)), att_q_b=zeros(H),
            att_v_w=rnd((H,)), att_v_b=zeros(1),
            w_w=rnd((9 * H, H)), w_b=zeros(H),
            lstm=lstm_p(10 * H),
            e1=dict(fwd=lstm_p(2 * H), bwd=lstm_p(2 * H)),
            e2=dict(fwd=lstm_p(4 * H), bwd=lstm_p(4 * H)),
            a1s_w=rnd((2 * H,)), a1s_b=zeros(1),
            a1e_w=rnd((2 * H,)), a1e_b=zeros(1),
            a2s_w=rnd((2 * H,)), a2s_b=zeros(1),
            a2e_w=rnd((2 * H,)), a2e_b=zeros(1),
            rel_w=rnd((9 * H, rel_size)), rel_b=zeros(rel_size),
        ),
    )


# --------------------------------------------------------------------------
if __name__ == "__main__":
    B, S = 2, 8
    H, NH, FF = 32, 4, 64          # enc_hidden == dec_inp == dec_hidden
    BERT_VOCAB, TYPE_VOCAB, MAX_POS = 50, 2, 64
    NER_VOCAB, REL_SIZE, TRG_REL_CNT = 10, 5, 3

    params = init_params(H, FF, BERT_VOCAB, TYPE_VOCAB, MAX_POS,
                         NER_VOCAB, REL_SIZE)

    key = jax.random.PRNGKey(0)
    src_words_seq = jax.random.randint(key, (B, S), 0, BERT_VOCAB,
                                       dtype=jnp.int32)
    src_segment = jnp.zeros((B, S), jnp.int32)
    # BERT attention mask: 1 = keep (second example has one pad token)
    src_mask = jnp.ones((B, S), jnp.float32).at[1, S - 1].set(0.0)
    # ori_src_words_mask: 1.0 = pad position (masked_fill_ with -inf)
    ori_src_words_mask = jnp.zeros((B, S), jnp.float32).at[1, S - 1].set(1.0)
    input_span_mask = jnp.ones((B, S, S), jnp.float32)

    fwd = jax.jit(functools.partial(model_forward, trg_rel_cnt=TRG_REL_CNT,
                                    dec_hidden_size=H, nh=NH))
    out = jax.block_until_ready(fwd(params, src_words_seq, src_mask,
                                    ori_src_words_mask, src_segment,
                                    input_span_mask))
    rel, arg1s, arg1e, arg2s, arg2e, ner_logits = out

    assert rel.shape == (B, TRG_REL_CNT, REL_SIZE)
    assert arg1s.shape == (B, TRG_REL_CNT, S)
    assert arg1e.shape == (B, TRG_REL_CNT, S)
    assert arg2s.shape == (B, TRG_REL_CNT, S)
    assert arg2e.shape == (B, TRG_REL_CNT, S)
    assert ner_logits.shape == (B, S, NER_VOCAB)
    for a in (rel, arg1s, arg1e, arg2s, arg2e, ner_logits):
        assert bool(jnp.all(jnp.isfinite(a)))
    # softmax rows sum to ~1 (approx EUP reciprocal), pad position gets ~0 prob
    assert bool(jnp.allclose(jnp.sum(rel, -1), 1.0, atol=5e-3))
    assert bool(jnp.allclose(jnp.sum(arg1s, -1), 1.0, atol=5e-3))
    assert float(arg1s[1, 0, S - 1]) < 1e-6

    print("KERNEL_OK")
</pallas_src>

<mosaic_0001>
module attributes {stable_mosaic.version = 11 : i64} {
  func.func @_bert_layer_kernel(%arg0: i32, %arg1: memref<1x8x32xf32, #tpu.memory_space<vmem>>, %arg2: memref<1x8x8xf32, #tpu.memory_space<vmem>>, %arg3: memref<32x96xbf16, #tpu.memory_space<vmem>>, %arg4: memref<1x96xf32, #tpu.memory_space<vmem>>, %arg5: memref<32x32xbf16, #tpu.memory_space<vmem>>, %arg6: memref<1x32xf32, #tpu.memory_space<vmem>>, %arg7: memref<1x32xf32, #tpu.memory_space<vmem>>, %arg8: memref<1x32xf32, #tpu.memory_space<vmem>>, %arg9: memref<32x64xbf16, #tpu.memory_space<vmem>>, %arg10: memref<1x64xf32, #tpu.memory_space<vmem>>, %arg11: memref<64x32xbf16, #tpu.memory_space<vmem>>, %arg12: memref<1x32xf32, #tpu.memory_space<vmem>>, %arg13: memref<1x32xf32, #tpu.memory_space<vmem>>, %arg14: memref<1x32xf32, #tpu.memory_space<vmem>>, %arg15: memref<1x8x32xf32, #tpu.memory_space<vmem>>) attributes {dimension_semantics = [#tpu.dimension_semantics<parallel>], iteration_bounds = array<i64: 2>, scalar_prefetch = 0 : i64, scratch_operands = 0 : i64, tpu.core_type = #tpu.core_type<tc>, window_params = [{transform_indices = @transform_0, window_bounds = array<i64: 1, 8, 32>}, {transform_indices = @transform_1, window_bounds = array<i64: 1, 8, 8>}, {pipeline_mode = #tpu.pipeline_mode<synchronous>, transform_indices = @transform_2, window_bounds = array<i64: 32, 96>}, {pipeline_mode = #tpu.pipeline_mode<synchronous>, transform_indices = @transform_3, window_bounds = array<i64: 1, 96>}, {pipeline_mode = #tpu.pipeline_mode<synchronous>, transform_indices = @transform_4, window_bounds = array<i64: 32, 32>}, {pipeline_mode = #tpu.pipeline_mode<synchronous>, transform_indices = @transform_5, window_bounds = array<i64: 1, 32>}, {pipeline_mode = #tpu.pipeline_mode<synchronous>, transform_indices = @transform_6, window_bounds = array<i64: 1, 32>}, {pipeline_mode = #tpu.pipeline_mode<synchronous>, transform_indices = @transform_7, window_bounds = array<i64: 1, 32>}, {pipeline_mode = #tpu.pipeline_mode<synchronous>, transform_indices = @transform_8, window_bounds = array<i64: 32, 64>}, {pipeline_mode = #tpu.pipeline_mode<synchronous>, transform_indices = @transform_9, window_bounds = array<i64: 1, 64>}, {pipeline_mode = #tpu.pipeline_mode<synchronous>, transform_indices = @transform_10, window_bounds = array<i64: 64, 32>}, {pipeline_mode = #tpu.pipeline_mode<synchronous>, transform_indices = @transform_11, window_bounds = array<i64: 1, 32>}, {pipeline_mode = #tpu.pipeline_mode<synchronous>, transform_indices = @transform_12, window_bounds = array<i64: 1, 32>}, {pipeline_mode = #tpu.pipeline_mode<synchronous>, transform_indices = @transform_13, window_bounds = array<i64: 1, 32>}, {transform_indices = @transform_14, window_bounds = array<i64: 1, 8, 32>}]} {
    %c0 = arith.constant 0 : index
    %c0_0 = arith.constant 0 : index
    %c0_1 = arith.constant 0 : index
    %0 = vector.load %arg1[%c0, %c0_0, %c0_1] : memref<1x8x32xf32, #tpu.memory_space<vmem>>, vector<1x8x32xf32>
    %1 = vector.shape_cast %0 : vector<1x8x32xf32> to vector<8x32xf32>
    %c0_2 = arith.constant 0 : index
    %c0_3 = arith.constant 0 : index
    %c0_4 = arith.constant 0 : index
    %2 = vector.load %arg2[%c0_2, %c0_3, %c0_4] : memref<1x8x8xf32, #tpu.memory_space<vmem>>, vector<1x8x8xf32>
    %3 = vector.shape_cast %2 : vector<1x8x8xf32> to vector<8x8xf32>
    %4 = arith.truncf %1 : vector<8x32xf32> to vector<8x32xbf16>
    %c0_5 = arith.constant 0 : index
    %c0_6 = arith.constant 0 : index
    %5 = vector.load %arg3[%c0_5, %c0_6] : memref<32x96xbf16, #tpu.memory_space<vmem>>, vector<32x96xbf16>
    %cst = arith.constant dense<0.000000e+00> : vector<8x96xf32>
    %6 = tpu.matmul %4, %5, %cst {dimension_numbers = #tpu.dot_dimension_numbers<[1], [0], [0], [1], [0, 0, 1, 1], [], []>} : vector<8x32xbf16>, vector<32x96xbf16>, vector<8x96xf32> -> vector<8x96xf32>
    %c0_7 = arith.constant 0 : index
    %c0_8 = arith.constant 0 : index
    %7 = vector.load %arg4[%c0_7, %c0_8] : memref<1x96xf32, #tpu.memory_space<vmem>>, vector<1x96xf32>
    %8 = vector.broadcast %7 : vector<1x96xf32> to vector<8x96xf32>
    %9 = arith.addf %6, %8 : vector<8x96xf32>
    %10 = arith.truncf %9 : vector<8x96xf32> to vector<8x96xbf16>
    %11 = vector.extract_strided_slice %10 {offsets = [0, 0], sizes = [8, 8], strides = [1, 1]} : vector<8x96xbf16> to vector<8x8xbf16>
    %12 = vector.extract_strided_slice %10 {offsets = [0, 32], sizes = [8, 8], strides = [1, 1]} : vector<8x96xbf16> to vector<8x8xbf16>
    %13 = vector.extract_strided_slice %10 {offsets = [0, 64], sizes = [8, 8], strides = [1, 1]} : vector<8x96xbf16> to vector<8x8xbf16>
    "tpu.trace_start"() <{level = 10 : i32, message = "qd,kd->qk"}> : () -> ()
    %cst_9 = arith.constant dense<0.000000e+00> : vector<8x8xf32>
    %14 = tpu.matmul %11, %12, %cst_9 {dimension_numbers = #tpu.dot_dimension_numbers<[1], [1], [0], [0], [0, 0, 1, 0], [], []>} : vector<8x8xbf16>, vector<8x8xbf16>, vector<8x8xf32> -> vector<8x8xf32>
    "tpu.trace_stop"() : () -> ()
    %cst_10 = arith.constant 0.353553385 : f32
    %15 = vector.broadcast %cst_10 : f32 to vector<8x8xf32>
    %16 = arith.mulf %14, %15 : vector<8x8xf32>
    %17 = arith.addf %16, %3 : vector<8x8xf32>
    %cst_11 = arith.constant dense<0xFF800000> : vector<8xf32>
    %18 = vector.multi_reduction <maximumf>, %17, %cst_11 [1] : vector<8x8xf32> to vector<8xf32>
    %19 = vector.shape_cast %18 : vector<8xf32> to vector<8x1xf32>
    %20 = vector.broadcast %19 : vector<8x1xf32> to vector<8x8xf32>
    %21 = arith.subf %17, %20 : vector<8x8xf32>
    %22 = math.exp %21 : vector<8x8xf32>
    %cst_12 = arith.constant dense<0.000000e+00> : vector<8xf32>
    %23 = vector.multi_reduction <add>, %22, %cst_12 [1] : vector<8x8xf32> to vector<8xf32>
    %24 = vector.shape_cast %23 : vector<8xf32> to vector<8x1xf32>
    %25 = tpu.reciprocal %24 {approx = true} : vector<8x1xf32> -> vector<8x1xf32>
    %26 = vector.broadcast %25 : vector<8x1xf32> to vector<8x8xf32>
    %27 = arith.mulf %22, %26 : vector<8x8xf32>
    %28 = arith.truncf %27 : vector<8x8xf32> to vector<8x8xbf16>
    %cst_13 = arith.constant dense<0.000000e+00> : vector<8x8xf32>
    %29 = tpu.matmul %28, %13, %cst_13 {dimension_numbers = #tpu.dot_dimension_numbers<[1], [0], [0], [1], [0, 0, 1, 1], [], []>} : vector<8x8xbf16>, vector<8x8xbf16>, vector<8x8xf32> -> vector<8x8xf32>
    %30 = vector.extract_strided_slice %10 {offsets = [0, 8], sizes = [8, 8], strides = [1, 1]} : vector<8x96xbf16> to vector<8x8xbf16>
    %31 = vector.extract_strided_slice %10 {offsets = [0, 40], sizes = [8, 8], strides = [1, 1]} : vector<8x96xbf16> to vector<8x8xbf16>
    %32 = vector.extract_strided_slice %10 {offsets = [0, 72], sizes = [8, 8], strides = [1, 1]} : vector<8x96xbf16> to vector<8x8xbf16>
    "tpu.trace_start"() <{level = 10 : i32, message = "qd,kd->qk"}> : () -> ()
    %cst_14 = arith.constant dense<0.000000e+00> : vector<8x8xf32>
    %33 = tpu.matmul %30, %31, %cst_14 {dimension_numbers = #tpu.dot_dimension_numbers<[1], [1], [0], [0], [0, 0, 1, 0], [], []>} : vector<8x8xbf16>, vector<8x8xbf16>, vector<8x8xf32> -> vector<8x8xf32>
    "tpu.trace_stop"() : () -> ()
    %cst_15 = arith.constant 0.353553385 : f32
    %34 = vector.broadcast %cst_15 : f32 to vector<8x8xf32>
    %35 = arith.mulf %33, %34 : vector<8x8xf32>
    %36 = arith.addf %35, %3 : vector<8x8xf32>
    %cst_16 = arith.constant dense<0xFF800000> : vector<8xf32>
    %37 = vector.multi_reduction <maximumf>, %36, %cst_16 [1] : vector<8x8xf32> to vector<8xf32>
    %38 = vector.shape_cast %37 : vector<8xf32> to vector<8x1xf32>
    %39 = vector.broadcast %38 : vector<8x1xf32> to vector<8x8xf32>
    %40 = arith.subf %36, %39 : vector<8x8xf32>
    %41 = math.exp %40 : vector<8x8xf32>
    %cst_17 = arith.constant dense<0.000000e+00> : vector<8xf32>
    %42 = vector.multi_reduction <add>, %41, %cst_17 [1] : vector<8x8xf32> to vector<8xf32>
    %43 = vector.shape_cast %42 : vector<8xf32> to vector<8x1xf32>
    %44 = tpu.reciprocal %43 {approx = true} : vector<8x1xf32> -> vector<8x1xf32>
    %45 = vector.broadcast %44 : vector<8x1xf32> to vector<8x8xf32>
    %46 = arith.mulf %41, %45 : vector<8x8xf32>
    %47 = arith.truncf %46 : vector<8x8xf32> to vector<8x8xbf16>
    %cst_18 = arith.constant dense<0.000000e+00> : vector<8x8xf32>
    %48 = tpu.matmul %47, %32, %cst_18 {dimension_numbers = #tpu.dot_dimension_numbers<[1], [0], [0], [1], [0, 0, 1, 1], [], []>} : vector<8x8xbf16>, vector<8x8xbf16>, vector<8x8xf32> -> vector<8x8xf32>
    %49 = vector.extract_strided_slice %10 {offsets = [0, 16], sizes = [8, 8], strides = [1, 1]} : vector<8x96xbf16> to vector<8x8xbf16>
    %50 = vector.extract_strided_slice %10 {offsets = [0, 48], sizes = [8, 8], strides = [1, 1]} : vector<8x96xbf16> to vector<8x8xbf16>
    %51 = vector.extract_strided_slice %10 {offsets = [0, 80], sizes = [8, 8], strides = [1, 1]} : vector<8x96xbf16> to vector<8x8xbf16>
    "tpu.trace_start"() <{level = 10 : i32, message = "qd,kd->qk"}> : () -> ()
    %cst_19 = arith.constant dense<0.000000e+00> : vector<8x8xf32>
    %52 = tpu.matmul %49, %50, %cst_19 {dimension_numbers = #tpu.dot_dimension_numbers<[1], [1], [0], [0], [0, 0, 1, 0], [], []>} : vector<8x8xbf16>, vector<8x8xbf16>, vector<8x8xf32> -> vector<8x8xf32>
    "tpu.trace_stop"() : () -> ()
    %cst_20 = arith.constant 0.353553385 : f32
    %53 = vector.broadcast %cst_20 : f32 to vector<8x8xf32>
    %54 = arith.mulf %52, %53 : vector<8x8xf32>
    %55 = arith.addf %54, %3 : vector<8x8xf32>
    %cst_21 = arith.constant dense<0xFF800000> : vector<8xf32>
    %56 = vector.multi_reduction <maximumf>, %55, %cst_21 [1] : vector<8x8xf32> to vector<8xf32>
    %57 = vector.shape_cast %56 : vector<8xf32> to vector<8x1xf32>
    %58 = vector.broadcast %57 : vector<8x1xf32> to vector<8x8xf32>
    %59 = arith.subf %55, %58 : vector<8x8xf32>
    %60 = math.exp %59 : vector<8x8xf32>
    %cst_22 = arith.constant dense<0.000000e+00> : vector<8xf32>
    %61 = vector.multi_reduction <add>, %60, %cst_22 [1] : vector<8x8xf32> to vector<8xf32>
    %62 = vector.shape_cast %61 : vector<8xf32> to vector<8x1xf32>
    %63 = tpu.reciprocal %62 {approx = true} : vector<8x1xf32> -> vector<8x1xf32>
    %64 = vector.broadcast %63 : vector<8x1xf32> to vector<8x8xf32>
    %65 = arith.mulf %60, %64 : vector<8x8xf32>
    %66 = arith.truncf %65 : vector<8x8xf32> to vector<8x8xbf16>
    %cst_23 = arith.constant dense<0.000000e+00> : vector<8x8xf32>
    %67 = tpu.matmul %66, %51, %cst_23 {dimension_numbers = #tpu.dot_dimension_numbers<[1], [0], [0], [1], [0, 0, 1, 1], [], []>} : vector<8x8xbf16>, vector<8x8xbf16>, vector<8x8xf32> -> vector<8x8xf32>
    %68 = vector.extract_strided_slice %10 {offsets = [0, 24], sizes = [8, 8], strides = [1, 1]} : vector<8x96xbf16> to vector<8x8xbf16>
    %69 = vector.extract_strided_slice %10 {offsets = [0, 56], sizes = [8, 8], strides = [1, 1]} : vector<8x96xbf16> to vector<8x8xbf16>
    %70 = vector.extract_strided_slice %10 {offsets = [0, 88], sizes = [8, 8], strides = [1, 1]} : vector<8x96xbf16> to vector<8x8xbf16>
    "tpu.trace_start"() <{level = 10 : i32, message = "qd,kd->qk"}> : () -> ()
    %cst_24 = arith.constant dense<0.000000e+00> : vector<8x8xf32>
    %71 = tpu.matmul %68, %69, %cst_24 {dimension_numbers = #tpu.dot_dimension_numbers<[1], [1], [0], [0], [0, 0, 1, 0], [], []>} : vector<8x8xbf16>, vector<8x8xbf16>, vector<8x8xf32> -> vector<8x8xf32>
    "tpu.trace_stop"() : () -> ()
    %cst_25 = arith.constant 0.353553385 : f32
    %72 = vector.broadcast %cst_25 : f32 to vector<8x8xf32>
    %73 = arith.mulf %71, %72 : vector<8x8xf32>
    %74 = arith.addf %73, %3 : vector<8x8xf32>
    %cst_26 = arith.constant dense<0xFF800000> : vector<8xf32>
    %75 = vector.multi_reduction <maximumf>, %74, %cst_26 [1] : vector<8x8xf32> to vector<8xf32>
    %76 = vector.shape_cast %75 : vector<8xf32> to vector<8x1xf32>
    %77 = vector.broadcast %76 : vector<8x1xf32> to vector<8x8xf32>
    %78 = arith.subf %74, %77 : vector<8x8xf32>
    %79 = math.exp %78 : vector<8x8xf32>
    %cst_27 = arith.constant dense<0.000000e+00> : vector<8xf32>
    %80 = vector.multi_reduction <add>, %79, %cst_27 [1] : vector<8x8xf32> to vector<8xf32>
    %81 = vector.shape_cast %80 : vector<8xf32> to vector<8x1xf32>
    %82 = tpu.reciprocal %81 {approx = true} : vector<8x1xf32> -> vector<8x1xf32>
    %83 = vector.broadcast %82 : vector<8x1xf32> to vector<8x8xf32>
    %84 = arith.mulf %79, %83 : vector<8x8xf32>
    %85 = arith.truncf %84 : vector<8x8xf32> to vector<8x8xbf16>
    %cst_28 = arith.constant dense<0.000000e+00> : vector<8x8xf32>
    %86 = tpu.matmul %85, %70, %cst_28 {dimension_numbers = #tpu.dot_dimension_numbers<[1], [0], [0], [1], [0, 0, 1, 1], [], []>} : vector<8x8xbf16>, vector<8x8xbf16>, vector<8x8xf32> -> vector<8x8xf32>
    %87 = tpu.concatenate %29, %48, %67, %86 in 1 : vector<8x8xf32>, vector<8x8xf32>, vector<8x8xf32>, vector<8x8xf32> -> vector<8x32xf32>
    %88 = arith.truncf %87 : vector<8x32xf32> to vector<8x32xbf16>
    %c0_29 = arith.constant 0 : index
    %c0_30 = arith.constant 0 : index
    %89 = vector.load %arg5[%c0_29, %c0_30] : memref<32x32xbf16, #tpu.memory_space<vmem>>, vector<32x32xbf16>
    %cst_31 = arith.constant dense<0.000000e+00> : vector<8x32xf32>
    %90 = tpu.matmul %88, %89, %cst_31 {dimension_numbers = #tpu.dot_dimension_numbers<[1], [0], [0], [1], [0, 0, 1, 1], [], []>} : vector<8x32xbf16>, vector<32x32xbf16>, vector<8x32xf32> -> vector<8x32xf32>
    %c0_32 = arith.constant 0 : index
    %c0_33 = arith.constant 0 : index
    %91 = vector.load %arg6[%c0_32, %c0_33] : memref<1x32xf32, #tpu.memory_space<vmem>>, vector<1x32xf32>
    %92 = vector.broadcast %91 : vector<1x32xf32> to vector<8x32xf32>
    %93 = arith.addf %90, %92 : vector<8x32xf32>
    %94 = arith.addf %93, %1 : vector<8x32xf32>
    %c0_34 = arith.constant 0 : index
    %c0_35 = arith.constant 0 : index
    %95 = vector.load %arg7[%c0_34, %c0_35] : memref<1x32xf32, #tpu.memory_space<vmem>>, vector<1x32xf32>
    %c0_36 = arith.constant 0 : index
    %c0_37 = arith.constant 0 : index
    %96 = vector.load %arg8[%c0_36, %c0_37] : memref<1x32xf32, #tpu.memory_space<vmem>>, vector<1x32xf32>
    %cst_38 = arith.constant dense<0.000000e+00> : vector<8xf32>
    %97 = vector.multi_reduction <add>, %94, %cst_38 [1] : vector<8x32xf32> to vector<8xf32>
    %98 = vector.shape_cast %97 : vector<8xf32> to vector<8x1xf32>
    %cst_39 = arith.constant 3.200000e+01 : f32
    %99 = vector.broadcast %cst_39 : f32 to vector<8x1xf32>
    %100 = arith.divf %98, %99 : vector<8x1xf32>
    %101 = vector.broadcast %100 : vector<8x1xf32> to vector<8x32xf32>
    %102 = arith.subf %94, %101 : vector<8x32xf32>
    %103 = arith.mulf %102, %102 : vector<8x32xf32>
    %cst_40 = arith.constant dense<0.000000e+00> : vector<8xf32>
    %104 = vector.multi_reduction <add>, %103, %cst_40 [1] : vector<8x32xf32> to vector<8xf32>
    %105 = vector.shape_cast %104 : vector<8xf32> to vector<8x1xf32>
    %cst_41 = arith.constant 3.200000e+01 : f32
    %106 = vector.broadcast %cst_41 : f32 to vector<8x1xf32>
    %107 = arith.divf %105, %106 : vector<8x1xf32>
    %108 = vector.broadcast %100 : vector<8x1xf32> to vector<8x32xf32>
    %109 = arith.subf %94, %108 : vector<8x32xf32>
    %cst_42 = arith.constant 9.99999996E-13 : f32
    %110 = vector.broadcast %cst_42 : f32 to vector<8x1xf32>
    %111 = arith.addf %107, %110 : vector<8x1xf32>
    %112 = math.rsqrt %111 : vector<8x1xf32>
    %113 = vector.broadcast %112 : vector<8x1xf32> to vector<8x32xf32>
    %114 = arith.mulf %109, %113 : vector<8x32xf32>
    %115 = vector.broadcast %95 : vector<1x32xf32> to vector<8x32xf32>
    %116 = arith.mulf %114, %115 : vector<8x32xf32>
    %117 = vector.broadcast %96 : vector<1x32xf32> to vector<8x32xf32>
    %118 = arith.addf %116, %117 : vector<8x32xf32>
    %119 = arith.truncf %118 : vector<8x32xf32> to vector<8x32xbf16>
    %c0_43 = arith.constant 0 : index
    %c0_44 = arith.constant 0 : index
    %120 = vector.load %arg9[%c0_43, %c0_44] : memref<32x64xbf16, #tpu.memory_space<vmem>>, vector<32x64xbf16>
    %cst_45 = arith.constant dense<0.000000e+00> : vector<8x64xf32>
    %121 = tpu.matmul %119, %120, %cst_45 {dimension_numbers = #tpu.dot_dimension_numbers<[1], [0], [0], [1], [0, 0, 1, 1], [], []>} : vector<8x32xbf16>, vector<32x64xbf16>, vector<8x64xf32> -> vector<8x64xf32>
    %c0_46 = arith.constant 0 : index
    %c0_47 = arith.constant 0 : index
    %122 = vector.load %arg10[%c0_46, %c0_47] : memref<1x64xf32, #tpu.memory_space<vmem>>, vector<1x64xf32>
    %123 = vector.broadcast %122 : vector<1x64xf32> to vector<8x64xf32>
    %124 = arith.addf %121, %123 : vector<8x64xf32>
    %cst_48 = arith.constant 5.000000e-01 : f32
    %125 = vector.broadcast %cst_48 : f32 to vector<8x64xf32>
    %126 = arith.mulf %125, %124 : vector<8x64xf32>
    %cst_49 = arith.constant 4.471500e-02 : f32
    %127 = vector.broadcast %cst_49 : f32 to vector<8x64xf32>
    %128 = arith.mulf %127, %124 : vector<8x64xf32>
    %129 = arith.mulf %128, %124 : vector<8x64xf32>
    %130 = arith.mulf %129, %124 : vector<8x64xf32>
    %131 = arith.addf %124, %130 : vector<8x64xf32>
    %cst_50 = arith.constant 0.797884583 : f32
    %132 = vector.broadcast %cst_50 : f32 to vector<8x64xf32>
    %133 = arith.mulf %132, %131 : vector<8x64xf32>
    %134 = math.tanh %133 : vector<8x64xf32>
    %cst_51 = arith.constant 1.000000e+00 : f32
    %135 = vector.broadcast %cst_51 : f32 to vector<8x64xf32>
    %136 = arith.addf %135, %134 : vector<8x64xf32>
    %137 = arith.mulf %126, %136 : vector<8x64xf32>
    %138 = arith.truncf %137 : vector<8x64xf32> to vector<8x64xbf16>
    %c0_52 = arith.constant 0 : index
    %c0_53 = arith.constant 0 : index
    %139 = vector.load %arg11[%c0_52, %c0_53] : memref<64x32xbf16, #tpu.memory_space<vmem>>, vector<64x32xbf16>
    %cst_54 = arith.constant dense<0.000000e+00> : vector<8x32xf32>
    %140 = tpu.matmul %138, %139, %cst_54 {dimension_numbers = #tpu.dot_dimension_numbers<[1], [0], [0], [1], [0, 0, 1, 1], [], []>} : vector<8x64xbf16>, vector<64x32xbf16>, vector<8x32xf32> -> vector<8x32xf32>
    %c0_55 = arith.constant 0 : index
    %c0_56 = arith.constant 0 : index
    %141 = vector.load %arg12[%c0_55, %c0_56] : memref<1x32xf32, #tpu.memory_space<vmem>>, vector<1x32xf32>
    %142 = vector.broadcast %141 : vector<1x32xf32> to vector<8x32xf32>
    %143 = arith.addf %140, %142 : vector<8x32xf32>
    %144 = arith.addf %143, %118 : vector<8x32xf32>
    %c0_57 = arith.constant 0 : index
    %c0_58 = arith.constant 0 : index
    %145 = vector.load %arg13[%c0_57, %c0_58] : memref<1x32xf32, #tpu.memory_space<vmem>>, vector<1x32xf32>
    %c0_59 = arith.constant 0 : index
    %c0_60 = arith.constant 0 : index
    %146 = vector.load %arg14[%c0_59, %c0_60] : memref<1x32xf32, #tpu.memory_space<vmem>>, vector<1x32xf32>
    %cst_61 = arith.constant dense<0.000000e+00> : vector<8xf32>
    %147 = vector.multi_reduction <add>, %144, %cst_61 [1] : vector<8x32xf32> to vector<8xf32>
    %148 = vector.shape_cast %147 : vector<8xf32> to vector<8x1xf32>
    %cst_62 = arith.constant 3.200000e+01 : f32
    %149 = vector.broadcast %cst_62 : f32 to vector<8x1xf32>
    %150 = arith.divf %148, %149 : vector<8x1xf32>
    %151 = vector.broadcast %150 : vector<8x1xf32> to vector<8x32xf32>
    %152 = arith.subf %144, %151 : vector<8x32xf32>
    %153 = arith.mulf %152, %152 : vector<8x32xf32>
    %cst_63 = arith.constant dense<0.000000e+00> : vector<8xf32>
    %154 = vector.multi_reduction <add>, %153, %cst_63 [1] : vector<8x32xf32> to vector<8xf32>
    %155 = vector.shape_cast %154 : vector<8xf32> to vector<8x1xf32>
    %cst_64 = arith.constant 3.200000e+01 : f32
    %156 = vector.broadcast %cst_64 : f32 to vector<8x1xf32>
    %157 = arith.divf %155, %156 : vector<8x1xf32>
    %158 = vector.broadcast %150 : vector<8x1xf32> to vector<8x32xf32>
    %159 = arith.subf %144, %158 : vector<8x32xf32>
    %cst_65 = arith.constant 9.99999996E-13 : f32
    %160 = vector.broadcast %cst_65 : f32 to vector<8x1xf32>
    %161 = arith.addf %157, %160 : vector<8x1xf32>
    %162 = math.rsqrt %161 : vector<8x1xf32>
    %163 = vector.broadcast %162 : vector<8x1xf32> to vector<8x32xf32>
    %164 = arith.mulf %159, %163 : vector<8x32xf32>
    %165 = vector.broadcast %145 : vector<1x32xf32> to vector<8x32xf32>
    %166 = arith.mulf %164, %165 : vector<8x32xf32>
    %167 = vector.broadcast %146 : vector<1x32xf32> to vector<8x32xf32>
    %168 = arith.addf %166, %167 : vector<8x32xf32>
    %c0_66 = arith.constant 0 : index
    %c0_67 = arith.constant 0 : index
    %c0_68 = arith.constant 0 : index
    %169 = vector.load %arg15[%c0_66, %c0_67, %c0_68] : memref<1x8x32xf32, #tpu.memory_space<vmem>>, vector<1x8x32xf32>
    %170 = vector.shape_cast %169 : vector<1x8x32xf32> to vector<8x32xf32>
    %171 = vector.shape_cast %168 : vector<8x32xf32> to vector<1x8x32xf32>
    tpu.vector_store %arg15[%c0_66, %c0_67, %c0_68], %171 {strides = array<i32>} : memref<1x8x32xf32, #tpu.memory_space<vmem>>, vector<1x8x32xf32>,
    return
  }
  func.func @transform_0(%arg0: i32) -> (i32, i32, i32) {
    %c0_i32 = arith.constant 0 : i32
    %c0_i32_0 = arith.constant 0 : i32
    %c0_i32_1 = arith.constant 0 : i32
    return %arg0, %c0_i32, %c0_i32_0 : i32, i32, i32
  }
  func.func @transform_1(%arg0: i32) -> (i32, i32, i32) {
    %c0_i32 = arith.constant 0 : i32
    %c0_i32_0 = arith.constant 0 : i32
    %c0_i32_1 = arith.constant 0 : i32
    return %arg0, %c0_i32, %c0_i32_0 : i32, i32, i32
  }
  func.func @transform_2(%arg0: i32) -> (i32, i32) {
    %c0_i32 = arith.constant 0 : i32
    %c0_i32_0 = arith.constant 0 : i32
    %c0_i32_1 = arith.constant 0 : i32
    return %c0_i32, %c0_i32_0 : i32, i32
  }
  func.func @transform_3(%arg0: i32) -> (i32, i32) {
    %c0_i32 = arith.constant 0 : i32
    %c0_i32_0 = arith.constant 0 : i32
    %c0_i32_1 = arith.constant 0 : i32
    return %c0_i32, %c0_i32_0 : i32, i32
  }
  func.func @transform_4(%arg0: i32) -> (i32, i32) {
    %c0_i32 = arith.constant 0 : i32
    %c0_i32_0 = arith.constant 0 : i32
    %c0_i32_1 = arith.constant 0 : i32
    return %c0_i32, %c0_i32_0 : i32, i32
  }
  func.func @transform_5(%arg0: i32) -> (i32, i32) {
    %c0_i32 = arith.constant 0 : i32
    %c0_i32_0 = arith.constant 0 : i32
    %c0_i32_1 = arith.constant 0 : i32
    return %c0_i32, %c0_i32_0 : i32, i32
  }
  func.func @transform_6(%arg0: i32) -> (i32, i32) {
    %c0_i32 = arith.constant 0 : i32
    %c0_i32_0 = arith.constant 0 : i32
    %c0_i32_1 = arith.constant 0 : i32
    return %c0_i32, %c0_i32_0 : i32, i32
  }
  func.func @transform_7(%arg0: i32) -> (i32, i32) {
    %c0_i32 = arith.constant 0 : i32
    %c0_i32_0 = arith.constant 0 : i32
    %c0_i32_1 = arith.constant 0 : i32
    return %c0_i32, %c0_i32_0 : i32, i32
  }
  func.func @transform_8(%arg0: i32) -> (i32, i32) {
    %c0_i32 = arith.constant 0 : i32
    %c0_i32_0 = arith.constant 0 : i32
    %c0_i32_1 = arith.constant 0 : i32
    return %c0_i32, %c0_i32_0 : i32, i32
  }
  func.func @transform_9(%arg0: i32) -> (i32, i32) {
    %c0_i32 = arith.constant 0 : i32
    %c0_i32_0 = arith.constant 0 : i32
    %c0_i32_1 = arith.constant 0 : i32
    return %c0_i32, %c0_i32_0 : i32, i32
  }
  func.func @transform_10(%arg0: i32) -> (i32, i32) {
    %c0_i32 = arith.constant 0 : i32
    %c0_i32_0 = arith.constant 0 : i32
    %c0_i32_1 = arith.constant 0 : i32
    return %c0_i32, %c0_i32_0 : i32, i32
  }
  func.func @transform_11(%arg0: i32) -> (i32, i32) {
    %c0_i32 = arith.constant 0 : i32
    %c0_i32_0 = arith.constant 0 : i32
    %c0_i32_1 = arith.constant 0 : i32
    return %c0_i32, %c0_i32_0 : i32, i32
  }
  func.func @transform_12(%arg0: i32) -> (i32, i32) {
    %c0_i32 = arith.constant 0 : i32
    %c0_i32_0 = arith.constant 0 : i32
    %c0_i32_1 = arith.constant 0 : i32
    return %c0_i32, %c0_i32_0 : i32, i32
  }
  func.func @transform_13(%arg0: i32) -> (i32, i32) {
    %c0_i32 = arith.constant 0 : i32
    %c0_i32_0 = arith.constant 0 : i32
    %c0_i32_1 = arith.constant 0 : i32
    return %c0_i32, %c0_i32_0 : i32, i32
  }
  func.func @transform_14(%arg0: i32) -> (i32, i32, i32) {
    %c0_i32 = arith.constant 0 : i32
    %c0_i32_0 = arith.constant 0 : i32
    %c0_i32_1 = arith.constant 0 : i32
    return %arg0, %c0_i32, %c0_i32_0 : i32, i32, i32
  }
}

module attributes {stable_mosaic.version = 11 : i64} {
  func.func @_bert_layer_kernel(%arg0: i32, %arg1: memref<1x8x32xf32, #tpu.memory_space<vmem>>, %arg2: memref<1x1x8xf32, #tpu.memory_space<vmem>>, %arg3: memref<32x96xbf16, #tpu.memory_space<vmem>>, %arg4: memref<1x96xf32, #tpu.memory_space<vmem>>, %arg5: memref<32x32xbf16, #tpu.memory_space<vmem>>, %arg6: memref<1x32xf32, #tpu.memory_space<vmem>>, %arg7: memref<1x32xf32, #tpu.memory_space<vmem>>, %arg8: memref<1x32xf32, #tpu.memory_space<vmem>>, %arg9: memref<32x64xbf16, #tpu.memory_space<vmem>>, %arg10: memref<1x64xf32, #tpu.memory_space<vmem>>, %arg11: memref<64x32xbf16, #tpu.memory_space<vmem>>, %arg12: memref<1x32xf32, #tpu.memory_space<vmem>>, %arg13: memref<1x32xf32, #tpu.memory_space<vmem>>, %arg14: memref<1x32xf32, #tpu.memory_space<vmem>>, %arg15: memref<1x8x32xf32, #tpu.memory_space<vmem>>) attributes {dimension_semantics = [#tpu.dimension_semantics<parallel>], iteration_bounds = array<i64: 2>, scalar_prefetch = 0 : i64, scratch_operands = 0 : i64, tpu.core_type = #tpu.core_type<tc>, window_params = [{transform_indices = @transform_0, window_bounds = array<i64: 1, 8, 32>}, {transform_indices = @transform_1, window_bounds = array<i64: 1, 1, 8>}, {pipeline_mode = #tpu.pipeline_mode<synchronous>, transform_indices = @transform_2, window_bounds = array<i64: 32, 96>}, {pipeline_mode = #tpu.pipeline_mode<synchronous>, transform_indices = @transform_3, window_bounds = array<i64: 1, 96>}, {pipeline_mode = #tpu.pipeline_mode<synchronous>, transform_indices = @transform_4, window_bounds = array<i64: 32, 32>}, {pipeline_mode = #tpu.pipeline_mode<synchronous>, transform_indices = @transform_5, window_bounds = array<i64: 1, 32>}, {pipeline_mode = #tpu.pipeline_mode<synchronous>, transform_indices = @transform_6, window_bounds = array<i64: 1, 32>}, {pipeline_mode = #tpu.pipeline_mode<synchronous>, transform_indices = @transform_7, window_bounds = array<i64: 1, 32>}, {pipeline_mode = #tpu.pipeline_mode<synchronous>, transform_indices = @transform_8, window_bounds = array<i64: 32, 64>}, {pipeline_mode = #tpu.pipeline_mode<synchronous>, transform_indices = @transform_9, window_bounds = array<i64: 1, 64>}, {pipeline_mode = #tpu.pipeline_mode<synchronous>, transform_indices = @transform_10, window_bounds = array<i64: 64, 32>}, {pipeline_mode = #tpu.pipeline_mode<synchronous>, transform_indices = @transform_11, window_bounds = array<i64: 1, 32>}, {pipeline_mode = #tpu.pipeline_mode<synchronous>, transform_indices = @transform_12, window_bounds = array<i64: 1, 32>}, {pipeline_mode = #tpu.pipeline_mode<synchronous>, transform_indices = @transform_13, window_bounds = array<i64: 1, 32>}, {transform_indices = @transform_14, window_bounds = array<i64: 1, 8, 32>}]} {
    %c0 = arith.constant 0 : index
    %c0_0 = arith.constant 0 : index
    %c0_1 = arith.constant 0 : index
    %0 = vector.load %arg1[%c0, %c0_0, %c0_1] : memref<1x8x32xf32, #tpu.memory_space<vmem>>, vector<1x8x32xf32>
    %1 = vector.shape_cast %0 : vector<1x8x32xf32> to vector<8x32xf32>
    %c0_2 = arith.constant 0 : index
    %c0_3 = arith.constant 0 : index
    %c0_4 = arith.constant 0 : index
    %2 = vector.load %arg2[%c0_2, %c0_3, %c0_4] : memref<1x1x8xf32, #tpu.memory_space<vmem>>, vector<1x1x8xf32>
    %3 = vector.shape_cast %2 : vector<1x1x8xf32> to vector<1x8xf32>
    %4 = arith.truncf %1 : vector<8x32xf32> to vector<8x32xbf16>
    %c0_5 = arith.constant 0 : index
    %c0_6 = arith.constant 0 : index
    %5 = vector.load %arg3[%c0_5, %c0_6] : memref<32x96xbf16, #tpu.memory_space<vmem>>, vector<32x96xbf16>
    %cst = arith.constant dense<0.000000e+00> : vector<8x96xf32>
    %6 = tpu.matmul %4, %5, %cst {dimension_numbers = #tpu.dot_dimension_numbers<[1], [0], [0], [1], [0, 0, 1, 1], [], []>} : vector<8x32xbf16>, vector<32x96xbf16>, vector<8x96xf32> -> vector<8x96xf32>
    %c0_7 = arith.constant 0 : index
    %c0_8 = arith.constant 0 : index
    %7 = vector.load %arg4[%c0_7, %c0_8] : memref<1x96xf32, #tpu.memory_space<vmem>>, vector<1x96xf32>
    %8 = vector.broadcast %7 : vector<1x96xf32> to vector<8x96xf32>
    %9 = arith.addf %6, %8 : vector<8x96xf32>
    %10 = arith.truncf %9 : vector<8x96xf32> to vector<8x96xbf16>
    %11 = vector.extract_strided_slice %10 {offsets = [0, 0], sizes = [8, 8], strides = [1, 1]} : vector<8x96xbf16> to vector<8x8xbf16>
    %12 = vector.extract_strided_slice %10 {offsets = [0, 32], sizes = [8, 8], strides = [1, 1]} : vector<8x96xbf16> to vector<8x8xbf16>
    %13 = vector.extract_strided_slice %10 {offsets = [0, 64], sizes = [8, 8], strides = [1, 1]} : vector<8x96xbf16> to vector<8x8xbf16>
    "tpu.trace_start"() <{level = 10 : i32, message = "qd,kd->qk"}> : () -> ()
    %cst_9 = arith.constant dense<0.000000e+00> : vector<8x8xf32>
    %14 = tpu.matmul %11, %12, %cst_9 {dimension_numbers = #tpu.dot_dimension_numbers<[1], [1], [0], [0], [0, 0, 1, 0], [], []>} : vector<8x8xbf16>, vector<8x8xbf16>, vector<8x8xf32> -> vector<8x8xf32>
    "tpu.trace_stop"() : () -> ()
    %cst_10 = arith.constant 0.353553385 : f32
    %15 = vector.broadcast %cst_10 : f32 to vector<8x8xf32>
    %16 = arith.mulf %14, %15 : vector<8x8xf32>
    %17 = vector.broadcast %3 : vector<1x8xf32> to vector<8x8xf32>
    %18 = arith.addf %16, %17 : vector<8x8xf32>
    %cst_11 = arith.constant dense<0xFF800000> : vector<8xf32>
    %19 = vector.multi_reduction <maximumf>, %18, %cst_11 [1] : vector<8x8xf32> to vector<8xf32>
    %20 = vector.shape_cast %19 : vector<8xf32> to vector<8x1xf32>
    %21 = vector.broadcast %20 : vector<8x1xf32> to vector<8x8xf32>
    %22 = arith.subf %18, %21 : vector<8x8xf32>
    %23 = math.exp %22 : vector<8x8xf32>
    %cst_12 = arith.constant dense<0.000000e+00> : vector<8xf32>
    %24 = vector.multi_reduction <add>, %23, %cst_12 [1] : vector<8x8xf32> to vector<8xf32>
    %25 = vector.shape_cast %24 : vector<8xf32> to vector<8x1xf32>
    %26 = tpu.reciprocal %25 {approx = true} : vector<8x1xf32> -> vector<8x1xf32>
    %27 = vector.broadcast %26 : vector<8x1xf32> to vector<8x8xf32>
    %28 = arith.mulf %23, %27 : vector<8x8xf32>
    %29 = arith.truncf %28 : vector<8x8xf32> to vector<8x8xbf16>
    %cst_13 = arith.constant dense<0.000000e+00> : vector<8x8xf32>
    %30 = tpu.matmul %29, %13, %cst_13 {dimension_numbers = #tpu.dot_dimension_numbers<[1], [0], [0], [1], [0, 0, 1, 1], [], []>} : vector<8x8xbf16>, vector<8x8xbf16>, vector<8x8xf32> -> vector<8x8xf32>
    %31 = vector.extract_strided_slice %10 {offsets = [0, 8], sizes = [8, 8], strides = [1, 1]} : vector<8x96xbf16> to vector<8x8xbf16>
    %32 = vector.extract_strided_slice %10 {offsets = [0, 40], sizes = [8, 8], strides = [1, 1]} : vector<8x96xbf16> to vector<8x8xbf16>
    %33 = vector.extract_strided_slice %10 {offsets = [0, 72], sizes = [8, 8], strides = [1, 1]} : vector<8x96xbf16> to vector<8x8xbf16>
    "tpu.trace_start"() <{level = 10 : i32, message = "qd,kd->qk"}> : () -> ()
    %cst_14 = arith.constant dense<0.000000e+00> : vector<8x8xf32>
    %34 = tpu.matmul %31, %32, %cst_14 {dimension_numbers = #tpu.dot_dimension_numbers<[1], [1], [0], [0], [0, 0, 1, 0], [], []>} : vector<8x8xbf16>, vector<8x8xbf16>, vector<8x8xf32> -> vector<8x8xf32>
    "tpu.trace_stop"() : () -> ()
    %cst_15 = arith.constant 0.353553385 : f32
    %35 = vector.broadcast %cst_15 : f32 to vector<8x8xf32>
    %36 = arith.mulf %34, %35 : vector<8x8xf32>
    %37 = vector.broadcast %3 : vector<1x8xf32> to vector<8x8xf32>
    %38 = arith.addf %36, %37 : vector<8x8xf32>
    %cst_16 = arith.constant dense<0xFF800000> : vector<8xf32>
    %39 = vector.multi_reduction <maximumf>, %38, %cst_16 [1] : vector<8x8xf32> to vector<8xf32>
    %40 = vector.shape_cast %39 : vector<8xf32> to vector<8x1xf32>
    %41 = vector.broadcast %40 : vector<8x1xf32> to vector<8x8xf32>
    %42 = arith.subf %38, %41 : vector<8x8xf32>
    %43 = math.exp %42 : vector<8x8xf32>
    %cst_17 = arith.constant dense<0.000000e+00> : vector<8xf32>
    %44 = vector.multi_reduction <add>, %43, %cst_17 [1] : vector<8x8xf32> to vector<8xf32>
    %45 = vector.shape_cast %44 : vector<8xf32> to vector<8x1xf32>
    %46 = tpu.reciprocal %45 {approx = true} : vector<8x1xf32> -> vector<8x1xf32>
    %47 = vector.broadcast %46 : vector<8x1xf32> to vector<8x8xf32>
    %48 = arith.mulf %43, %47 : vector<8x8xf32>
    %49 = arith.truncf %48 : vector<8x8xf32> to vector<8x8xbf16>
    %cst_18 = arith.constant dense<0.000000e+00> : vector<8x8xf32>
    %50 = tpu.matmul %49, %33, %cst_18 {dimension_numbers = #tpu.dot_dimension_numbers<[1], [0], [0], [1], [0, 0, 1, 1], [], []>} : vector<8x8xbf16>, vector<8x8xbf16>, vector<8x8xf32> -> vector<8x8xf32>
    %51 = vector.extract_strided_slice %10 {offsets = [0, 16], sizes = [8, 8], strides = [1, 1]} : vector<8x96xbf16> to vector<8x8xbf16>
    %52 = vector.extract_strided_slice %10 {offsets = [0, 48], sizes = [8, 8], strides = [1, 1]} : vector<8x96xbf16> to vector<8x8xbf16>
    %53 = vector.extract_strided_slice %10 {offsets = [0, 80], sizes = [8, 8], strides = [1, 1]} : vector<8x96xbf16> to vector<8x8xbf16>
    "tpu.trace_start"() <{level = 10 : i32, message = "qd,kd->qk"}> : () -> ()
    %cst_19 = arith.constant dense<0.000000e+00> : vector<8x8xf32>
    %54 = tpu.matmul %51, %52, %cst_19 {dimension_numbers = #tpu.dot_dimension_numbers<[1], [1], [0], [0], [0, 0, 1, 0], [], []>} : vector<8x8xbf16>, vector<8x8xbf16>, vector<8x8xf32> -> vector<8x8xf32>
    "tpu.trace_stop"() : () -> ()
    %cst_20 = arith.constant 0.353553385 : f32
    %55 = vector.broadcast %cst_20 : f32 to vector<8x8xf32>
    %56 = arith.mulf %54, %55 : vector<8x8xf32>
    %57 = vector.broadcast %3 : vector<1x8xf32> to vector<8x8xf32>
    %58 = arith.addf %56, %57 : vector<8x8xf32>
    %cst_21 = arith.constant dense<0xFF800000> : vector<8xf32>
    %59 = vector.multi_reduction <maximumf>, %58, %cst_21 [1] : vector<8x8xf32> to vector<8xf32>
    %60 = vector.shape_cast %59 : vector<8xf32> to vector<8x1xf32>
    %61 = vector.broadcast %60 : vector<8x1xf32> to vector<8x8xf32>
    %62 = arith.subf %58, %61 : vector<8x8xf32>
    %63 = math.exp %62 : vector<8x8xf32>
    %cst_22 = arith.constant dense<0.000000e+00> : vector<8xf32>
    %64 = vector.multi_reduction <add>, %63, %cst_22 [1] : vector<8x8xf32> to vector<8xf32>
    %65 = vector.shape_cast %64 : vector<8xf32> to vector<8x1xf32>
    %66 = tpu.reciprocal %65 {approx = true} : vector<8x1xf32> -> vector<8x1xf32>
    %67 = vector.broadcast %66 : vector<8x1xf32> to vector<8x8xf32>
    %68 = arith.mulf %63, %67 : vector<8x8xf32>
    %69 = arith.truncf %68 : vector<8x8xf32> to vector<8x8xbf16>
    %cst_23 = arith.constant dense<0.000000e+00> : vector<8x8xf32>
    %70 = tpu.matmul %69, %53, %cst_23 {dimension_numbers = #tpu.dot_dimension_numbers<[1], [0], [0], [1], [0, 0, 1, 1], [], []>} : vector<8x8xbf16>, vector<8x8xbf16>, vector<8x8xf32> -> vector<8x8xf32>
    %71 = vector.extract_strided_slice %10 {offsets = [0, 24], sizes = [8, 8], strides = [1, 1]} : vector<8x96xbf16> to vector<8x8xbf16>
    %72 = vector.extract_strided_slice %10 {offsets = [0, 56], sizes = [8, 8], strides = [1, 1]} : vector<8x96xbf16> to vector<8x8xbf16>
    %73 = vector.extract_strided_slice %10 {offsets = [0, 88], sizes = [8, 8], strides = [1, 1]} : vector<8x96xbf16> to vector<8x8xbf16>
    "tpu.trace_start"() <{level = 10 : i32, message = "qd,kd->qk"}> : () -> ()
    %cst_24 = arith.constant dense<0.000000e+00> : vector<8x8xf32>
    %74 = tpu.matmul %71, %72, %cst_24 {dimension_numbers = #tpu.dot_dimension_numbers<[1], [1], [0], [0], [0, 0, 1, 0], [], []>} : vector<8x8xbf16>, vector<8x8xbf16>, vector<8x8xf32> -> vector<8x8xf32>
    "tpu.trace_stop"() : () -> ()
    %cst_25 = arith.constant 0.353553385 : f32
    %75 = vector.broadcast %cst_25 : f32 to vector<8x8xf32>
    %76 = arith.mulf %74, %75 : vector<8x8xf32>
    %77 = vector.broadcast %3 : vector<1x8xf32> to vector<8x8xf32>
    %78 = arith.addf %76, %77 : vector<8x8xf32>
    %cst_26 = arith.constant dense<0xFF800000> : vector<8xf32>
    %79 = vector.multi_reduction <maximumf>, %78, %cst_26 [1] : vector<8x8xf32> to vector<8xf32>
    %80 = vector.shape_cast %79 : vector<8xf32> to vector<8x1xf32>
    %81 = vector.broadcast %80 : vector<8x1xf32> to vector<8x8xf32>
    %82 = arith.subf %78, %81 : vector<8x8xf32>
    %83 = math.exp %82 : vector<8x8xf32>
    %cst_27 = arith.constant dense<0.000000e+00> : vector<8xf32>
    %84 = vector.multi_reduction <add>, %83, %cst_27 [1] : vector<8x8xf32> to vector<8xf32>
    %85 = vector.shape_cast %84 : vector<8xf32> to vector<8x1xf32>
    %86 = tpu.reciprocal %85 {approx = true} : vector<8x1xf32> -> vector<8x1xf32>
    %87 = vector.broadcast %86 : vector<8x1xf32> to vector<8x8xf32>
    %88 = arith.mulf %83, %87 : vector<8x8xf32>
    %89 = arith.truncf %88 : vector<8x8xf32> to vector<8x8xbf16>
    %cst_28 = arith.constant dense<0.000000e+00> : vector<8x8xf32>
    %90 = tpu.matmul %89, %73, %cst_28 {dimension_numbers = #tpu.dot_dimension_numbers<[1], [0], [0], [1], [0, 0, 1, 1], [], []>} : vector<8x8xbf16>, vector<8x8xbf16>, vector<8x8xf32> -> vector<8x8xf32>
    %91 = tpu.concatenate %30, %50, %70, %90 in 1 : vector<8x8xf32>, vector<8x8xf32>, vector<8x8xf32>, vector<8x8xf32> -> vector<8x32xf32>
    %92 = arith.truncf %91 : vector<8x32xf32> to vector<8x32xbf16>
    %c0_29 = arith.constant 0 : index
    %c0_30 = arith.constant 0 : index
    %93 = vector.load %arg5[%c0_29, %c0_30] : memref<32x32xbf16, #tpu.memory_space<vmem>>, vector<32x32xbf16>
    %cst_31 = arith.constant dense<0.000000e+00> : vector<8x32xf32>
    %94 = tpu.matmul %92, %93, %cst_31 {dimension_numbers = #tpu.dot_dimension_numbers<[1], [0], [0], [1], [0, 0, 1, 1], [], []>} : vector<8x32xbf16>, vector<32x32xbf16>, vector<8x32xf32> -> vector<8x32xf32>
    %c0_32 = arith.constant 0 : index
    %c0_33 = arith.constant 0 : index
    %95 = vector.load %arg6[%c0_32, %c0_33] : memref<1x32xf32, #tpu.memory_space<vmem>>, vector<1x32xf32>
    %96 = vector.broadcast %95 : vector<1x32xf32> to vector<8x32xf32>
    %97 = arith.addf %94, %96 : vector<8x32xf32>
    %98 = arith.addf %97, %1 : vector<8x32xf32>
    %c0_34 = arith.constant 0 : index
    %c0_35 = arith.constant 0 : index
    %99 = vector.load %arg7[%c0_34, %c0_35] : memref<1x32xf32, #tpu.memory_space<vmem>>, vector<1x32xf32>
    %c0_36 = arith.constant 0 : index
    %c0_37 = arith.constant 0 : index
    %100 = vector.load %arg8[%c0_36, %c0_37] : memref<1x32xf32, #tpu.memory_space<vmem>>, vector<1x32xf32>
    %cst_38 = arith.constant dense<0.000000e+00> : vector<8xf32>
    %101 = vector.multi_reduction <add>, %98, %cst_38 [1] : vector<8x32xf32> to vector<8xf32>
    %102 = vector.shape_cast %101 : vector<8xf32> to vector<8x1xf32>
    %cst_39 = arith.constant 3.200000e+01 : f32
    %103 = vector.broadcast %cst_39 : f32 to vector<8x1xf32>
    %104 = arith.divf %102, %103 : vector<8x1xf32>
    %105 = vector.broadcast %104 : vector<8x1xf32> to vector<8x32xf32>
    %106 = arith.subf %98, %105 : vector<8x32xf32>
    %107 = arith.mulf %106, %106 : vector<8x32xf32>
    %cst_40 = arith.constant dense<0.000000e+00> : vector<8xf32>
    %108 = vector.multi_reduction <add>, %107, %cst_40 [1] : vector<8x32xf32> to vector<8xf32>
    %109 = vector.shape_cast %108 : vector<8xf32> to vector<8x1xf32>
    %cst_41 = arith.constant 3.200000e+01 : f32
    %110 = vector.broadcast %cst_41 : f32 to vector<8x1xf32>
    %111 = arith.divf %109, %110 : vector<8x1xf32>
    %112 = vector.broadcast %104 : vector<8x1xf32> to vector<8x32xf32>
    %113 = arith.subf %98, %112 : vector<8x32xf32>
    %cst_42 = arith.constant 9.99999996E-13 : f32
    %114 = vector.broadcast %cst_42 : f32 to vector<8x1xf32>
    %115 = arith.addf %111, %114 : vector<8x1xf32>
    %116 = math.rsqrt %115 : vector<8x1xf32>
    %117 = vector.broadcast %116 : vector<8x1xf32> to vector<8x32xf32>
    %118 = arith.mulf %113, %117 : vector<8x32xf32>
    %119 = vector.broadcast %99 : vector<1x32xf32> to vector<8x32xf32>
    %120 = arith.mulf %118, %119 : vector<8x32xf32>
    %121 = vector.broadcast %100 : vector<1x32xf32> to vector<8x32xf32>
    %122 = arith.addf %120, %121 : vector<8x32xf32>
    %123 = arith.truncf %122 : vector<8x32xf32> to vector<8x32xbf16>
    %c0_43 = arith.constant 0 : index
    %c0_44 = arith.constant 0 : index
    %124 = vector.load %arg9[%c0_43, %c0_44] : memref<32x64xbf16, #tpu.memory_space<vmem>>, vector<32x64xbf16>
    %cst_45 = arith.constant dense<0.000000e+00> : vector<8x64xf32>
    %125 = tpu.matmul %123, %124, %cst_45 {dimension_numbers = #tpu.dot_dimension_numbers<[1], [0], [0], [1], [0, 0, 1, 1], [], []>} : vector<8x32xbf16>, vector<32x64xbf16>, vector<8x64xf32> -> vector<8x64xf32>
    %c0_46 = arith.constant 0 : index
    %c0_47 = arith.constant 0 : index
    %126 = vector.load %arg10[%c0_46, %c0_47] : memref<1x64xf32, #tpu.memory_space<vmem>>, vector<1x64xf32>
    %127 = vector.broadcast %126 : vector<1x64xf32> to vector<8x64xf32>
    %128 = arith.addf %125, %127 : vector<8x64xf32>
    %cst_48 = arith.constant 5.000000e-01 : f32
    %129 = vector.broadcast %cst_48 : f32 to vector<8x64xf32>
    %130 = arith.mulf %129, %128 : vector<8x64xf32>
    %cst_49 = arith.constant 4.471500e-02 : f32
    %131 = vector.broadcast %cst_49 : f32 to vector<8x64xf32>
    %132 = arith.mulf %131, %128 : vector<8x64xf32>
    %133 = arith.mulf %132, %128 : vector<8x64xf32>
    %134 = arith.mulf %133, %128 : vector<8x64xf32>
    %135 = arith.addf %128, %134 : vector<8x64xf32>
    %cst_50 = arith.constant 0.797884583 : f32
    %136 = vector.broadcast %cst_50 : f32 to vector<8x64xf32>
    %137 = arith.mulf %136, %135 : vector<8x64xf32>
    %138 = math.tanh %137 : vector<8x64xf32>
    %cst_51 = arith.constant 1.000000e+00 : f32
    %139 = vector.broadcast %cst_51 : f32 to vector<8x64xf32>
    %140 = arith.addf %139, %138 : vector<8x64xf32>
    %141 = arith.mulf %130, %140 : vector<8x64xf32>
    %142 = arith.truncf %141 : vector<8x64xf32> to vector<8x64xbf16>
    %c0_52 = arith.constant 0 : index
    %c0_53 = arith.constant 0 : index
    %143 = vector.load %arg11[%c0_52, %c0_53] : memref<64x32xbf16, #tpu.memory_space<vmem>>, vector<64x32xbf16>
    %cst_54 = arith.constant dense<0.000000e+00> : vector<8x32xf32>
    %144 = tpu.matmul %142, %143, %cst_54 {dimension_numbers = #tpu.dot_dimension_numbers<[1], [0], [0], [1], [0, 0, 1, 1], [], []>} : vector<8x64xbf16>, vector<64x32xbf16>, vector<8x32xf32> -> vector<8x32xf32>
    %c0_55 = arith.constant 0 : index
    %c0_56 = arith.constant 0 : index
    %145 = vector.load %arg12[%c0_55, %c0_56] : memref<1x32xf32, #tpu.memory_space<vmem>>, vector<1x32xf32>
    %146 = vector.broadcast %145 : vector<1x32xf32> to vector<8x32xf32>
    %147 = arith.addf %144, %146 : vector<8x32xf32>
    %148 = arith.addf %147, %122 : vector<8x32xf32>
    %c0_57 = arith.constant 0 : index
    %c0_58 = arith.constant 0 : index
    %149 = vector.load %arg13[%c0_57, %c0_58] : memref<1x32xf32, #tpu.memory_space<vmem>>, vector<1x32xf32>
    %c0_59 = arith.constant 0 : index
    %c0_60 = arith.constant 0 : index
    %150 = vector.load %arg14[%c0_59, %c0_60] : memref<1x32xf32, #tpu.memory_space<vmem>>, vector<1x32xf32>
    %cst_61 = arith.constant dense<0.000000e+00> : vector<8xf32>
    %151 = vector.multi_reduction <add>, %148, %cst_61 [1] : vector<8x32xf32> to vector<8xf32>
    %152 = vector.shape_cast %151 : vector<8xf32> to vector<8x1xf32>
    %cst_62 = arith.constant 3.200000e+01 : f32
    %153 = vector.broadcast %cst_62 : f32 to vector<8x1xf32>
    %154 = arith.divf %152, %153 : vector<8x1xf32>
    %155 = vector.broadcast %154 : vector<8x1xf32> to vector<8x32xf32>
    %156 = arith.subf %148, %155 : vector<8x32xf32>
    %157 = arith.mulf %156, %156 : vector<8x32xf32>
    %cst_63 = arith.constant dense<0.000000e+00> : vector<8xf32>
    %158 = vector.multi_reduction <add>, %157, %cst_63 [1] : vector<8x32xf32> to vector<8xf32>
    %159 = vector.shape_cast %158 : vector<8xf32> to vector<8x1xf32>
    %cst_64 = arith.constant 3.200000e+01 : f32
    %160 = vector.broadcast %cst_64 : f32 to vector<8x1xf32>
    %161 = arith.divf %159, %160 : vector<8x1xf32>
    %162 = vector.broadcast %154 : vector<8x1xf32> to vector<8x32xf32>
    %163 = arith.subf %148, %162 : vector<8x32xf32>
    %cst_65 = arith.constant 9.99999996E-13 : f32
    %164 = vector.broadcast %cst_65 : f32 to vector<8x1xf32>
    %165 = arith.addf %161, %164 : vector<8x1xf32>
    %166 = math.rsqrt %165 : vector<8x1xf32>
    %167 = vector.broadcast %166 : vector<8x1xf32> to vector<8x32xf32>
    %168 = arith.mulf %163, %167 : vector<8x32xf32>
    %169 = vector.broadcast %149 : vector<1x32xf32> to vector<8x32xf32>
    %170 = arith.mulf %168, %169 : vector<8x32xf32>
    %171 = vector.broadcast %150 : vector<1x32xf32> to vector<8x32xf32>
    %172 = arith.addf %170, %171 : vector<8x32xf32>
    %c0_66 = arith.constant 0 : index
    %c0_67 = arith.constant 0 : index
    %c0_68 = arith.constant 0 : index
    %173 = vector.load %arg15[%c0_66, %c0_67, %c0_68] : memref<1x8x32xf32, #tpu.memory_space<vmem>>, vector<1x8x32xf32>
    %174 = vector.shape_cast %173 : vector<1x8x32xf32> to vector<8x32xf32>
    %175 = vector.shape_cast %172 : vector<8x32xf32> to vector<1x8x32xf32>
    tpu.vector_store %arg15[%c0_66, %c0_67, %c0_68], %175 {strides = array<i32>} : memref<1x8x32xf32, #tpu.memory_space<vmem>>, vector<1x8x32xf32>,
    return
  }
  func.func @transform_0(%arg0: i32) -> (i32, i32, i32) {
    %c0_i32 = arith.constant 0 : i32
    %c0_i32_0 = arith.constant 0 : i32
    %c0_i32_1 = arith.constant 0 : i32
    return %arg0, %c0_i32, %c0_i32_0 : i32, i32, i32
  }
  func.func @transform_1(%arg0: i32) -> (i32, i32, i32) {
    %c0_i32 = arith.constant 0 : i32
    %c0_i32_0 = arith.constant 0 : i32
    %c0_i32_1 = arith.constant 0 : i32
    return %arg0, %c0_i32, %c0_i32_0 : i32, i32, i32
  }
  func.func @transform_2(%arg0: i32) -> (i32, i32) {
    %c0_i32 = arith.constant 0 : i32
    %c0_i32_0 = arith.constant 0 : i32
    %c0_i32_1 = arith.constant 0 : i32
    return %c0_i32, %c0_i32_0 : i32, i32
  }
  func.func @transform_3(%arg0: i32) -> (i32, i32) {
    %c0_i32 = arith.constant 0 : i32
    %c0_i32_0 = arith.constant 0 : i32
    %c0_i32_1 = arith.constant 0 : i32
    return %c0_i32, %c0_i32_0 : i32, i32
  }
  func.func @transform_4(%arg0: i32) -> (i32, i32) {
    %c0_i32 = arith.constant 0 : i32
    %c0_i32_0 = arith.constant 0 : i32
    %c0_i32_1 = arith.constant 0 : i32
    return %c0_i32, %c0_i32_0 : i32, i32
  }
  func.func @transform_5(%arg0: i32) -> (i32, i32) {
    %c0_i32 = arith.constant 0 : i32
    %c0_i32_0 = arith.constant 0 : i32
    %c0_i32_1 = arith.constant 0 : i32
    return %c0_i32, %c0_i32_0 : i32, i32
  }
  func.func @transform_6(%arg0: i32) -> (i32, i32) {
    %c0_i32 = arith.constant 0 : i32
    %c0_i32_0 = arith.constant 0 : i32
    %c0_i32_1 = arith.constant 0 : i32
    return %c0_i32, %c0_i32_0 : i32, i32
  }
  func.func @transform_7(%arg0: i32) -> (i32, i32) {
    %c0_i32 = arith.constant 0 : i32
    %c0_i32_0 = arith.constant 0 : i32
    %c0_i32_1 = arith.constant 0 : i32
    return %c0_i32, %c0_i32_0 : i32, i32
  }
  func.func @transform_8(%arg0: i32) -> (i32, i32) {
    %c0_i32 = arith.constant 0 : i32
    %c0_i32_0 = arith.constant 0 : i32
    %c0_i32_1 = arith.constant 0 : i32
    return %c0_i32, %c0_i32_0 : i32, i32
  }
  func.func @transform_9(%arg0: i32) -> (i32, i32) {
    %c0_i32 = arith.constant 0 : i32
    %c0_i32_0 = arith.constant 0 : i32
    %c0_i32_1 = arith.constant 0 : i32
    return %c0_i32, %c0_i32_0 : i32, i32
  }
  func.func @transform_10(%arg0: i32) -> (i32, i32) {
    %c0_i32 = arith.constant 0 : i32
    %c0_i32_0 = arith.constant 0 : i32
    %c0_i32_1 = arith.constant 0 : i32
    return %c0_i32, %c0_i32_0 : i32, i32
  }
  func.func @transform_11(%arg0: i32) -> (i32, i32) {
    %c0_i32 = arith.constant 0 : i32
    %c0_i32_0 = arith.constant 0 : i32
    %c0_i32_1 = arith.constant 0 : i32
    return %c0_i32, %c0_i32_0 : i32, i32
  }
  func.func @transform_12(%arg0: i32) -> (i32, i32) {
    %c0_i32 = arith.constant 0 : i32
    %c0_i32_0 = arith.constant 0 : i32
    %c0_i32_1 = arith.constant 0 : i32
    return %c0_i32, %c0_i32_0 : i32, i32
  }
  func.func @transform_13(%arg0: i32) -> (i32, i32) {
    %c0_i32 = arith.constant 0 : i32
    %c0_i32_0 = arith.constant 0 : i32
    %c0_i32_1 = arith.constant 0 : i32
    return %c0_i32, %c0_i32_0 : i32, i32
  }
  func.func @transform_14(%arg0: i32) -> (i32, i32, i32) {
    %c0_i32 = arith.constant 0 : i32
    %c0_i32_0 = arith.constant 0 : i32
    %c0_i32_1 = arith.constant 0 : i32
    return %arg0, %c0_i32, %c0_i32_0 : i32, i32, i32
  }
}

module attributes {stable_mosaic.version = 11 : i64} {
  func.func @_linear_kernel(%arg0: i32, %arg1: memref<8x32xbf16, #tpu.memory_space<vmem>>, %arg2: memref<32x544xbf16, #tpu.memory_space<vmem>>, %arg3: memref<1x544xf32, #tpu.memory_space<vmem>>, %arg4: memref<8x544xf32, #tpu.memory_space<vmem>>) attributes {dimension_semantics = [#tpu.dimension_semantics<parallel>], iteration_bounds = array<i64: 2>, scalar_prefetch = 0 : i64, scratch_operands = 0 : i64, tpu.core_type = #tpu.core_type<tc>, window_params = [{transform_indices = @transform_0, window_bounds = array<i64: 8, 32>}, {pipeline_mode = #tpu.pipeline_mode<synchronous>, transform_indices = @transform_1, window_bounds = array<i64: 32, 544>}, {pipeline_mode = #tpu.pipeline_mode<synchronous>, transform_indices = @transform_2, window_bounds = array<i64: 1, 544>}, {transform_indices = @transform_3, window_bounds = array<i64: 8, 544>}]} {
    %c0 = arith.constant 0 : index
    %c0_0 = arith.constant 0 : index
    %0 = vector.load %arg1[%c0, %c0_0] : memref<8x32xbf16, #tpu.memory_space<vmem>>, vector<8x32xbf16>
    %c0_1 = arith.constant 0 : index
    %c0_2 = arith.constant 0 : index
    %1 = vector.load %arg2[%c0_1, %c0_2] : memref<32x544xbf16, #tpu.memory_space<vmem>>, vector<32x544xbf16>
    %cst = arith.constant dense<0.000000e+00> : vector<8x544xf32>
    %2 = tpu.matmul %0, %1, %cst {dimension_numbers = #tpu.dot_dimension_numbers<[1], [0], [0], [1], [0, 0, 1, 1], [], []>} : vector<8x32xbf16>, vector<32x544xbf16>, vector<8x544xf32> -> vector<8x544xf32>
    %c0_3 = arith.constant 0 : index
    %c0_4 = arith.constant 0 : index
    %3 = vector.load %arg3[%c0_3, %c0_4] : memref<1x544xf32, #tpu.memory_space<vmem>>, vector<1x544xf32>
    %4 = vector.broadcast %3 : vector<1x544xf32> to vector<8x544xf32>
    %5 = arith.addf %2, %4 : vector<8x544xf32>
    %c0_5 = arith.constant 0 : index
    %c0_6 = arith.constant 0 : index
    %6 = vector.load %arg4[%c0_5, %c0_6] : memref<8x544xf32, #tpu.memory_space<vmem>>, vector<8x544xf32>
    tpu.vector_store %arg4[%c0_5, %c0_6], %5 {strides = array<i32>} : memref<8x544xf32, #tpu.memory_space<vmem>>, vector<8x544xf32>,
    return
  }
  func.func @transform_0(%arg0: i32) -> (i32, i32) {
    %c0_i32 = arith.constant 0 : i32
    %c0_i32_0 = arith.constant 0 : i32
    return %arg0, %c0_i32 : i32, i32
  }
  func.func @transform_1(%arg0: i32) -> (i32, i32) {
    %c0_i32 = arith.constant 0 : i32
    %c0_i32_0 = arith.constant 0 : i32
    %c0_i32_1 = arith.constant 0 : i32
    return %c0_i32, %c0_i32_0 : i32, i32
  }
  func.func @transform_2(%arg0: i32) -> (i32, i32) {
    %c0_i32 = arith.constant 0 : i32
    %c0_i32_0 = arith.constant 0 : i32
    %c0_i32_1 = arith.constant 0 : i32
    return %c0_i32, %c0_i32_0 : i32, i32
  }
  func.func @transform_3(%arg0: i32) -> (i32, i32) {
    %c0_i32 = arith.constant 0 : i32
    %c0_i32_0 = arith.constant 0 : i32
    return %arg0, %c0_i32 : i32, i32
  }
}

module attributes {stable_mosaic.version = 11 : i64} {
  func.func @_decoder_kernel(%arg0: i32, %arg1: memref<2x8x32xf32, #tpu.memory_space<vmem>>, %arg2: memref<2x8x32xf32, #tpu.memory_space<vmem>>, %arg3: memref<8x2x128xf32, #tpu.memory_space<vmem>>, %arg4: memref<8x2x128xf32, #tpu.memory_space<vmem>>, %arg5: memref<8x2x128xf32, #tpu.memory_space<vmem>>, %arg6: memref<8x2x128xf32, #tpu.memory_space<vmem>>, %arg7: memref<2x8xf32, #tpu.memory_space<vmem>>, %arg8: memref<5x32xf32, #tpu.memory_space<vmem>>, %arg9: memref<288x32xbf16, #tpu.memory_space<vmem>>, %arg10: memref<1x32xf32, #tpu.memory_space<vmem>>, %arg11: memref<32x32xbf16, #tpu.memory_space<vmem>>, %arg12: memref<1x32xf32, #tpu.memory_space<vmem>>, %arg13: memref<1x32xf32, #tpu.memory_space<vmem>>, %arg14: memref<1x1xf32, #tpu.memory_space<smem>>, %arg15: memref<320x128xbf16, #tpu.memory_space<vmem>>, %arg16: memref<32x128xbf16, #tpu.memory_space<vmem>>, %arg17: memref<1x128xf32, #tpu.memory_space<vmem>>, %arg18: memref<4x32x128xbf16, #tpu.memory_space<vmem>>, %arg19: memref<4x32x128xbf16, #tpu.memory_space<vmem>>, %arg20: memref<2x64x128xbf16, #tpu.memory_space<vmem>>, %arg21: memref<4x64xf32, #tpu.memory_space<vmem>>, %arg22: memref<1x4xf32, #tpu.memory_space<smem>>, %arg23: memref<288x5xbf16, #tpu.memory_space<vmem>>, %arg24: memref<1x5xf32, #tpu.memory_space<vmem>>, %arg25: memref<1x2x37xf32, #tpu.memory_space<vmem>>, %arg26: memref<2x288xf32, #tpu.memory_space<vmem>>, %arg27: memref<2x32xf32, #tpu.memory_space<vmem>>, %arg28: memref<2x32xf32, #tpu.memory_space<vmem>>, %arg29: memref<2x128xf32, #tpu.memory_space<vmem>>, %arg30: memref<2x128xf32, #tpu.memory_space<vmem>>, %arg31: memref<2x32xf32, #tpu.memory_space<vmem>>, %arg32: memref<8x2x32xf32, #tpu.memory_space<vmem>>, %arg33: memref<8x2x32xf32, #tpu.memory_space<vmem>>, %arg34: memref<8x2x32xf32, #tpu.memory_space<vmem>>, %arg35: memref<8x2x32xf32, #tpu.memory_space<vmem>>) attributes {dimension_semantics = [#tpu.dimension_semantics<arbitrary>], iteration_bounds = array<i64: 3>, scalar_prefetch = 0 : i64, scratch_operands = 10 : i64, tpu.core_type = #tpu.core_type<tc>, window_params = [{pipeline_mode = #tpu.pipeline_mode<synchronous>, transform_indices = @transform_0, window_bounds = array<i64: 2, 8, 32>}, {pipeline_mode = #tpu.pipeline_mode<synchronous>, transform_indices = @transform_1, window_bounds = array<i64: 2, 8, 32>}, {pipeline_mode = #tpu.pipeline_mode<synchronous>, transform_indices = @transform_2, window_bounds = array<i64: 8, 2, 128>}, {pipeline_mode = #tpu.pipeline_mode<synchronous>, transform_indices = @transform_3, window_bounds = array<i64: 8, 2, 128>}, {pipeline_mode = #tpu.pipeline_mode<synchronous>, transform_indices = @transform_4, window_bounds = array<i64: 8, 2, 128>}, {pipeline_mode = #tpu.pipeline_mode<synchronous>, transform_indices = @transform_5, window_bounds = array<i64: 8, 2, 128>}, {pipeline_mode = #tpu.pipeline_mode<synchronous>, transform_indices = @transform_6, window_bounds = array<i64: 2, 8>}, {pipeline_mode = #tpu.pipeline_mode<synchronous>, transform_indices = @transform_7, window_bounds = array<i64: 5, 32>}, {pipeline_mode = #tpu.pipeline_mode<synchronous>, transform_indices = @transform_8, window_bounds = array<i64: 288, 32>}, {pipeline_mode = #tpu.pipeline_mode<synchronous>, transform_indices = @transform_9, window_bounds = array<i64: 1, 32>}, {pipeline_mode = #tpu.pipeline_mode<synchronous>, transform_indices = @transform_10, window_bounds = array<i64: 32, 32>}, {pipeline_mode = #tpu.pipeline_mode<synchronous>, transform_indices = @transform_11, window_bounds = array<i64: 1, 32>}, {pipeline_mode = #tpu.pipeline_mode<synchronous>, transform_indices = @transform_12, window_bounds = array<i64: 1, 32>}, {transform_indices = @transform_13, window_bounds = array<i64: 1, 1>}, {pipeline_mode = #tpu.pipeline_mode<synchronous>, transform_indices = @transform_14, window_bounds = array<i64: 320, 128>}, {pipeline_mode = #tpu.pipeline_mode<synchronous>, transform_indices = @transform_15, window_bounds = array<i64: 32, 128>}, {pipeline_mode = #tpu.pipeline_mode<synchronous>, transform_indices = @transform_16, window_bounds = array<i64: 1, 128>}, {pipeline_mode = #tpu.pipeline_mode<synchronous>, transform_indices = @transform_17, window_bounds = array<i64: 4, 32, 128>}, {pipeline_mode = #tpu.pipeline_mode<synchronous>, transform_indices = @transform_18, window_bounds = array<i64: 4, 32, 128>}, {pipeline_mode = #tpu.pipeline_mode<synchronous>, transform_indices = @transform_19, window_bounds = array<i64: 2, 64, 128>}, {pipeline_mode = #tpu.pipeline_mode<synchronous>, transform_indices = @transform_20, window_bounds = array<i64: 4, 64>}, {transform_indices = @transform_21, window_bounds = array<i64: 1, 4>}, {pipeline_mode = #tpu.pipeline_mode<synchronous>, transform_indices = @transform_22, window_bounds = array<i64: 288, 5>}, {pipeline_mode = #tpu.pipeline_mode<synchronous>, transform_indices = @transform_23, window_bounds = array<i64: 1, 5>}, {transform_indices = @transform_24, window_bounds = array<i64: 1, 2, 37>}]} {
    %c0_i32 = arith.constant 0 : i32
    %0 = arith.cmpi eq, %arg0, %c0_i32 : i32
    %1 = arith.extui %0 : i1 to i32
    %c0_i32_0 = arith.constant 0 : i32
    %2 = arith.cmpi ne, %1, %c0_i32_0 : i32
    scf.if %2 {
      %cst_180 = arith.constant 0.000000e+00 : f32
      %289 = vector.broadcast %cst_180 : f32 to vector<2x288xf32>
      %c0_181 = arith.constant 0 : index
      %c0_182 = arith.constant 0 : index
      %290 = vector.load %arg26[%c0_181, %c0_182] : memref<2x288xf32, #tpu.memory_space<vmem>>, vector<2x288xf32>
      tpu.vector_store %arg26[%c0_181, %c0_182], %289 {strides = array<i32>} : memref<2x288xf32, #tpu.memory_space<vmem>>, vector<2x288xf32>,
      %cst_183 = arith.constant 0.000000e+00 : f32
      %291 = vector.broadcast %cst_183 : f32 to vector<2x32xf32>
      %c0_184 = arith.constant 0 : index
      %c0_185 = arith.constant 0 : index
      %292 = vector.load %arg27[%c0_184, %c0_185] : memref<2x32xf32, #tpu.memory_space<vmem>>, vector<2x32xf32>
      tpu.vector_store %arg27[%c0_184, %c0_185], %291 {strides = array<i32>} : memref<2x32xf32, #tpu.memory_space<vmem>>, vector<2x32xf32>,
      %cst_186 = arith.constant 0.000000e+00 : f32
      %293 = vector.broadcast %cst_186 : f32 to vector<2x32xf32>
      %c0_187 = arith.constant 0 : index
      %c0_188 = arith.constant 0 : index
      %294 = vector.load %arg28[%c0_187, %c0_188] : memref<2x32xf32, #tpu.memory_space<vmem>>, vector<2x32xf32>
      tpu.vector_store %arg28[%c0_187, %c0_188], %293 {strides = array<i32>} : memref<2x32xf32, #tpu.memory_space<vmem>>, vector<2x32xf32>,
      %cst_189 = arith.constant 0.000000e+00 : f32
      %295 = vector.broadcast %cst_189 : f32 to vector<2x128xf32>
      %c0_190 = arith.constant 0 : index
      %c0_191 = arith.constant 0 : index
      %296 = vector.load %arg29[%c0_190, %c0_191] : memref<2x128xf32, #tpu.memory_space<vmem>>, vector<2x128xf32>
      tpu.vector_store %arg29[%c0_190, %c0_191], %295 {strides = array<i32>} : memref<2x128xf32, #tpu.memory_space<vmem>>, vector<2x128xf32>,
      %cst_192 = arith.constant 0.000000e+00 : f32
      %297 = vector.broadcast %cst_192 : f32 to vector<2x128xf32>
      %c0_193 = arith.constant 0 : index
      %c0_194 = arith.constant 0 : index
      %298 = vector.load %arg30[%c0_193, %c0_194] : memref<2x128xf32, #tpu.memory_space<vmem>>, vector<2x128xf32>
      tpu.vector_store %arg30[%c0_193, %c0_194], %297 {strides = array<i32>} : memref<2x128xf32, #tpu.memory_space<vmem>>, vector<2x128xf32>,
      %cst_195 = arith.constant 0.000000e+00 : f32
      %299 = vector.broadcast %cst_195 : f32 to vector<2x32xf32>
      %c0_196 = arith.constant 0 : index
      %c0_197 = arith.constant 0 : index
      %300 = vector.load %arg31[%c0_196, %c0_197] : memref<2x32xf32, #tpu.memory_space<vmem>>, vector<2x32xf32>
      tpu.vector_store %arg31[%c0_196, %c0_197], %299 {strides = array<i32>} : memref<2x32xf32, #tpu.memory_space<vmem>>, vector<2x32xf32>,
    } else {
    }
    %c0_i32_1 = arith.constant 0 : i32
    %3 = arith.cmpi ne, %arg0, %c0_i32_1 : i32
    %4 = arith.extui %3 : i1 to i32
    %c0_i32_2 = arith.constant 0 : i32
    %5 = arith.cmpi ne, %4, %c0_i32_2 : i32
    scf.if %5 {
      %c0_180 = arith.constant 0 : index
      %c0_181 = arith.constant 0 : index
      %289 = vector.load %arg26[%c0_180, %c0_181] : memref<2x288xf32, #tpu.memory_space<vmem>>, vector<2x288xf32>
      %c0_182 = arith.constant 0 : index
      %c0_183 = arith.constant 0 : index
      %290 = vector.load %arg29[%c0_182, %c0_183] : memref<2x128xf32, #tpu.memory_space<vmem>>, vector<2x128xf32>
      %c0_184 = arith.constant 0 : index
      %c0_185 = arith.constant 0 : index
      %291 = vector.load %arg30[%c0_184, %c0_185] : memref<2x128xf32, #tpu.memory_space<vmem>>, vector<2x128xf32>
      %c0_186 = arith.constant 0 : index
      %c0_187 = arith.constant 0 : index
      %292 = vector.load %arg31[%c0_186, %c0_187] : memref<2x32xf32, #tpu.memory_space<vmem>>, vector<2x32xf32>
      %293 = tpu.concatenate %290, %291, %292 in 1 : vector<2x128xf32>, vector<2x128xf32>, vector<2x32xf32> -> vector<2x288xf32>
      %294 = arith.addf %289, %293 : vector<2x288xf32>
      %c0_188 = arith.constant 0 : index
      %c0_189 = arith.constant 0 : index
      %295 = vector.load %arg26[%c0_188, %c0_189] : memref<2x288xf32, #tpu.memory_space<vmem>>, vector<2x288xf32>
      tpu.vector_store %arg26[%c0_188, %c0_189], %294 {strides = array<i32>} : memref<2x288xf32, #tpu.memory_space<vmem>>, vector<2x288xf32>,
    } else {
    }
    %c0 = arith.constant 0 : index
    %c0_3 = arith.constant 0 : index
    %6 = vector.load %arg26[%c0, %c0_3] : memref<2x288xf32, #tpu.memory_space<vmem>>, vector<2x288xf32>
    %7 = arith.truncf %6 : vector<2x288xf32> to vector<2x288xbf16>
    %c0_4 = arith.constant 0 : index
    %c0_5 = arith.constant 0 : index
    %8 = vector.load %arg7[%c0_4, %c0_5] : memref<2x8xf32, #tpu.memory_space<vmem>>, vector<2x8xf32>
    %9 = tpu.transpose %8, [1, 0] : vector<2x8xf32> -> vector<8x2xf32>
    %c0_6 = arith.constant 0 : index
    %c0_7 = arith.constant 0 : index
    %10 = vector.load %arg9[%c0_6, %c0_7] : memref<288x32xbf16, #tpu.memory_space<vmem>>, vector<288x32xbf16>
    %cst = arith.constant dense<0.000000e+00> : vector<2x32xf32>
    %11 = tpu.matmul %7, %10, %cst {dimension_numbers = #tpu.dot_dimension_numbers<[1], [0], [0], [1], [0, 0, 1, 1], [], []>} : vector<2x288xbf16>, vector<288x32xbf16>, vector<2x32xf32> -> vector<2x32xf32>
    %c0_8 = arith.constant 0 : index
    %c0_9 = arith.constant 0 : index
    %12 = vector.load %arg10[%c0_8, %c0_9] : memref<1x32xf32, #tpu.memory_space<vmem>>, vector<1x32xf32>
    %13 = vector.broadcast %12 : vector<1x32xf32> to vector<2x32xf32>
    %14 = arith.addf %11, %13 : vector<2x32xf32>
    %15 = arith.truncf %14 : vector<2x32xf32> to vector<2x32xbf16>
    %c0_10 = arith.constant 0 : index
    %c0_11 = arith.constant 0 : index
    %16 = vector.load %arg11[%c0_10, %c0_11] : memref<32x32xbf16, #tpu.memory_space<vmem>>, vector<32x32xbf16>
    %cst_12 = arith.constant dense<0.000000e+00> : vector<2x32xf32>
    %17 = tpu.matmul %15, %16, %cst_12 {dimension_numbers = #tpu.dot_dimension_numbers<[1], [0], [0], [1], [0, 0, 1, 1], [], []>} : vector<2x32xbf16>, vector<32x32xbf16>, vector<2x32xf32> -> vector<2x32xf32>
    %c0_13 = arith.constant 0 : index
    %c0_14 = arith.constant 0 : index
    %18 = vector.load %arg12[%c0_13, %c0_14] : memref<1x32xf32, #tpu.memory_space<vmem>>, vector<1x32xf32>
    %19 = vector.broadcast %18 : vector<1x32xf32> to vector<2x32xf32>
    %20 = arith.addf %17, %19 : vector<2x32xf32>
    %c0_15 = arith.constant 0 : index
    %c0_16 = arith.constant 0 : index
    %c0_17 = arith.constant 0 : index
    %21 = vector.load %arg1[%c0_15, %c0_16, %c0_17] : memref<2x8x32xf32, #tpu.memory_space<vmem>>, vector<2x8x32xf32>
    %22 = vector.shape_cast %20 : vector<2x32xf32> to vector<2x1x32xf32>
    %23 = vector.broadcast %22 : vector<2x1x32xf32> to vector<2x8x32xf32>
    %24 = arith.addf %21, %23 : vector<2x8x32xf32>
    %25 = math.tanh %24 : vector<2x8x32xf32>
    %c0_18 = arith.constant 0 : index
    %c0_19 = arith.constant 0 : index
    %26 = vector.load %arg13[%c0_18, %c0_19] : memref<1x32xf32, #tpu.memory_space<vmem>>, vector<1x32xf32>
    %27 = vector.shape_cast %26 : vector<1x32xf32> to vector<1x1x32xf32>
    %28 = vector.broadcast %27 : vector<1x1x32xf32> to vector<2x8x32xf32>
    %29 = arith.mulf %25, %28 : vector<2x8x32xf32>
    %cst_20 = arith.constant dense<0.000000e+00> : vector<2x8xf32>
    %30 = vector.multi_reduction <add>, %29, %cst_20 [2] : vector<2x8x32xf32> to vector<2x8xf32>
    %c0_21 = arith.constant 0 : index
    %c0_22 = arith.constant 0 : index
    %31 = memref.load %arg14[%c0_21, %c0_22] : memref<1x1xf32, #tpu.memory_space<smem>>
    %32 = vector.broadcast %31 : f32 to vector<2x8xf32>
    %33 = arith.addf %30, %32 : vector<2x8xf32>
    %cst_23 = arith.constant 5.000000e-01 : f32
    %34 = vector.broadcast %cst_23 : f32 to vector<2x8xf32>
    %35 = arith.cmpf ogt, %8, %34 : vector<2x8xf32>
    %cst_24 = arith.constant -1.000000e+30 : f32
    %36 = vector.broadcast %cst_24 : f32 to vector<2x8xf32>
    %37 = arith.select %35, %36, %33 : vector<2x8xi1>, vector<2x8xf32>
    %cst_25 = arith.constant dense<0xFF800000> : vector<2xf32>
    %38 = vector.multi_reduction <maximumf>, %37, %cst_25 [1] : vector<2x8xf32> to vector<2xf32>
    %39 = vector.shape_cast %38 : vector<2xf32> to vector<2x1xf32>
    %40 = vector.broadcast %39 : vector<2x1xf32> to vector<2x8xf32>
    %41 = arith.subf %37, %40 : vector<2x8xf32>
    %42 = math.exp %41 : vector<2x8xf32>
    %cst_26 = arith.constant dense<0.000000e+00> : vector<2xf32>
    %43 = vector.multi_reduction <add>, %42, %cst_26 [1] : vector<2x8xf32> to vector<2xf32>
    %44 = vector.shape_cast %43 : vector<2xf32> to vector<2x1xf32>
    %45 = tpu.reciprocal %44 {approx = true} : vector<2x1xf32> -> vector<2x1xf32>
    %46 = vector.broadcast %45 : vector<2x1xf32> to vector<2x8xf32>
    %47 = arith.mulf %42, %46 : vector<2x8xf32>
    %48 = vector.shape_cast %47 : vector<2x8xf32> to vector<2x8x1xf32>
    %c0_27 = arith.constant 0 : index
    %c0_28 = arith.constant 0 : index
    %c0_29 = arith.constant 0 : index
    %49 = vector.load %arg2[%c0_27, %c0_28, %c0_29] : memref<2x8x32xf32, #tpu.memory_space<vmem>>, vector<2x8x32xf32>
    %50 = vector.broadcast %48 : vector<2x8x1xf32> to vector<2x8x32xf32>
    %51 = arith.mulf %50, %49 : vector<2x8x32xf32>
    %cst_30 = arith.constant dense<0.000000e+00> : vector<2x32xf32>
    %52 = vector.multi_reduction <add>, %51, %cst_30 [1] : vector<2x8x32xf32> to vector<2x32xf32>
    %c0_31 = arith.constant 0 : index
    %c0_32 = arith.constant 0 : index
    %53 = vector.load %arg15[%c0_31, %c0_32] : memref<320x128xbf16, #tpu.memory_space<vmem>>, vector<288x128xbf16>
    %cst_33 = arith.constant dense<0.000000e+00> : vector<2x128xf32>
    %54 = tpu.matmul %7, %53, %cst_33 {dimension_numbers = #tpu.dot_dimension_numbers<[1], [0], [0], [1], [0, 0, 1, 1], [], []>} : vector<2x288xbf16>, vector<288x128xbf16>, vector<2x128xf32> -> vector<2x128xf32>
    %55 = arith.truncf %52 : vector<2x32xf32> to vector<2x32xbf16>
    %c288 = arith.constant 288 : index
    %c0_34 = arith.constant 0 : index
    %56 = vector.load %arg15[%c288, %c0_34] : memref<320x128xbf16, #tpu.memory_space<vmem>>, vector<32x128xbf16>
    %cst_35 = arith.constant dense<0.000000e+00> : vector<2x128xf32>
    %57 = tpu.matmul %55, %56, %cst_35 {dimension_numbers = #tpu.dot_dimension_numbers<[1], [0], [0], [1], [0, 0, 1, 1], [], []>} : vector<2x32xbf16>, vector<32x128xbf16>, vector<2x128xf32> -> vector<2x128xf32>
    %58 = arith.addf %54, %57 : vector<2x128xf32>
    %c0_36 = arith.constant 0 : index
    %c0_37 = arith.constant 0 : index
    %59 = vector.load %arg27[%c0_36, %c0_37] : memref<2x32xf32, #tpu.memory_space<vmem>>, vector<2x32xf32>
    %60 = arith.truncf %59 : vector<2x32xf32> to vector<2x32xbf16>
    %c0_38 = arith.constant 0 : index
    %c0_39 = arith.constant 0 : index
    %61 = vector.load %arg16[%c0_38, %c0_39] : memref<32x128xbf16, #tpu.memory_space<vmem>>, vector<32x128xbf16>
    %cst_40 = arith.constant dense<0.000000e+00> : vector<2x128xf32>
    %62 = tpu.matmul %60, %61, %cst_40 {dimension_numbers = #tpu.dot_dimension_numbers<[1], [0], [0], [1], [0, 0, 1, 1], [], []>} : vector<2x32xbf16>, vector<32x128xbf16>, vector<2x128xf32> -> vector<2x128xf32>
    %63 = arith.addf %58, %62 : vector<2x128xf32>
    %c0_41 = arith.constant 0 : index
    %c0_42 = arith.constant 0 : index
    %64 = vector.load %arg17[%c0_41, %c0_42] : memref<1x128xf32, #tpu.memory_space<vmem>>, vector<1x128xf32>
    %65 = vector.broadcast %64 : vector<1x128xf32> to vector<2x128xf32>
    %66 = arith.addf %63, %65 : vector<2x128xf32>
    %67 = vector.extract_strided_slice %66 {offsets = [0, 0], sizes = [2, 96], strides = [1, 1]} : vector<2x128xf32> to vector<2x96xf32>
    %68 = arith.negf %67 : vector<2x96xf32>
    %69 = math.exp %68 : vector<2x96xf32>
    %cst_43 = arith.constant 1.000000e+00 : f32
    %70 = vector.broadcast %cst_43 : f32 to vector<2x96xf32>
    %71 = arith.addf %70, %69 : vector<2x96xf32>
    %72 = arith.divf %70, %71 : vector<2x96xf32>
    %73 = vector.extract_strided_slice %72 {offsets = [0, 32], sizes = [2, 32], strides = [1, 1]} : vector<2x96xf32> to vector<2x32xf32>
    %c0_44 = arith.constant 0 : index
    %c0_45 = arith.constant 0 : index
    %74 = vector.load %arg28[%c0_44, %c0_45] : memref<2x32xf32, #tpu.memory_space<vmem>>, vector<2x32xf32>
    %75 = arith.mulf %73, %74 : vector<2x32xf32>
    %76 = vector.extract_strided_slice %72 {offsets = [0, 0], sizes = [2, 32], strides = [1, 1]} : vector<2x96xf32> to vector<2x32xf32>
    %77 = vector.extract_strided_slice %66 {offsets = [0, 96], sizes = [2, 32], strides = [1, 1]} : vector<2x128xf32> to vector<2x32xf32>
    %78 = math.tanh %77 : vector<2x32xf32>
    %79 = arith.mulf %76, %78 : vector<2x32xf32>
    %80 = arith.addf %75, %79 : vector<2x32xf32>
    %81 = vector.extract_strided_slice %72 {offsets = [0, 64], sizes = [2, 32], strides = [1, 1]} : vector<2x96xf32> to vector<2x32xf32>
    %82 = math.tanh %80 : vector<2x32xf32>
    %83 = arith.mulf %81, %82 : vector<2x32xf32>
    %c0_46 = arith.constant 0 : index
    %c0_47 = arith.constant 0 : index
    %84 = vector.load %arg27[%c0_46, %c0_47] : memref<2x32xf32, #tpu.memory_space<vmem>>, vector<2x32xf32>
    tpu.vector_store %arg27[%c0_46, %c0_47], %83 {strides = array<i32>} : memref<2x32xf32, #tpu.memory_space<vmem>>, vector<2x32xf32>,
    %c0_48 = arith.constant 0 : index
    %c0_49 = arith.constant 0 : index
    %85 = vector.load %arg28[%c0_48, %c0_49] : memref<2x32xf32, #tpu.memory_space<vmem>>, vector<2x32xf32>
    tpu.vector_store %arg28[%c0_48, %c0_49], %80 {strides = array<i32>} : memref<2x32xf32, #tpu.memory_space<vmem>>, vector<2x32xf32>,
    %86 = arith.truncf %83 : vector<2x32xf32> to vector<2x32xbf16>
    %c0_50 = arith.constant 0 : index
    %c0_51 = arith.constant 0 : index
    %c0_52 = arith.constant 0 : index
    %87 = vector.load %arg18[%c0_50, %c0_51, %c0_52] : memref<4x32x128xbf16, #tpu.memory_space<vmem>>, vector<1x32x128xbf16>
    %88 = vector.shape_cast %87 : vector<1x32x128xbf16> to vector<32x128xbf16>
    %cst_53 = arith.constant dense<0.000000e+00> : vector<2x128xf32>
    %89 = tpu.matmul %86, %88, %cst_53 {dimension_numbers = #tpu.dot_dimension_numbers<[1], [0], [0], [1], [0, 0, 1, 1], [], []>} : vector<2x32xbf16>, vector<32x128xbf16>, vector<2x128xf32> -> vector<2x128xf32>
    %c1 = arith.constant 1 : index
    %c0_54 = arith.constant 0 : index
    %c0_55 = arith.constant 0 : index
    %90 = vector.load %arg18[%c1, %c0_54, %c0_55] : memref<4x32x128xbf16, #tpu.memory_space<vmem>>, vector<1x32x128xbf16>
    %91 = vector.shape_cast %90 : vector<1x32x128xbf16> to vector<32x128xbf16>
    %cst_56 = arith.constant dense<0.000000e+00> : vector<2x128xf32>
    %92 = tpu.matmul %86, %91, %cst_56 {dimension_numbers = #tpu.dot_dimension_numbers<[1], [0], [0], [1], [0, 0, 1, 1], [], []>} : vector<2x32xbf16>, vector<32x128xbf16>, vector<2x128xf32> -> vector<2x128xf32>
    %c2 = arith.constant 2 : index
    %c0_57 = arith.constant 0 : index
    %c0_58 = arith.constant 0 : index
    %93 = vector.load %arg18[%c2, %c0_57, %c0_58] : memref<4x32x128xbf16, #tpu.memory_space<vmem>>, vector<1x32x128xbf16>
    %94 = vector.shape_cast %93 : vector<1x32x128xbf16> to vector<32x128xbf16>
    %cst_59 = arith.constant dense<0.000000e+00> : vector<2x128xf32>
    %95 = tpu.matmul %86, %94, %cst_59 {dimension_numbers = #tpu.dot_dimension_numbers<[1], [0], [0], [1], [0, 0, 1, 1], [], []>} : vector<2x32xbf16>, vector<32x128xbf16>, vector<2x128xf32> -> vector<2x128xf32>
    %c3 = arith.constant 3 : index
    %c0_60 = arith.constant 0 : index
    %c0_61 = arith.constant 0 : index
    %96 = vector.load %arg18[%c3, %c0_60, %c0_61] : memref<4x32x128xbf16, #tpu.memory_space<vmem>>, vector<1x32x128xbf16>
    %97 = vector.shape_cast %96 : vector<1x32x128xbf16> to vector<32x128xbf16>
    %cst_62 = arith.constant dense<0.000000e+00> : vector<2x128xf32>
    %98 = tpu.matmul %86, %97, %cst_62 {dimension_numbers = #tpu.dot_dimension_numbers<[1], [0], [0], [1], [0, 0, 1, 1], [], []>} : vector<2x32xbf16>, vector<32x128xbf16>, vector<2x128xf32> -> vector<2x128xf32>
    %c0_63 = arith.constant 0 : index
    %c0_64 = arith.constant 0 : index
    %c0_65 = arith.constant 0 : index
    %99 = vector.load %arg19[%c0_63, %c0_64, %c0_65] : memref<4x32x128xbf16, #tpu.memory_space<vmem>>, vector<1x32x128xbf16>
    %100 = vector.shape_cast %99 : vector<1x32x128xbf16> to vector<32x128xbf16>
    %cst_66 = arith.constant 0.000000e+00 : f32
    %101 = vector.broadcast %cst_66 : f32 to vector<2x32xf32>
    %c0_i32_67 = arith.constant 0 : i32
    %c8_i32 = arith.constant 8 : i32
    %102 = arith.addi %c0_i32_67, %c8_i32 : i32
    %c1_i32 = arith.constant 1 : i32
    %103:2 = scf.for %arg36 = %c0_i32_67 to %102 step %c1_i32 iter_args(%arg37 = %101, %arg38 = %101) -> (vector<2x32xf32>, vector<2x32xf32>)  : i32 {
      %289 = arith.index_cast %arg36 : i32 to index
      %c0_180 = arith.constant 0 : index
      %c0_181 = arith.constant 0 : index
      %290 = vector.load %arg3[%289, %c0_180, %c0_181] : memref<8x2x128xf32, #tpu.memory_space<vmem>>, vector<1x2x128xf32>
      %291 = vector.shape_cast %290 : vector<1x2x128xf32> to vector<2x128xf32>
      %292 = arith.addf %291, %89 : vector<2x128xf32>
      %293 = arith.truncf %arg37 : vector<2x32xf32> to vector<2x32xbf16>
      %cst_182 = arith.constant dense<0.000000e+00> : vector<2x128xf32>
      %294 = tpu.matmul %293, %100, %cst_182 {dimension_numbers = #tpu.dot_dimension_numbers<[1], [0], [0], [1], [0, 0, 1, 1], [], []>} : vector<2x32xbf16>, vector<32x128xbf16>, vector<2x128xf32> -> vector<2x128xf32>
      %295 = arith.addf %292, %294 : vector<2x128xf32>
      %296 = vector.extract_strided_slice %295 {offsets = [0, 0], sizes = [2, 96], strides = [1, 1]} : vector<2x128xf32> to vector<2x96xf32>
      %297 = arith.negf %296 : vector<2x96xf32>
      %298 = math.exp %297 : vector<2x96xf32>
      %cst_183 = arith.constant 1.000000e+00 : f32
      %299 = vector.broadcast %cst_183 : f32 to vector<2x96xf32>
      %300 = arith.addf %299, %298 : vector<2x96xf32>
      %301 = arith.divf %299, %300 : vector<2x96xf32>
      %302 = vector.extract_strided_slice %301 {offsets = [0, 32], sizes = [2, 32], strides = [1, 1]} : vector<2x96xf32> to vector<2x32xf32>
      %303 = arith.mulf %302, %arg38 : vector<2x32xf32>
      %304 = vector.extract_strided_slice %301 {offsets = [0, 0], sizes = [2, 32], strides = [1, 1]} : vector<2x96xf32> to vector<2x32xf32>
      %305 = vector.extract_strided_slice %295 {offsets = [0, 96], sizes = [2, 32], strides = [1, 1]} : vector<2x128xf32> to vector<2x32xf32>
      %306 = math.tanh %305 : vector<2x32xf32>
      %307 = arith.mulf %304, %306 : vector<2x32xf32>
      %308 = arith.addf %303, %307 : vector<2x32xf32>
      %309 = vector.extract_strided_slice %301 {offsets = [0, 64], sizes = [2, 32], strides = [1, 1]} : vector<2x96xf32> to vector<2x32xf32>
      %310 = math.tanh %308 : vector<2x32xf32>
      %311 = arith.mulf %309, %310 : vector<2x32xf32>
      %312 = arith.index_cast %arg36 : i32 to index
      %c0_184 = arith.constant 0 : index
      %c0_185 = arith.constant 0 : index
      %313 = vector.load %arg32[%312, %c0_184, %c0_185] : memref<8x2x32xf32, #tpu.memory_space<vmem>>, vector<1x2x32xf32>
      %314 = vector.shape_cast %313 : vector<1x2x32xf32> to vector<2x32xf32>
      %315 = vector.shape_cast %311 : vector<2x32xf32> to vector<1x2x32xf32>
      tpu.vector_store %arg32[%312, %c0_184, %c0_185], %315 {strides = array<i32>} : memref<8x2x32xf32, #tpu.memory_space<vmem>>, vector<1x2x32xf32>,
      scf.yield %311, %308 : vector<2x32xf32>, vector<2x32xf32>
    }
    %c8_i32_68 = arith.constant 8 : i32
    %c1_69 = arith.constant 1 : index
    %c0_70 = arith.constant 0 : index
    %c0_71 = arith.constant 0 : index
    %104 = vector.load %arg19[%c1_69, %c0_70, %c0_71] : memref<4x32x128xbf16, #tpu.memory_space<vmem>>, vector<1x32x128xbf16>
    %105 = vector.shape_cast %104 : vector<1x32x128xbf16> to vector<32x128xbf16>
    %cst_72 = arith.constant 0.000000e+00 : f32
    %106 = vector.broadcast %cst_72 : f32 to vector<2x32xf32>
    %c0_i32_73 = arith.constant 0 : i32
    %c8_i32_74 = arith.constant 8 : i32
    %107 = arith.addi %c0_i32_73, %c8_i32_74 : i32
    %c1_i32_75 = arith.constant 1 : i32
    %108:2 = scf.for %arg36 = %c0_i32_73 to %107 step %c1_i32_75 iter_args(%arg37 = %106, %arg38 = %106) -> (vector<2x32xf32>, vector<2x32xf32>)  : i32 {
      %c7_i32 = arith.constant 7 : i32
      %289 = arith.subi %c7_i32, %arg36 : i32
      %290 = arith.index_cast %289 : i32 to index
      %c0_180 = arith.constant 0 : index
      %c0_181 = arith.constant 0 : index
      %291 = vector.load %arg4[%290, %c0_180, %c0_181] : memref<8x2x128xf32, #tpu.memory_space<vmem>>, vector<1x2x128xf32>
      %292 = vector.shape_cast %291 : vector<1x2x128xf32> to vector<2x128xf32>
      %293 = arith.addf %292, %92 : vector<2x128xf32>
      %294 = arith.truncf %arg37 : vector<2x32xf32> to vector<2x32xbf16>
      %cst_182 = arith.constant dense<0.000000e+00> : vector<2x128xf32>
      %295 = tpu.matmul %294, %105, %cst_182 {dimension_numbers = #tpu.dot_dimension_numbers<[1], [0], [0], [1], [0, 0, 1, 1], [], []>} : vector<2x32xbf16>, vector<32x128xbf16>, vector<2x128xf32> -> vector<2x128xf32>
      %296 = arith.addf %293, %295 : vector<2x128xf32>
      %297 = vector.extract_strided_slice %296 {offsets = [0, 0], sizes = [2, 96], strides = [1, 1]} : vector<2x128xf32> to vector<2x96xf32>
      %298 = arith.negf %297 : vector<2x96xf32>
      %299 = math.exp %298 : vector<2x96xf32>
      %cst_183 = arith.constant 1.000000e+00 : f32
      %300 = vector.broadcast %cst_183 : f32 to vector<2x96xf32>
      %301 = arith.addf %300, %299 : vector<2x96xf32>
      %302 = arith.divf %300, %301 : vector<2x96xf32>
      %303 = vector.extract_strided_slice %302 {offsets = [0, 32], sizes = [2, 32], strides = [1, 1]} : vector<2x96xf32> to vector<2x32xf32>
      %304 = arith.mulf %303, %arg38 : vector<2x32xf32>
      %305 = vector.extract_strided_slice %302 {offsets = [0, 0], sizes = [2, 32], strides = [1, 1]} : vector<2x96xf32> to vector<2x32xf32>
      %306 = vector.extract_strided_slice %296 {offsets = [0, 96], sizes = [2, 32], strides = [1, 1]} : vector<2x128xf32> to vector<2x32xf32>
      %307 = math.tanh %306 : vector<2x32xf32>
      %308 = arith.mulf %305, %307 : vector<2x32xf32>
      %309 = arith.addf %304, %308 : vector<2x32xf32>
      %310 = vector.extract_strided_slice %302 {offsets = [0, 64], sizes = [2, 32], strides = [1, 1]} : vector<2x96xf32> to vector<2x32xf32>
      %311 = math.tanh %309 : vector<2x32xf32>
      %312 = arith.mulf %310, %311 : vector<2x32xf32>
      %313 = arith.index_cast %289 : i32 to index
      %c0_184 = arith.constant 0 : index
      %c0_185 = arith.constant 0 : index
      %314 = vector.load %arg33[%313, %c0_184, %c0_185] : memref<8x2x32xf32, #tpu.memory_space<vmem>>, vector<1x2x32xf32>
      %315 = vector.shape_cast %314 : vector<1x2x32xf32> to vector<2x32xf32>
      %316 = vector.shape_cast %312 : vector<2x32xf32> to vector<1x2x32xf32>
      tpu.vector_store %arg33[%313, %c0_184, %c0_185], %316 {strides = array<i32>} : memref<8x2x32xf32, #tpu.memory_space<vmem>>, vector<1x2x32xf32>,
      scf.yield %312, %309 : vector<2x32xf32>, vector<2x32xf32>
    }
    %c8_i32_76 = arith.constant 8 : i32
    %c0_77 = arith.constant 0 : index
    %c0_78 = arith.constant 0 : index
    %c0_79 = arith.constant 0 : index
    %109 = vector.load %arg20[%c0_77, %c0_78, %c0_79] : memref<2x64x128xbf16, #tpu.memory_space<vmem>>, vector<1x32x128xbf16>
    %110 = vector.shape_cast %109 : vector<1x32x128xbf16> to vector<32x128xbf16>
    %c0_80 = arith.constant 0 : index
    %c32 = arith.constant 32 : index
    %c0_81 = arith.constant 0 : index
    %111 = vector.load %arg20[%c0_80, %c32, %c0_81] : memref<2x64x128xbf16, #tpu.memory_space<vmem>>, vector<1x32x128xbf16>
    %112 = vector.shape_cast %111 : vector<1x32x128xbf16> to vector<32x128xbf16>
    %c1_82 = arith.constant 1 : index
    %c0_83 = arith.constant 0 : index
    %c0_84 = arith.constant 0 : index
    %113 = vector.load %arg20[%c1_82, %c0_83, %c0_84] : memref<2x64x128xbf16, #tpu.memory_space<vmem>>, vector<1x32x128xbf16>
    %114 = vector.shape_cast %113 : vector<1x32x128xbf16> to vector<32x128xbf16>
    %c1_85 = arith.constant 1 : index
    %c32_86 = arith.constant 32 : index
    %c0_87 = arith.constant 0 : index
    %115 = vector.load %arg20[%c1_85, %c32_86, %c0_87] : memref<2x64x128xbf16, #tpu.memory_space<vmem>>, vector<1x32x128xbf16>
    %116 = vector.shape_cast %115 : vector<1x32x128xbf16> to vector<32x128xbf16>
    %c2_88 = arith.constant 2 : index
    %c0_89 = arith.constant 0 : index
    %c0_90 = arith.constant 0 : index
    %117 = vector.load %arg19[%c2_88, %c0_89, %c0_90] : memref<4x32x128xbf16, #tpu.memory_space<vmem>>, vector<1x32x128xbf16>
    %118 = vector.shape_cast %117 : vector<1x32x128xbf16> to vector<32x128xbf16>
    %cst_91 = arith.constant 0.000000e+00 : f32
    %119 = vector.broadcast %cst_91 : f32 to vector<2x32xf32>
    %c0_i32_92 = arith.constant 0 : i32
    %c8_i32_93 = arith.constant 8 : i32
    %120 = arith.addi %c0_i32_92, %c8_i32_93 : i32
    %c1_i32_94 = arith.constant 1 : i32
    %121:2 = scf.for %arg36 = %c0_i32_92 to %120 step %c1_i32_94 iter_args(%arg37 = %119, %arg38 = %119) -> (vector<2x32xf32>, vector<2x32xf32>)  : i32 {
      %289 = arith.index_cast %arg36 : i32 to index
      %c0_180 = arith.constant 0 : index
      %c0_181 = arith.constant 0 : index
      %290 = vector.load %arg5[%289, %c0_180, %c0_181] : memref<8x2x128xf32, #tpu.memory_space<vmem>>, vector<1x2x128xf32>
      %291 = vector.shape_cast %290 : vector<1x2x128xf32> to vector<2x128xf32>
      %292 = arith.addf %291, %95 : vector<2x128xf32>
      %293 = arith.index_cast %arg36 : i32 to index
      %c0_182 = arith.constant 0 : index
      %c0_183 = arith.constant 0 : index
      %294 = vector.load %arg32[%293, %c0_182, %c0_183] : memref<8x2x32xf32, #tpu.memory_space<vmem>>, vector<1x2x32xf32>
      %295 = vector.shape_cast %294 : vector<1x2x32xf32> to vector<2x32xf32>
      %296 = arith.truncf %295 : vector<2x32xf32> to vector<2x32xbf16>
      %cst_184 = arith.constant dense<0.000000e+00> : vector<2x128xf32>
      %297 = tpu.matmul %296, %110, %cst_184 {dimension_numbers = #tpu.dot_dimension_numbers<[1], [0], [0], [1], [0, 0, 1, 1], [], []>} : vector<2x32xbf16>, vector<32x128xbf16>, vector<2x128xf32> -> vector<2x128xf32>
      %298 = arith.addf %292, %297 : vector<2x128xf32>
      %299 = arith.index_cast %arg36 : i32 to index
      %c0_185 = arith.constant 0 : index
      %c0_186 = arith.constant 0 : index
      %300 = vector.load %arg33[%299, %c0_185, %c0_186] : memref<8x2x32xf32, #tpu.memory_space<vmem>>, vector<1x2x32xf32>
      %301 = vector.shape_cast %300 : vector<1x2x32xf32> to vector<2x32xf32>
      %302 = arith.truncf %301 : vector<2x32xf32> to vector<2x32xbf16>
      %cst_187 = arith.constant dense<0.000000e+00> : vector<2x128xf32>
      %303 = tpu.matmul %302, %112, %cst_187 {dimension_numbers = #tpu.dot_dimension_numbers<[1], [0], [0], [1], [0, 0, 1, 1], [], []>} : vector<2x32xbf16>, vector<32x128xbf16>, vector<2x128xf32> -> vector<2x128xf32>
      %304 = arith.addf %298, %303 : vector<2x128xf32>
      %305 = arith.truncf %arg37 : vector<2x32xf32> to vector<2x32xbf16>
      %cst_188 = arith.constant dense<0.000000e+00> : vector<2x128xf32>
      %306 = tpu.matmul %305, %118, %cst_188 {dimension_numbers = #tpu.dot_dimension_numbers<[1], [0], [0], [1], [0, 0, 1, 1], [], []>} : vector<2x32xbf16>, vector<32x128xbf16>, vector<2x128xf32> -> vector<2x128xf32>
      %307 = arith.addf %304, %306 : vector<2x128xf32>
      %308 = vector.extract_strided_slice %307 {offsets = [0, 0], sizes = [2, 96], strides = [1, 1]} : vector<2x128xf32> to vector<2x96xf32>
      %309 = arith.negf %308 : vector<2x96xf32>
      %310 = math.exp %309 : vector<2x96xf32>
      %cst_189 = arith.constant 1.000000e+00 : f32
      %311 = vector.broadcast %cst_189 : f32 to vector<2x96xf32>
      %312 = arith.addf %311, %310 : vector<2x96xf32>
      %313 = arith.divf %311, %312 : vector<2x96xf32>
      %314 = vector.extract_strided_slice %313 {offsets = [0, 32], sizes = [2, 32], strides = [1, 1]} : vector<2x96xf32> to vector<2x32xf32>
      %315 = arith.mulf %314, %arg38 : vector<2x32xf32>
      %316 = vector.extract_strided_slice %313 {offsets = [0, 0], sizes = [2, 32], strides = [1, 1]} : vector<2x96xf32> to vector<2x32xf32>
      %317 = vector.extract_strided_slice %307 {offsets = [0, 96], sizes = [2, 32], strides = [1, 1]} : vector<2x128xf32> to vector<2x32xf32>
      %318 = math.tanh %317 : vector<2x32xf32>
      %319 = arith.mulf %316, %318 : vector<2x32xf32>
      %320 = arith.addf %315, %319 : vector<2x32xf32>
      %321 = vector.extract_strided_slice %313 {offsets = [0, 64], sizes = [2, 32], strides = [1, 1]} : vector<2x96xf32> to vector<2x32xf32>
      %322 = math.tanh %320 : vector<2x32xf32>
      %323 = arith.mulf %321, %322 : vector<2x32xf32>
      %324 = arith.index_cast %arg36 : i32 to index
      %c0_190 = arith.constant 0 : index
      %c0_191 = arith.constant 0 : index
      %325 = vector.load %arg34[%324, %c0_190, %c0_191] : memref<8x2x32xf32, #tpu.memory_space<vmem>>, vector<1x2x32xf32>
      %326 = vector.shape_cast %325 : vector<1x2x32xf32> to vector<2x32xf32>
      %327 = vector.shape_cast %323 : vector<2x32xf32> to vector<1x2x32xf32>
      tpu.vector_store %arg34[%324, %c0_190, %c0_191], %327 {strides = array<i32>} : memref<8x2x32xf32, #tpu.memory_space<vmem>>, vector<1x2x32xf32>,
      scf.yield %323, %320 : vector<2x32xf32>, vector<2x32xf32>
    }
    %c8_i32_95 = arith.constant 8 : i32
    %c3_96 = arith.constant 3 : index
    %c0_97 = arith.constant 0 : index
    %c0_98 = arith.constant 0 : index
    %122 = vector.load %arg19[%c3_96, %c0_97, %c0_98] : memref<4x32x128xbf16, #tpu.memory_space<vmem>>, vector<1x32x128xbf16>
    %123 = vector.shape_cast %122 : vector<1x32x128xbf16> to vector<32x128xbf16>
    %cst_99 = arith.constant 0.000000e+00 : f32
    %124 = vector.broadcast %cst_99 : f32 to vector<2x32xf32>
    %c0_i32_100 = arith.constant 0 : i32
    %c8_i32_101 = arith.constant 8 : i32
    %125 = arith.addi %c0_i32_100, %c8_i32_101 : i32
    %c1_i32_102 = arith.constant 1 : i32
    %126:2 = scf.for %arg36 = %c0_i32_100 to %125 step %c1_i32_102 iter_args(%arg37 = %124, %arg38 = %124) -> (vector<2x32xf32>, vector<2x32xf32>)  : i32 {
      %c7_i32 = arith.constant 7 : i32
      %289 = arith.subi %c7_i32, %arg36 : i32
      %290 = arith.index_cast %289 : i32 to index
      %c0_180 = arith.constant 0 : index
      %c0_181 = arith.constant 0 : index
      %291 = vector.load %arg6[%290, %c0_180, %c0_181] : memref<8x2x128xf32, #tpu.memory_space<vmem>>, vector<1x2x128xf32>
      %292 = vector.shape_cast %291 : vector<1x2x128xf32> to vector<2x128xf32>
      %293 = arith.addf %292, %98 : vector<2x128xf32>
      %294 = arith.index_cast %289 : i32 to index
      %c0_182 = arith.constant 0 : index
      %c0_183 = arith.constant 0 : index
      %295 = vector.load %arg32[%294, %c0_182, %c0_183] : memref<8x2x32xf32, #tpu.memory_space<vmem>>, vector<1x2x32xf32>
      %296 = vector.shape_cast %295 : vector<1x2x32xf32> to vector<2x32xf32>
      %297 = arith.truncf %296 : vector<2x32xf32> to vector<2x32xbf16>
      %cst_184 = arith.constant dense<0.000000e+00> : vector<2x128xf32>
      %298 = tpu.matmul %297, %114, %cst_184 {dimension_numbers = #tpu.dot_dimension_numbers<[1], [0], [0], [1], [0, 0, 1, 1], [], []>} : vector<2x32xbf16>, vector<32x128xbf16>, vector<2x128xf32> -> vector<2x128xf32>
      %299 = arith.addf %293, %298 : vector<2x128xf32>
      %300 = arith.index_cast %289 : i32 to index
      %c0_185 = arith.constant 0 : index
      %c0_186 = arith.constant 0 : index
      %301 = vector.load %arg33[%300, %c0_185, %c0_186] : memref<8x2x32xf32, #tpu.memory_space<vmem>>, vector<1x2x32xf32>
      %302 = vector.shape_cast %301 : vector<1x2x32xf32> to vector<2x32xf32>
      %303 = arith.truncf %302 : vector<2x32xf32> to vector<2x32xbf16>
      %cst_187 = arith.constant dense<0.000000e+00> : vector<2x128xf32>
      %304 = tpu.matmul %303, %116, %cst_187 {dimension_numbers = #tpu.dot_dimension_numbers<[1], [0], [0], [1], [0, 0, 1, 1], [], []>} : vector<2x32xbf16>, vector<32x128xbf16>, vector<2x128xf32> -> vector<2x128xf32>
      %305 = arith.addf %299, %304 : vector<2x128xf32>
      %306 = arith.truncf %arg37 : vector<2x32xf32> to vector<2x32xbf16>
      %cst_188 = arith.constant dense<0.000000e+00> : vector<2x128xf32>
      %307 = tpu.matmul %306, %123, %cst_188 {dimension_numbers = #tpu.dot_dimension_numbers<[1], [0], [0], [1], [0, 0, 1, 1], [], []>} : vector<2x32xbf16>, vector<32x128xbf16>, vector<2x128xf32> -> vector<2x128xf32>
      %308 = arith.addf %305, %307 : vector<2x128xf32>
      %309 = vector.extract_strided_slice %308 {offsets = [0, 0], sizes = [2, 96], strides = [1, 1]} : vector<2x128xf32> to vector<2x96xf32>
      %310 = arith.negf %309 : vector<2x96xf32>
      %311 = math.exp %310 : vector<2x96xf32>
      %cst_189 = arith.constant 1.000000e+00 : f32
      %312 = vector.broadcast %cst_189 : f32 to vector<2x96xf32>
      %313 = arith.addf %312, %311 : vector<2x96xf32>
      %314 = arith.divf %312, %313 : vector<2x96xf32>
      %315 = vector.extract_strided_slice %314 {offsets = [0, 32], sizes = [2, 32], strides = [1, 1]} : vector<2x96xf32> to vector<2x32xf32>
      %316 = arith.mulf %315, %arg38 : vector<2x32xf32>
      %317 = vector.extract_strided_slice %314 {offsets = [0, 0], sizes = [2, 32], strides = [1, 1]} : vector<2x96xf32> to vector<2x32xf32>
      %318 = vector.extract_strided_slice %308 {offsets = [0, 96], sizes = [2, 32], strides = [1, 1]} : vector<2x128xf32> to vector<2x32xf32>
      %319 = math.tanh %318 : vector<2x32xf32>
      %320 = arith.mulf %317, %319 : vector<2x32xf32>
      %321 = arith.addf %316, %320 : vector<2x32xf32>
      %322 = vector.extract_strided_slice %314 {offsets = [0, 64], sizes = [2, 32], strides = [1, 1]} : vector<2x96xf32> to vector<2x32xf32>
      %323 = math.tanh %321 : vector<2x32xf32>
      %324 = arith.mulf %322, %323 : vector<2x32xf32>
      %325 = arith.index_cast %289 : i32 to index
      %c0_190 = arith.constant 0 : index
      %c0_191 = arith.constant 0 : index
      %326 = vector.load %arg35[%325, %c0_190, %c0_191] : memref<8x2x32xf32, #tpu.memory_space<vmem>>, vector<1x2x32xf32>
      %327 = vector.shape_cast %326 : vector<1x2x32xf32> to vector<2x32xf32>
      %328 = vector.shape_cast %324 : vector<2x32xf32> to vector<1x2x32xf32>
      tpu.vector_store %arg35[%325, %c0_190, %c0_191], %328 {strides = array<i32>} : memref<8x2x32xf32, #tpu.memory_space<vmem>>, vector<1x2x32xf32>,
      scf.yield %324, %321 : vector<2x32xf32>, vector<2x32xf32>
    }
    %c8_i32_103 = arith.constant 8 : i32
    %c0_104 = arith.constant 0 : index
    %c0_105 = arith.constant 0 : index
    %c0_106 = arith.constant 0 : index
    %127 = vector.load %arg32[%c0_104, %c0_105, %c0_106] : memref<8x2x32xf32, #tpu.memory_space<vmem>>, vector<8x2x32xf32>
    %c0_107 = arith.constant 0 : index
    %c0_108 = arith.constant 0 : index
    %c0_109 = arith.constant 0 : index
    %128 = vector.load %arg33[%c0_107, %c0_108, %c0_109] : memref<8x2x32xf32, #tpu.memory_space<vmem>>, vector<8x2x32xf32>
    %129 = tpu.concatenate %127, %128 in 2 : vector<8x2x32xf32>, vector<8x2x32xf32> -> vector<8x2x64xf32>
    %c0_110 = arith.constant 0 : index
    %c0_111 = arith.constant 0 : index
    %c0_112 = arith.constant 0 : index
    %130 = vector.load %arg34[%c0_110, %c0_111, %c0_112] : memref<8x2x32xf32, #tpu.memory_space<vmem>>, vector<8x2x32xf32>
    %c0_113 = arith.constant 0 : index
    %c0_114 = arith.constant 0 : index
    %c0_115 = arith.constant 0 : index
    %131 = vector.load %arg35[%c0_113, %c0_114, %c0_115] : memref<8x2x32xf32, #tpu.memory_space<vmem>>, vector<8x2x32xf32>
    %132 = tpu.concatenate %130, %131 in 2 : vector<8x2x32xf32>, vector<8x2x32xf32> -> vector<8x2x64xf32>
    %c0_116 = arith.constant 0 : index
    %c0_117 = arith.constant 0 : index
    %133 = vector.load %arg21[%c0_116, %c0_117] : memref<4x64xf32, #tpu.memory_space<vmem>>, vector<1x64xf32>
    %134 = vector.shape_cast %133 : vector<1x64xf32> to vector<1x1x64xf32>
    %135 = vector.broadcast %134 : vector<1x1x64xf32> to vector<8x2x64xf32>
    %136 = arith.mulf %129, %135 : vector<8x2x64xf32>
    %cst_118 = arith.constant dense<0.000000e+00> : vector<8x2xf32>
    %137 = vector.multi_reduction <add>, %136, %cst_118 [2] : vector<8x2x64xf32> to vector<8x2xf32>
    %c0_119 = arith.constant 0 : index
    %c0_120 = arith.constant 0 : index
    %138 = memref.load %arg22[%c0_119, %c0_120] : memref<1x4xf32, #tpu.memory_space<smem>>
    %139 = vector.broadcast %138 : f32 to vector<8x2xf32>
    %140 = arith.addf %137, %139 : vector<8x2xf32>
    %cst_121 = arith.constant 5.000000e-01 : f32
    %141 = vector.broadcast %cst_121 : f32 to vector<8x2xf32>
    %142 = arith.cmpf ogt, %9, %141 : vector<8x2xf32>
    %cst_122 = arith.constant -1.000000e+30 : f32
    %143 = vector.broadcast %cst_122 : f32 to vector<8x2xf32>
    %144 = arith.select %142, %143, %140 : vector<8x2xi1>, vector<8x2xf32>
    %cst_123 = arith.constant dense<0xFF800000> : vector<2xf32>
    %145 = vector.multi_reduction <maximumf>, %144, %cst_123 [0] : vector<8x2xf32> to vector<2xf32>
    %146 = vector.shape_cast %145 : vector<2xf32> to vector<1x2xf32>
    %147 = vector.broadcast %146 : vector<1x2xf32> to vector<8x2xf32>
    %148 = arith.subf %144, %147 : vector<8x2xf32>
    %149 = math.exp %148 : vector<8x2xf32>
    %cst_124 = arith.constant dense<0.000000e+00> : vector<2xf32>
    %150 = vector.multi_reduction <add>, %149, %cst_124 [0] : vector<8x2xf32> to vector<2xf32>
    %151 = vector.shape_cast %150 : vector<2xf32> to vector<1x2xf32>
    %152 = tpu.reciprocal %151 {approx = true} : vector<1x2xf32> -> vector<1x2xf32>
    %153 = vector.broadcast %152 : vector<1x2xf32> to vector<8x2xf32>
    %154 = arith.mulf %149, %153 : vector<8x2xf32>
    %c1_125 = arith.constant 1 : index
    %c0_126 = arith.constant 0 : index
    %155 = vector.load %arg21[%c1_125, %c0_126] : memref<4x64xf32, #tpu.memory_space<vmem>>, vector<1x64xf32>
    %156 = vector.shape_cast %155 : vector<1x64xf32> to vector<1x1x64xf32>
    %157 = vector.broadcast %156 : vector<1x1x64xf32> to vector<8x2x64xf32>
    %158 = arith.mulf %129, %157 : vector<8x2x64xf32>
    %cst_127 = arith.constant dense<0.000000e+00> : vector<8x2xf32>
    %159 = vector.multi_reduction <add>, %158, %cst_127 [2] : vector<8x2x64xf32> to vector<8x2xf32>
    %c0_128 = arith.constant 0 : index
    %c1_129 = arith.constant 1 : index
    %160 = memref.load %arg22[%c0_128, %c1_129] : memref<1x4xf32, #tpu.memory_space<smem>>
    %161 = vector.broadcast %160 : f32 to vector<8x2xf32>
    %162 = arith.addf %159, %161 : vector<8x2xf32>
    %cst_130 = arith.constant 5.000000e-01 : f32
    %163 = vector.broadcast %cst_130 : f32 to vector<8x2xf32>
    %164 = arith.cmpf ogt, %9, %163 : vector<8x2xf32>
    %cst_131 = arith.constant -1.000000e+30 : f32
    %165 = vector.broadcast %cst_131 : f32 to vector<8x2xf32>
    %166 = arith.select %164, %165, %162 : vector<8x2xi1>, vector<8x2xf32>
    %cst_132 = arith.constant dense<0xFF800000> : vector<2xf32>
    %167 = vector.multi_reduction <maximumf>, %166, %cst_132 [0] : vector<8x2xf32> to vector<2xf32>
    %168 = vector.shape_cast %167 : vector<2xf32> to vector<1x2xf32>
    %169 = vector.broadcast %168 : vector<1x2xf32> to vector<8x2xf32>
    %170 = arith.subf %166, %169 : vector<8x2xf32>
    %171 = math.exp %170 : vector<8x2xf32>
    %cst_133 = arith.constant dense<0.000000e+00> : vector<2xf32>
    %172 = vector.multi_reduction <add>, %171, %cst_133 [0] : vector<8x2xf32> to vector<2xf32>
    %173 = vector.shape_cast %172 : vector<2xf32> to vector<1x2xf32>
    %174 = tpu.reciprocal %173 {approx = true} : vector<1x2xf32> -> vector<1x2xf32>
    %175 = vector.broadcast %174 : vector<1x2xf32> to vector<8x2xf32>
    %176 = arith.mulf %171, %175 : vector<8x2xf32>
    %c2_134 = arith.constant 2 : index
    %c0_135 = arith.constant 0 : index
    %177 = vector.load %arg21[%c2_134, %c0_135] : memref<4x64xf32, #tpu.memory_space<vmem>>, vector<1x64xf32>
    %178 = vector.shape_cast %177 : vector<1x64xf32> to vector<1x1x64xf32>
    %179 = vector.broadcast %178 : vector<1x1x64xf32> to vector<8x2x64xf32>
    %180 = arith.mulf %132, %179 : vector<8x2x64xf32>
    %cst_136 = arith.constant dense<0.000000e+00> : vector<8x2xf32>
    %181 = vector.multi_reduction <add>, %180, %cst_136 [2] : vector<8x2x64xf32> to vector<8x2xf32>
    %c0_137 = arith.constant 0 : index
    %c2_138 = arith.constant 2 : index
    %182 = memref.load %arg22[%c0_137, %c2_138] : memref<1x4xf32, #tpu.memory_space<smem>>
    %183 = vector.broadcast %182 : f32 to vector<8x2xf32>
    %184 = arith.addf %181, %183 : vector<8x2xf32>
    %cst_139 = arith.constant 5.000000e-01 : f32
    %185 = vector.broadcast %cst_139 : f32 to vector<8x2xf32>
    %186 = arith.cmpf ogt, %9, %185 : vector<8x2xf32>
    %cst_140 = arith.constant -1.000000e+30 : f32
    %187 = vector.broadcast %cst_140 : f32 to vector<8x2xf32>
    %188 = arith.select %186, %187, %184 : vector<8x2xi1>, vector<8x2xf32>
    %cst_141 = arith.constant dense<0xFF800000> : vector<2xf32>
    %189 = vector.multi_reduction <maximumf>, %188, %cst_141 [0] : vector<8x2xf32> to vector<2xf32>
    %190 = vector.shape_cast %189 : vector<2xf32> to vector<1x2xf32>
    %191 = vector.broadcast %190 : vector<1x2xf32> to vector<8x2xf32>
    %192 = arith.subf %188, %191 : vector<8x2xf32>
    %193 = math.exp %192 : vector<8x2xf32>
    %cst_142 = arith.constant dense<0.000000e+00> : vector<2xf32>
    %194 = vector.multi_reduction <add>, %193, %cst_142 [0] : vector<8x2xf32> to vector<2xf32>
    %195 = vector.shape_cast %194 : vector<2xf32> to vector<1x2xf32>
    %196 = tpu.reciprocal %195 {approx = true} : vector<1x2xf32> -> vector<1x2xf32>
    %197 = vector.broadcast %196 : vector<1x2xf32> to vector<8x2xf32>
    %198 = arith.mulf %193, %197 : vector<8x2xf32>
    %c3_143 = arith.constant 3 : index
    %c0_144 = arith.constant 0 : index
    %199 = vector.load %arg21[%c3_143, %c0_144] : memref<4x64xf32, #tpu.memory_space<vmem>>, vector<1x64xf32>
    %200 = vector.shape_cast %199 : vector<1x64xf32> to vector<1x1x64xf32>
    %201 = vector.broadcast %200 : vector<1x1x64xf32> to vector<8x2x64xf32>
    %202 = arith.mulf %132, %201 : vector<8x2x64xf32>
    %cst_145 = arith.constant dense<0.000000e+00> : vector<8x2xf32>
    %203 = vector.multi_reduction <add>, %202, %cst_145 [2] : vector<8x2x64xf32> to vector<8x2xf32>
    %c0_146 = arith.constant 0 : index
    %c3_147 = arith.constant 3 : index
    %204 = memref.load %arg22[%c0_146, %c3_147] : memref<1x4xf32, #tpu.memory_space<smem>>
    %205 = vector.broadcast %204 : f32 to vector<8x2xf32>
    %206 = arith.addf %203, %205 : vector<8x2xf32>
    %cst_148 = arith.constant 5.000000e-01 : f32
    %207 = vector.broadcast %cst_148 : f32 to vector<8x2xf32>
    %208 = arith.cmpf ogt, %9, %207 : vector<8x2xf32>
    %cst_149 = arith.constant -1.000000e+30 : f32
    %209 = vector.broadcast %cst_149 : f32 to vector<8x2xf32>
    %210 = arith.select %208, %209, %206 : vector<8x2xi1>, vector<8x2xf32>
    %cst_150 = arith.constant dense<0xFF800000> : vector<2xf32>
    %211 = vector.multi_reduction <maximumf>, %210, %cst_150 [0] : vector<8x2xf32> to vector<2xf32>
    %212 = vector.shape_cast %211 : vector<2xf32> to vector<1x2xf32>
    %213 = vector.broadcast %212 : vector<1x2xf32> to vector<8x2xf32>
    %214 = arith.subf %210, %213 : vector<8x2xf32>
    %215 = math.exp %214 : vector<8x2xf32>
    %cst_151 = arith.constant dense<0.000000e+00> : vector<2xf32>
    %216 = vector.multi_reduction <add>, %215, %cst_151 [0] : vector<8x2xf32> to vector<2xf32>
    %217 = vector.shape_cast %216 : vector<2xf32> to vector<1x2xf32>
    %218 = tpu.reciprocal %217 {approx = true} : vector<1x2xf32> -> vector<1x2xf32>
    %219 = vector.broadcast %218 : vector<1x2xf32> to vector<8x2xf32>
    %220 = arith.mulf %215, %219 : vector<8x2xf32>
    %221 = vector.shape_cast %176 : vector<8x2xf32> to vector<8x2x1xf32>
    %222 = vector.broadcast %221 : vector<8x2x1xf32> to vector<8x2x64xf32>
    %223 = arith.mulf %222, %129 : vector<8x2x64xf32>
    %cst_152 = arith.constant dense<0.000000e+00> : vector<2x64xf32>
    %224 = vector.multi_reduction <add>, %223, %cst_152 [0] : vector<8x2x64xf32> to vector<2x64xf32>
    %225 = vector.shape_cast %154 : vector<8x2xf32> to vector<8x2x1xf32>
    %226 = vector.broadcast %225 : vector<8x2x1xf32> to vector<8x2x64xf32>
    %227 = arith.mulf %226, %129 : vector<8x2x64xf32>
    %cst_153 = arith.constant dense<0.000000e+00> : vector<2x64xf32>
    %228 = vector.multi_reduction <add>, %227, %cst_153 [0] : vector<8x2x64xf32> to vector<2x64xf32>
    %229 = tpu.concatenate %224, %228 in 1 : vector<2x64xf32>, vector<2x64xf32> -> vector<2x128xf32>
    %230 = vector.shape_cast %220 : vector<8x2xf32> to vector<8x2x1xf32>
    %231 = vector.broadcast %230 : vector<8x2x1xf32> to vector<8x2x64xf32>
    %232 = arith.mulf %231, %132 : vector<8x2x64xf32>
    %cst_154 = arith.constant dense<0.000000e+00> : vector<2x64xf32>
    %233 = vector.multi_reduction <add>, %232, %cst_154 [0] : vector<8x2x64xf32> to vector<2x64xf32>
    %234 = vector.shape_cast %198 : vector<8x2xf32> to vector<8x2x1xf32>
    %235 = vector.broadcast %234 : vector<8x2x1xf32> to vector<8x2x64xf32>
    %236 = arith.mulf %235, %132 : vector<8x2x64xf32>
    %cst_155 = arith.constant dense<0.000000e+00> : vector<2x64xf32>
    %237 = vector.multi_reduction <add>, %236, %cst_155 [0] : vector<8x2x64xf32> to vector<2x64xf32>
    %238 = tpu.concatenate %233, %237 in 1 : vector<2x64xf32>, vector<2x64xf32> -> vector<2x128xf32>
    %c0_156 = arith.constant 0 : index
    %c0_157 = arith.constant 0 : index
    %239 = vector.load %arg29[%c0_156, %c0_157] : memref<2x128xf32, #tpu.memory_space<vmem>>, vector<2x128xf32>
    tpu.vector_store %arg29[%c0_156, %c0_157], %229 {strides = array<i32>} : memref<2x128xf32, #tpu.memory_space<vmem>>, vector<2x128xf32>,
    %c0_158 = arith.constant 0 : index
    %c0_159 = arith.constant 0 : index
    %240 = vector.load %arg30[%c0_158, %c0_159] : memref<2x128xf32, #tpu.memory_space<vmem>>, vector<2x128xf32>
    tpu.vector_store %arg30[%c0_158, %c0_159], %238 {strides = array<i32>} : memref<2x128xf32, #tpu.memory_space<vmem>>, vector<2x128xf32>,
    %241 = tpu.concatenate %83, %229, %238 in 1 : vector<2x32xf32>, vector<2x128xf32>, vector<2x128xf32> -> vector<2x288xf32>
    %242 = arith.truncf %241 : vector<2x288xf32> to vector<2x288xbf16>
    %c0_160 = arith.constant 0 : index
    %c0_161 = arith.constant 0 : index
    %243 = vector.load %arg23[%c0_160, %c0_161] : memref<288x5xbf16, #tpu.memory_space<vmem>>, vector<288x5xbf16>
    %cst_162 = arith.constant dense<0.000000e+00> : vector<2x5xf32>
    %244 = tpu.matmul %242, %243, %cst_162 {dimension_numbers = #tpu.dot_dimension_numbers<[1], [0], [0], [1], [0, 0, 1, 1], [], []>} : vector<2x288xbf16>, vector<288x5xbf16>, vector<2x5xf32> -> vector<2x5xf32>
    %c0_163 = arith.constant 0 : index
    %c0_164 = arith.constant 0 : index
    %245 = vector.load %arg24[%c0_163, %c0_164] : memref<1x5xf32, #tpu.memory_space<vmem>>, vector<1x5xf32>
    %246 = vector.broadcast %245 : vector<1x5xf32> to vector<2x5xf32>
    %247 = arith.addf %244, %246 : vector<2x5xf32>
    %cst_165 = arith.constant dense<0xFF800000> : vector<2xf32>
    %248 = vector.multi_reduction <maximumf>, %247, %cst_165 [1] : vector<2x5xf32> to vector<2xf32>
    %249 = vector.shape_cast %248 : vector<2xf32> to vector<2x1xf32>
    %250 = vector.broadcast %249 : vector<2x1xf32> to vector<2x5xf32>
    %251 = arith.subf %247, %250 : vector<2x5xf32>
    %252 = math.exp %251 : vector<2x5xf32>
    %cst_166 = arith.constant dense<0.000000e+00> : vector<2xf32>
    %253 = vector.multi_reduction <add>, %252, %cst_166 [1] : vector<2x5xf32> to vector<2xf32>
    %254 = vector.shape_cast %253 : vector<2xf32> to vector<2x1xf32>
    %255 = tpu.reciprocal %254 {approx = true} : vector<2x1xf32> -> vector<2x1xf32>
    %256 = vector.broadcast %255 : vector<2x1xf32> to vector<2x5xf32>
    %257 = arith.mulf %252, %256 : vector<2x5xf32>
    %258 = tpu.iota {dimensions = array<i32: 1>} : vector<2x5xi32>
    %c1_i32_167 = arith.constant 1 : i32
    %259 = vector.broadcast %c1_i32_167 : i32 to vector<2x5xi32>
    %260 = arith.cmpi sge, %258, %259 : vector<2x5xi32>
    %cst_168 = arith.constant -1.000000e+00 : f32
    %261 = vector.broadcast %cst_168 : f32 to vector<2x5xf32>
    %262 = arith.select %260, %257, %261 : vector<2x5xi1>, vector<2x5xf32>
    %cst_169 = arith.constant dense<0xFF800000> : vector<2xf32>
    %263 = vector.multi_reduction <maximumf>, %262, %cst_169 [1] : vector<2x5xf32> to vector<2xf32>
    %264 = vector.shape_cast %263 : vector<2xf32> to vector<2x1xf32>
    %265 = vector.broadcast %264 : vector<2x1xf32> to vector<2x5xf32>
    %266 = arith.cmpf oge, %262, %265 : vector<2x5xf32>
    %c1_i32_170 = arith.constant 1 : i32
    %267 = vector.broadcast %c1_i32_170 : i32 to vector<2x5xi32>
    %268 = arith.cmpi sge, %258, %267 : vector<2x5xi32>
    %269 = arith.andi %266, %268 : vector<2x5xi1>
    %c5_i32 = arith.constant 5 : i32
    %270 = vector.broadcast %c5_i32 : i32 to vector<2x5xi32>
    %271 = arith.select %269, %258, %270 : vector<2x5xi1>, vector<2x5xi32>
    %cst_171 = arith.constant dense<2147483647> : vector<2xi32>
    %272 = vector.multi_reduction <minsi>, %271, %cst_171 [1] : vector<2x5xi32> to vector<2xi32>
    %273 = vector.shape_cast %272 : vector<2xi32> to vector<2x1xi32>
    %274 = vector.broadcast %273 : vector<2x1xi32> to vector<2x5xi32>
    %275 = arith.cmpi eq, %258, %274 : vector<2x5xi32>
    %276 = arith.extui %275 : vector<2x5xi1> to vector<2x5xi32>
    %277 = arith.sitofp %276 : vector<2x5xi32> to vector<2x5xf32>
    %c0_172 = arith.constant 0 : index
    %c0_173 = arith.constant 0 : index
    %278 = vector.load %arg8[%c0_172, %c0_173] : memref<5x32xf32, #tpu.memory_space<vmem>>, vector<5x32xf32>
    %cst_174 = arith.constant dense<0.000000e+00> : vector<2x32xf32>
    %279 = tpu.matmul %277, %278, %cst_174 {dimension_numbers = #tpu.dot_dimension_numbers<[1], [0], [0], [1], [0, 0, 1, 1], [], []>} : vector<2x5xf32>, vector<5x32xf32>, vector<2x32xf32> -> vector<2x32xf32>
    %c0_175 = arith.constant 0 : index
    %c0_176 = arith.constant 0 : index
    %280 = vector.load %arg31[%c0_175, %c0_176] : memref<2x32xf32, #tpu.memory_space<vmem>>, vector<2x32xf32>
    tpu.vector_store %arg31[%c0_175, %c0_176], %279 {strides = array<i32>} : memref<2x32xf32, #tpu.memory_space<vmem>>, vector<2x32xf32>,
    %281 = tpu.transpose %154, [1, 0] : vector<8x2xf32> -> vector<2x8xf32>
    %282 = tpu.transpose %176, [1, 0] : vector<8x2xf32> -> vector<2x8xf32>
    %283 = tpu.transpose %198, [1, 0] : vector<8x2xf32> -> vector<2x8xf32>
    %284 = tpu.transpose %220, [1, 0] : vector<8x2xf32> -> vector<2x8xf32>
    %285 = tpu.concatenate %257, %281, %282, %283, %284 in 1 : vector<2x5xf32>, vector<2x8xf32>, vector<2x8xf32>, vector<2x8xf32>, vector<2x8xf32> -> vector<2x37xf32>
    %c0_177 = arith.constant 0 : index
    %c0_178 = arith.constant 0 : index
    %c0_179 = arith.constant 0 : index
    %286 = vector.load %arg25[%c0_177, %c0_178, %c0_179] : memref<1x2x37xf32, #tpu.memory_space<vmem>>, vector<1x2x37xf32>
    %287 = vector.shape_cast %286 : vector<1x2x37xf32> to vector<2x37xf32>
    %288 = vector.shape_cast %285 : vector<2x37xf32> to vector<1x2x37xf32>
    tpu.vector_store %arg25[%c0_177, %c0_178, %c0_179], %288 {strides = array<i32>} : memref<1x2x37xf32, #tpu.memory_space<vmem>>, vector<1x2x37xf32>,
    return
  }
  func.func @transform_0(%arg0: i32) -> (i32, i32, i32) {
    %c0_i32 = arith.constant 0 : i32
    %c0_i32_0 = arith.constant 0 : i32
    %c0_i32_1 = arith.constant 0 : i32
    %c0_i32_2 = arith.constant 0 : i32
    return %c0_i32, %c0_i32_0, %c0_i32_1 : i32, i32, i32
  }
  func.func @transform_1(%arg0: i32) -> (i32, i32, i32) {
    %c0_i32 = arith.constant 0 : i32
    %c0_i32_0 = arith.constant 0 : i32
    %c0_i32_1 = arith.constant 0 : i32
    %c0_i32_2 = arith.constant 0 : i32
    return %c0_i32, %c0_i32_0, %c0_i32_1 : i32, i32, i32
  }
  func.func @transform_2(%arg0: i32) -> (i32, i32, i32) {
    %c0_i32 = arith.constant 0 : i32
    %c0_i32_0 = arith.constant 0 : i32
    %c0_i32_1 = arith.constant 0 : i32
    %c0_i32_2 = arith.constant 0 : i32
    return %c0_i32, %c0_i32_0, %c0_i32_1 : i32, i32, i32
  }
  func.func @transform_3(%arg0: i32) -> (i32, i32, i32) {
    %c0_i32 = arith.constant 0 : i32
    %c0_i32_0 = arith.constant 0 : i32
    %c0_i32_1 = arith.constant 0 : i32
    %c0_i32_2 = arith.constant 0 : i32
    return %c0_i32, %c0_i32_0, %c0_i32_1 : i32, i32, i32
  }
  func.func @transform_4(%arg0: i32) -> (i32, i32, i32) {
    %c0_i32 = arith.constant 0 : i32
    %c0_i32_0 = arith.constant 0 : i32
    %c0_i32_1 = arith.constant 0 : i32
    %c0_i32_2 = arith.constant 0 : i32
    return %c0_i32, %c0_i32_0, %c0_i32_1 : i32, i32, i32
  }
  func.func @transform_5(%arg0: i32) -> (i32, i32, i32) {
    %c0_i32 = arith.constant 0 : i32
    %c0_i32_0 = arith.constant 0 : i32
    %c0_i32_1 = arith.constant 0 : i32
    %c0_i32_2 = arith.constant 0 : i32
    return %c0_i32, %c0_i32_0, %c0_i32_1 : i32, i32, i32
  }
  func.func @transform_6(%arg0: i32) -> (i32, i32) {
    %c0_i32 = arith.constant 0 : i32
    %c0_i32_0 = arith.constant 0 : i32
    %c0_i32_1 = arith.constant 0 : i32
    return %c0_i32, %c0_i32_0 : i32, i32
  }
  func.func @transform_7(%arg0: i32) -> (i32, i32) {
    %c0_i32 = arith.constant 0 : i32
    %c0_i32_0 = arith.constant 0 : i32
    %c0_i32_1 = arith.constant 0 : i32
    return %c0_i32, %c0_i32_0 : i32, i32
  }
  func.func @transform_8(%arg0: i32) -> (i32, i32) {
    %c0_i32 = arith.constant 0 : i32
    %c0_i32_0 = arith.constant 0 : i32
    %c0_i32_1 = arith.constant 0 : i32
    return %c0_i32, %c0_i32_0 : i32, i32
  }
  func.func @transform_9(%arg0: i32) -> (i32, i32) {
    %c0_i32 = arith.constant 0 : i32
    %c0_i32_0 = arith.constant 0 : i32
    %c0_i32_1 = arith.constant 0 : i32
    return %c0_i32, %c0_i32_0 : i32, i32
  }
  func.func @transform_10(%arg0: i32) -> (i32, i32) {
    %c0_i32 = arith.constant 0 : i32
    %c0_i32_0 = arith.constant 0 : i32
    %c0_i32_1 = arith.constant 0 : i32
    return %c0_i32, %c0_i32_0 : i32, i32
  }
  func.func @transform_11(%arg0: i32) -> (i32, i32) {
    %c0_i32 = arith.constant 0 : i32
    %c0_i32_0 = arith.constant 0 : i32
    %c0_i32_1 = arith.constant 0 : i32
    return %c0_i32, %c0_i32_0 : i32, i32
  }
  func.func @transform_12(%arg0: i32) -> (i32, i32) {
    %c0_i32 = arith.constant 0 : i32
    %c0_i32_0 = arith.constant 0 : i32
    %c0_i32_1 = arith.constant 0 : i32
    return %c0_i32, %c0_i32_0 : i32, i32
  }
  func.func @transform_13(%arg0: i32) -> (i32, i32) {
    %c0_i32 = arith.constant 0 : i32
    %c0_i32_0 = arith.constant 0 : i32
    %c0_i32_1 = arith.constant 0 : i32
    return %c0_i32, %c0_i32_0 : i32, i32
  }
  func.func @transform_14(%arg0: i32) -> (i32, i32) {
    %c0_i32 = arith.constant 0 : i32
    %c0_i32_0 = arith.constant 0 : i32
    %c0_i32_1 = arith.constant 0 : i32
    return %c0_i32, %c0_i32_0 : i32, i32
  }
  func.func @transform_15(%arg0: i32) -> (i32, i32) {
    %c0_i32 = arith.constant 0 : i32
    %c0_i32_0 = arith.constant 0 : i32
    %c0_i32_1 = arith.constant 0 : i32
    return %c0_i32, %c0_i32_0 : i32, i32
  }
  func.func @transform_16(%arg0: i32) -> (i32, i32) {
    %c0_i32 = arith.constant 0 : i32
    %c0_i32_0 = arith.constant 0 : i32
    %c0_i32_1 = arith.constant 0 : i32
    return %c0_i32, %c0_i32_0 : i32, i32
  }
  func.func @transform_17(%arg0: i32) -> (i32, i32, i32) {
    %c0_i32 = arith.constant 0 : i32
    %c0_i32_0 = arith.constant 0 : i32
    %c0_i32_1 = arith.constant 0 : i32
    %c0_i32_2 = arith.constant 0 : i32
    return %c0_i32, %c0_i32_0, %c0_i32_1 : i32, i32, i32
  }
  func.func @transform_18(%arg0: i32) -> (i32, i32, i32) {
    %c0_i32 = arith.constant 0 : i32
    %c0_i32_0 = arith.constant 0 : i32
    %c0_i32_1 = arith.constant 0 : i32
    %c0_i32_2 = arith.constant 0 : i32
    return %c0_i32, %c0_i32_0, %c0_i32_1 : i32, i32, i32
  }
  func.func @transform_19(%arg0: i32) -> (i32, i32, i32) {
    %c0_i32 = arith.constant 0 : i32
    %c0_i32_0 = arith.constant 0 : i32
    %c0_i32_1 = arith.constant 0 : i32
    %c0_i32_2 = arith.constant 0 : i32
    return %c0_i32, %c0_i32_0, %c0_i32_1 : i32, i32, i32
  }
  func.func @transform_20(%arg0: i32) -> (i32, i32) {
    %c0_i32 = arith.constant 0 : i32
    %c0_i32_0 = arith.constant 0 : i32
    %c0_i32_1 = arith.constant 0 : i32
    return %c0_i32, %c0_i32_0 : i32, i32
  }
  func.func @transform_21(%arg0: i32) -> (i32, i32) {
    %c0_i32 = arith.constant 0 : i32
    %c0_i32_0 = arith.constant 0 : i32
    %c0_i32_1 = arith.constant 0 : i32
    return %c0_i32, %c0_i32_0 : i32, i32
  }
  func.func @transform_22(%arg0: i32) -> (i32, i32) {
    %c0_i32 = arith.constant 0 : i32
    %c0_i32_0 = arith.constant 0 : i32
    %c0_i32_1 = arith.constant 0 : i32
    return %c0_i32, %c0_i32_0 : i32, i32
  }
  func.func @transform_23(%arg0: i32) -> (i32, i32) {
    %c0_i32 = arith.constant 0 : i32
    %c0_i32_0 = arith.constant 0 : i32
    %c0_i32_1 = arith.constant 0 : i32
    return %c0_i32, %c0_i32_0 : i32, i32
  }
  func.func @transform_24(%arg0: i32) -> (i32, i32, i32) {
    %c0_i32 = arith.constant 0 : i32
    %c0_i32_0 = arith.constant 0 : i32
    %c0_i32_1 = arith.constant 0 : i32
    return %arg0, %c0_i32, %c0_i32_0 : i32, i32, i32
  }
}

module attributes {stable_mosaic.version = 11 : i64} {
  func.func @_linear_kernel(%arg0: i32, %arg1: memref<8x32xbf16, #tpu.memory_space<vmem>>, %arg2: memref<32x128xbf16, #tpu.memory_space<vmem>>, %arg3: memref<1x128xf32, #tpu.memory_space<vmem>>, %arg4: memref<8x128xf32, #tpu.memory_space<vmem>>) attributes {dimension_semantics = [#tpu.dimension_semantics<parallel>], iteration_bounds = array<i64: 2>, scalar_prefetch = 0 : i64, scratch_operands = 0 : i64, tpu.core_type = #tpu.core_type<tc>, window_params = [{transform_indices = @transform_0, window_bounds = array<i64: 8, 32>}, {pipeline_mode = #tpu.pipeline_mode<synchronous>, transform_indices = @transform_1, window_bounds = array<i64: 32, 128>}, {pipeline_mode = #tpu.pipeline_mode<synchronous>, transform_indices = @transform_2, window_bounds = array<i64: 1, 128>}, {transform_indices = @transform_3, window_bounds = array<i64: 8, 128>}]} {
    %c0 = arith.constant 0 : index
    %c0_0 = arith.constant 0 : index
    %0 = vector.load %arg1[%c0, %c0_0] : memref<8x32xbf16, #tpu.memory_space<vmem>>, vector<8x32xbf16>
    %c0_1 = arith.constant 0 : index
    %c0_2 = arith.constant 0 : index
    %1 = vector.load %arg2[%c0_1, %c0_2] : memref<32x128xbf16, #tpu.memory_space<vmem>>, vector<32x128xbf16>
    %cst = arith.constant dense<0.000000e+00> : vector<8x128xf32>
    %2 = tpu.matmul %0, %1, %cst {dimension_numbers = #tpu.dot_dimension_numbers<[1], [0], [0], [1], [0, 0, 1, 1], [], []>} : vector<8x32xbf16>, vector<32x128xbf16>, vector<8x128xf32> -> vector<8x128xf32>
    %c0_3 = arith.constant 0 : index
    %c0_4 = arith.constant 0 : index
    %3 = vector.load %arg3[%c0_3, %c0_4] : memref<1x128xf32, #tpu.memory_space<vmem>>, vector<1x128xf32>
    %4 = vector.broadcast %3 : vector<1x128xf32> to vector<8x128xf32>
    %5 = arith.addf %2, %4 : vector<8x128xf32>
    %c0_5 = arith.constant 0 : index
    %c0_6 = arith.constant 0 : index
    %6 = vector.load %arg4[%c0_5, %c0_6] : memref<8x128xf32, #tpu.memory_space<vmem>>, vector<8x128xf32>
    tpu.vector_store %arg4[%c0_5, %c0_6], %5 {strides = array<i32>} : memref<8x128xf32, #tpu.memory_space<vmem>>, vector<8x128xf32>,
    return
  }
  func.func @transform_0(%arg0: i32) -> (i32, i32) {
    %c0_i32 = arith.constant 0 : i32
    %c0_i32_0 = arith.constant 0 : i32
    return %arg0, %c0_i32 : i32, i32
  }
  func.func @transform_1(%arg0: i32) -> (i32, i32) {
    %c0_i32 = arith.constant 0 : i32
    %c0_i32_0 = arith.constant 0 : i32
    %c0_i32_1 = arith.constant 0 : i32
    return %c0_i32, %c0_i32_0 : i32, i32
  }
  func.func @transform_2(%arg0: i32) -> (i32, i32) {
    %c0_i32 = arith.constant 0 : i32
    %c0_i32_0 = arith.constant 0 : i32
    %c0_i32_1 = arith.constant 0 : i32
    return %c0_i32, %c0_i32_0 : i32, i32
  }
  func.func @transform_3(%arg0: i32) -> (i32, i32) {
    %c0_i32 = arith.constant 0 : i32
    %c0_i32_0 = arith.constant 0 : i32
    return %arg0, %c0_i32 : i32, i32
  }
}

</mosaic_0001>

<bundles_post_ra>
// kernel: model_forward.8
= control target key start
LH: loop header
LB: loop body
LE: loop exit
PB: predicated region body
PF: predicated region fallthrough
CT: control target
= control target key end

     0   :  { %s537_s12 = smov 0   ;;  %s595_s0 = inlined_call_operand.vmem [shape: bf16[16,32], index: 0, kind: input, shape index: {}]   ;;  %s596_s1 = inlined_call_operand.vmem [shape: bf16[32,544], index: 1, kind: input, shape index: {}]   ;;  %s597_s2 = inlined_call_operand.vmem [shape: f32[1,544], index: 2, kind: input, shape index: {}]   ;;  %s598_s3 = inlined_call_operand.vmem [shape: f32[16,544], index: 3, kind: output, shape index: {}]  }
   0x1 LB: > { %s447_s13 = sadd.s32 4294967295, %s512_s12   ;;  %p451_p0 = scmp.ge.s32.totalorder %s512_s12, 1  ;;  %s512_s12 = sphi %s537_s12, %s13_s12  }
   0x2   : > { %p136_p1 = scmp.lt.s32.totalorder %s512_s12, 3 }
   0x4   : > { %p137_p2 = pnand %p451_p0, %p136_p1 }
   0x5   : > { %v492_v0 = vld [vmem:[%s596_s1 + $0x4] ss:$20 sps:$4 sm:$0xff] (!%p137_p2)   ;;  %p159_p3 = scmp.lt.s32.totalorder (!%p137_p2), %s447_s13, 1  ;;  %v494_v1 = vld [vmem:[%s596_s1] ss:$20 sps:$4 sm:$0xff] (!%p137_p2)   ;;  %v514_v2 = vmov (!%p137_p2), 0   ;;  %v184_v13 = vlaneseq (!%p137_p2) }
   0x6   : > { %140 = sbr.rel (%p137_p2) target bundleno = 240 (0xf0), region = 32  ;;  %297 = vmatprep.mubr.bf16.mxu0 (!%p137_p2), %v514_v2  ;;  %338 = vmatprep.mubr.bf16.mxu1 (!%p137_p2), %v514_v2  ;;  %v495_v3 = vld [vmem:[%s596_s1 + $0x2c] ss:$20 sps:$4 sm:$0xff] (!%p137_p2)   ;;  %v497_v4 = vld [vmem:[%s596_s1 + $0x28] ss:$20 sps:$4 sm:$0xff] (!%p137_p2)   ;;  %vm261_vm0 = vcmask (!%p137_p2), 261120  }
   0x7   : > { %265 = vmatprep.subr.bf16.mxu0 (!%p137_p2), %v492_v0  ;;  %v498_v5 = vld [vmem:[%s596_s1 + $0xc] ss:$20 sps:$4 sm:$0xff] (!%p137_p2)   ;;  %v500_v6 = vld [vmem:[%s596_s1 + $0x8] ss:$20 sps:$4 sm:$0xff] (!%p137_p2)   ;;  %v504_v8 = vld [vmem:[%s596_s1 + $0x30] ss:$20 sps:$4 sm:$0xff] (!%p137_p2)  }
   0x8   : > { %266 = vmatpush1.bf16.msra.mxu0 (!%p137_p2), %v494_v1  ;;  %v501_v7 = vld [vmem:[%s596_s1 + $0x34] ss:$20 sps:$4 sm:$0xff] (!%p137_p2)   ;;  %306 = vmatprep.subr.bf16.mxu1 (!%p137_p2), %v498_v5  ;;  %v503_v10 = vld [vmem:[%s596_s1 + $0x10] ss:$20 sps:$4 sm:$0xff] (!%p137_p2)   ;;  %v515_v11 = vmov (!%p137_p2), 0.0   ;;  %vm516_vm1 = vmmov (!%p137_p2), 0  }
   0x9   : > { %267 = vmatprep.subr.bf16.mxu0 (!%p137_p2), %v495_v3  ;;  %307 = vmatpush1.bf16.msra.mxu1 (!%p137_p2), %v500_v6  ;;  %v505_v12 = vld [vmem:[%s596_s1 + $0x38] ss:$20 sps:$4 sm:$0xff] (!%p137_p2)   ;;  %v185_v14 = vshrl.u32 (!%p137_p2), %v184_v13, 7  ;;  %v182_v16 = vld [vmem:[%s597_s2] sm:$0x1f] (!%p137_p2) }
   0xa   : > { %308 = vmatprep.subr.bf16.mxu1 (!%p137_p2), %v501_v7 }
   0xb   : > { %v186_v15 = vsub.s32 (!%p137_p2), 0, %v185_v14  ;;  %v190_v17 = vsub.s32 (!%p137_p2), 1, %v185_v14  ;;  %v194_v18 = vsub.s32 (!%p137_p2), 2, %v185_v14  ;;  %v198_v20 = vsub.s32 (!%p137_p2), 3, %v185_v14 }
   0xc   : > { %268 = vmatpush1.bf16.msra.mxu0 (!%p137_p2), %v497_v4  ;;  %v202_v27 = vsub.s32 (!%p137_p2), 4, %v185_v14 }
   0xd   : > { %s600_s13 = smov (!%p159_p3, %s447_s13), 1  ;;  %472 = vmatprep.subr.bf16.mxu0 %v515_v11  ;;  %309 = vmatpush1.bf16.msra.mxu1 %v504_v8  ;;  %v187_v19 = vrot.slane %v182_v16, %v186_v15  ;;  %v191_v21 = vrot.slane %v182_v16, %v190_v17  ;;  %v195_v23 = vrot.slane %v182_v16, %v194_v18 }
   0xe   : > { %s452_s26 = sshll.u32 %s600_s13, 2  ;;  %s480_s15 = smul.u32 40, %s600_s13  ;;  %v199_v26 = vrot.slane %v182_v16, %v198_v20  ;;  %v203_v36 = vrot.slane %v182_v16, %v202_v27 }
   0xf   : > { %s162_s4 = scalar_lea.vmem %s595_s0, %s452_s26 }
  0x10   : > { %v169_v9 = vld [vmem:[%s162_s4] sm:$0xf]  ;;  %s167_s18 = scalar_lea.vmem %s598_s3, %s480_s15 }
  0x11   : > { %464 = vmatmul.mubr.msk.bf16.vlgmr.msra.gmra.mrb[0].mxu0 %vm261_vm0, %v169_v9  ;;  %465 = vmatmul.mubr.msk.bf16.vlgmr.msra.gmra.mrb[0].mxu1 %vm261_vm0, %v169_v9 }
  0x12   : > { %473 = vmatpush3.bf16.msra.mxu0 %v503_v10  ;;  %476 = vmatprep.mubr.msk.bf16.mxu0 %vm516_vm1, %v515_v11 }
  0x13   : > { %474 = vmatprep.subr.bf16.mxu0 %v515_v11 }
  0x16   : > { %475 = vmatpush3.bf16.msra.mxu0 %v505_v12 }
  0x19   : > { %477 = vmatmul.mubr.msk.bf16.vlgmr.msra.gmra.mrb[4].mxu0 %vm261_vm0, %v169_v9 }
  0xe4   : > { %v299_v22 = vpop.f32.mrb[0].mxu0  ;;  %v340_v31 = vpop.f32.mrb[0].mxu1 }
  0xe5   : > { %v300_v24 = vadd.f32 %v299_v22, %v187_v19  ;;  %v301_v25 = vpop.f32.mrb[1].mxu0  ;;  %v341_v32 = vadd.f32 %v340_v31, %v195_v23  ;;  %v342_v33 = vpop.f32.mrb[1].mxu1 }
  0xe6   : > { %v302_v28 = vadd.f32 %v301_v25, %v191_v21  ;;  %v303_v29 = vpop.f32.mrb[2].mxu0  ;;  %v343_v34 = vadd.f32 %v342_v33, %v199_v26  ;;  %v344_v35 = vpop.f32.mrb[2].mxu1 }
  0xe7   : > { %387 = vst [vmem:[%s167_s18] sm:$0xff] %v300_v24  ;;  %v304_v30 = vpop.f32.mrb[3].mxu0  ;;  %389 = vst [vmem:[%s167_s18 + $0x10] sm:$0xff] %v341_v32  ;;  %v345_v37 = vpop.f32.mrb[3].mxu1 }
  0xe8   : > { %388 = vst [vmem:[%s167_s18 + $0x8] sm:$0xff] %v302_v28  ;;  %390 = vst [vmem:[%s167_s18 + $0x18] sm:$0xff] %v343_v34 }
  0xec   : > { %v381_v38 = vpop.f32.mrb[4].mxu0 }
  0xed   : > { %v382_v39 = vadd.f32 %v381_v38, %v203_v36  ;;  %v478_v40 = vpop.f32.mrb[5].mxu0 }
  0xee   : > { %v384_v41 = vpop.f32.mrb[6].mxu0 }
  0xef   : > { %391 = vst.msk [vmem:[%s167_s18 + $0x20] sm:$0xff] %vm261_vm0, %v382_v39  ;;  %v479_v42 = vpop.f32.mrb[7].mxu0 }
  0xf0 PF: > { %s13_s12 = sadd.s32 1, %s512_s12  }
  0xf1   : > { %p10_p4 = scmp.ge.s32.totalorder %s13_s12, 4  }
  0xf3   :  { %12 = sbr.rel (!%p10_p4) target bundleno = 1 (0x1), region = 62 }

// kernel: model_forward.5
= control target key start
LH: loop header
LB: loop body
LE: loop exit
PB: predicated region body
PF: predicated region fallthrough
CT: control target
= control target key end

     0   :  { %s1681_s29 = smov 0   ;;  %s1857_s0 = inlined_call_operand.vmem [shape: f32[2,8,32], index: 0, kind: input, shape index: {}]   ;;  %s1858_s1 = inlined_call_operand.vmem [shape: f32[2,1,8], index: 1, kind: input, shape index: {}]   ;;  %s1859_s2 = inlined_call_operand.vmem [shape: bf16[32,96], index: 2, kind: input, shape index: {}]   ;;  %s1860_s3 = inlined_call_operand.vmem [shape: f32[1,96], index: 3, kind: input, shape index: {}]   ;;  %s1861_s4 = inlined_call_operand.vmem [shape: bf16[32,32], index: 4, kind: input, shape index: {}]   ;;  %s1862_s5 = inlined_call_operand.vmem [shape: f32[1,32], index: 5, kind: input, shape index: {}]   ;;  %s1863_s6 = inlined_call_operand.vmem [shape: f32[1,32], index: 6, kind: input, shape index: {}]   ;;  %s1864_s7 = inlined_call_operand.vmem [shape: f32[1,32], index: 7, kind: input, shape index: {}]   ;;  %s1865_s8 = inlined_call_operand.vmem [shape: bf16[32,64], index: 8, kind: input, shape index: {}]   ;;  %s1866_s9 = inlined_call_operand.vmem [shape: f32[1,64], index: 9, kind: input, shape index: {}]   ;;  %s1867_s10 = inlined_call_operand.vmem [shape: bf16[64,32], index: 10, kind: input, shape index: {}]   ;;  %s1868_s11 = inlined_call_operand.vmem [shape: f32[1,32], index: 11, kind: input, shape index: {}]   ;;  %s1869_s12 = inlined_call_operand.vmem [shape: f32[1,32], index: 12, kind: input, shape index: {}]   ;;  %s1870_s13 = inlined_call_operand.vmem [shape: f32[1,32], index: 13, kind: input, shape index: {}]   ;;  %s1871_s14 = inlined_call_operand.vmem [shape: f32[2,8,32], index: 14, kind: output, shape index: {}]  }
   0x1 LB: > { %s1372_s30 = sadd.s32 4294967295, %s1588_s29   ;;  %p1376_p0 = scmp.ge.s32.totalorder %s1588_s29, 1  ;;  %s1588_s29 = sphi %s1681_s29, %s24_s29  }
   0x2   : > { %p419_p1 = scmp.lt.s32.totalorder %s1588_s29, 3 }
   0x4   : > { %p420_p2 = pnand %p1376_p0, %p419_p1 }
   0x5   : > { %v1550_v0 = vld [vmem:[%s1859_s2] sm:$0xff] (!%p420_p2)   ;;  %v1590_v1 = vmov (!%p420_p2), 0.0   ;;  %v1551_v2 = vld [vmem:[%s1859_s2 + $0x8] sm:$0xff] (!%p420_p2)   ;;  %vm1591_vm0 = vmmov (!%p420_p2), 0   ;;  %p466_p3 = scmp.lt.s32.totalorder (!%p420_p2), %s1372_s30, 1  ;;  %vm504_vm1 = vcmask (!%p420_p2), 261120  }
   0x6   : > { %423 = sbr.rel (%p420_p2) target bundleno = 2584 (0xa18), region = 76  ;;  %1442 = vmatprep.subr.bf16.mxu0 (!%p420_p2), %v1590_v1  ;;  %1450 = vmatprep.subr.bf16.mxu1 (!%p420_p2), %v1590_v1  ;;  %v1379_v5 = vld [vmem:[%s1860_s3] ss:$0 sm:$0xff] (!%p420_p2)  ;;  %s1592_s25 = smov (!%p420_p2), 120   ;;  %vm552_vm2 = vcmask (!%p420_p2), 64512   ;;  %vm624_vm3 = vcmask (!%p420_p2), 1043456  }
   0x7   : > { %1443 = vmatpush3.bf16.msra.mxu0 (!%p420_p2), %v1550_v0  ;;  %1446 = vmatprep.mubr.msk.bf16.mxu0 (!%p420_p2), %vm1591_vm0, %v1590_v1  ;;  %s1593_s26 = smov (!%p420_p2), 96   ;;  %s1594_s27 = smov (!%p420_p2), 80   ;;  %vm1017_vm4 = vcmask (!%p420_p2), 130048   ;;  %vm1019_vm5 = vcmask (!%p420_p2), 195584   ;;  %vm1235_vm6 = vcmask (!%p420_p2), 523264  }
   0x8   : > { %1444 = vmatprep.subr.bf16.mxu0 (!%p420_p2), %v1590_v1  ;;  %1452 = vmatprep.mubr.msk.bf16.mxu1 (!%p420_p2), %vm1591_vm0, %v1590_v1  ;;  %s1595_s28 = smov (!%p420_p2), 88   ;;  %s1596_s15 = smov (!%p420_p2), 72  }
   0x9   : > { %s1597_s16 = smov (!%p420_p2), 112   ;;  %s1598_s17 = smov (!%p420_p2), 104  }
   0xa   : > { %s1600_s23 = smov (!%p420_p2), 64   ;;  %s1601_s24 = smov (!%p420_p2), 40  }
   0xb   : > { %1445 = vmatpush3.bf16.msra.mxu0 (!%p420_p2), %v1551_v2  ;;  %s1605_s18 = smov (!%p420_p2), 24  }
   0xc   : > { %1456 = vmatprep.subr.bf16.mxu0 (!%p420_p2), %v1590_v1 }
   0xd   : > { %s1873_s30 = smov (!%p466_p3, %s1372_s30), 1 }
   0xe   : > { %s1377_s19 = sshll.u32 %s1873_s30, 3  ;;  %s472_s21 = scalar_lea.vmem %s1858_s1, %s1873_s30 }
   0xf   : > { %s469_s22 = scalar_lea.vmem %s1857_s0, %s1377_s19  ;;  %v1384_v24 = vld [vmem:[%s472_s21] ss:$0 sm:$0xff] }
  0x10   : > { %v1711_v3 = vld [vmem:[%s469_s22] sm:$0xff]  ;;  %s1599_s22 = smov 56  }
  0x11   : > { %v480_v4 = vpack.c.bf16 %v1711_v3, %v1711_v3 }
  0x13   : > { %1447 = vmatmul.mubr.msk.bf16.vlgmr.msra.gmra.mrb[0].mxu0 %vm504_vm1, %v480_v4 }
  0x14   : > { %1458 = vmatprep.mubr.msk.bf16.mxu0 %vm1591_vm0, %v1590_v1 }
  0xe6   : > { %v542_v6 = vpop.f32.mrb[0].mxu0 }
  0xe7   : > { %v543_v7 = vadd.f32 %v1379_v5, %v542_v6  ;;  %v1448_v8 = vpop.f32.mrb[1].mxu0 }
  0xe8   : > { %v545_v9 = vpop.f32.mrb[2].mxu0 }
  0xe9   : > { %v1721_v10 = vpack.c.bf16 %v543_v7, %v543_v7  ;;  %v1449_v11 = vpop.f32.mrb[3].mxu0 }
  0xeb   : > { %668 = vrot.lane.b32.xlu1 %v1721_v10, %s1592_s25  ;;  %550 = vrot.lane.b32.xlu0 %v1721_v10, %s1593_s26  ;;  %s1602_s25 = smov 48   ;;  %s1603_s26 = smov 8  }
  0xef   : > { %782 = vrot.lane.b32.xlu1 %v1721_v10, %s1594_s27  ;;  %670 = vrot.lane.b32.xlu0 %v1721_v10, %s1595_s28 }
  0xf3   : > { %894 = vrot.lane.b32.xlu1 %v1721_v10, %s1596_s15  ;;  %780 = vrot.lane.b32.xlu0 %v1721_v10, %s1597_s16 }
  0xf7   : > { %892 = vrot.lane.b32.xlu0 %v1721_v10, %s1598_s17  ;;  %s1604_s17 = smov 16  }
 0x15d   : > { %v551_v12 = vpop.permute.xlu0 %550  ;;  %v669_v15 = vpop.permute.xlu1 %668 }
 0x15e   : > { %v557_v13 = vsel %vm552_vm2, %v551_v12, 0 }
 0x15f   : > { %1451 = vmatpush3.bf16.xpose.msra.mxu1 %v557_v13 }
 0x160   : > { %1462 = vmatprep.subr.bf16.mxu1 %v1590_v1 }
 0x161   : > { %v671_v14 = vpop.permute.xlu0 %670  ;;  %v783_v17 = vpop.permute.xlu1 %782 }
 0x162   : > { %v676_v16 = vsel %vm552_vm2, %v671_v14, 0  ;;  %v788_v18 = vsel %vm552_vm2, %v783_v17, 0 }
 0x165   : > { %v895_v19 = vpop.permute.xlu1 %894  ;;  %v781_v20 = vpop.permute.xlu0 %780 }
 0x166   : > { %1453 = vmatmul.mubr.msk.bf16.vlgmr.msra.gmra.mrb[0].mxu1 %vm552_vm2, %v1721_v10  ;;  %v900_v21 = vsel %vm552_vm2, %v895_v19, 0 }
 0x167   : > { %1463 = vmatpush3.bf16.xpose.msra.mxu1 %v676_v16  ;;  %1464 = vmatprep.mubr.msk.bf16.mxu1 %vm1591_vm0, %v1590_v1 }
 0x168   : > { %1474 = vmatprep.subr.bf16.mxu1 %v1590_v1 }
 0x169   : > { %v893_v22 = vpop.permute.xlu0 %892 }
 0x16e   : > { %1465 = vmatmul.mubr.msk.bf16.vlgmr.msra.gmra.mrb[4].mxu1 %vm552_vm2, %v669_v15 }
 0x16f   : > { %1475 = vmatpush3.bf16.xpose.msra.mxu1 %v788_v18  ;;  %1476 = vmatprep.mubr.msk.bf16.mxu1 %vm1591_vm0, %v1590_v1 }
 0x170   : > { %1486 = vmatprep.subr.bf16.mxu1 %v1590_v1 }
 0x176   : > { %1477 = vmatmul.mubr.msk.bf16.vlgmr.msra.gmra.mrb[8].mxu1 %vm552_vm2, %v781_v20 }
 0x177   : > { %1487 = vmatpush3.bf16.xpose.msra.mxu1 %v900_v21  ;;  %1488 = vmatprep.mubr.msk.bf16.mxu1 %vm1591_vm0, %v1590_v1 }
 0x178   : > { %1498 = vmatprep.subr.bf16.mxu1 %v1590_v1 }
 0x17e   : > { %1489 = vmatmul.mubr.msk.bf16.vlgmr.msra.gmra.mrb[12].mxu1 %vm552_vm2, %v893_v22 }
 0x17f   : > { %1502 = vmatprep.mubr.msk.bf16.mxu1 %vm1591_vm0, %v1590_v1 }
 0x239   : > { %v593_v23 = vpop.f32.mrb[0].mxu1 }
 0x23a   : > { %v599_v25 = vmul.f32 0.35355338, %v593_v23  ;;  %v1454_v26 = vpop.f32.mrb[1].mxu1 }
 0x23b   : > { %v596_v27 = vpop.f32.mrb[2].mxu1 }
 0x23c   : > { %v1455_v28 = vpop.f32.mrb[3].mxu1  ;;  %v606_v29 = vadd.f32 %v1384_v24, %v599_v25 }
 0x23e   : > { %v607_v30 = vsel %vm552_vm2, %v606_v29, -inf }
 0x23f   : > { %608 = vmax.xlane.f32.xlu1 %v607_v30 }
 0x241   : > { %v712_v31 = vpop.f32.mrb[4].mxu1 }
 0x242   : > { %v718_v32 = vmul.f32 0.35355338, %v712_v31  ;;  %v1466_v33 = vpop.f32.mrb[5].mxu1 }
 0x243   : > { %v715_v34 = vpop.f32.mrb[6].mxu1 }
 0x244   : > { %v1467_v35 = vpop.f32.mrb[7].mxu1  ;;  %v719_v36 = vadd.f32 %v1384_v24, %v718_v32 }
 0x246   : > { %v720_v37 = vsel %vm552_vm2, %v719_v36, -inf }
 0x247   : > { %721 = vmax.xlane.f32.xlu0 %v720_v37 }
 0x249   : > { %v824_v38 = vpop.f32.mrb[8].mxu1 }
 0x24a   : > { %v830_v39 = vmul.f32 0.35355338, %v824_v38  ;;  %v1478_v40 = vpop.f32.mrb[9].mxu1 }
 0x24b   : > { %v827_v41 = vpop.f32.mrb[10].mxu1 }
 0x24c   : > { %v1479_v42 = vpop.f32.mrb[11].mxu1  ;;  %v831_v43 = vadd.f32 %v1384_v24, %v830_v39 }
 0x24d   : > { %v1552_v42 = vld [vmem:[%s1861_s4] sm:$0xff]  }
 0x24e   : > { %v832_v44 = vsel %vm552_vm2, %v831_v43, -inf  ;;  %1499 = vmatpush3.bf16.msra.mxu1 %v1552_v42 }
 0x24f   : > { %833 = vmax.xlane.f32.xlu0 %v832_v44  ;;  %1500 = vmatprep.subr.bf16.mxu1 %v1590_v1 }
 0x251   : > { %v936_v45 = vpop.f32.mrb[12].mxu1 }
 0x252   : > { %v942_v46 = vmul.f32 0.35355338, %v936_v45  ;;  %v1490_v47 = vpop.f32.mrb[13].mxu1 }
 0x253   : > { %v939_v48 = vpop.f32.mrb[14].mxu1 }
 0x254   : > { %v1491_v49 = vpop.f32.mrb[15].mxu1  ;;  %v943_v50 = vadd.f32 %v1384_v24, %v942_v46 }
 0x256   : > { %v944_v51 = vsel %vm552_vm2, %v943_v50, -inf }
 0x257   : > { %945 = vmax.xlane.f32.xlu1 %v944_v51 }
 0x2cc   : > { %v609_v52 = vpop.xlane.xlu1 %608 }
 0x2cd   : > { %v610_v53 = vsub.f32 %v606_v29, %v609_v52 }
 0x2cf   : > { %v611_v54 = vmul.f32 1.442695, %v610_v53 }
 0x2d1   : > { %1560 = vpow2.f32 %v611_v54 }
 0x2d4   : > { %v722_v55 = vpop.xlane.xlu0 %721 }
 0x2d5   : > { %v723_v56 = vsub.f32 %v719_v36, %v722_v55 }
 0x2d7   : > { %v724_v57 = vmul.f32 1.442695, %v723_v56 }
 0x2d9   : > { %1562 = vpow2.f32 %v724_v57 }
 0x2db   : > { %v1561_v58 = vpop.eup %1560 }
 0x2dc   : > { %v834_v59 = vpop.xlane.xlu0 %833  ;;  %v613_v60 = vsel %vm552_vm2, %v1561_v58, 0.0 }
 0x2dd   : > { %v835_v61 = vsub.f32 %v831_v43, %v834_v59  ;;  %614 = vadd.xlane.f32.xlu0 %v613_v60  ;;  %v1553_v43 = vld [vmem:[%s1861_s4 + $0x8] sm:$0xff]   ;;  %v1392_v59 = vld [vmem:[%s1862_s5] ss:$0 sm:$0xff] }
 0x2de   : > { %1501 = vmatpush3.bf16.msra.mxu1 %v1553_v43 }
 0x2df   : > { %v836_v62 = vmul.f32 1.442695, %v835_v61  ;;  %1514 = vmatprep.subr.bf16.mxu1 %v1590_v1 }
 0x2e1   : > { %1564 = vpow2.f32 %v836_v62 }
 0x2e3   : > { %v1563_v63 = vpop.eup %1562 }
 0x2e4   : > { %v726_v0 = vsel %vm552_vm2, %v1563_v63, 0.0  ;;  %v946_v5 = vpop.xlane.xlu1 %945 }
 0x2e5   : > { %727 = vadd.xlane.f32.xlu1 %v726_v0  ;;  %v947_v6 = vsub.f32 %v943_v50, %v946_v5 }
 0x2e7   : > { %v948_v7 = vmul.f32 1.442695, %v947_v6 }
 0x2e9   : > { %1566 = vpow2.f32 %v948_v7 }
 0x2eb   : > { %v1565_v2 = vpop.eup %1564 }
 0x2ec   : > { %v838_v4 = vsel %vm552_vm2, %v1565_v2, 0.0 }
 0x2ed   : > { %839 = vadd.xlane.f32.xlu0 %v838_v4 }
 0x2f3   : > { %v1567_v8 = vpop.eup %1566 }
 0x2f4   : > { %v950_v9 = vsel %vm552_vm2, %v1567_v8, 0.0 }
 0x2f6   : > { %732 = vrot.lane.b32.xlu1 %v1721_v10, %s1599_s22  ;;  %s476_s22 = scalar_lea.vmem %s1871_s14, %s1377_s19 }
 0x303   : > { %619 = vrot.lane.b32.xlu0 %v1721_v10, %s1600_s23 }
 0x307   : > { %956 = vrot.lane.b32.xlu0 %v1721_v10, %s1601_s24 }
 0x31a   : > { %951 = vadd.xlane.f32.xlu1 %v950_v9 }
 0x32b   : > { %844 = vrot.lane.b32.xlu1 %v1721_v10, %s1602_s25 }
 0x36a   : > { %v615_v11 = vpop.xlane.xlu0 %614 }
 0x36b   : > { %1568 = vrcp.f32 %v615_v11  ;;  %v1554_v11 = vld [vmem:[%s1865_s8] sm:$0xff]  }
 0x372   : > { %v728_v12 = vpop.xlane.xlu1 %727 }
 0x373   : > { %1570 = vrcp.f32 %v728_v12 }
 0x375   : > { %v1569_v13 = vpop.eup %1568 }
 0x376   : > { %v617_v15 = vmul.f32 %v1569_v13, %v1561_v58  ;;  %v733_v18 = vpop.permute.xlu1 %732 }
 0x377   : > { %v738_v21 = vsel %vm624_vm3, %v733_v18, 0  ;;  %v1397_v18 = vld [vmem:[%s1864_s7] ss:$0 sm:$0xff] }
 0x378   : > { %v618_v19 = vpack.c.bf16 %v617_v15, %v617_v15 }
 0x37a   : > { %v840_v14 = vpop.xlane.xlu0 %839 }
 0x37b   : > { %1572 = vrcp.f32 %v840_v14 }
 0x37d   : > { %v1571_v20 = vpop.eup %1570 }
 0x37e   : > { %v620_v16 = vpop.permute.xlu0 %619  ;;  %v730_v10 = vmul.f32 %v1571_v20, %v1563_v63 }
 0x37f   : > { %v626_v17 = vsel %vm624_vm3, %v620_v16, 0  ;;  %v1396_v16 = vld [vmem:[%s1863_s6] ss:$0 sm:$0xff] }
 0x380   : > { %1457 = vmatpush3.bf16.msra.mxu0 %v626_v17  ;;  %v731_v22 = vpack.c.bf16 %v730_v10, %v730_v10  ;;  %v1556_v10 = vld [vmem:[%s1867_s10] sm:$0xff]  }
 0x381   : > { %1468 = vmatprep.subr.bf16.mxu0 %v1590_v1 }
 0x382   : > { %v957_v28 = vpop.permute.xlu0 %956 }
 0x383   : > { %1459 = vmatmul.mubr.msk.bf16.vlgmr.msra.gmra.mrb[4].mxu0 %vm552_vm2, %v618_v19  ;;  %v962_v30 = vsel %vm624_vm3, %v957_v28, 0 }
 0x384   : > { %1469 = vmatpush3.bf16.msra.mxu0 %v738_v21  ;;  %1470 = vmatprep.mubr.msk.bf16.mxu0 %vm1591_vm0, %v1590_v1 }
 0x385   : > { %1480 = vmatprep.subr.bf16.mxu0 %v1590_v1  ;;  %v1573_v23 = vpop.eup %1572 }
 0x386   : > { %v842_v25 = vmul.f32 %v1573_v23, %v1565_v2  ;;  %v1558_v23 = vld [vmem:[%s1867_s10 + $0x10] sm:$0xff]  }
 0x388   : > { %v843_v29 = vpack.c.bf16 %v842_v25, %v842_v25  ;;  %v1398_v25 = vld [vmem:[%s1866_s9] ss:$0 sm:$0xff] }
 0x38b   : > { %1471 = vmatmul.mubr.msk.bf16.vlgmr.msra.gmra.mrb[8].mxu0 %vm552_vm2, %v731_v22  ;;  %v1557_v22 = vld [vmem:[%s1867_s10 + $0x8] sm:$0xff]  }
 0x38c   : > { %1482 = vmatprep.mubr.msk.bf16.mxu0 %vm1591_vm0, %v1590_v1 }
 0x3a7   : > { %v952_v24 = vpop.xlane.xlu1 %951 }
 0x3a8   : > { %1574 = vrcp.f32 %v952_v24  ;;  %v1559_v24 = vld [vmem:[%s1867_s10 + $0x18] sm:$0xff]  }
 0x3ab   : > { %v845_v26 = vpop.permute.xlu1 %844 }
 0x3ac   : > { %v850_v27 = vsel %vm624_vm3, %v845_v26, 0 }
 0x3ad   : > { %1481 = vmatpush3.bf16.msra.mxu0 %v850_v27 }
 0x3ae   : > { %1492 = vmatprep.subr.bf16.mxu0 %v1590_v1 }
 0x3b0   : > { %1483 = vmatmul.mubr.msk.bf16.vlgmr.msra.gmra.mrb[12].mxu0 %vm552_vm2, %v843_v29 }
 0x3b1   : > { %1493 = vmatpush3.bf16.msra.mxu0 %v962_v30  ;;  %1494 = vmatprep.mubr.msk.bf16.mxu0 %vm1591_vm0, %v1590_v1 }
 0x3b2   : > { %v1575_v31 = vpop.eup %1574  ;;  %1506 = vmatprep.subr.bf16.mxu0 %v1590_v1 }
 0x3b3   : > { %v954_v32 = vmul.f32 %v1575_v31, %v1567_v8 }
 0x3b5   : > { %v955_v33 = vpack.c.bf16 %v954_v32, %v954_v32 }
 0x3b8   : > { %1495 = vmatmul.mubr.msk.bf16.vlgmr.msra.gmra.mrb[16].mxu0 %vm552_vm2, %v955_v33 }
 0x3b9   : > { %1510 = vmatprep.mubr.msk.bf16.mxu0 %vm1591_vm0, %v1590_v1  ;;  %1507 = vmatpush3.bf16.msra.mxu0 %v1554_v11 }
 0x3ba   : > { %1508 = vmatprep.subr.bf16.mxu0 %v1590_v1 }
 0x456   : > { %v662_v34 = vpop.f32.mrb[4].mxu0 }
 0x457   : > { %v1460_v35 = vpop.f32.mrb[5].mxu0 }
 0x458   : > { %v665_v36 = vpop.f32.mrb[6].mxu0 }
 0x459   : > { %v1461_v37 = vpop.f32.mrb[7].mxu0 }
 0x45e   : > { %v774_v38 = vpop.f32.mrb[8].mxu0 }
 0x45f   : > { %1005 = vrot.lane.b32.xlu1 %v774_v38, %s1603_s26  ;;  %v1472_v39 = vpop.f32.mrb[9].mxu0 }
 0x460   : > { %v777_v40 = vpop.f32.mrb[10].mxu0 }
 0x461   : > { %v1473_v41 = vpop.f32.mrb[11].mxu0  ;;  %v1402_v40 = vld [vmem:[%s1868_s11] ss:$0 sm:$0xff] }
 0x483   : > { %v886_v44 = vpop.f32.mrb[12].mxu0 }
 0x484   : > { %1009 = vrot.lane.b32.xlu0 %v886_v44, %s1604_s17  ;;  %v1484_v45 = vpop.f32.mrb[13].mxu0 }
 0x485   : > { %v889_v46 = vpop.f32.mrb[14].mxu0 }
 0x486   : > { %v1485_v47 = vpop.f32.mrb[15].mxu0 }
 0x48b   : > { %v998_v48 = vpop.f32.mrb[16].mxu0 }
 0x48c   : > { %1013 = vrot.lane.b32.xlu1 %v998_v48, %s1605_s18  ;;  %v1496_v49 = vpop.f32.mrb[17].mxu0 }
 0x48d   : > { %v1001_v50 = vpop.f32.mrb[18].mxu0 }
 0x48e   : > { %v1497_v51 = vpop.f32.mrb[19].mxu0 }
 0x4d1   : > { %v1006_v52 = vpop.permute.xlu1 %1005 }
 0x4d2   : > { %v1016_v54 = vsel %vm552_vm2, %v662_v34, %v1006_v52 }
 0x4f6   : > { %v1010_v53 = vpop.permute.xlu0 %1009 }
 0x4f7   : > { %v1018_v55 = vsel %vm1017_vm4, %v1016_v54, %v1010_v53 }
 0x4fe   : > { %v1014_v56 = vpop.permute.xlu1 %1013 }
 0x4ff   : > { %v1020_v57 = vsel %vm1019_vm5, %v1018_v55, %v1014_v56 }
 0x500   : > { %v1021_v58 = vpack.c.bf16 %v1020_v57, %v1020_v57  ;;  %v1408_v57 = vld [vmem:[%s1869_s12] ss:$0 sm:$0xff] }
 0x502   : > { %1503 = vmatmul.mubr.msk.bf16.vlgmr.msra.gmra.mrb[16].mxu1 %vm504_vm1, %v1021_v58 }
 0x503   : > { %1522 = vmatprep.mubr.msk.bf16.mxu1 %vm1591_vm0, %v1590_v1  ;;  %1515 = vmatpush3.bf16.msra.mxu1 %v1556_v10 }
 0x504   : > { %1516 = vmatprep.subr.bf16.mxu1 %v1590_v1 }
 0x507   : > { %1517 = vmatpush3.bf16.msra.mxu1 %v1557_v22 }
 0x508   : > { %1518 = vmatprep.subr.bf16.mxu1 %v1590_v1 }
 0x50b   : > { %1519 = vmatpush3.bf16.msra.mxu1 %v1558_v23 }
 0x50c   : > { %1520 = vmatprep.subr.bf16.mxu1 %v1590_v1 }
 0x50f   : > { %1521 = vmatpush3.bf16.msra.mxu1 %v1559_v24 }
 0x5d5   : > { %v1082_v60 = vpop.f32.mrb[16].mxu1 }
 0x5d6   : > { %v1083_v61 = vadd.f32 %v1392_v59, %v1082_v60  ;;  %v1504_v62 = vpop.f32.mrb[17].mxu1  ;;  %v1409_v59 = vld [vmem:[%s1870_s13] ss:$0 sm:$0xff] }
 0x5d7   : > { %v1085_v63 = vpop.f32.mrb[18].mxu1 }
 0x5d8   : > { %v1505_v0 = vpop.f32.mrb[19].mxu1  ;;  %v1088_v2 = vadd.f32 %v1083_v61, %v1711_v3  ;;  %v1555_v3 = vld [vmem:[%s1865_s8 + $0x8] sm:$0xff]  }
 0x5d9   : > { %1509 = vmatpush3.bf16.msra.mxu0 %v1555_v3 }
 0x5da   : > { %v1091_v4 = vsel %vm504_vm1, %v1088_v2, 0.0 }
 0x5db   : > { %1092 = vadd.xlane.f32.xlu0 %v1091_v4 }
 0x668   : > { %v1093_v5 = vpop.xlane.xlu0 %1092 }
 0x669   : > { %v1095_v6 = vmul.f32 0.03125, %v1093_v5 }
 0x66b   : > { %v1096_v7 = vsub.f32 %v1088_v2, %v1095_v6 }
 0x66d   : > { %v1097_v8 = vmul.f32 %v1096_v7, %v1096_v7 }
 0x66f   : > { %v1098_v9 = vsel %vm504_vm1, %v1097_v8, 0.0 }
 0x670   : > { %1099 = vadd.xlane.f32.xlu1 %v1098_v9 }
 0x6fd   : > { %v1100_v12 = vpop.xlane.xlu1 %1099 }
 0x6fe   : > { %v1101_v13 = vmul.f32 0.03125, %v1100_v12 }
 0x700   : > { %v1102_v14 = vadd.f32 1e-12, %v1101_v13 }
 0x702   : > { %1576 = vrsqrt.f32 %v1102_v14 }
 0x70c   : > { %v1577_v15 = vpop.eup %1576 }
 0x70d   : > { %v1104_v17 = vmul.f32 %v1577_v15, %v1096_v7 }
 0x70f   : > { %v1111_v19 = vmul.f32 %v1396_v16, %v1104_v17 }
 0x711   : > { %v1118_v20 = vadd.f32 %v1397_v18, %v1111_v19 }
 0x713   : > { %v1119_v21 = vpack.c.bf16 %v1118_v20, %v1118_v20 }
 0x715   : > { %1511 = vmatmul.mubr.msk.bf16.vlgmr.msra.gmra.mrb[20].mxu0 %vm504_vm1, %v1119_v21 }
 0x7e8   : > { %v1180_v26 = vpop.f32.mrb[20].mxu0 }
 0x7e9   : > { %v1181_v27 = vadd.f32 %v1398_v25, %v1180_v26  ;;  %v1512_v28 = vpop.f32.mrb[21].mxu0 }
 0x7ea   : > { %v1183_v29 = vpop.f32.mrb[22].mxu0 }
 0x7eb   : > { %v1187_v30 = vmul.f32 0.044715, %v1181_v27  ;;  %v1513_v31 = vpop.f32.mrb[23].mxu0  ;;  %v1186_v37 = vmul.f32 0.5, %v1181_v27 }
 0x7ed   : > { %v1188_v32 = vmul.f32 %v1187_v30, %v1181_v27 }
 0x7ef   : > { %v1189_v33 = vmul.f32 %v1188_v32, %v1181_v27 }
 0x7f1   : > { %v1190_v34 = vadd.f32 %v1189_v33, %v1181_v27 }
 0x7f3   : > { %v1191_v35 = vmul.f32 0.7978846, %v1190_v34 }
 0x7f5   : > { %1578 = vtanh.f32 %v1191_v35 }
 0x7ff   : > { %v1579_v36 = vpop.eup %1578 }
 0x800   : > { %v1193_v38 = vadd.f32 1.0, %v1579_v36 }
 0x802   : > { %v1194_v1 = vmul.f32 %v1193_v38, %v1186_v37 }
 0x804   : > { %v1195_v39 = vpack.c.bf16 %v1194_v1, %v1194_v1 }
 0x806   : > { %1523 = vmatmul.mubr.msk.bf16.vlgmr.msra.gmra.mrb[20].mxu1 %vm1235_vm6, %v1195_v39 }
 0x8d9   : > { %v1273_v41 = vpop.f32.mrb[20].mxu1 }
 0x8da   : > { %v1274_v42 = vadd.f32 %v1402_v40, %v1273_v41  ;;  %v1524_v43 = vpop.f32.mrb[21].mxu1 }
 0x8db   : > { %v1276_v44 = vpop.f32.mrb[22].mxu1 }
 0x8dc   : > { %v1525_v45 = vpop.f32.mrb[23].mxu1  ;;  %v1279_v46 = vadd.f32 %v1274_v42, %v1118_v20 }
 0x8de   : > { %v1282_v47 = vsel %vm504_vm1, %v1279_v46, 0.0 }
 0x8df   : > { %1283 = vadd.xlane.f32.xlu0 %v1282_v47 }
 0x96c   : > { %v1284_v48 = vpop.xlane.xlu0 %1283 }
 0x96d   : > { %v1285_v49 = vmul.f32 0.03125, %v1284_v48 }
 0x96f   : > { %v1286_v50 = vsub.f32 %v1279_v46, %v1285_v49 }
 0x971   : > { %v1287_v51 = vmul.f32 %v1286_v50, %v1286_v50 }
 0x973   : > { %v1288_v52 = vsel %vm504_vm1, %v1287_v51, 0.0 }
 0x974   : > { %1289 = vadd.xlane.f32.xlu0 %v1288_v52 }
 0xa01   : > { %v1290_v53 = vpop.xlane.xlu0 %1289 }
 0xa02   : > { %v1291_v54 = vmul.f32 0.03125, %v1290_v53 }
 0xa04   : > { %v1292_v55 = vadd.f32 1e-12, %v1291_v54 }
 0xa06   : > { %1580 = vrsqrt.f32 %v1292_v55 }
 0xa10   : > { %v1581_v56 = vpop.eup %1580 }
 0xa11   : > { %v1294_v58 = vmul.f32 %v1581_v56, %v1286_v50 }
 0xa13   : > { %v1301_v60 = vmul.f32 %v1408_v57, %v1294_v58 }
 0xa15   : > { %v1308_v61 = vadd.f32 %v1409_v59, %v1301_v60 }
 0xa17   : > { %1309 = vst.msk [vmem:[%s476_s22] sm:$0xff] %vm504_vm1, %v1308_v61 }
 0xa18 PF: > { %s24_s29 = sadd.s32 1, %s1588_s29  }
 0xa19   : > { %p21_p4 = scmp.ge.s32.totalorder %s24_s29, 4  }
 0xa1b   :  { %23 = sbr.rel (!%p21_p4) target bundleno = 1 (0x1), region = 109 }

// kernel: model_forward.7
= control target key start
LH: loop header
LB: loop body
LE: loop exit
PB: predicated region body
PF: predicated region fallthrough
CT: control target
= control target key end

     0   :  { %s1681_s29 = smov 0   ;;  %s1854_s0 = inlined_call_operand.vmem [shape: f32[2,8,32], index: 0, kind: input, shape index: {}]   ;;  %s1855_s1 = inlined_call_operand.vmem [shape: f32[2,8,8], index: 1, kind: input, shape index: {}]   ;;  %s1856_s2 = inlined_call_operand.vmem [shape: bf16[32,96], index: 2, kind: input, shape index: {}]   ;;  %s1857_s3 = inlined_call_operand.vmem [shape: f32[1,96], index: 3, kind: input, shape index: {}]   ;;  %s1858_s4 = inlined_call_operand.vmem [shape: bf16[32,32], index: 4, kind: input, shape index: {}]   ;;  %s1859_s5 = inlined_call_operand.vmem [shape: f32[1,32], index: 5, kind: input, shape index: {}]   ;;  %s1860_s6 = inlined_call_operand.vmem [shape: f32[1,32], index: 6, kind: input, shape index: {}]   ;;  %s1861_s7 = inlined_call_operand.vmem [shape: f32[1,32], index: 7, kind: input, shape index: {}]   ;;  %s1862_s8 = inlined_call_operand.vmem [shape: bf16[32,64], index: 8, kind: input, shape index: {}]   ;;  %s1863_s9 = inlined_call_operand.vmem [shape: f32[1,64], index: 9, kind: input, shape index: {}]   ;;  %s1864_s10 = inlined_call_operand.vmem [shape: bf16[64,32], index: 10, kind: input, shape index: {}]   ;;  %s1865_s11 = inlined_call_operand.vmem [shape: f32[1,32], index: 11, kind: input, shape index: {}]   ;;  %s1866_s12 = inlined_call_operand.vmem [shape: f32[1,32], index: 12, kind: input, shape index: {}]   ;;  %s1867_s13 = inlined_call_operand.vmem [shape: f32[1,32], index: 13, kind: input, shape index: {}]   ;;  %s1868_s14 = inlined_call_operand.vmem [shape: f32[2,8,32], index: 14, kind: output, shape index: {}]  }
   0x1 LB: > { %s1372_s30 = sadd.s32 4294967295, %s1588_s29   ;;  %p1376_p0 = scmp.ge.s32.totalorder %s1588_s29, 1  ;;  %s1588_s29 = sphi %s1681_s29, %s24_s29  }
   0x2   : > { %p420_p1 = scmp.lt.s32.totalorder %s1588_s29, 3 }
   0x4   : > { %p421_p2 = pnand %p1376_p0, %p420_p1 }
   0x5   : > { %v1550_v0 = vld [vmem:[%s1856_s2] sm:$0xff] (!%p421_p2)   ;;  %v1590_v1 = vmov (!%p421_p2), 0.0   ;;  %v1551_v2 = vld [vmem:[%s1856_s2 + $0x8] sm:$0xff] (!%p421_p2)   ;;  %vm1591_vm0 = vmmov (!%p421_p2), 0   ;;  %p468_p3 = scmp.lt.s32.totalorder (!%p421_p2), %s1372_s30, 1  ;;  %vm507_vm1 = vcmask (!%p421_p2), 261120  }
   0x6   : > { %424 = sbr.rel (%p421_p2) target bundleno = 2584 (0xa18), region = 76  ;;  %1442 = vmatprep.subr.bf16.mxu0 (!%p421_p2), %v1590_v1  ;;  %1450 = vmatprep.subr.bf16.mxu1 (!%p421_p2), %v1590_v1  ;;  %v1380_v5 = vld [vmem:[%s1857_s3] ss:$0 sm:$0xff] (!%p421_p2)  ;;  %s1592_s25 = smov (!%p421_p2), 120   ;;  %vm555_vm2 = vcmask (!%p421_p2), 64512   ;;  %vm621_vm3 = vcmask (!%p421_p2), 1043456  }
   0x7   : > { %1443 = vmatpush3.bf16.msra.mxu0 (!%p421_p2), %v1550_v0  ;;  %1446 = vmatprep.mubr.msk.bf16.mxu0 (!%p421_p2), %vm1591_vm0, %v1590_v1  ;;  %s1593_s26 = smov (!%p421_p2), 96   ;;  %s1594_s27 = smov (!%p421_p2), 80   ;;  %vm1014_vm4 = vcmask (!%p421_p2), 130048   ;;  %vm1016_vm5 = vcmask (!%p421_p2), 195584   ;;  %vm1232_vm6 = vcmask (!%p421_p2), 523264  }
   0x8   : > { %1444 = vmatprep.subr.bf16.mxu0 (!%p421_p2), %v1590_v1  ;;  %1452 = vmatprep.mubr.msk.bf16.mxu1 (!%p421_p2), %vm1591_vm0, %v1590_v1  ;;  %s1595_s28 = smov (!%p421_p2), 88   ;;  %s1597_s15 = smov (!%p421_p2), 112  }
   0x9   : > { %s1598_s16 = smov (!%p421_p2), 104   ;;  %s1599_s21 = smov (!%p421_p2), 56  }
   0xa   : > { %s1601_s23 = smov (!%p421_p2), 40   ;;  %s1602_s24 = smov (!%p421_p2), 48  }
   0xb   : > { %1445 = vmatpush3.bf16.msra.mxu0 (!%p421_p2), %v1551_v2 }
   0xc   : > { %1456 = vmatprep.subr.bf16.mxu0 (!%p421_p2), %v1590_v1 }
   0xd   : > { %s1870_s30 = smov (!%p468_p3, %s1372_s30), 1 }
   0xe   : > { %s1702_s19 = sshll.u32 %s1870_s30, 3  ;;  %s1596_s30 = smov 72  }
   0xf   : > { %s471_s22 = scalar_lea.vmem %s1854_s0, %s1702_s19  ;;  %s475_s20 = scalar_lea.vmem %s1855_s1, %s1702_s19 }
  0x10   : > { %v1709_v3 = vld [vmem:[%s471_s22] sm:$0xff]  ;;  %s1600_s22 = smov 64   ;;  %s479_s17 = scalar_lea.vmem %s1868_s14, %s1702_s19 }
  0x11   : > { %v483_v4 = vpack.c.bf16 %v1709_v3, %v1709_v3  ;;  %v482_v24 = vld [vmem:[%s475_s20] sm:$0xff] }
  0x13   : > { %1447 = vmatmul.mubr.msk.bf16.vlgmr.msra.gmra.mrb[0].mxu0 %vm507_vm1, %v483_v4 }
  0x14   : > { %1458 = vmatprep.mubr.msk.bf16.mxu0 %vm1591_vm0, %v1590_v1 }
  0xe6   : > { %v545_v6 = vpop.f32.mrb[0].mxu0 }
  0xe7   : > { %v546_v7 = vadd.f32 %v1380_v5, %v545_v6  ;;  %v1448_v8 = vpop.f32.mrb[1].mxu0 }
  0xe8   : > { %v548_v9 = vpop.f32.mrb[2].mxu0 }
  0xe9   : > { %v1719_v10 = vpack.c.bf16 %v546_v7, %v546_v7  ;;  %v1449_v11 = vpop.f32.mrb[3].mxu0 }
  0xeb   : > { %665 = vrot.lane.b32.xlu1 %v1719_v10, %s1592_s25  ;;  %553 = vrot.lane.b32.xlu0 %v1719_v10, %s1593_s26  ;;  %s1603_s25 = smov 8  }
  0xef   : > { %779 = vrot.lane.b32.xlu1 %v1719_v10, %s1594_s27  ;;  %667 = vrot.lane.b32.xlu0 %v1719_v10, %s1595_s28 }
  0xf3   : > { %891 = vrot.lane.b32.xlu1 %v1719_v10, %s1596_s30  ;;  %777 = vrot.lane.b32.xlu0 %v1719_v10, %s1597_s15  ;;  %s1604_s15 = smov 16  }
  0xf7   : > { %889 = vrot.lane.b32.xlu0 %v1719_v10, %s1598_s16  ;;  %s1605_s16 = smov 24  }
 0x15d   : > { %v554_v12 = vpop.permute.xlu0 %553  ;;  %v666_v15 = vpop.permute.xlu1 %665 }
 0x15e   : > { %v560_v13 = vsel %vm555_vm2, %v554_v12, 0 }
 0x15f   : > { %1451 = vmatpush3.bf16.xpose.msra.mxu1 %v560_v13 }
 0x160   : > { %1462 = vmatprep.subr.bf16.mxu1 %v1590_v1 }
 0x161   : > { %v668_v14 = vpop.permute.xlu0 %667  ;;  %v780_v17 = vpop.permute.xlu1 %779 }
 0x162   : > { %v673_v16 = vsel %vm555_vm2, %v668_v14, 0  ;;  %v785_v18 = vsel %vm555_vm2, %v780_v17, 0 }
 0x165   : > { %v892_v19 = vpop.permute.xlu1 %891  ;;  %v778_v20 = vpop.permute.xlu0 %777 }
 0x166   : > { %1453 = vmatmul.mubr.msk.bf16.vlgmr.msra.gmra.mrb[0].mxu1 %vm555_vm2, %v1719_v10  ;;  %v897_v21 = vsel %vm555_vm2, %v892_v19, 0 }
 0x167   : > { %1463 = vmatpush3.bf16.xpose.msra.mxu1 %v673_v16  ;;  %1464 = vmatprep.mubr.msk.bf16.mxu1 %vm1591_vm0, %v1590_v1 }
 0x168   : > { %1474 = vmatprep.subr.bf16.mxu1 %v1590_v1 }
 0x169   : > { %v890_v22 = vpop.permute.xlu0 %889 }
 0x16e   : > { %1465 = vmatmul.mubr.msk.bf16.vlgmr.msra.gmra.mrb[4].mxu1 %vm555_vm2, %v666_v15 }
 0x16f   : > { %1475 = vmatpush3.bf16.xpose.msra.mxu1 %v785_v18  ;;  %1476 = vmatprep.mubr.msk.bf16.mxu1 %vm1591_vm0, %v1590_v1 }
 0x170   : > { %1486 = vmatprep.subr.bf16.mxu1 %v1590_v1 }
 0x176   : > { %1477 = vmatmul.mubr.msk.bf16.vlgmr.msra.gmra.mrb[8].mxu1 %vm555_vm2, %v778_v20 }
 0x177   : > { %1487 = vmatpush3.bf16.xpose.msra.mxu1 %v897_v21  ;;  %1488 = vmatprep.mubr.msk.bf16.mxu1 %vm1591_vm0, %v1590_v1 }
 0x178   : > { %1498 = vmatprep.subr.bf16.mxu1 %v1590_v1 }
 0x17e   : > { %1489 = vmatmul.mubr.msk.bf16.vlgmr.msra.gmra.mrb[12].mxu1 %vm555_vm2, %v890_v22 }
 0x17f   : > { %1502 = vmatprep.mubr.msk.bf16.mxu1 %vm1591_vm0, %v1590_v1 }
 0x239   : > { %v596_v23 = vpop.f32.mrb[0].mxu1 }
 0x23a   : > { %v602_v25 = vmul.f32 0.35355338, %v596_v23  ;;  %v1454_v26 = vpop.f32.mrb[1].mxu1 }
 0x23b   : > { %v599_v27 = vpop.f32.mrb[2].mxu1 }
 0x23c   : > { %v1455_v28 = vpop.f32.mrb[3].mxu1  ;;  %v603_v29 = vadd.f32 %v602_v25, %v482_v24 }
 0x23e   : > { %v604_v30 = vsel %vm555_vm2, %v603_v29, -inf }
 0x23f   : > { %605 = vmax.xlane.f32.xlu1 %v604_v30 }
 0x241   : > { %v709_v31 = vpop.f32.mrb[4].mxu1 }
 0x242   : > { %v715_v32 = vmul.f32 0.35355338, %v709_v31  ;;  %v1466_v33 = vpop.f32.mrb[5].mxu1 }
 0x243   : > { %v712_v34 = vpop.f32.mrb[6].mxu1 }
 0x244   : > { %v1467_v35 = vpop.f32.mrb[7].mxu1  ;;  %v716_v36 = vadd.f32 %v715_v32, %v482_v24 }
 0x246   : > { %v717_v37 = vsel %vm555_vm2, %v716_v36, -inf }
 0x247   : > { %718 = vmax.xlane.f32.xlu0 %v717_v37 }
 0x249   : > { %v821_v38 = vpop.f32.mrb[8].mxu1 }
 0x24a   : > { %v827_v39 = vmul.f32 0.35355338, %v821_v38  ;;  %v1478_v40 = vpop.f32.mrb[9].mxu1 }
 0x24b   : > { %v824_v41 = vpop.f32.mrb[10].mxu1 }
 0x24c   : > { %v1479_v42 = vpop.f32.mrb[11].mxu1  ;;  %v828_v43 = vadd.f32 %v827_v39, %v482_v24 }
 0x24d   : > { %v1552_v42 = vld [vmem:[%s1858_s4] sm:$0xff]  }
 0x24e   : > { %v829_v44 = vsel %vm555_vm2, %v828_v43, -inf  ;;  %1499 = vmatpush3.bf16.msra.mxu1 %v1552_v42 }
 0x24f   : > { %830 = vmax.xlane.f32.xlu0 %v829_v44  ;;  %1500 = vmatprep.subr.bf16.mxu1 %v1590_v1 }
 0x251   : > { %v933_v45 = vpop.f32.mrb[12].mxu1 }
 0x252   : > { %v939_v46 = vmul.f32 0.35355338, %v933_v45  ;;  %v1490_v47 = vpop.f32.mrb[13].mxu1 }
 0x253   : > { %v936_v48 = vpop.f32.mrb[14].mxu1 }
 0x254   : > { %v1491_v49 = vpop.f32.mrb[15].mxu1  ;;  %v940_v50 = vadd.f32 %v939_v46, %v482_v24 }
 0x256   : > { %v941_v51 = vsel %vm555_vm2, %v940_v50, -inf }
 0x257   : > { %942 = vmax.xlane.f32.xlu1 %v941_v51 }
 0x2cc   : > { %v606_v52 = vpop.xlane.xlu1 %605 }
 0x2cd   : > { %v607_v53 = vsub.f32 %v603_v29, %v606_v52 }
 0x2cf   : > { %v608_v54 = vmul.f32 1.442695, %v607_v53 }
 0x2d1   : > { %1560 = vpow2.f32 %v608_v54 }
 0x2d4   : > { %v719_v55 = vpop.xlane.xlu0 %718 }
 0x2d5   : > { %v720_v56 = vsub.f32 %v716_v36, %v719_v55 }
 0x2d7   : > { %v721_v57 = vmul.f32 1.442695, %v720_v56 }
 0x2d9   : > { %1562 = vpow2.f32 %v721_v57 }
 0x2db   : > { %v1561_v58 = vpop.eup %1560 }
 0x2dc   : > { %v831_v59 = vpop.xlane.xlu0 %830  ;;  %v610_v60 = vsel %vm555_vm2, %v1561_v58, 0.0 }
 0x2dd   : > { %v832_v61 = vsub.f32 %v828_v43, %v831_v59  ;;  %611 = vadd.xlane.f32.xlu0 %v610_v60  ;;  %v1553_v43 = vld [vmem:[%s1858_s4 + $0x8] sm:$0xff]   ;;  %v1392_v59 = vld [vmem:[%s1859_s5] ss:$0 sm:$0xff] }
 0x2de   : > { %1501 = vmatpush3.bf16.msra.mxu1 %v1553_v43 }
 0x2df   : > { %v833_v62 = vmul.f32 1.442695, %v832_v61  ;;  %1514 = vmatprep.subr.bf16.mxu1 %v1590_v1 }
 0x2e1   : > { %1564 = vpow2.f32 %v833_v62 }
 0x2e3   : > { %v1563_v63 = vpop.eup %1562 }
 0x2e4   : > { %v723_v0 = vsel %vm555_vm2, %v1563_v63, 0.0  ;;  %v943_v5 = vpop.xlane.xlu1 %942 }
 0x2e5   : > { %724 = vadd.xlane.f32.xlu1 %v723_v0  ;;  %v944_v6 = vsub.f32 %v940_v50, %v943_v5 }
 0x2e7   : > { %v945_v7 = vmul.f32 1.442695, %v944_v6 }
 0x2e9   : > { %1566 = vpow2.f32 %v945_v7 }
 0x2eb   : > { %v1565_v2 = vpop.eup %1564 }
 0x2ec   : > { %v835_v4 = vsel %vm555_vm2, %v1565_v2, 0.0 }
 0x2ed   : > { %836 = vadd.xlane.f32.xlu0 %v835_v4 }
 0x2f3   : > { %v1567_v8 = vpop.eup %1566 }
 0x2f4   : > { %v947_v9 = vsel %vm555_vm2, %v1567_v8, 0.0 }
 0x2f6   : > { %729 = vrot.lane.b32.xlu1 %v1719_v10, %s1599_s21 }
 0x303   : > { %616 = vrot.lane.b32.xlu0 %v1719_v10, %s1600_s22 }
 0x307   : > { %953 = vrot.lane.b32.xlu0 %v1719_v10, %s1601_s23 }
 0x31a   : > { %948 = vadd.xlane.f32.xlu1 %v947_v9 }
 0x32b   : > { %841 = vrot.lane.b32.xlu1 %v1719_v10, %s1602_s24 }
 0x36a   : > { %v612_v11 = vpop.xlane.xlu0 %611 }
 0x36b   : > { %1568 = vrcp.f32 %v612_v11  ;;  %v1554_v11 = vld [vmem:[%s1862_s8] sm:$0xff]  }
 0x372   : > { %v725_v12 = vpop.xlane.xlu1 %724 }
 0x373   : > { %1570 = vrcp.f32 %v725_v12 }
 0x375   : > { %v1569_v13 = vpop.eup %1568 }
 0x376   : > { %v614_v15 = vmul.f32 %v1569_v13, %v1561_v58  ;;  %v730_v18 = vpop.permute.xlu1 %729 }
 0x377   : > { %v735_v21 = vsel %vm621_vm3, %v730_v18, 0  ;;  %v1397_v18 = vld [vmem:[%s1861_s7] ss:$0 sm:$0xff] }
 0x378   : > { %v615_v19 = vpack.c.bf16 %v614_v15, %v614_v15 }
 0x37a   : > { %v837_v14 = vpop.xlane.xlu0 %836 }
 0x37b   : > { %1572 = vrcp.f32 %v837_v14 }
 0x37d   : > { %v1571_v20 = vpop.eup %1570 }
 0x37e   : > { %v617_v16 = vpop.permute.xlu0 %616  ;;  %v727_v10 = vmul.f32 %v1571_v20, %v1563_v63 }
 0x37f   : > { %v623_v17 = vsel %vm621_vm3, %v617_v16, 0  ;;  %v1396_v16 = vld [vmem:[%s1860_s6] ss:$0 sm:$0xff] }
 0x380   : > { %1457 = vmatpush3.bf16.msra.mxu0 %v623_v17  ;;  %v728_v22 = vpack.c.bf16 %v727_v10, %v727_v10  ;;  %v1556_v10 = vld [vmem:[%s1864_s10] sm:$0xff]  }
 0x381   : > { %1468 = vmatprep.subr.bf16.mxu0 %v1590_v1 }
 0x382   : > { %v954_v28 = vpop.permute.xlu0 %953 }
 0x383   : > { %1459 = vmatmul.mubr.msk.bf16.vlgmr.msra.gmra.mrb[4].mxu0 %vm555_vm2, %v615_v19  ;;  %v959_v30 = vsel %vm621_vm3, %v954_v28, 0 }
 0x384   : > { %1469 = vmatpush3.bf16.msra.mxu0 %v735_v21  ;;  %1470 = vmatprep.mubr.msk.bf16.mxu0 %vm1591_vm0, %v1590_v1 }
 0x385   : > { %1480 = vmatprep.subr.bf16.mxu0 %v1590_v1  ;;  %v1573_v23 = vpop.eup %1572 }
 0x386   : > { %v839_v25 = vmul.f32 %v1573_v23, %v1565_v2  ;;  %v1558_v23 = vld [vmem:[%s1864_s10 + $0x10] sm:$0xff]  }
 0x388   : > { %v840_v29 = vpack.c.bf16 %v839_v25, %v839_v25  ;;  %v1398_v25 = vld [vmem:[%s1863_s9] ss:$0 sm:$0xff] }
 0x38b   : > { %1471 = vmatmul.mubr.msk.bf16.vlgmr.msra.gmra.mrb[8].mxu0 %vm555_vm2, %v728_v22  ;;  %v1557_v22 = vld [vmem:[%s1864_s10 + $0x8] sm:$0xff]  }
 0x38c   : > { %1482 = vmatprep.mubr.msk.bf16.mxu0 %vm1591_vm0, %v1590_v1 }
 0x3a7   : > { %v949_v24 = vpop.xlane.xlu1 %948 }
 0x3a8   : > { %1574 = vrcp.f32 %v949_v24  ;;  %v1559_v24 = vld [vmem:[%s1864_s10 + $0x18] sm:$0xff]  }
 0x3ab   : > { %v842_v26 = vpop.permute.xlu1 %841 }
 0x3ac   : > { %v847_v27 = vsel %vm621_vm3, %v842_v26, 0 }
 0x3ad   : > { %1481 = vmatpush3.bf16.msra.mxu0 %v847_v27 }
 0x3ae   : > { %1492 = vmatprep.subr.bf16.mxu0 %v1590_v1 }
 0x3b0   : > { %1483 = vmatmul.mubr.msk.bf16.vlgmr.msra.gmra.mrb[12].mxu0 %vm555_vm2, %v840_v29 }
 0x3b1   : > { %1493 = vmatpush3.bf16.msra.mxu0 %v959_v30  ;;  %1494 = vmatprep.mubr.msk.bf16.mxu0 %vm1591_vm0, %v1590_v1 }
 0x3b2   : > { %v1575_v31 = vpop.eup %1574  ;;  %1506 = vmatprep.subr.bf16.mxu0 %v1590_v1 }
 0x3b3   : > { %v951_v32 = vmul.f32 %v1575_v31, %v1567_v8 }
 0x3b5   : > { %v952_v33 = vpack.c.bf16 %v951_v32, %v951_v32 }
 0x3b8   : > { %1495 = vmatmul.mubr.msk.bf16.vlgmr.msra.gmra.mrb[16].mxu0 %vm555_vm2, %v952_v33 }
 0x3b9   : > { %1510 = vmatprep.mubr.msk.bf16.mxu0 %vm1591_vm0, %v1590_v1  ;;  %1507 = vmatpush3.bf16.msra.mxu0 %v1554_v11 }
 0x3ba   : > { %1508 = vmatprep.subr.bf16.mxu0 %v1590_v1 }
 0x456   : > { %v659_v34 = vpop.f32.mrb[4].mxu0 }
 0x457   : > { %v1460_v35 = vpop.f32.mrb[5].mxu0 }
 0x458   : > { %v662_v36 = vpop.f32.mrb[6].mxu0 }
 0x459   : > { %v1461_v37 = vpop.f32.mrb[7].mxu0 }
 0x45e   : > { %v771_v38 = vpop.f32.mrb[8].mxu0 }
 0x45f   : > { %1002 = vrot.lane.b32.xlu1 %v771_v38, %s1603_s25  ;;  %v1472_v39 = vpop.f32.mrb[9].mxu0 }
 0x460   : > { %v774_v40 = vpop.f32.mrb[10].mxu0 }
 0x461   : > { %v1473_v41 = vpop.f32.mrb[11].mxu0  ;;  %v1402_v40 = vld [vmem:[%s1865_s11] ss:$0 sm:$0xff] }
 0x483   : > { %v883_v44 = vpop.f32.mrb[12].mxu0 }
 0x484   : > { %1006 = vrot.lane.b32.xlu0 %v883_v44, %s1604_s15  ;;  %v1484_v45 = vpop.f32.mrb[13].mxu0 }
 0x485   : > { %v886_v46 = vpop.f32.mrb[14].mxu0 }
 0x486   : > { %v1485_v47 = vpop.f32.mrb[15].mxu0 }
 0x48b   : > { %v995_v48 = vpop.f32.mrb[16].mxu0 }
 0x48c   : > { %1010 = vrot.lane.b32.xlu1 %v995_v48, %s1605_s16  ;;  %v1496_v49 = vpop.f32.mrb[17].mxu0 }
 0x48d   : > { %v998_v50 = vpop.f32.mrb[18].mxu0 }
 0x48e   : > { %v1497_v51 = vpop.f32.mrb[19].mxu0 }
 0x4d1   : > { %v1003_v52 = vpop.permute.xlu1 %1002 }
 0x4d2   : > { %v1013_v54 = vsel %vm555_vm2, %v659_v34, %v1003_v52 }
 0x4f6   : > { %v1007_v53 = vpop.permute.xlu0 %1006 }
 0x4f7   : > { %v1015_v55 = vsel %vm1014_vm4, %v1013_v54, %v1007_v53 }
 0x4fe   : > { %v1011_v56 = vpop.permute.xlu1 %1010 }
 0x4ff   : > { %v1017_v57 = vsel %vm1016_vm5, %v1015_v55, %v1011_v56 }
 0x500   : > { %v1018_v58 = vpack.c.bf16 %v1017_v57, %v1017_v57  ;;  %v1408_v57 = vld [vmem:[%s1866_s12] ss:$0 sm:$0xff] }
 0x502   : > { %1503 = vmatmul.mubr.msk.bf16.vlgmr.msra.gmra.mrb[16].mxu1 %vm507_vm1, %v1018_v58 }
 0x503   : > { %1522 = vmatprep.mubr.msk.bf16.mxu1 %vm1591_vm0, %v1590_v1  ;;  %1515 = vmatpush3.bf16.msra.mxu1 %v1556_v10 }
 0x504   : > { %1516 = vmatprep.subr.bf16.mxu1 %v1590_v1 }
 0x507   : > { %1517 = vmatpush3.bf16.msra.mxu1 %v1557_v22 }
 0x508   : > { %1518 = vmatprep.subr.bf16.mxu1 %v1590_v1 }
 0x50b   : > { %1519 = vmatpush3.bf16.msra.mxu1 %v1558_v23 }
 0x50c   : > { %1520 = vmatprep.subr.bf16.mxu1 %v1590_v1 }
 0x50f   : > { %1521 = vmatpush3.bf16.msra.mxu1 %v1559_v24 }
 0x5d5   : > { %v1079_v60 = vpop.f32.mrb[16].mxu1 }
 0x5d6   : > { %v1080_v61 = vadd.f32 %v1392_v59, %v1079_v60  ;;  %v1504_v62 = vpop.f32.mrb[17].mxu1  ;;  %v1409_v59 = vld [vmem:[%s1867_s13] ss:$0 sm:$0xff] }
 0x5d7   : > { %v1082_v63 = vpop.f32.mrb[18].mxu1 }
 0x5d8   : > { %v1505_v0 = vpop.f32.mrb[19].mxu1  ;;  %v1085_v2 = vadd.f32 %v1080_v61, %v1709_v3  ;;  %v1555_v3 = vld [vmem:[%s1862_s8 + $0x8] sm:$0xff]  }
 0x5d9   : > { %1509 = vmatpush3.bf16.msra.mxu0 %v1555_v3 }
 0x5da   : > { %v1088_v4 = vsel %vm507_vm1, %v1085_v2, 0.0 }
 0x5db   : > { %1089 = vadd.xlane.f32.xlu0 %v1088_v4 }
 0x668   : > { %v1090_v5 = vpop.xlane.xlu0 %1089 }
 0x669   : > { %v1092_v6 = vmul.f32 0.03125, %v1090_v5 }
 0x66b   : > { %v1093_v7 = vsub.f32 %v1085_v2, %v1092_v6 }
 0x66d   : > { %v1094_v8 = vmul.f32 %v1093_v7, %v1093_v7 }
 0x66f   : > { %v1095_v9 = vsel %vm507_vm1, %v1094_v8, 0.0 }
 0x670   : > { %1096 = vadd.xlane.f32.xlu1 %v1095_v9 }
 0x6fd   : > { %v1097_v12 = vpop.xlane.xlu1 %1096 }
 0x6fe   : > { %v1098_v13 = vmul.f32 0.03125, %v1097_v12 }
 0x700   : > { %v1099_v14 = vadd.f32 1e-12, %v1098_v13 }
 0x702   : > { %1576 = vrsqrt.f32 %v1099_v14 }
 0x70c   : > { %v1577_v15 = vpop.eup %1576 }
 0x70d   : > { %v1101_v17 = vmul.f32 %v1577_v15, %v1093_v7 }
 0x70f   : > { %v1108_v19 = vmul.f32 %v1396_v16, %v1101_v17 }
 0x711   : > { %v1115_v20 = vadd.f32 %v1397_v18, %v1108_v19 }
 0x713   : > { %v1116_v21 = vpack.c.bf16 %v1115_v20, %v1115_v20 }
 0x715   : > { %1511 = vmatmul.mubr.msk.bf16.vlgmr.msra.gmra.mrb[20].mxu0 %vm507_vm1, %v1116_v21 }
 0x7e8   : > { %v1177_v26 = vpop.f32.mrb[20].mxu0 }
 0x7e9   : > { %v1178_v27 = vadd.f32 %v1398_v25, %v1177_v26  ;;  %v1512_v28 = vpop.f32.mrb[21].mxu0 }
 0x7ea   : > { %v1180_v29 = vpop.f32.mrb[22].mxu0 }
 0x7eb   : > { %v1184_v30 = vmul.f32 0.044715, %v1178_v27  ;;  %v1513_v31 = vpop.f32.mrb[23].mxu0  ;;  %v1183_v37 = vmul.f32 0.5, %v1178_v27 }
 0x7ed   : > { %v1185_v32 = vmul.f32 %v1184_v30, %v1178_v27 }
 0x7ef   : > { %v1186_v33 = vmul.f32 %v1185_v32, %v1178_v27 }
 0x7f1   : > { %v1187_v34 = vadd.f32 %v1186_v33, %v1178_v27 }
 0x7f3   : > { %v1188_v35 = vmul.f32 0.7978846, %v1187_v34 }
 0x7f5   : > { %1578 = vtanh.f32 %v1188_v35 }
 0x7ff   : > { %v1579_v36 = vpop.eup %1578 }
 0x800   : > { %v1190_v38 = vadd.f32 1.0, %v1579_v36 }
 0x802   : > { %v1191_v1 = vmul.f32 %v1190_v38, %v1183_v37 }
 0x804   : > { %v1192_v39 = vpack.c.bf16 %v1191_v1, %v1191_v1 }
 0x806   : > { %1523 = vmatmul.mubr.msk.bf16.vlgmr.msra.gmra.mrb[20].mxu1 %vm1232_vm6, %v1192_v39 }
 0x8d9   : > { %v1270_v41 = vpop.f32.mrb[20].mxu1 }
 0x8da   : > { %v1271_v42 = vadd.f32 %v1402_v40, %v1270_v41  ;;  %v1524_v43 = vpop.f32.mrb[21].mxu1 }
 0x8db   : > { %v1273_v44 = vpop.f32.mrb[22].mxu1 }
 0x8dc   : > { %v1525_v45 = vpop.f32.mrb[23].mxu1  ;;  %v1276_v46 = vadd.f32 %v1271_v42, %v1115_v20 }
 0x8de   : > { %v1279_v47 = vsel %vm507_vm1, %v1276_v46, 0.0 }
 0x8df   : > { %1280 = vadd.xlane.f32.xlu0 %v1279_v47 }
 0x96c   : > { %v1281_v48 = vpop.xlane.xlu0 %1280 }
 0x96d   : > { %v1282_v49 = vmul.f32 0.03125, %v1281_v48 }
 0x96f   : > { %v1283_v50 = vsub.f32 %v1276_v46, %v1282_v49 }
 0x971   : > { %v1284_v51 = vmul.f32 %v1283_v50, %v1283_v50 }
 0x973   : > { %v1285_v52 = vsel %vm507_vm1, %v1284_v51, 0.0 }
 0x974   : > { %1286 = vadd.xlane.f32.xlu0 %v1285_v52 }
 0xa01   : > { %v1287_v53 = vpop.xlane.xlu0 %1286 }
 0xa02   : > { %v1288_v54 = vmul.f32 0.03125, %v1287_v53 }
 0xa04   : > { %v1289_v55 = vadd.f32 1e-12, %v1288_v54 }
 0xa06   : > { %1580 = vrsqrt.f32 %v1289_v55 }
 0xa10   : > { %v1581_v56 = vpop.eup %1580 }
 0xa11   : > { %v1291_v58 = vmul.f32 %v1581_v56, %v1283_v50 }
 0xa13   : > { %v1298_v60 = vmul.f32 %v1408_v57, %v1291_v58 }
 0xa15   : > { %v1305_v61 = vadd.f32 %v1409_v59, %v1298_v60 }
 0xa17   : > { %1306 = vst.msk [vmem:[%s479_s17] sm:$0xff] %vm507_vm1, %v1305_v61 }
 0xa18 PF: > { %s24_s29 = sadd.s32 1, %s1588_s29  }
 0xa19   : > { %p21_p4 = scmp.ge.s32.totalorder %s24_s29, 4  }
 0xa1b   :  { %23 = sbr.rel (!%p21_p4) target bundleno = 1 (0x1), region = 109 }

// kernel: model_forward.6
= control target key start
LH: loop header
LB: loop body
LE: loop exit
PB: predicated region body
PF: predicated region fallthrough
CT: control target
= control target key end

     0   :  { %8 = vsyncpa [#allocation3], 0  ;;  %s573_s0 = inlined_call_operand.vmem [shape: bf16[16,32], index: 0, kind: input, shape index: {}]   ;;  %s574_s1 = inlined_call_operand.vmem [shape: bf16[32,128], index: 1, kind: input, shape index: {}]   ;;  %s575_s2 = inlined_call_operand.vmem [shape: f32[1,128], index: 2, kind: input, shape index: {}]   ;;  %s576_s3 = inlined_call_operand.hbm [shape: f32[16,128], index: 3, kind: output, shape index: {}]  }
   0x1   :  { %10 = vsyncpa [#allocation3 + $0x1], 0  ;;  %s464_s12 = smov 0   ;;  %s466_s13 = smov 0  }
   0x2   :  { %s468_s14 = smov 0   ;;  %s470_s15 = smov 0  }
   0x3 LB: > { %s485_s16 = sadd.s32 4294967295, %s439_s15   ;;  %s309_s17 = sadd.s32 4294967294, %s439_s15   ;;  %s439_s15 = sphi %s470_s15, %s582_s15   ;;  %s435_s14 = sphi %s468_s14, %s581_s14   ;;  %s431_s13 = sphi %s466_s13, %s580_s13   ;;  %s427_s12 = sphi %s464_s12, %s579_s12  }
   0x4   : > { %s489_s18 = sadd.s32 1, %s439_s15   ;;  %s91_s19 = sadd.s32 1, %s435_s14 }
   0x5   : > { %s88_s20 = ssub.s32 %s439_s15, %s489_s18  ;;  %p101_p0 = scmp.ne.s32.totalorder %s435_s14, %s431_s13 }
   0x6   : > { %p89_p1 = scmp.eq.s32.totalorder %s88_s20, 0  ;;  %p102_p2 = scmp.eq.s32.totalorder %s485_s16, 1 }
   0x7   : > { %p107_p3 = scmp.ne.s32.totalorder %s431_s13, %s427_s12  ;;  %p108_p4 = scmp.eq.s32.totalorder %s309_s17, 1 }
   0x8   : > { %s500_s21 = scalar_select %p89_p1, %s435_s14, %s91_s19  }
   0x9   : > { %p502_p5 = por %p102_p2, %p101_p0  ;;  %p506_p6 = por %p108_p4, %p107_p3 }
   0xa   : > { %p312_p7 = scmp.ge.s32.totalorder %s439_s15, 1  ;;  %p139_p8 = scmp.lt.s32.totalorder %s439_s15, 3 }
   0xc   : > { %p140_p9 = pnand %p312_p7, %p139_p8 }
   0xd   : > { %v375_v0 = vld [vmem:[%s574_s1] sm:$0xff] (!%p140_p9)   ;;  %v441_v1 = vmov (!%p140_p9), 0.0   ;;  %v376_v2 = vld [vmem:[%s574_s1 + $0x8] sm:$0xff] (!%p140_p9)   ;;  %vm442_vm0 = vmmov (!%p140_p9), 0   ;;  %p162_p10 = scmp.lt.s32.totalorder (!%p140_p9), %s485_s16, 1  ;;  %vm191_vm1 = vcmask (!%p140_p9), 261120  }
   0xe   : > { %143 = sbr.rel (%p140_p9) target bundleno = 254 (0xfe), region = 32  ;;  %326 = vmatprep.subr.bf16.mxu0 (!%p140_p9), %v441_v1  ;;  %330 = vmatprep.mubr.msk.bf16.mxu0 (!%p140_p9), %vm442_vm0, %v441_v1  ;;  %s159_s6 = sand.u32 (!%p140_p9), 1, %s431_s13   ;;  %v315_v4 = vld [vmem:[%s575_s2] ss:$0 sm:$0xff] (!%p140_p9) }
   0xf   : > { %327 = vmatpush3.bf16.msra.mxu0 (!%p140_p9), %v375_v0  ;;  %s313_s7 = sshll.u32 (!%p140_p9), %s159_s6, 3  ;;  %s320_s10 = sshll.u32 (!%p140_p9), %s485_s16, 7 }
  0x10   : > { %328 = vmatprep.subr.bf16.mxu0 (!%p140_p9), %v441_v1  ;;  %s161_s11 = scalar_lea.vmem (!%p140_p9), [#allocation2], %s313_s7  ;;  %s531_s24 = scalar_lea.hbm (!%p140_p9), %s576_s3, %s320_s10 }
  0x11   : > { %s250_s17 = sshll.u32 (!%p140_p9), %s161_s11, 4  ;;  %s237_s25 = scalar_lea.sflag (!%p140_p9), [#allocation3], %s159_s6  ;;  %s533_s17 = int_to_ptr.vmem [resolvable:$true] %s250_s17 }
  0x12   : > { %s443_s26 = smov (!%p140_p9), [#allocation2]  }
  0x13   : > { %329 = vmatpush3.bf16.msra.mxu0 (!%p140_p9), %v376_v2  ;;  %s381_s27 = sshll.u32 (!%p140_p9), %s443_s26, 4  ;;  %s382_s27 = int_to_ptr.vmem [resolvable:$false] %s381_s27 }
  0x14   : > { %p384_p0 = scmp.lt.s32.totalorder (!%p140_p9), %s533_s17, %s382_s27 }
  0x15   : > { %s163_s28 = scalar_select %p162_p10, %s485_s16, 1 }
  0x16   : > { %s377_s16 = scalar_lea.vmem %s533_s17, 128 }
  0x17   : > { %s314_s29 = sshll.u32 %s163_s28, 2  ;;  %p378_p11 = scmp.ne.s32.totalorder %s533_s17, %s377_s16 }
  0x18   : > { %s165_s5 = scalar_lea.vmem %s573_s0, %s314_s29  ;;  %s383_s28 = scalar_lea.vmem %s382_s27, 256 }
  0x19   : > { %v167_v3 = vld [vmem:[%s165_s5] sm:$0xf]  ;;  %p379_p12 = pnand %p378_p11, %p502_p5  ;;  %p385_p1 = scmp.lt.s32.totalorder %s383_s28, %s377_s16 }
  0x1a   : > { %331 = vmatmul.mubr.msk.bf16.vlgmr.msra.gmra.mrb[0].mxu0 %vm191_vm1, %v167_v3 }
  0x1b   : > { %p380_p13 = pneg %p379_p12  ;;  %p386_p2 = por %p385_p1, %p384_p0 }
  0x1d   : > { %p387_p3 = pnand %p386_p2, %p380_p13 }
  0xed   : > { %v229_v5 = vpop.f32.mrb[0].mxu0 }
  0xee   : > { %v230_v6 = vadd.f32 %v315_v4, %v229_v5  ;;  %v332_v7 = vpop.f32.mrb[1].mxu0 }
  0xef   : > { %v232_v8 = vpop.f32.mrb[2].mxu0 }
  0xf0   : > { %235 = vst [vmem:[%s161_s11] sm:$0xff] %v230_v6  ;;  %v333_v9 = vpop.f32.mrb[3].mxu0 }
  0xf1   : > { %390 = shalt.err (!%p387_p3)
}
  0xf2   : > { %s391_s29 = scalar_lea.hbm %s531_s24, 128  ;;  %s395_s5 = scalar_lea.hbm %s576_s3, 256 }
  0xf3   : > { %p392_p4 = scmp.ne.s32.totalorder %s531_s24, %s391_s29  ;;  %p396_p9 = scmp.lt.u32.totalorder %s531_s24, %s576_s3 }
  0xf4   : > { %p397_p10 = scmp.lt.u32.totalorder %s395_s5, %s391_s29  ;;  %p399_p12 = scmp.lt.u32.totalorder %s391_s29, %s531_s24 }
  0xf5   : > { %p393_p7 = pnand %p392_p4, %p502_p5 }
  0xf6   : > { %p398_p11 = por %p397_p10, %p396_p9 }
  0xf7   : > { %p394_p8 = pneg %p393_p7 }
  0xf8   : > { %p400_p13 = por %p399_p12, %p398_p11 }
  0xfa   : > { %p401_p0 = pnand %p400_p13, %p394_p8 }
  0xfc   : > { %404 = shalt.err (!%p401_p0)
}
  0xfd   : > { %334 = dma.vmem_to_hbm [thread:$0]  (%p502_p5), %s533_s17, 128, %s531_s24, %s237_s25  }
  0xfe PF: > { %p340_p1 = scmp.ge.s32.totalorder %s439_s15, 2  ;;  %s262_s8 = sand.u32 1, %s427_s12  }
  0xff   : > { %s263_s9 = scalar_lea.sflag [#allocation3], %s262_s8 }
 0x100   : > { %p337_p2 = pnand %p340_p1, %p506_p6 }
 0x102   : > { %422 = dma.done.wait (!%p337_p2), %s263_s9, 128  }
 0x103   : > { %424 = vsyncadd (!%p337_p2), %s263_s9, 4294967168  ;;  %p13_p3 = scmp.ge.s32.totalorder %s489_s18, 4   ;;  %s579_s12 = smov %s431_s13 }
 0x104   : > { %s580_s13 = smov %s435_s14  ;;  %s581_s14 = smov %s500_s21 }
 0x105   : > { %s582_s15 = smov %s489_s18  ;;  %15 = sbr.rel (!%p13_p3) target bundleno = 3 (0x3), region = 67 }
 0x10c   :  { %268 = vsyncpa [#allocation3], 1 }
 0x10d   :  { %270 = vsyncpa [#allocation3 + $0x1], 1 }

// kernel: model_forward.9
= control target key start
LH: loop header
LB: loop body
LE: loop exit
PB: predicated region body
PF: predicated region fallthrough
CT: control target
= control target key end

     0   :  { %s6260_s0 = inlined_call_operand.vmem [shape: f32[2,8,32], index: 0, kind: input, shape index: {}]   ;;  %s6261_s1 = inlined_call_operand.vmem [shape: f32[2,8,32], index: 1, kind: input, shape index: {}]   ;;  %s6262_s2 = inlined_call_operand.vmem [shape: f32[8,2,128], index: 2, kind: input, shape index: {}]   ;;  %s6263_s3 = inlined_call_operand.vmem [shape: f32[8,2,128], index: 3, kind: input, shape index: {}]   ;;  %s6264_s4 = inlined_call_operand.vmem [shape: f32[8,2,128], index: 4, kind: input, shape index: {}]   ;;  %s6265_s5 = inlined_call_operand.vmem [shape: f32[8,2,128], index: 5, kind: input, shape index: {}]   ;;  %s6266_s6 = inlined_call_operand.vmem [shape: f32[2,8], index: 6, kind: input, shape index: {}]   ;;  %s6267_s7 = inlined_call_operand.vmem [shape: f32[5,32], index: 7, kind: input, shape index: {}]   ;;  %s6268_s8 = inlined_call_operand.vmem [shape: bf16[288,32], index: 8, kind: input, shape index: {}]   ;;  %s6269_s9 = inlined_call_operand.vmem [shape: f32[1,32], index: 9, kind: input, shape index: {}]   ;;  %s6270_s10 = inlined_call_operand.vmem [shape: bf16[32,32], index: 10, kind: input, shape index: {}]   ;;  %s6271_s11 = inlined_call_operand.vmem [shape: f32[1,32], index: 11, kind: input, shape index: {}]   ;;  %s6272_s12 = inlined_call_operand.vmem [shape: f32[1,32], index: 12, kind: input, shape index: {}]   ;;  %s6273_s13 = inlined_call_operand.<no memory space> [shape: f32[1,1], index: 13, kind: input, shape index: {}]   ;;  %s6274_s14 = inlined_call_operand.vmem [shape: bf16[320,128], index: 14, kind: input, shape index: {}]   ;;  %s6275_s15 = inlined_call_operand.vmem [shape: bf16[32,128], index: 15, kind: input, shape index: {}]   ;;  %s6276_s16 = inlined_call_operand.vmem [shape: f32[1,128], index: 16, kind: input, shape index: {}]   ;;  %s6277_s17 = inlined_call_operand.vmem [shape: bf16[4,32,128], index: 17, kind: input, shape index: {}]   ;;  %s6278_s18 = inlined_call_operand.vmem [shape: bf16[4,32,128], index: 18, kind: input, shape index: {}]   ;;  %s6279_s19 = inlined_call_operand.vmem [shape: bf16[2,64,128], index: 19, kind: input, shape index: {}]   ;;  %s6280_s20 = inlined_call_operand.vmem [shape: f32[4,64], index: 20, kind: input, shape index: {}]   ;;  %s6281_s21 = inlined_call_operand.vmem [shape: f32[1,4], index: 21, kind: input, shape index: {}]   ;;  %s6282_s22 = inlined_call_operand.vmem [shape: bf16[288,5], index: 22, kind: input, shape index: {}]   ;;  %s6283_s23 = inlined_call_operand.vmem [shape: f32[1,5], index: 23, kind: input, shape index: {}]   ;;  %s6284_s24 = inlined_call_operand.vmem [shape: f32[3,2,37], index: 24, kind: output, shape index: {}]  }
   0x1   :  { %6290 = sst [smem:[#allocation16_spill]] %s6260_s0 }
   0x2   :  { %6291 = sst [smem:[#allocation17_spill]] %s6261_s1 }
   0x3   :  { %6292 = sst [smem:[#allocation18_spill]] %s6262_s2 }
   0x4   :  { %6293 = sst [smem:[#allocation19_spill]] %s6263_s3 }
   0x5   :  { %6294 = sst [smem:[#allocation20_spill]] %s6264_s4 }
   0x6   :  { %6295 = sst [smem:[#allocation21_spill]] %s6265_s5 }
   0x7   :  { %6296 = sst [smem:[#allocation22_spill]] %s6266_s6 }
   0x8   :  { %6297 = sst [smem:[#allocation23_spill]] %s6267_s7 }
   0x9   :  { %6298 = sst [smem:[#allocation24_spill]] %s6268_s8 }
   0xa   :  { %29 = sst [smem:[#allocation12]] %s6273_s13 }
   0xb   :  { %30 = vsyncpa [#allocation14], 0  ;;  %s5147_s27 = smov 0  }
   0xc LB: > { %s5153_s28 = sadd.s32 4294967295, %s4939_s27   ;;  %p4129_p0 = scmp.ge.s32.totalorder %s4939_s27, 1  ;;  %s4939_s27 = sphi %s5147_s27, %s36_s27  }
   0xd   : > { %p571_p1 = scmp.lt.s32.totalorder %s4939_s27, 4  ;;  %s647_s2 = sshll.u32 %s6281_s21, 4  ;;  %s648_s2 = int_to_ptr.vmem [resolvable:$true] %s647_s2 }
   0xe   : > { %p4588_p4 = scmp.eq.s32.totalorder %s5153_s28, 0  ;;  %s4866_s0 = scalar_lea.vmem %s648_s2, 16 }
   0xf   : > { %p5161_p3 = pnand %p4129_p0, %p571_p1  ;;  %p4867_p7 = scmp.ne.s32.totalorder %s648_s2, %s4866_s0 }
  0x10   : > { %p4874_p11 = scmp.lt.s32.totalorder %s648_s2, %s648_s2  ;;  %p4875_p12 = scmp.lt.s32.totalorder %s4866_s0, %s4866_s0 }
  0x11   : > { %p4584_p5 = pneg %p5161_p3 }
  0x12   : > { %p4876_p13 = por %p4875_p12, %p4874_p11 }
  0x13   : > { %p4585_p6 = pnand %p4588_p4, %p4584_p5 }
  0x15   : > { %p4868_p8 = pneg %p4585_p6 }
  0x17   : > { %p4869_p9 = pnand %p4868_p8, %p4867_p7 }
  0x19   : > { %p4870_p10 = pneg %p4869_p9 }
  0x1b   : > { %p4877_p2 = pnand %p4876_p13, %p4870_p10 }
  0x1d   : > { %4880 = shalt.err (!%p4877_p2)
}
  0x1e   : > { %s4989_s7 = smov [#allocation13]   ;;  %666 = sbr.rel (%p5161_p3) target bundleno = 7362 (0x1cc2), region = 116 }
  0x1f   : > { %4587 = dma.vmem_to_smem (!%p4585_p6), %s648_s2, 16, %s4989_s7, [#allocation14]  }
  0x25   : > { %4934 = dma.done.wait (%p4588_p4), [#allocation14], 16  }
  0x26   : > { %4936 = vsyncadd (%p4588_p4), [#allocation14], 4294967280 }
  0x27   : > { %672 = sfence }
  0x28   : > { %p727_p0 = scmp.lt.s32.totalorder %s5153_s28, 2  ;;  %p6300_p1 = scmp.ne.s32.totalorder %s5153_s28, 0 }
  0x29   : > { %vm736_vm0 = vcmask (!%p6300_p1), 1041408   ;;  %vm737_vm1 = vcmask (!%p6300_p1), 1043458   ;;  %vm739_vm2 = vcmask (!%p6300_p1), 259076   ;;  %v4990_v0 = vmov (!%p6300_p1), 0.0  }
  0x2a   : > { %s728_s30 = scalar_select %p727_p0, %s5153_s28, 2 }
  0x2b   : > { %735 = sbr.rel (%p6300_p1) target bundleno = 50 (0x32), region = 124  ;;  %vm738_vm3 = vmor (!%p6300_p1), %vm737_vm1, %vm736_vm0  ;;  %745 = vst [vmem:[#allocation5] sm:$0x3] (!%p6300_p1), %v4990_v0  ;;  %vm742_vm4 = vcmask (!%p6300_p1), 254976  }
  0x2c   : > { %s4133_s3 = sshll.u32 %s728_s30, 1  ;;  %746 = vst [vmem:[#allocation6] sm:$0x3] (!%p6300_p1), %v4990_v0  ;;  %vm740_vm5 = vmor (!%p6300_p1), %vm739_vm2, %vm738_vm3 }
  0x2d   : > { %s5181_s4 = scalar_lea.vmem %s6284_s24, %s4133_s3  ;;  %743 = vst.msk [vmem:[#allocation3] sm:$0x3] (!%p6300_p1), %vm742_vm4, %v4990_v0  ;;  %744 = vst.msk [vmem:[#allocation4] sm:$0x3] (!%p6300_p1), %vm742_vm4, %v4990_v0 }
  0x2e   : > { %747 = vst.msk [vmem:[#allocation7] sm:$0x3] (!%p6300_p1), %vm742_vm4, %v4990_v0 }
  0x2f   : > { %741 = vst.msk [vmem:[#allocation2] sm:$0x3f] (!%p6300_p1), %vm740_vm5, %v4990_v0 }
  0x32 PF: > { %751 = sbr.rel (%p4588_p4) target bundleno = 64 (0x40), region = 128  ;;  %v763_v1 = vlaneseq (!%p4588_p4)  ;;  %v753_v2 = vld [vmem:[#allocation5] sm:$0x3] (!%p4588_p4)  ;;  %v4991_v4 = vmov (!%p4588_p4), 1983009808   ;;  %vm777_vm6 = vcmask (!%p4588_p4), 1041408  }
  0x33   : > { %v754_v3 = vld [vmem:[#allocation6] sm:$0x3] (!%p4588_p4)  ;;  %v761_v5 = vunpack.c.l.s4 (!%p4588_p4), %v4991_v4  ;;  %vm778_vm7 = vcmask (!%p4588_p4), 1043458   ;;  %vm780_vm9 = vcmask (!%p4588_p4), 259076  }
  0x34   : > { %v764_v6 = vshrl.u32 (!%p4588_p4), %v763_v1, 7  ;;  %v759_v7 = vcombine.low (!%p4588_p4), %v753_v2, %v754_v3  ;;  %vm779_vm8 = vmor (!%p4588_p4), %vm778_vm7, %vm777_vm6 }
  0x35   : > { %v762_v8 = vunpack.c.0.s8 (!%p4588_p4), %v761_v5  ;;  %v4136_v10 = vld.sshfl [vmem:[#allocation7] sm:$0x3 pattern:$0x76325410] (!%p4588_p4)  ;;  %vm781_vm10 = vmor (!%p4588_p4), %vm780_vm9, %vm779_vm8 }
  0x36   : > { %v752_v12 = vld [vmem:[#allocation2] sm:$0x3f] (!%p4588_p4) }
  0x37   : > { %v765_v9 = vsub.s32 (!%p4588_p4), %v762_v8, %v764_v6 }
  0x39   : > { %v766_v11 = vrot.slane %v759_v7, %v765_v9 }
  0x3b   : > { %v774_v13 = vcombine.low %v766_v11, %v4136_v10 }
  0x3d   : > { %v776_v14 = vadd.f32 %v774_v13, %v752_v12 }
  0x3f   : > { %782 = vst.msk [vmem:[#allocation2] sm:$0x3f] %vm781_vm10, %v776_v14 }
  0x40 PF: > { %s6301_s26 = sld [smem:[#allocation24_spill]]  ;;  %v4992_v17 = vmov 0.0   ;;  %vm4993_vm11 = vmmov 0   ;;  %v789_v25 = vlaneseq  ;;  %v4994_v33 = vmov 1983009808   ;;  %v4743_v48 = vld [vmem:[%s6270_s10] sm:$0xff]  }
  0x41   : > { %4419 = vmatprep.subr.bf16.mxu1 %v4992_v17  ;;  %4423 = vmatprep.mubr.msk.bf16.mxu1 %vm4993_vm11, %v4992_v17  ;;  %v787_v34 = vunpack.c.l.s4 %v4994_v33  ;;  %vm991_vm12 = vcmask 261120   ;;  %v4744_v49 = vld [vmem:[%s6270_s10 + $0x8] sm:$0xff]   ;;  %v4137_v56 = vld [vmem:[%s6269_s9] ss:$0 sm:$0xff]  ;;  %v4995_v63 = vmov 1966171168  }
  0x42   : > { %v5227_v29 = vshrl.u32 %v789_v25, 7  ;;  %v1146_v0 = vunpack.c.l.s4 %v4995_v63  ;;  %v4157_v2 = vld [vmem:[%s6271_s11] ss:$0 sm:$0xff]  ;;  %s6302_s0 = sld [smem:[#allocation16_spill]]  ;;  %s6303_s28 = sld [smem:[#allocation22_spill]]  ;;  %vm1213_vm13 = vcmask 1041409  }
  0x43   : > { %v788_v37 = vunpack.c.0.s8 %v787_v34  ;;  %s1196_s8 = sld [smem:[#allocation12]]  ;;  %vm1217_vm15 = vcmask 58368   ;;  %v1552_v63 = vld [vmem:[#allocation3] sm:$0x3]  ;;  %s6304_s7 = sld [smem:[#allocation17_spill]]  ;;  %vm1655_vm0 = vcmask 254976  }
  0x44   : > { %v1147_v1 = vunpack.c.0.s8 %v1146_v0  ;;  %v5284_v9 = vsub.s32 0, %v5227_v29  ;;  %v1553_v0 = vpack.c.bf16 %v1552_v63, %v1552_v63  ;;  %s4996_s3 = smov 32   ;;  %s6288_s29 = smov 64  }
  0x45   : > { %v791_v40 = vsub.s32 %v788_v37, %v5227_v29  ;;  %s4998_s30 = smov 96   ;;  %s5496_s2 = smov 0  }
  0x46   : > { %v4724_v15 = vld [vmem:[%s6301_s26 + $0x40] sm:$0xff]   ;;  %v4726_v18 = vld [vmem:[%s6301_s26 + $0x48] sm:$0xff]   ;;  %v4728_v20 = vld [vmem:[%s6301_s26 + $0x50] sm:$0xff]   ;;  %v1150_v3 = vsub.s32 %v1147_v1, %v5227_v29 }
  0x47   : > { %v4725_v16 = vld [vmem:[%s6301_s26] sm:$0xff]   ;;  %4297 = vmatprep.subr.bf16.mxu0 %v4724_v15  ;;  %v4727_v19 = vld [vmem:[%s6301_s26 + $0x8] sm:$0xff]   ;;  %v4729_v21 = vld [vmem:[%s6301_s26 + $0x10] sm:$0xff]  }
  0x48   : > { %4298 = vmatpush3.bf16.msra.mxu0 %v4725_v16  ;;  %v4730_v22 = vld [vmem:[%s6301_s26 + $0x58] sm:$0xff]   ;;  %v4732_v24 = vld [vmem:[%s6301_s26 + $0x60] sm:$0xff]   ;;  %v4734_v28 = vld [vmem:[%s6301_s26 + $0x68] sm:$0xff]  }
  0x49   : > { %4299 = vmatprep.subr.bf16.mxu0 %v4726_v18  ;;  %v4731_v23 = vld [vmem:[%s6301_s26 + $0x18] sm:$0xff]   ;;  %v4738_v26 = vld [vmem:[%s6301_s26 + $0x80] sm:$0xff]   ;;  %v4735_v30 = vld [vmem:[%s6301_s26 + $0x28] sm:$0xff]  }
  0x4a   : > { %v4733_v27 = vld [vmem:[%s6301_s26 + $0x20] sm:$0xff]   ;;  %4420 = vmatpush3.bf16.msra.mxu1 %v4738_v26  ;;  %v4736_v32 = vld [vmem:[%s6301_s26 + $0x70] sm:$0xff]   ;;  %v4742_v35 = vld [vmem:[%s6301_s26 + $0x88] sm:$0xff]  }
  0x4b   : > { %4421 = vmatprep.subr.bf16.mxu1 %v4992_v17  ;;  %v783_v31 = vld [vmem:[#allocation2] sm:$0x3f]  ;;  %v4737_v38 = vld [vmem:[%s6301_s26 + $0x30] sm:$0xff]   ;;  %v4739_v39 = vld [vmem:[%s6301_s26 + $0x78] sm:$0xff]  }
  0x4c   : > { %4300 = vmatpush3.bf16.msra.mxu0 %v4727_v19  ;;  %v785_v36 = vcombine.high %v783_v31, %v783_v31  ;;  %v792_v41 = vrot.slane %v783_v31, %v791_v40  ;;  %v4740_v43 = vld [vmem:[%s6301_s26 + $0x38] sm:$0xff]   ;;  %v1142_v13 = vld [vmem:[%s6302_s0] sm:$0xff]  ;;  %v1143_v16 = vld [vmem:[%s6302_s0 + $0x8] sm:$0xff]  ;;  %v1197_v31 = vstv %s1196_s8 }
  0x4d   : > { %4301 = vmatprep.subr.bf16.mxu0 %v4728_v20  ;;  %v1243_v1 = vld [vmem:[%s6304_s7] sm:$0xff] }
  0x4e   : > { %4422 = vmatpush3.bf16.msra.mxu1 %v4742_v35  ;;  %v799_v42 = vrot.slane %v785_v36, %v791_v40  ;;  %v800_v44 = vcombine.high %v792_v41, %v792_v41  ;;  %v5259_v47 = vpack.c.bf16 %v792_v41, %v792_v41  ;;  %v5309_v36 = vld [vmem:[%s6303_s28] sm:$0x3] }
  0x4f   : > { %4427 = vmatprep.subr.bf16.mxu1 %v4992_v17  ;;  %vm1200_vm14 = vcmp.gt.f32.partialorder %v5309_v36, 0.5 }
  0x50   : > { %4302 = vmatpush3.bf16.msra.mxu0 %v4729_v21  ;;  %v5250_v45 = vpack.c.bf16 %v799_v42, %v799_v42  ;;  %v5252_v46 = vpack.c.bf16 %v800_v44, %v800_v44  ;;  %v4161_v21 = vld [vmem:[%s6272_s12] ss:$0 sm:$0xff] }
  0x51   : > { %4303 = vmatprep.subr.bf16.mxu0 %v4730_v22 }
  0x52   : > { %4424 = vmatmul.mubr.msk.bf16.vlgmr.msra.gmra.mrb[0].mxu1 %vm991_vm12, %v5250_v45  ;;  %1027 = vmatprep.mubr.bf16.mxu0 %v5252_v46 }
  0x53   : > { %4431 = vmatprep.mubr.msk.bf16.mxu1 %vm4993_vm11, %v4992_v17  ;;  %4428 = vmatpush3.bf16.msra.mxu1 %v4743_v48 }
  0x54   : > { %4304 = vmatpush3.bf16.msra.mxu0 %v4731_v23  ;;  %4429 = vmatprep.subr.bf16.mxu1 %v4992_v17 }
  0x55   : > { %4305 = vmatprep.subr.bf16.mxu0 %v4732_v24 }
  0x57   : > { %4430 = vmatpush3.bf16.msra.mxu1 %v4744_v49 }
  0x58   : > { %4306 = vmatpush3.bf16.msra.mxu0 %v4733_v27  ;;  %4435 = vmatprep.subr.bf16.mxu1 %v4992_v17 }
  0x59   : > { %4307 = vmatprep.subr.bf16.mxu0 %v4734_v28 }
  0x5c   : > { %4308 = vmatpush3.bf16.msra.mxu0 %v4735_v30  ;;  %v5300_v30 = vand.u32 127, %v789_v25 }
  0x5d   : > { %4309 = vmatprep.subr.bf16.mxu0 %v4736_v32 }
  0x5e   : > { %v5304_v33 = vsub.s32 %v5300_v30, %v5227_v29 }
  0x60   : > { %4310 = vmatpush3.bf16.msra.mxu0 %v4737_v38 }
  0x61   : > { %4311 = vmatprep.subr.bf16.mxu0 %v4739_v39 }
  0x64   : > { %4312 = vmatpush3.bf16.msra.mxu0 %v4740_v43 }
  0x65   : > { %4443 = vmatprep.subr.bf16.mxu0 %v4992_v17 }
  0x67   : > { %1028 = vmatmul.mubr.bf16.vlgmr.msra.gmra.mrb[0].mxu0 %v5259_v47 }
  0x68   : > { %4447 = vmatprep.mubr.msk.bf16.mxu0 %vm4993_vm11, %v4992_v17 }
 0x125   : > { %v1069_v50 = vpop.f32.mrb[0].mxu1 }
 0x126   : > { %v4425_v51 = vpop.f32.mrb[1].mxu1 }
 0x127   : > { %v1072_v52 = vpop.f32.mrb[2].mxu1  ;;  %v5316_v51 = vsub.s32 1, %v5227_v29 }
 0x128   : > { %v4426_v53 = vpop.f32.mrb[3].mxu1 }
 0x13a   : > { %v4313_v54 = vpop.f32.mrb[0].mxu0 }
 0x13b   : > { %v4314_v55 = vpop.f32.mrb[1].mxu0 }
 0x13c   : > { %v4315_v57 = vadd.f32 %v4314_v55, %v4313_v54  ;;  %v4316_v58 = vpop.f32.mrb[2].mxu0 }
 0x13d   : > { %v4317_v59 = vpop.f32.mrb[3].mxu0  ;;  %v4747_v58 = vld [vmem:[%s6274_s14 + $0x40] sm:$0xff]  }
 0x13e   : > { %v1030_v60 = vadd.f32 %v4315_v57, %v4137_v56  ;;  %v4745_v56 = vld [vmem:[%s6274_s14 + $0x90] sm:$0xff]   ;;  %v4746_v57 = vld [vmem:[%s6274_s14 + $0x98] sm:$0xff]   ;;  %v4759_v59 = vld [vmem:[%s6274_s14 + $0x80] sm:$0xff]  }
 0x13f   : > { %4444 = vmatpush3.bf16.msra.mxu0 %v4759_v59 }
 0x140   : > { %v1070_v61 = vadd.f32 %v1069_v50, %v1030_v60  ;;  %4445 = vmatprep.subr.bf16.mxu0 %v4992_v17  ;;  %v4762_v60 = vld [vmem:[%s6274_s14 + $0x88] sm:$0xff]  }
 0x142   : > { %v1075_v62 = vpack.c.bf16 %v1070_v61, %v1070_v61  ;;  %v4765_v61 = vld [vmem:[%s6275_s15] sm:$0xff]  }
 0x143   : > { %4446 = vmatpush3.bf16.msra.mxu0 %v4762_v60 }
 0x144   : > { %4432 = vmatmul.mubr.msk.bf16.vlgmr.msra.gmra.mrb[4].mxu1 %vm991_vm12, %v1075_v62  ;;  %4451 = vmatprep.subr.bf16.mxu0 %v4992_v17  ;;  %v4766_v62 = vld [vmem:[%s6275_s15 + $0x8] sm:$0xff]  }
 0x145   : > { %4439 = vmatprep.mubr.msk.bf16.mxu1 %vm4993_vm11, %v4992_v17  ;;  %4436 = vmatpush3.bf16.msra.mxu1 %v4745_v56 }
 0x146   : > { %4437 = vmatprep.subr.bf16.mxu1 %v4992_v17  ;;  %4448 = vmatmul.mubr.msk.bf16.vlgmr.msra.gmra.mrb[4].mxu0 %vm991_vm12, %v5250_v45  ;;  %v1244_v45 = vld [vmem:[%s6304_s7 + $0x8] sm:$0xff] }
 0x147   : > { %4452 = vmatpush3.bf16.msra.mxu0 %v4765_v61  ;;  %4455 = vmatprep.mubr.msk.bf16.mxu0 %vm4993_vm11, %v4992_v17 }
 0x148   : > { %4453 = vmatprep.subr.bf16.mxu0 %v4992_v17 }
 0x149   : > { %4438 = vmatpush3.bf16.msra.mxu1 %v4746_v57 }
 0x14a   : > { %4328 = vmatprep.subr.bf16.mxu1 %v4747_v58 }
 0x14b   : > { %4454 = vmatpush3.bf16.msra.mxu0 %v4766_v62 }
 0x14c   : > { %4459 = vmatprep.subr.bf16.mxu0 %v4992_v17 }
 0x14e   : > { %4456 = vmatmul.mubr.msk.bf16.vlgmr.msra.gmra.mrb[8].mxu0 %vm991_vm12, %v1553_v0 }
 0x14f   : > { %4463 = vmatprep.mubr.msk.bf16.mxu0 %vm4993_vm11, %v4992_v17 }
 0x217   : > { %v1136_v4 = vpop.f32.mrb[4].mxu1 }
 0x218   : > { %v1137_v5 = vadd.f32 %v4157_v2, %v1136_v4  ;;  %v4433_v6 = vpop.f32.mrb[5].mxu1 }
 0x219   : > { %v1139_v7 = vpop.f32.mrb[6].mxu1 }
 0x21a   : > { %v1151_v8 = vrot.slane %v1137_v5, %v1150_v3  ;;  %v4434_v10 = vpop.f32.mrb[7].mxu1 }
 0x21c   : > { %v1152_v11 = vcombine.high %v1151_v8, %v1151_v8  ;;  %v1159_v12 = vrot.slane %v1151_v8, %v1150_v3 }
 0x21e   : > { %v1166_v14 = vrot.slane %v1152_v11, %v1150_v3  ;;  %v1170_v15 = vrot.slane %v1159_v12, %v5284_v9 }
 0x220   : > { %v1174_v18 = vrot.slane %v1166_v14, %v5284_v9  ;;  %v1177_v19 = vadd.f32 %v1170_v15, %v1142_v13 }
 0x222   : > { %v1178_v20 = vadd.f32 %v1174_v18, %v1143_v16  ;;  %4775 = vtanh.f32 %v1177_v19 }
 0x224   : > { %4777 = vtanh.f32 %v1178_v20 }
 0x22c   : > { %v4776_v22 = vpop.eup %4775 }
 0x22d   : > { %v1188_v23 = vmul.f32 %v4776_v22, %v4161_v21 }
 0x22e   : > { %v4778_v24 = vpop.eup %4777 }
 0x22f   : > { %v1190_v26 = vsel %vm991_vm12, %v1188_v23, 0.0  ;;  %v1189_v27 = vmul.f32 %v4778_v24, %v4161_v21 }
 0x230   : > { %1191 = vadd.xlane.f32.xlu0 %v1190_v26 }
 0x231   : > { %v1193_v28 = vsel %vm991_vm12, %v1189_v27, 0.0 }
 0x234   : > { %1194 = vadd.xlane.f32.xlu0 %v1193_v28  ;;  %v4748_v28 = vld [vmem:[%s6274_s14] sm:$0xff]  }
 0x2bd   : > { %v1192_v32 = vpop.xlane.xlu0 %1191 }
 0x2be   : > { %v1198_v34 = vadd.f32 %v1197_v31, %v1192_v32  ;;  %v4749_v32 = vld [vmem:[%s6274_s14 + $0x48] sm:$0xff]  }
 0x2c0   : > { %v1208_v38 = vrot.slane %v1198_v34, %v5304_v33  ;;  %v4750_v34 = vld [vmem:[%s6274_s14 + $0x8] sm:$0xff]  }
 0x2c1   : > { %v1195_v35 = vpop.xlane.xlu0 %1194 }
 0x2c2   : > { %v1199_v37 = vadd.f32 %v1197_v31, %v1195_v35  ;;  %v4751_v35 = vld [vmem:[%s6274_s14 + $0x50] sm:$0xff]  }
 0x2c4   : > { %v1212_v25 = vrot.slane %v1199_v37, %v5304_v33  ;;  %v4752_v37 = vld [vmem:[%s6274_s14 + $0x10] sm:$0xff]  }
 0x2c6   : > { %v1214_v39 = vsel %vm1213_vm13, %v1212_v25, %v1208_v38  ;;  %v4753_v38 = vld [vmem:[%s6274_s14 + $0x58] sm:$0xff]   ;;  %v4755_v25 = vld [vmem:[%s6274_s14 + $0x60] sm:$0xff]  }
 0x2c7   : > { %v1216_v40 = vsel %vm1200_vm14, -1e+30, %v1214_v39  ;;  %v4756_v39 = vld [vmem:[%s6274_s14 + $0x20] sm:$0xff]  }
 0x2c8   : > { %v1218_v41 = vsel %vm1217_vm15, %v1216_v40, -inf }
 0x2c9   : > { %1219 = vmax.xlane.f32.xlu1 %v1218_v41  ;;  %v4758_v41 = vld [vmem:[%s6274_s14 + $0x28] sm:$0xff]  }
 0x356   : > { %v1220_v42 = vpop.xlane.xlu1 %1219 }
 0x357   : > { %v1221_v43 = vsub.f32 %v1216_v40, %v1220_v42  ;;  %v4757_v40 = vld [vmem:[%s6274_s14 + $0x68] sm:$0xff]   ;;  %v4760_v42 = vld [vmem:[%s6274_s14 + $0x70] sm:$0xff]  }
 0x359   : > { %v1222_v44 = vmul.f32 1.442695, %v1221_v43  ;;  %v4761_v43 = vld [vmem:[%s6274_s14 + $0x30] sm:$0xff]  }
 0x35b   : > { %4779 = vpow2.f32 %v1222_v44  ;;  %v4763_v44 = vld [vmem:[%s6274_s14 + $0x78] sm:$0xff]  }
 0x365   : > { %v4780_v48 = vpop.eup %4779 }
 0x366   : > { %v1224_v49 = vsel %vm1217_vm15, %v4780_v48, 0.0 }
 0x367   : > { %1225 = vadd.xlane.f32.xlu1 %v1224_v49  ;;  %v1546_v49 = vpop.f32.mrb[4].mxu0 }
 0x3f4   : > { %v1226_v50 = vpop.xlane.xlu1 %1225 }
 0x3f5   : > { %4781 = vrcp.f32 %v1226_v50  ;;  %v4449_v50 = vpop.f32.mrb[5].mxu0 }
 0x3ff   : > { %v4782_v52 = vpop.eup %4781 }
 0x400   : > { %v1228_v53 = vmul.f32 %v4782_v52, %v4780_v48  ;;  %v4764_v48 = vld [vmem:[%s6274_s14 + $0x38] sm:$0xff]   ;;  %v1549_v52 = vpop.f32.mrb[6].mxu0 }
 0x402   : > { %v1239_v54 = vrot.slane %v1228_v53, %v5316_v51  ;;  %v1232_v55 = vrot.slane %v1228_v53, %v5284_v9  ;;  %v4450_v53 = vpop.f32.mrb[7].mxu0 }
 0x404   : > { %1241 = vbcast.lane.b32.xlu1 %v1239_v54, 256  ;;  %1234 = vbcast.lane.b32.xlu0 %v1232_v55, 256  ;;  %v1607_v54 = vpop.f32.mrb[8].mxu0 }
 0x405   : > { %v4457_v55 = vpop.f32.mrb[9].mxu0 }
 0x406   : > { %v1610_v56 = vpop.f32.mrb[10].mxu0 }
 0x407   : > { %v4458_v57 = vpop.f32.mrb[11].mxu0 }
 0x476   : > { %v1242_v2 = vpop.permute.xlu1 %1241  ;;  %v1235_v3 = vpop.permute.xlu0 %1234 }
 0x477   : > { %v1246_v4 = vmul.f32 %v1244_v45, %v1242_v2  ;;  %v1245_v5 = vmul.f32 %v1243_v1, %v1235_v3  ;;  %v4187_v3 = vld [vmem:[%s6276_s16] ss:$0 sm:$0xff] }
 0x479   : > { %v1254_v6 = vsel %vm991_vm12, %v1246_v4, 0.0  ;;  %v1247_v7 = vsel %vm991_vm12, %v1245_v5, 0.0 }
 0x47a   : > { %v1255_v8 = vrot.slane %v1254_v6, 4  ;;  %v1248_v10 = vrot.slane %v1247_v7, 4 }
 0x47c   : > { %v1256_v11 = vadd.f32 %v1255_v8, %v1254_v6  ;;  %v1249_v12 = vadd.f32 %v1248_v10, %v1247_v7  ;;  %v1628_v7 = vld [vmem:[#allocation4] sm:$0x3] }
 0x47e   : > { %v1257_v13 = vrot.slane %v1256_v11, 2  ;;  %v1250_v14 = vrot.slane %v1249_v12, 2 }
 0x480   : > { %v1258_v15 = vadd.f32 %v1257_v13, %v1256_v11  ;;  %v1251_v16 = vadd.f32 %v1250_v14, %v1249_v12 }
 0x482   : > { %v1259_v18 = vrot.slane %v1258_v15, 1  ;;  %v1252_v19 = vrot.slane %v1251_v16, 1 }
 0x484   : > { %v1260_v20 = vadd.f32 %v1259_v18, %v1258_v15  ;;  %v1253_v21 = vadd.f32 %v1252_v19, %v1251_v16 }
 0x486   : > { %v1298_v22 = vpack.c.bf16 %v1260_v20, %v1260_v20  ;;  %v1297_v23 = vpack.c.bf16 %v1253_v21, %v1253_v21  ;;  %v4767_v20 = vld [vmem:[%s6277_s17] sm:$0xff]  }
 0x487   : > { %v4768_v21 = vld [vmem:[%s6277_s17 + $0x20] sm:$0xff]   ;;  %4460 = vmatpush3.bf16.msra.mxu0 %v4767_v20 }
 0x488   : > { %v1306_v24 = vunpack.c.l.b16 %v1298_v22  ;;  %v1305_v26 = vunpack.c.l.b16 %v1297_v23  ;;  %v4769_v22 = vld [vmem:[%s6277_s17 + $0x8] sm:$0xff]   ;;  %4461 = vmatprep.subr.bf16.mxu0 %v4992_v17 }
 0x489   : > { %v4770_v23 = vld [vmem:[%s6277_s17 + $0x28] sm:$0xff]  }
 0x48a   : > { %v1307_v27 = vsel %vm1213_vm13, %v1306_v24, %v1305_v26 }
 0x48b   : > { %v1308_v31 = vpack.c.b16 %v1307_v27, %v1307_v27  ;;  %4462 = vmatpush3.bf16.msra.mxu0 %v4769_v22 }
 0x48c   : > { %4467 = vmatprep.subr.bf16.mxu0 %v4992_v17 }
 0x48d   : > { %4440 = vmatmul.mubr.msk.bf16.vlgmr.msra.gmra.mrb[8].mxu1 %vm991_vm12, %v1308_v31 }
 0x48e   : > { %4329 = vmatpush3.bf16.msra.mxu1 %v4748_v28  ;;  %1504 = vmatprep.mubr.bf16.mxu1 %v5252_v46  ;;  %v4754_v46 = vld [vmem:[%s6274_s14 + $0x18] sm:$0xff]  }
 0x48f   : > { %4330 = vmatprep.subr.bf16.mxu1 %v4749_v32  ;;  %v4771_v32 = vld [vmem:[%s6277_s17 + $0x10] sm:$0xff]  }
 0x492   : > { %4331 = vmatpush3.bf16.msra.mxu1 %v4750_v34 }
 0x493   : > { %4332 = vmatprep.subr.bf16.mxu1 %v4751_v35 }
 0x496   : > { %4333 = vmatpush3.bf16.msra.mxu1 %v4752_v37  ;;  %v4773_v37 = vld [vmem:[%s6277_s17 + $0x30] sm:$0xff]  }
 0x497   : > { %4334 = vmatprep.subr.bf16.mxu1 %v4753_v38  ;;  %v4774_v38 = vld [vmem:[%s6277_s17 + $0x38] sm:$0xff]  }
 0x49a   : > { %4335 = vmatpush3.bf16.msra.mxu1 %v4754_v46 }
 0x49b   : > { %4336 = vmatprep.subr.bf16.mxu1 %v4755_v25  ;;  %v5471_v25 = vld [vmem:[%s6278_s18] sm:$0xf] }
 0x49e   : > { %4337 = vmatpush3.bf16.msra.mxu1 %v4756_v39  ;;  %v5476_v39 = vld [vmem:[%s6278_s18 + $0x4] sm:$0xf] }
 0x49f   : > { %4338 = vmatprep.subr.bf16.mxu1 %v4757_v40  ;;  %v5481_v40 = vld [vmem:[%s6278_s18 + $0x8] sm:$0xf] }
 0x4a2   : > { %4339 = vmatpush3.bf16.msra.mxu1 %v4758_v41  ;;  %v5486_v41 = vld [vmem:[%s6278_s18 + $0xc] sm:$0xf] }
 0x4a3   : > { %4340 = vmatprep.subr.bf16.mxu1 %v4760_v42 }
 0x4a6   : > { %4341 = vmatpush3.bf16.msra.mxu1 %v4761_v43 }
 0x4a7   : > { %4342 = vmatprep.subr.bf16.mxu1 %v4763_v44 }
 0x4aa   : > { %4343 = vmatpush3.bf16.msra.mxu1 %v4764_v48 }
 0x4ab   : > { %4475 = vmatprep.subr.bf16.mxu1 %v4992_v17 }
 0x4ad   : > { %1505 = vmatmul.mubr.bf16.vlgmr.msra.gmra.mrb[12].mxu1 %v5259_v47 }
 0x4ae   : > { %4479 = vmatprep.mubr.msk.bf16.mxu1 %vm4993_vm11, %v4992_v17  ;;  %4476 = vmatpush3.bf16.msra.mxu1 %v4768_v21 }
 0x4af   : > { %4477 = vmatprep.subr.bf16.mxu1 %v4992_v17 }
 0x4b2   : > { %4478 = vmatpush3.bf16.msra.mxu1 %v4770_v23 }
 0x560   : > { %v1358_v58 = vpop.f32.mrb[8].mxu1 }
 0x561   : > { %v4441_v59 = vpop.f32.mrb[9].mxu1 }
 0x562   : > { %v1361_v60 = vpop.f32.mrb[10].mxu1 }
 0x563   : > { %v4442_v61 = vpop.f32.mrb[11].mxu1 }
 0x580   : > { %v4344_v62 = vpop.f32.mrb[12].mxu1 }
 0x581   : > { %v4345_v63 = vpop.f32.mrb[13].mxu1 }
 0x582   : > { %v4346_v0 = vadd.f32 %v4345_v63, %v4344_v62  ;;  %v4347_v45 = vpop.f32.mrb[14].mxu1  ;;  %v4941_v62 = vmov 0.0   ;;  %v4945_v63 = vmov 0.0  }
 0x583   : > { %v4348_v47 = vpop.f32.mrb[15].mxu1 }
 0x584   : > { %v1507_v1 = vadd.f32 %v4346_v0, %v1358_v58 }
 0x586   : > { %v1547_v2 = vadd.f32 %v1546_v49, %v1507_v1 }
 0x588   : > { %v1613_v4 = vadd.f32 %v1607_v54, %v1547_v2 }
 0x58a   : > { %v1621_v5 = vadd.f32 %v4187_v3, %v1613_v4 }
 0x58c   : > { %4783 = vtanh.f32 %v1621_v5  ;;  %v4188_v8 = vmul.f32 -1.442695, %v1621_v5 }
 0x58e   : > { %4785 = vpow2.f32 %v4188_v8 }
 0x596   : > { %v4784_v6 = vpop.eup %4783 }
 0x597   : > { %1636 = vrot.lane.b32.xlu1 %v4784_v6, %s4996_s3 }
 0x598   : > { %v4786_v10 = vpop.eup %4785 }
 0x599   : > { %v1625_v11 = vadd.f32 1.0, %v4786_v10 }
 0x59b   : > { %1630 = vrot.lane.b32.xlu1 %v1628_v7, %s4996_s3  ;;  %4787 = vrcp.f32 %v1625_v11 }
 0x5a5   : > { %v4788_v12 = vpop.eup %4787 }
 0x609   : > { %v1637_v13 = vpop.permute.xlu1 %1636 }
 0x60a   : > { %v1639_v14 = vmul.f32 %v4788_v12, %v1637_v13 }
 0x60c   : > { %1641 = vrot.lane.b32.xlu0 %v1639_v14, %s4996_s3 }
 0x60d   : > { %v1631_v15 = vpop.permute.xlu1 %1630 }
 0x60e   : > { %v1633_v16 = vmul.f32 %v4788_v12, %v1631_v15 }
 0x67e   : > { %v1642_v18 = vpop.permute.xlu0 %1641 }
 0x67f   : > { %v1644_v19 = vadd.f32 %v1642_v18, %v1633_v16 }
 0x681   : > { %4789 = vtanh.f32 %v1644_v19 }
 0x68b   : > { %v4790_v24 = vpop.eup %4789 }
 0x68c   : > { %1647 = vrot.lane.b32.xlu1 %v4790_v24, %s4996_s3 }
 0x6fe   : > { %v1648_v26 = vpop.permute.xlu1 %1647 }
 0x6ff   : > { %v1650_v27 = vmul.f32 %v4788_v12, %v1648_v26 }
 0x701   : > { %v1662_v28 = vpack.c.bf16 %v1650_v27, %v1650_v27  ;;  %1652 = vrot.lane.b32.xlu1 %v1650_v27, %s6288_s29 }
 0x703   : > { %1668 = vrot.lane.b32.xlu0 %v1662_v28, %s6288_s29 }
 0x707   : > { %1658 = vrot.lane.b32.xlu0 %v1644_v19, %s4998_s30 }
 0x72a   : > { %808 = vxpose.xlu1.b32.start.end [1/1] (short) (narrow) %v5309_v36, 8  ;;  %v4772_v36 = vld [vmem:[%s6277_s17 + $0x18] sm:$0xff]  }
 0x773   : > { %v5438_v31 = vpop.permute.xlu1 %1652 }
 0x774   : > { %1656 = vst.msk [vmem:[#allocation3] sm:$0x3] %vm1655_vm0, %v5438_v31 }
 0x775   : > { %v1669_v34 = vpop.permute.xlu0 %1668 }
 0x776   : > { %4464 = vmatmul.mubr.msk.bf16.vlgmr.msra.gmra.mrb[12].mxu0 %vm991_vm12, %v1669_v34  ;;  %4480 = vmatmul.mubr.msk.bf16.vlgmr.msra.gmra.mrb[16].mxu1 %vm991_vm12, %v1669_v34 }
 0x777   : > { %4468 = vmatpush3.bf16.msra.mxu0 %v4771_v32  ;;  %4471 = vmatprep.mubr.msk.bf16.mxu0 %vm4993_vm11, %v4992_v17 }
 0x778   : > { %4469 = vmatprep.subr.bf16.mxu0 %v4992_v17 }
 0x779   : > { %v1659_v35 = vpop.permute.xlu0 %1658 }
 0x77a   : > { %1661 = vst.msk [vmem:[#allocation4] sm:$0x3] %vm1655_vm0, %v1659_v35 }
 0x77b   : > { %4470 = vmatpush3.bf16.msra.mxu0 %v4772_v36 }
 0x77c   : > { %4483 = vmatprep.subr.bf16.mxu0 %v4992_v17 }
 0x77e   : > { %4472 = vmatmul.mubr.msk.bf16.vlgmr.msra.gmra.mrb[16].mxu0 %vm991_vm12, %v1669_v34 }
 0x77f   : > { %4484 = vmatpush3.bf16.msra.mxu0 %v4773_v37  ;;  %4487 = vmatprep.mubr.msk.bf16.mxu0 %vm4993_vm11, %v4992_v17 }
 0x780   : > { %4485 = vmatprep.subr.bf16.mxu0 %v4992_v17 }
 0x783   : > { %4486 = vmatpush3.bf16.msra.mxu0 %v4774_v38 }
 0x786   : > { %4488 = vmatmul.mubr.msk.bf16.vlgmr.msra.gmra.mrb[20].mxu0 %vm991_vm12, %v1669_v34 }
 0x7aa   : > { %v5466_v46 = vpop.trf.xlu1 }
 0x849   : > { %v5488_v42 = vpop.f32.mrb[12].mxu0  ;;  %v5490_v43 = vpop.f32.mrb[16].mxu1 }
 0x84a   : > { %v4465_v44 = vpop.f32.mrb[13].mxu0  ;;  %v4481_v48 = vpop.f32.mrb[17].mxu1 }
 0x84b   : > { %v1722_v49 = vpop.f32.mrb[14].mxu0  ;;  %v1836_v50 = vpop.f32.mrb[18].mxu1 }
 0x84c   : > { %v4466_v52 = vpop.f32.mrb[15].mxu0  ;;  %v4482_v53 = vpop.f32.mrb[19].mxu1 }
 0x851   : > { %v5492_v54 = vpop.f32.mrb[16].mxu0 }
 0x852   : > { %v4473_v55 = vpop.f32.mrb[17].mxu0 }
 0x853   : > { %v1779_v56 = vpop.f32.mrb[18].mxu0 }
 0x854   : > { %v4474_v57 = vpop.f32.mrb[19].mxu0 }
 0x859   : > { %v5494_v58 = vpop.f32.mrb[20].mxu0 }
 0x85a   : > { %v4489_v59 = vpop.f32.mrb[21].mxu0 }
 0x85b   : > { %v1893_v60 = vpop.f32.mrb[22].mxu0 }
 0x85c   : > { %v4490_v61 = vpop.f32.mrb[23].mxu0 }
 0x85d LB: >> { %v4214_v0 = vcombine.low %v5471_v25, %v5476_v39  ;;  %v4999_v45 = vmov 0.0   ;;  %v1912_v47 = vpack.c.bf16 %v4947_v63, %v4947_v63  ;;  %v4215_v1 = vcombine.low %v5481_v40, %v5486_v41  ;;  %s5001_s30 = smov 64   ;;  %s4213_s25 = sshll.u32 %s4951_s2, 1  ;;  %s4951_s2 = sphi %s5496_s2, %s1905_s2   ;;  %v4947_v63 = vphi %v4945_v63, %v1995_v63   ;;  %v4943_v62 = vphi %v4941_v62, %v1989_v62  }
 0x85e   : >> { %4491 = vmatprep.subr.bf16.mxu0 %v4999_v45  ;;  %vm5000_vm1 = vmmov 0   ;;  %s6305_s5 = sld [smem:[#allocation18_spill]]  ;;  %s5002_s13 = smov 32  }
 0x85f   : >> { %4492 = vmatpush3.bf16.msra.mxu0 %v4214_v0  ;;  %4495 = vmatprep.mubr.msk.bf16.mxu0 %vm5000_vm1, %v4999_v45  ;;  %s2000_s6 = scalar_lea.vmem [#allocation8], %s4213_s25  ;;  %s1905_s2 = sadd.s32 1, %s4951_s2  }
 0x860   : >> { %4493 = vmatprep.subr.bf16.mxu0 %v4999_v45  ;;  %1914 = vrot.lane.b32.xlu0 %v1912_v47, %s5001_s30  ;;  %p1902_p2 = scmp.ge.s32.totalorder %s1905_s2, 8  }
 0x861   : > { %v5524_v24 = vld [vmem:[%s6278_s18 + $0x10] sm:$0xf] (%p1902_p2)  ;;  %v5529_v26 = vld [vmem:[%s6278_s18 + $0x14] sm:$0xf] (%p1902_p2)  ;;  %v5534_v27 = vld [vmem:[%s6278_s18 + $0x18] sm:$0xf] (%p1902_p2) }
 0x862   : > { %v5539_v28 = vld [vmem:[%s6278_s18 + $0x1c] sm:$0xf] (%p1902_p2)  ;;  %v4953_v32 = vmov (%p1902_p2), 0.0   ;;  %v4957_v34 = vmov (%p1902_p2), 0.0   ;;  %s5541_s2 = smov (%p1902_p2), 0  }
 0x863   : >> { %4494 = vmatpush3.bf16.msra.mxu0 %v4215_v1 }
 0x864   : >> { %s1909_s28 = scalar_lea.vmem %s6305_s5, %s4213_s25 }
 0x865   : >> { %v1910_v3 = vld [vmem:[%s1909_s28] sm:$0x3] }
 0x866   : >> { %v1911_v4 = vadd.f32 %v1910_v3, %v5488_v42 }
 0x8d2   : >> { %v1915_v2 = vpop.permute.xlu0 %1914 }
 0x8d3   : >> { %4496 = vmatmul.mubr.msk.bf16.vlgmr.msra.gmra.mrb[0].mxu0 %vm991_vm12, %v1915_v2 }
 0x9a6   : >> { %v1965_v5 = vpop.f32.mrb[0].mxu0 }
 0x9a7   : >> { %v1971_v6 = vadd.f32 %v1965_v5, %v1911_v4  ;;  %v4497_v7 = vpop.f32.mrb[1].mxu0 }
 0x9a8   : >> { %v1968_v8 = vpop.f32.mrb[2].mxu0 }
 0x9a9   : >> { %4791 = vtanh.f32 %v1971_v6  ;;  %v4498_v10 = vpop.f32.mrb[3].mxu0  ;;  %v4217_v12 = vmul.f32 -1.442695, %v1971_v6 }
 0x9ab   : >> { %4793 = vpow2.f32 %v4217_v12 }
 0x9b3   : >> { %v4792_v11 = vpop.eup %4791 }
 0x9b4   : >> { %1981 = vrot.lane.b32.xlu0 %v4792_v11, %s5002_s13 }
 0x9b5   : >> { %v4794_v13 = vpop.eup %4793 }
 0x9b6   : >> { %v1975_v14 = vadd.f32 1.0, %v4794_v13 }
 0x9b8   : >> { %4795 = vrcp.f32 %v1975_v14 }
 0x9c2   : >> { %v4796_v15 = vpop.eup %4795 }
 0x9c3   : >> { %v1978_v19 = vmul.f32 %v4943_v62, %v4796_v15 }
 0xa26   : >> { %v1982_v16 = vpop.permute.xlu0 %1981 }
 0xa27   : >> { %v1984_v18 = vmul.f32 %v4796_v15, %v1982_v16 }
 0xa29   : >> { %1986 = vrot.lane.b32.xlu1 %v1984_v18, %s5002_s13 }
 0xa9b   : >> { %v1987_v20 = vpop.permute.xlu1 %1986 }
 0xa9c   : >> { %v1989_v62 = vadd.f32 %v1987_v20, %v1978_v19  }
 0xa9e   : >> { %4797 = vtanh.f32 %v1989_v62 }
 0xaa8   : >> { %v4798_v21 = vpop.eup %4797 }
 0xaa9   : >> { %1992 = vrot.lane.b32.xlu1 %v4798_v21, %s5002_s13 }
 0xb1b   : >> { %v1993_v22 = vpop.permute.xlu1 %1992 }
 0xb1c   : >> { %v1995_v63 = vmul.f32 %v4796_v15, %v1993_v22  }
 0xb1e   : >> { %1997 = vrot.lane.b32.xlu0 %v1995_v63, %s5001_s30 }
 0xb8b   : > { %1904 = sbr.rel (!%p1902_p2) target bundleno = 2141 (0x85d), region = 203 }
 0xb90   : >> { %v1998_v23 = vpop.permute.xlu0 %1997 }
 0xb91   : >> { %2001 = vst.msk [vmem:[%s2000_s6] sm:$0x3] %vm1655_vm0, %v1998_v23 }
 0xb92 LB: >> { %v4223_v36 = vcombine.low %v5524_v24, %v5529_v26  ;;  %v5003_v35 = vmov 0.0   ;;  %v2020_v37 = vpack.c.bf16 %v4959_v34, %v4959_v34  ;;  %v4224_v38 = vcombine.low %v5534_v27, %v5539_v28  ;;  %s5005_s8 = smov 64   ;;  %s2015_s1 = ssub.s32 7, %s4963_s2  ;;  %s4963_s2 = sphi %s5541_s2, %s2012_s2   ;;  %v4959_v34 = vphi %v4957_v34, %v2103_v34   ;;  %v4955_v32 = vphi %v4953_v32, %v2097_v32  }
 0xb93   : >> { %4499 = vmatprep.subr.bf16.mxu0 %v5003_v35  ;;  %vm5004_vm2 = vmmov 0   ;;  %s5553_s5 = sshll.u32 %s2015_s1, 1  ;;  %s6306_s28 = sld [smem:[#allocation19_spill]] }
 0xb94   : >> { %4500 = vmatpush3.bf16.msra.mxu0 %v4223_v36  ;;  %4503 = vmatprep.mubr.msk.bf16.mxu0 %vm5004_vm2, %v5003_v35  ;;  %s5006_s6 = smov 32   ;;  %s2108_s1 = scalar_lea.vmem [#allocation9], %s5553_s5 }
 0xb95   : >> { %4501 = vmatprep.subr.bf16.mxu0 %v5003_v35  ;;  %2022 = vrot.lane.b32.xlu0 %v2020_v37, %s5005_s8  ;;  %s2012_s2 = sadd.s32 1, %s4963_s2  }
 0xb96   : >> { %p2009_p3 = scmp.ge.s32.totalorder %s2012_s2, 8  }
 0xb97   : > { %v5569_v45 = vld [vmem:[%s6279_s19] sm:$0xf] (%p2009_p3)  ;;  %v5574_v47 = vld [vmem:[%s6279_s19 + $0x4] sm:$0xf] (%p2009_p3)  ;;  %v5579_v1 = vld [vmem:[%s6279_s19 + $0x8] sm:$0xf] (%p2009_p3) }
 0xb98   : >> { %4502 = vmatpush3.bf16.msra.mxu0 %v4224_v38  ;;  %v5584_v2 = vld [vmem:[%s6279_s19 + $0xc] sm:$0xf] (%p2009_p3)  ;;  %v5594_v3 = vld [vmem:[%s6279_s19 + $0x14] sm:$0xf] (%p2009_p3)  ;;  %v5599_v4 = vld [vmem:[%s6279_s19 + $0x18] sm:$0xf] (%p2009_p3) }
 0xb99   : >> { %s2017_s13 = scalar_lea.vmem %s6306_s28, %s5553_s5  ;;  %v5604_v5 = vld [vmem:[%s6279_s19 + $0x1c] sm:$0xf] (%p2009_p3)  ;;  %v5609_v6 = vld [vmem:[%s6279_s19 + $0x20] sm:$0xf] (%p2009_p3)  ;;  %v5614_v7 = vld [vmem:[%s6279_s19 + $0x24] sm:$0xf] (%p2009_p3) }
 0xb9a   : >> { %v2018_v39 = vld [vmem:[%s2017_s13] sm:$0x3]  ;;  %v5619_v8 = vld [vmem:[%s6279_s19 + $0x28] sm:$0xf] (%p2009_p3)  ;;  %v5624_v10 = vld [vmem:[%s6279_s19 + $0x2c] sm:$0xf] (%p2009_p3) }
 0xb9b   : >> { %v2019_v40 = vadd.f32 %v2018_v39, %v5492_v54  ;;  %v5589_v54 = vld [vmem:[%s6279_s19 + $0x10] sm:$0xf] (%p2009_p3)  ;;  %v5634_v12 = vld [vmem:[%s6279_s19 + $0x34] sm:$0xf] (%p2009_p3)  ;;  %v5639_v13 = vld [vmem:[%s6279_s19 + $0x38] sm:$0xf] (%p2009_p3) }
 0xb9c   : > { %v5629_v11 = vld [vmem:[%s6279_s19 + $0x30] sm:$0xf] (%p2009_p3)  ;;  %v5644_v14 = vld [vmem:[%s6279_s19 + $0x3c] sm:$0xf] (%p2009_p3)  ;;  %v5649_v15 = vld [vmem:[%s6278_s18 + $0x20] sm:$0xf] (%p2009_p3) }
 0xb9d   : > { %v5654_v16 = vld [vmem:[%s6278_s18 + $0x24] sm:$0xf] (%p2009_p3)  ;;  %v5659_v18 = vld [vmem:[%s6278_s18 + $0x28] sm:$0xf] (%p2009_p3)  ;;  %v5664_v19 = vld [vmem:[%s6278_s18 + $0x2c] sm:$0xf] (%p2009_p3) }
 0xb9e   : > { %v5666_v20 = vmov (%p2009_p3), 0.0   ;;  %v5668_v21 = vmov (%p2009_p3), 0.0   ;;  %s5670_s30 = smov (%p2009_p3), 0  }
 0xc07   : >> { %v2023_v25 = vpop.permute.xlu0 %2022 }
 0xc08   : >> { %4504 = vmatmul.mubr.msk.bf16.vlgmr.msra.gmra.mrb[0].mxu0 %vm991_vm12, %v2023_v25 }
 0xcdb   : >> { %v2073_v41 = vpop.f32.mrb[0].mxu0 }
 0xcdc   : >> { %v2079_v42 = vadd.f32 %v2073_v41, %v2019_v40  ;;  %v4505_v44 = vpop.f32.mrb[1].mxu0 }
 0xcdd   : >> { %v2076_v48 = vpop.f32.mrb[2].mxu0 }
 0xcde   : >> { %4799 = vtanh.f32 %v2079_v42  ;;  %v4506_v49 = vpop.f32.mrb[3].mxu0  ;;  %v4226_v52 = vmul.f32 -1.442695, %v2079_v42 }
 0xce0   : >> { %4801 = vpow2.f32 %v4226_v52 }
 0xce8   : >> { %v4800_v50 = vpop.eup %4799 }
 0xce9   : >> { %2089 = vrot.lane.b32.xlu0 %v4800_v50, %s5006_s6 }
 0xcea   : >> { %v4802_v53 = vpop.eup %4801 }
 0xceb   : >> { %v2083_v55 = vadd.f32 1.0, %v4802_v53 }
 0xced   : >> { %4803 = vrcp.f32 %v2083_v55 }
 0xcf7   : >> { %v4804_v56 = vpop.eup %4803 }
 0xcf8   : >> { %v2086_v60 = vmul.f32 %v4955_v32, %v4804_v56 }
 0xd5b   : >> { %v2090_v57 = vpop.permute.xlu0 %2089 }
 0xd5c   : >> { %v2092_v59 = vmul.f32 %v4804_v56, %v2090_v57 }
 0xd5e   : >> { %2094 = vrot.lane.b32.xlu1 %v2092_v59, %s5006_s6 }
 0xdd0   : >> { %v2095_v61 = vpop.permute.xlu1 %2094 }
 0xdd1   : >> { %v2097_v32 = vadd.f32 %v2095_v61, %v2086_v60  }
 0xdd3   : >> { %4805 = vtanh.f32 %v2097_v32 }
 0xddd   : >> { %v4806_v62 = vpop.eup %4805 }
 0xdde   : >> { %2100 = vrot.lane.b32.xlu1 %v4806_v62, %s5006_s6 }
 0xe50   : >> { %v2101_v63 = vpop.permute.xlu1 %2100 }
 0xe51   : >> { %v2103_v34 = vmul.f32 %v4804_v56, %v2101_v63  }
 0xe53   : >> { %2105 = vrot.lane.b32.xlu0 %v2103_v34, %s5005_s8 }
 0xec0   : > { %2011 = sbr.rel (!%p2009_p3) target bundleno = 2962 (0xb92), region = 214 }
 0xec5   : >> { %v2106_v0 = vpop.permute.xlu0 %2105 }
 0xec6   : >> { %2109 = vst.msk [vmem:[%s2108_s1] sm:$0x3] %vm1655_vm0, %v2106_v0 }
 0xec7 LB: >> { %v4243_v22 = vcombine.low %v5589_v54, %v5594_v3  ;;  %v5007_v23 = vmov 0.0   ;;  %v4240_v24 = vcombine.low %v5569_v45, %v5574_v47  ;;  %v2262_v26 = vpack.c.bf16 %v4971_v21, %v4971_v21  ;;  %s5687_s25 = sshll.u32 %s4975_s30, 1  ;;  %s5009_s28 = smov 64   ;;  %s4975_s30 = sphi %s5670_s30, %s2137_s30   ;;  %v4971_v21 = vphi %v5668_v21, %v2345_v21   ;;  %v4967_v20 = vphi %v5666_v20, %v2339_v20  }
 0xec8   : >> { %4515 = vmatprep.subr.bf16.mxu0 %v5007_v23  ;;  %4507 = vmatprep.subr.bf16.mxu1 %v5007_v23  ;;  %v4244_v27 = vcombine.low %v5599_v4, %v5604_v5  ;;  %vm5008_vm3 = vmmov 0   ;;  %v4241_v28 = vcombine.low %v5579_v1, %v5584_v2  ;;  %s2203_s13 = scalar_lea.vmem [#allocation9], %s5687_s25  ;;  %s2144_s8 = scalar_lea.vmem [#allocation8], %s5687_s25  ;;  %v4246_v35 = vcombine.low %v5649_v15, %v5654_v16 }
 0xec9   : >> { %4516 = vmatpush3.bf16.msra.mxu0 %v4243_v22  ;;  %4519 = vmatprep.mubr.msk.bf16.mxu0 %vm5008_vm3, %v5007_v23  ;;  %v2145_v34 = vld [vmem:[%s2144_s8] sm:$0x3]  ;;  %v4247_v38 = vcombine.low %v5659_v18, %v5664_v19  ;;  %s6307_s1 = sld [smem:[#allocation20_spill]]  ;;  %s5010_s2 = smov 32  }
 0xeca   : >> { %4517 = vmatprep.subr.bf16.mxu0 %v5007_v23  ;;  %4508 = vmatpush3.bf16.msra.mxu1 %v4240_v24  ;;  %v2146_v37 = vpack.c.bf16 %v2145_v34, %v2145_v34  ;;  %s2137_s30 = sadd.s32 1, %s4975_s30  }
 0xecb   : >> { %2264 = vrot.lane.b32.xlu0 %v2262_v26, %s5009_s28  ;;  %4509 = vmatprep.subr.bf16.mxu1 %v5007_v23  ;;  %p2134_p4 = scmp.ge.s32.totalorder %s2137_s30, 8  }
 0xecc   : >> { %4511 = vmatprep.mubr.msk.bf16.mxu1 %vm5008_vm3, %v5007_v23  ;;  %v5737_v34 = vld [vmem:[%s6278_s18 + $0x3c] sm:$0xf] (%p2134_p4)  ;;  %v5741_v45 = vmov (%p2134_p4), 0.0   ;;  %s5743_s30 = smov (%p2134_p4), 0  }
 0xecd   : >> { %v2204_v32 = vld [vmem:[%s2203_s13] sm:$0x3]  ;;  %4518 = vmatpush3.bf16.msra.mxu0 %v4244_v27  ;;  %s2350_s13 = scalar_lea.vmem [#allocation10], %s5687_s25  ;;  %v5722_v27 = vld [vmem:[%s6278_s18 + $0x30] sm:$0xf] (%p2134_p4) }
 0xece   : >> { %v2205_v36 = vpack.c.bf16 %v2204_v32, %v2204_v32  ;;  %4523 = vmatprep.subr.bf16.mxu0 %v5007_v23  ;;  %4510 = vmatpush3.bf16.msra.mxu1 %v4241_v28  ;;  %v5727_v28 = vld [vmem:[%s6278_s18 + $0x34] sm:$0xf] (%p2134_p4)  ;;  %v5732_v32 = vld [vmem:[%s6278_s18 + $0x38] sm:$0xf] (%p2134_p4) }
 0xecf   : >> { %s2141_s29 = scalar_lea.vmem %s6307_s1, %s5687_s25 }
 0xed0   : >> { %4520 = vmatmul.mubr.msk.bf16.vlgmr.msra.gmra.mrb[0].mxu0 %vm991_vm12, %v2205_v36  ;;  %v2142_v44 = vld [vmem:[%s2141_s29] sm:$0x3] }
 0xed1   : >> { %4524 = vmatpush3.bf16.msra.mxu0 %v4246_v35  ;;  %4512 = vmatmul.mubr.msk.bf16.vlgmr.msra.gmra.mrb[0].mxu1 %vm991_vm12, %v2146_v37  ;;  %v2143_v48 = vadd.f32 %v2142_v44, %v5490_v43  ;;  %v5739_v43 = vmov (%p2134_p4), 0.0  }
 0xed2   : >> { %4525 = vmatprep.subr.bf16.mxu0 %v5007_v23  ;;  %4527 = vmatprep.mubr.msk.bf16.mxu0 %vm5008_vm3, %v5007_v23 }
 0xed5   : >> { %4526 = vmatpush3.bf16.msra.mxu0 %v4247_v38 }
 0xf3d   : >> { %v2265_v25 = vpop.permute.xlu0 %2264 }
 0xf3e   : >> { %4528 = vmatmul.mubr.msk.bf16.vlgmr.msra.gmra.mrb[0].mxu0 %vm991_vm12, %v2265_v25 }
 0xfa4   : >> { %v2196_v39 = vpop.f32.mrb[0].mxu1 }
 0xfa5   : >> { %v4513_v40 = vpop.f32.mrb[1].mxu1  ;;  %v2202_v49 = vadd.f32 %v2196_v39, %v2143_v48 }
 0xfa6   : >> { %v2199_v41 = vpop.f32.mrb[2].mxu1 }
 0xfa7   : >> { %v4514_v42 = vpop.f32.mrb[3].mxu1 }
0x1011   : >> { %v2315_v50 = vpop.f32.mrb[0].mxu0 }
0x1012   : >> { %v4569_v52 = vadd.f32 %v2315_v50, %v2202_v49  ;;  %v4529_v53 = vpop.f32.mrb[1].mxu0 }
0x1013   : >> { %v2318_v55 = vpop.f32.mrb[2].mxu0 }
0x1014   : >> { %4807 = vtanh.f32 %v4569_v52  ;;  %v4530_v56 = vpop.f32.mrb[3].mxu0  ;;  %v4249_v59 = vmul.f32 -1.442695, %v4569_v52 }
0x1016   : >> { %4809 = vpow2.f32 %v4249_v59 }
0x101e   : >> { %v4808_v57 = vpop.eup %4807 }
0x101f   : >> { %2331 = vrot.lane.b32.xlu0 %v4808_v57, %s5010_s2 }
0x1020   : >> { %v4810_v60 = vpop.eup %4809 }
0x1021   : >> { %v2325_v61 = vadd.f32 1.0, %v4810_v60 }
0x1023   : >> { %4811 = vrcp.f32 %v2325_v61 }
0x102d   : >> { %v4812_v62 = vpop.eup %4811 }
0x102e   : >> { %v2328_v21 = vmul.f32 %v4967_v20, %v4812_v62 }
0x1091   : >> { %v2332_v63 = vpop.permute.xlu0 %2331 }
0x1092   : >> { %v2334_v0 = vmul.f32 %v4812_v62, %v2332_v63 }
0x1094   : >> { %2336 = vrot.lane.b32.xlu1 %v2334_v0, %s5010_s2 }
0x1106   : >> { %v2337_v22 = vpop.permute.xlu1 %2336 }
0x1107   : >> { %v2339_v20 = vadd.f32 %v2337_v22, %v2328_v21  }
0x1109   : >> { %4813 = vtanh.f32 %v2339_v20 }
0x1113   : >> { %v4814_v23 = vpop.eup %4813 }
0x1114   : >> { %2342 = vrot.lane.b32.xlu1 %v4814_v23, %s5010_s2 }
0x1186   : >> { %v2343_v24 = vpop.permute.xlu1 %2342 }
0x1187   : >> { %v2345_v21 = vmul.f32 %v4812_v62, %v2343_v24  }
0x1189   : >> { %2347 = vrot.lane.b32.xlu0 %v2345_v21, %s5009_s28 }
0x11f6   : > { %2136 = sbr.rel (!%p2134_p4) target bundleno = 3783 (0xec7), region = 225 }
0x11fb   : >> { %v2348_v26 = vpop.permute.xlu0 %2347 }
0x11fc   : >> { %2351 = vst.msk [vmem:[%s2350_s13] sm:$0x3] %vm1655_vm0, %v2348_v26 }
0x11fd LB: >> { %v4258_v47 = vcombine.low %v5629_v11, %v5634_v12  ;;  %v5011_v1 = vmov 0.0   ;;  %v4255_v2 = vcombine.low %v5609_v6, %v5614_v7  ;;  %v2488_v54 = vpack.c.bf16 %v4983_v45, %v4983_v45  ;;  %s2365_s13 = ssub.s32 7, %s4987_s30  ;;  %s5013_s5 = smov 64   ;;  %s4987_s30 = sphi %s5743_s30, %s2362_s30   ;;  %v4983_v45 = vphi %v5741_v45, %v2571_v45   ;;  %v4979_v43 = vphi %v5739_v43, %v2565_v43  }
0x11fe   : >> { %4539 = vmatprep.subr.bf16.mxu0 %v5011_v1  ;;  %4531 = vmatprep.subr.bf16.mxu1 %v5011_v1  ;;  %v4259_v3 = vcombine.low %v5639_v13, %v5644_v14  ;;  %vm5012_vm4 = vmmov 0   ;;  %s5760_s8 = sshll.u32 %s2365_s13, 1  ;;  %v4256_v4 = vcombine.low %v5619_v8, %v5624_v10  ;;  %v4261_v18 = vcombine.low %v5722_v27, %v5727_v28  ;;  %s6308_s29 = sld [smem:[#allocation21_spill]] }
0x11ff   : >> { %4540 = vmatpush3.bf16.msra.mxu0 %v4258_v47  ;;  %4543 = vmatprep.mubr.msk.bf16.mxu0 %vm5012_vm4, %v5011_v1  ;;  %s2429_s28 = scalar_lea.vmem [#allocation9], %s5760_s8  ;;  %s2370_s6 = scalar_lea.vmem [#allocation8], %s5760_s8  ;;  %v4262_v20 = vcombine.low %v5732_v32, %v5737_v34 }
0x1200   : >> { %4541 = vmatprep.subr.bf16.mxu0 %v5011_v1  ;;  %4532 = vmatpush3.bf16.msra.mxu1 %v4255_v2  ;;  %v2430_v5 = vld [vmem:[%s2429_s28] sm:$0x3]  ;;  %s5014_s13 = smov 32   ;;  %s2576_s28 = scalar_lea.vmem [#allocation11], %s5760_s8 }
0x1201   : >> { %2490 = vrot.lane.b32.xlu0 %v2488_v54, %s5013_s5  ;;  %4533 = vmatprep.subr.bf16.mxu1 %v5011_v1  ;;  %v2371_v15 = vld [vmem:[%s2370_s6] sm:$0x3]  ;;  %v2431_v16 = vpack.c.bf16 %v2430_v5, %v2430_v5  ;;  %s2362_s30 = sadd.s32 1, %s4987_s30  }
0x1202   : >> { %4535 = vmatprep.mubr.msk.bf16.mxu1 %vm5012_vm4, %v5011_v1  ;;  %v2372_v19 = vpack.c.bf16 %v2371_v15, %v2371_v15  ;;  %p2359_p5 = scmp.ge.s32.totalorder %s2362_s30, 8  }
0x1203   : >> { %4542 = vmatpush3.bf16.msra.mxu0 %v4259_v3  ;;  %v2586_v22 = vld [vmem:[#allocation9] sm:$0x3] (%p2359_p5)  ;;  %v2587_v24 = vld [vmem:[#allocation9 + $0x2] sm:$0x3] (%p2359_p5)  ;;  %v2590_v7 = vld [vmem:[#allocation9 + $0x8] sm:$0x3] (%p2359_p5) }
0x1204   : >> { %4547 = vmatprep.subr.bf16.mxu0 %v5011_v1  ;;  %4534 = vmatpush3.bf16.msra.mxu1 %v4256_v4  ;;  %s2367_s2 = scalar_lea.vmem %s6308_s29, %s5760_s8  ;;  %v2591_v10 = vld [vmem:[#allocation9 + $0xa] sm:$0x3] (%p2359_p5)  ;;  %v2592_v12 = vld [vmem:[#allocation9 + $0xc] sm:$0x3] (%p2359_p5)  ;;  %v2593_v14 = vld [vmem:[#allocation9 + $0xe] sm:$0x3] (%p2359_p5) }
0x1205   : >> { %v2368_v39 = vld [vmem:[%s2367_s2] sm:$0x3]  ;;  %4555 = vmatprep.subr.bf16.mxu1 (%p2359_p5), %v4992_v17  ;;  %v2578_v28 = vld [vmem:[#allocation8] sm:$0x3] (%p2359_p5)  ;;  %vm2703_vm5 = vcmask (%p2359_p5), 517120   ;;  %vm2780_vm6 = vcmask (%p2359_p5), 1042434  }
0x1206   : >> { %4544 = vmatmul.mubr.msk.bf16.vlgmr.msra.gmra.mrb[0].mxu0 %vm991_vm12, %v2431_v16  ;;  %v2369_v40 = vadd.f32 %v2368_v39, %v5494_v58  ;;  %v2589_v58 = vld [vmem:[#allocation9 + $0x6] sm:$0x3] (%p2359_p5)  ;;  %v2634_v32 = vld [vmem:[#allocation10] sm:$0x3] (%p2359_p5)  ;;  %v5814_v34 = vld [vmem:[%s6280_s20] ss:$0 sm:$0xff] (%p2359_p5) }
0x1207   : >> { %4548 = vmatpush3.bf16.msra.mxu0 %v4261_v18  ;;  %4536 = vmatmul.mubr.msk.bf16.vlgmr.msra.gmra.mrb[0].mxu1 %vm991_vm12, %v2372_v19  ;;  %v2579_v4 = vld [vmem:[#allocation8 + $0x2] sm:$0x3] (%p2359_p5)  ;;  %v2636_v39 = vld [vmem:[#allocation10 + $0x4] sm:$0x3] (%p2359_p5)  ;;  %vm2782_vm7 = vcmask (%p2359_p5), 1043459   ;;  %vm2784_vm8 = vcmask (%p2359_p5), 1044484  }
0x1208   : >> { %4549 = vmatprep.subr.bf16.mxu0 %v5011_v1  ;;  %4551 = vmatprep.mubr.msk.bf16.mxu0 %vm5012_vm4, %v5011_v1  ;;  %v2635_v15 = vld [vmem:[#allocation10 + $0x2] sm:$0x3] (%p2359_p5)  ;;  %vm2786_vm9 = vcmask (%p2359_p5), 1045509   ;;  %vm2788_vm10 = vcmask (%p2359_p5), 1046534   ;;  %vm2738_vm14 = vcmp.gt.f32.partialorder (%p2359_p5), %v5466_v46, 0.5  ;;  %vm2790_vm15 = vcmask (%p2359_p5), 1047559  }
0x1209   : > { %4559 = vmatprep.mubr.msk.bf16.mxu1 (%p2359_p5), %vm4993_vm11, %v4992_v17  ;;  %vm2794_vm1 = vcmask (%p2359_p5), 15360   ;;  %s4267_s30 = sld [smem:[#allocation13 + $0x1]] (%p2359_p5)  ;;  %s4271_s8 = sld [smem:[#allocation13 + $0x3]] (%p2359_p5)  ;;  %vm3778_vm4 = vcmask (%p2359_p5), 1044480  }
0x120a   : > { %s6310_s6 = sld [smem:[#allocation23_spill]] (%p2359_p5)  ;;  %s5015_s25 = smov (%p2359_p5), 5  }
0x120b   : >> { %4550 = vmatpush3.bf16.msra.mxu0 %v4262_v20  ;;  %s5016_s1 = smov (%p2359_p5), 13   ;;  %s5017_s29 = smov (%p2359_p5), 21  }
0x120c   : > { %s5018_s2 = smov (%p2359_p5), 29  }
0x1273   : >> { %v2491_v36 = vpop.permute.xlu0 %2490 }
0x1274   : >> { %4552 = vmatmul.mubr.msk.bf16.vlgmr.msra.gmra.mrb[0].mxu0 %vm991_vm12, %v2491_v36 }
0x12da   : >> { %v2422_v35 = vpop.f32.mrb[0].mxu1 }
0x12db   : >> { %v4537_v37 = vpop.f32.mrb[1].mxu1  ;;  %v2428_v41 = vadd.f32 %v2422_v35, %v2369_v40 }
0x12dc   : >> { %v2425_v38 = vpop.f32.mrb[2].mxu1  ;;  %v2580_v37 = vld [vmem:[#allocation8 + $0x4] sm:$0x3] (%p2359_p5) }
0x12dd   : >> { %v4538_v25 = vpop.f32.mrb[3].mxu1 }
0x1347   : >> { %v2541_v42 = vpop.f32.mrb[0].mxu0 }
0x1348   : >> { %v4575_v44 = vadd.f32 %v2541_v42, %v2428_v41  ;;  %v4553_v48 = vpop.f32.mrb[1].mxu0 }
0x1349   : >> { %v2544_v49 = vpop.f32.mrb[2].mxu0 }
0x134a   : >> { %4815 = vtanh.f32 %v4575_v44  ;;  %v4554_v50 = vpop.f32.mrb[3].mxu0  ;;  %v4264_v53 = vmul.f32 -1.442695, %v4575_v44 }
0x134b   : > { %v2581_v50 = vld [vmem:[#allocation8 + $0x6] sm:$0x3] (%p2359_p5) }
0x134c   : >> { %4817 = vpow2.f32 %v4264_v53 }
0x1354   : >> { %v4816_v52 = vpop.eup %4815 }
0x1355   : >> { %2557 = vrot.lane.b32.xlu0 %v4816_v52, %s5014_s13 }
0x1356   : >> { %v4818_v55 = vpop.eup %4817 }
0x1357   : >> { %v2551_v56 = vadd.f32 1.0, %v4818_v55  ;;  %v2637_v55 = vld [vmem:[#allocation10 + $0x6] sm:$0x3] (%p2359_p5) }
0x1359   : >> { %4819 = vrcp.f32 %v2551_v56 }
0x1363   : >> { %v4820_v57 = vpop.eup %4819 }
0x1364   : >> { %v2554_v61 = vmul.f32 %v4979_v43, %v4820_v57 }
0x13c7   : >> { %v2558_v59 = vpop.permute.xlu0 %2557 }
0x13c8   : >> { %v2560_v60 = vmul.f32 %v4820_v57, %v2558_v59 }
0x13ca   : >> { %2562 = vrot.lane.b32.xlu1 %v2560_v60, %s5014_s13 }
0x143c   : >> { %v2563_v62 = vpop.permute.xlu1 %2562 }
0x143d   : >> { %v2565_v43 = vadd.f32 %v2563_v62, %v2554_v61  }
0x143f   : >> { %4821 = vtanh.f32 %v2565_v43  ;;  %v5819_v43 = vld [vmem:[%s6280_s20 + $0x2] ss:$0 sm:$0xff] (%p2359_p5) }
0x1449   : >> { %v4822_v63 = vpop.eup %4821 }
0x144a   : >> { %2568 = vrot.lane.b32.xlu1 %v4822_v63, %s5014_s13  ;;  %v2582_v63 = vld [vmem:[#allocation8 + $0x8] sm:$0x3] (%p2359_p5)  ;;  %s2728_s13 = sld [smem:[#allocation13]] (%p2359_p5) }
0x14bc   : >> { %v2569_v0 = vpop.permute.xlu1 %2568 }
0x14bd   : >> { %v2571_v45 = vmul.f32 %v4820_v57, %v2569_v0  }
0x14bf   : >> { %2573 = vrot.lane.b32.xlu0 %v2571_v45, %s5013_s5  ;;  %v2588_v45 = vld [vmem:[#allocation9 + $0x4] sm:$0x3] (%p2359_p5) }
0x14c3   : > { %2602 = vrot.lane.b32.xlu0 (%p2359_p5), %v2586_v22, %s4996_s3  ;;  %v2638_v22 = vld [vmem:[#allocation10 + $0x8] sm:$0x3] (%p2359_p5) }
0x14c7   : > { %2604 = vrot.lane.b32.xlu0 (%p2359_p5), %v2587_v24, %s4996_s3 }
0x14cb   : > { %2606 = vrot.lane.b32.xlu0 (%p2359_p5), %v2588_v45, %s4996_s3 }
0x14cf   : > { %2608 = vrot.lane.b32.xlu0 (%p2359_p5), %v2589_v58, %s4996_s3 }
0x14d3   : > { %2610 = vrot.lane.b32.xlu0 (%p2359_p5), %v2590_v7, %s4996_s3 }
0x14d7   : > { %2612 = vrot.lane.b32.xlu0 (%p2359_p5), %v2591_v10, %s4996_s3  ;;  %v2639_v10 = vld [vmem:[#allocation10 + $0xa] sm:$0x3] (%p2359_p5) }
0x14db   : > { %2614 = vrot.lane.b32.xlu0 (%p2359_p5), %v2592_v12, %s4996_s3 }
0x14df   : > { %2616 = vrot.lane.b32.xlu0 (%p2359_p5), %v2593_v14, %s4996_s3 }
0x152c   : > { %2361 = sbr.rel (!%p2359_p5) target bundleno = 4605 (0x11fd), region = 236 }
0x1531   : >> { %v2574_v21 = vpop.permute.xlu0 %2573 }
0x1532   : >> { %2577 = vst.msk [vmem:[%s2576_s28] sm:$0x3] %vm1655_vm0, %v2574_v21  ;;  %s4269_s28 = sld [smem:[#allocation13 + $0x2]] (%p2359_p5) }
0x1535   : > { %v2603_v1 = vpop.permute.xlu0 %2602 }
0x1536   : > { %v5822_v54 = vsel %vm991_vm12, %v2578_v28, %v2603_v1 }
0x1537   : > { %v2695_v5 = vmul.f32 %v5814_v34, %v5822_v54 }
0x1539   : > { %v2642_v23 = vld [vmem:[#allocation11] sm:$0x3]  ;;  %v2643_v26 = vld [vmem:[#allocation11 + $0x2] sm:$0x3]  ;;  %v2644_v47 = vld [vmem:[#allocation11 + $0x4] sm:$0x3]  ;;  %v2605_v18 = vpop.permute.xlu0 %2604 }
0x153a   : > { %2658 = vrot.lane.b32.xlu1 %v2642_v23, %s4996_s3  ;;  %v2645_v6 = vld [vmem:[#allocation11 + $0x6] sm:$0x3]  ;;  %v2646_v8 = vld [vmem:[#allocation11 + $0x8] sm:$0x3]  ;;  %v2647_v11 = vld [vmem:[#allocation11 + $0xa] sm:$0x3]  ;;  %v5833_v36 = vsel %vm991_vm12, %v2579_v4, %v2605_v18 }
0x153b   : > { %v2648_v13 = vld [vmem:[#allocation11 + $0xc] sm:$0x3]  ;;  %v2649_v27 = vld [vmem:[#allocation11 + $0xe] sm:$0x3]  ;;  %v2704_v19 = vsel %vm2703_vm5, %v2695_v5, 0.0  ;;  %v2696_v38 = vmul.f32 %v5814_v34, %v5833_v36 }
0x153c   : > { %2705 = vadd.xlane.f32.xlu0 %v2704_v19  ;;  %v2640_v4 = vld [vmem:[#allocation10 + $0xc] sm:$0x3] }
0x153d   : > { %v2607_v41 = vpop.permute.xlu0 %2606  ;;  %v2707_v42 = vsel %vm2703_vm5, %v2696_v38, 0.0 }
0x153e   : > { %2660 = vrot.lane.b32.xlu1 %v2643_v26, %s4996_s3  ;;  %v5845_v48 = vsel %vm991_vm12, %v2580_v37, %v2607_v41  ;;  %v2585_v37 = vld [vmem:[#allocation8 + $0xe] sm:$0x3] }
0x153f   : > { %v2697_v52 = vmul.f32 %v5814_v34, %v5845_v48 }
0x1541   : > { %v2609_v57 = vpop.permute.xlu0 %2608  ;;  %v2710_v59 = vsel %vm2703_vm5, %v2697_v52, 0.0 }
0x1542   : > { %2662 = vrot.lane.b32.xlu1 %v2644_v47, %s4996_s3  ;;  %v5857_v61 = vsel %vm991_vm12, %v2581_v50, %v2609_v57 }
0x1543   : > { %v2698_v0 = vmul.f32 %v5814_v34, %v5857_v61 }
0x1545   : > { %v2611_v24 = vpop.permute.xlu0 %2610  ;;  %v2713_v26 = vsel %vm2703_vm5, %v2698_v0, 0.0 }
0x1546   : > { %2664 = vrot.lane.b32.xlu1 %v2645_v6, %s4996_s3  ;;  %v5869_v47 = vsel %vm991_vm12, %v2582_v63, %v2611_v24  ;;  %v2583_v6 = vld [vmem:[#allocation8 + $0xa] sm:$0x3]  ;;  %v4270_v63 = vld [vmem:[%s6280_s20 + $0x3] ss:$0 sm:$0xff] }
0x1547   : > { %v2699_v7 = vmul.f32 %v5814_v34, %v5869_v47 }
0x1549   : > { %v2613_v12 = vpop.permute.xlu0 %2612 }
0x154a   : > { %2666 = vrot.lane.b32.xlu1 %v2646_v8, %s4996_s3 }
0x154e   : > { %2668 = vrot.lane.b32.xlu1 %v2647_v11, %s4996_s3 }
0x1552   : > { %2670 = vrot.lane.b32.xlu1 %v2648_v13, %s4996_s3  ;;  %v2716_v13 = vsel %vm2703_vm5, %v2699_v7, 0.0 }
0x1556   : > { %2672 = vrot.lane.b32.xlu1 %v2649_v27, %s4996_s3  ;;  %v5881_v27 = vsel %vm991_vm12, %v2583_v6, %v2613_v12 }
0x1557   : > { %v2700_v1 = vmul.f32 %v5814_v34, %v5881_v27 }
0x157a   : > { %2708 = vadd.xlane.f32.xlu1 %v2707_v42 }
0x157e   : > { %2711 = vadd.xlane.f32.xlu1 %v2710_v59 }
0x1582   : > { %2714 = vadd.xlane.f32.xlu1 %v2713_v26 }
0x1586   : > { %2717 = vadd.xlane.f32.xlu1 %v2716_v13 }
0x15ac   : > { %v2659_v2 = vpop.permute.xlu1 %2658 }
0x15ad   : > { %v5825_v3 = vsel %vm991_vm12, %v2634_v32, %v2659_v2  ;;  %v2584_v32 = vld [vmem:[#allocation8 + $0xc] sm:$0x3] }
0x15ae   : > { %v2934_v16 = vmul.f32 %v5819_v43, %v5825_v3 }
0x15b0   : > { %v2661_v20 = vpop.permute.xlu1 %2660  ;;  %v2942_v25 = vsel %vm2703_vm5, %v2934_v16, 0.0  ;;  %v2719_v16 = vsel %vm2703_vm5, %v2700_v1, 0.0 }
0x15b1   : > { %v5836_v35 = vsel %vm991_vm12, %v2635_v15, %v2661_v20  ;;  %2943 = vadd.xlane.f32.xlu0 %v2942_v25  ;;  %v2615_v15 = vpop.permute.xlu0 %2614  ;;  %2720 = vadd.xlane.f32.xlu1 %v2719_v16 }
0x15b2   : > { %v2935_v40 = vmul.f32 %v5819_v43, %v5836_v35  ;;  %v5893_v19 = vsel %vm991_vm12, %v2584_v32, %v2615_v15  ;;  %v3050_v26 = vmul.f32 %v4270_v63, %v5836_v35 }
0x15b3   : > { %v2701_v38 = vmul.f32 %v5814_v34, %v5893_v19 }
0x15b4   : > { %v2663_v44 = vpop.permute.xlu1 %2662  ;;  %v2945_v53 = vsel %vm2703_vm5, %v2935_v40, 0.0  ;;  %v3060_v6 = vsel %vm2703_vm5, %v3050_v26, 0.0  ;;  %v2967_v26 = vstv %s4269_s28 }
0x15b5   : > { %v5848_v49 = vsel %vm991_vm12, %v2636_v39, %v2663_v44  ;;  %2946 = vadd.xlane.f32.xlu0 %v2945_v53  ;;  %v2641_v39 = vld [vmem:[#allocation10 + $0xe] sm:$0x3]  ;;  %v2617_v41 = vpop.permute.xlu0 %2616  ;;  %v2722_v42 = vsel %vm2703_vm5, %v2701_v38, 0.0  ;;  %v4266_v53 = vld [vmem:[%s6280_s20 + $0x1] ss:$0 sm:$0xff] }
0x15b6   : > { %v2936_v56 = vmul.f32 %v5819_v43, %v5848_v49  ;;  %v5905_v50 = vsel %vm991_vm12, %v2585_v37, %v2617_v41  ;;  %2723 = vadd.xlane.f32.xlu1 %v2722_v42  ;;  %v2821_v24 = vmul.f32 %v4266_v53, %v5845_v48  ;;  %v2822_v7 = vmul.f32 %v4266_v53, %v5857_v61 }
0x15b7   : > { %v2823_v12 = vmul.f32 %v4266_v53, %v5869_v47  ;;  %v2824_v1 = vmul.f32 %v4266_v53, %v5881_v27  ;;  %v2825_v15 = vmul.f32 %v4266_v53, %v5893_v19  ;;  %v2826_v38 = vmul.f32 %v4266_v53, %v5905_v50 }
0x15b8   : > { %v2665_v60 = vpop.permute.xlu1 %2664  ;;  %v2948_v21 = vsel %vm2703_vm5, %v2936_v56, 0.0 }
0x15b9   : > { %v5860_v62 = vsel %vm991_vm12, %v2637_v55, %v2665_v60  ;;  %2949 = vadd.xlane.f32.xlu0 %v2948_v21  ;;  %v2702_v55 = vmul.f32 %v5814_v34, %v5905_v50  ;;  %v2819_v60 = vmul.f32 %v4266_v53, %v5822_v54  ;;  %v3049_v34 = vmul.f32 %v4270_v63, %v5825_v3 }
0x15ba   : > { %v2937_v23 = vmul.f32 %v5819_v43, %v5860_v62  ;;  %v3052_v13 = vmul.f32 %v4270_v63, %v5860_v62 }
0x15bb   : > { %v2725_v59 = vsel %vm2703_vm5, %v2702_v55, 0.0  ;;  %v2827_v21 = vsel %vm2703_vm5, %v2819_v60, 0.0 }
0x15bc   : > { %v2667_v45 = vpop.permute.xlu1 %2666  ;;  %v2951_v8 = vsel %vm2703_vm5, %v2937_v23, 0.0  ;;  %2726 = vadd.xlane.f32.xlu1 %v2725_v59  ;;  %v3066_v32 = vsel %vm2703_vm5, %v3052_v13, 0.0 }
0x15bd   : > { %v5872_v58 = vsel %vm991_vm12, %v2638_v22, %v2667_v45  ;;  %2952 = vadd.xlane.f32.xlu0 %v2951_v8  ;;  %v2820_v22 = vmul.f32 %v4266_v53, %v5833_v36  ;;  %v2833_v45 = vsel %vm2703_vm5, %v2821_v24, 0.0  ;;  %v3051_v8 = vmul.f32 %v4270_v63, %v5848_v49 }
0x15be   : > { %v2938_v11 = vmul.f32 %v5819_v43, %v5872_v58 }
0x15bf   : > { %v2830_v23 = vsel %vm2703_vm5, %v2820_v22, 0.0 }
0x15c0   : > { %v2669_v14 = vpop.permute.xlu1 %2668  ;;  %v2954_v2 = vsel %vm2703_vm5, %v2938_v11, 0.0  ;;  %2828 = vadd.xlane.f32.xlu1 %v2827_v21  ;;  %v3063_v11 = vsel %vm2703_vm5, %v3051_v8, 0.0 }
0x15c1   : > { %v5884_v28 = vsel %vm991_vm12, %v2639_v10, %v2669_v14  ;;  %2955 = vadd.xlane.f32.xlu0 %v2954_v2  ;;  %v2836_v10 = vsel %vm2703_vm5, %v2822_v7, 0.0  ;;  %v2839_v14 = vsel %vm2703_vm5, %v2823_v12, 0.0  ;;  %v3053_v2 = vmul.f32 %v4270_v63, %v5872_v58 }
0x15c2   : > { %v2939_v5 = vmul.f32 %v5819_v43, %v5884_v28  ;;  %v3054_v16 = vmul.f32 %v4270_v63, %v5884_v28 }
0x15c4   : > { %v2671_v18 = vpop.permute.xlu1 %2670  ;;  %v2957_v25 = vsel %vm2703_vm5, %v2939_v5, 0.0  ;;  %v3069_v5 = vsel %vm2703_vm5, %v3053_v2, 0.0  ;;  %v3072_v37 = vsel %vm2703_vm5, %v3054_v16, 0.0 }
0x15c5   : > { %v5896_v20 = vsel %vm991_vm12, %v2640_v4, %v2671_v18  ;;  %2958 = vadd.xlane.f32.xlu0 %v2957_v25  ;;  %v2842_v4 = vsel %vm2703_vm5, %v2824_v1, 0.0  ;;  %v2845_v18 = vsel %vm2703_vm5, %v2825_v15, 0.0 }
0x15c6   : > { %v2940_v40 = vmul.f32 %v5819_v43, %v5896_v20  ;;  %v3055_v25 = vmul.f32 %v4270_v63, %v5896_v20 }
0x15c8   : > { %v2673_v44 = vpop.permute.xlu1 %2672  ;;  %v2960_v56 = vsel %vm2703_vm5, %v2940_v40, 0.0  ;;  %v3075_v40 = vsel %vm2703_vm5, %v3055_v25, 0.0 }
0x15c9   : > { %v5908_v52 = vsel %vm991_vm12, %v2641_v39, %v2673_v44  ;;  %2961 = vadd.xlane.f32.xlu0 %v2960_v56  ;;  %v2848_v39 = vsel %vm2703_vm5, %v2826_v38, 0.0  ;;  %v2706_v44 = vpop.xlane.xlu0 %2705 }
0x15ca   : > { %v2941_v57 = vmul.f32 %v5819_v43, %v5908_v52  ;;  %v3057_v43 = vsel %vm2703_vm5, %v3049_v34, 0.0  ;;  %v3056_v41 = vmul.f32 %v4270_v63, %v5908_v52  ;;  %v2729_v34 = vstv %s2728_s13  ;;  %s6309_s13 = smov 64  }
0x15cb   : > { %3058 = vadd.xlane.f32.xlu1 %v3057_v43  ;;  %v2730_v24 = vadd.f32 %v2729_v34, %v2706_v44 }
0x15cc   : > { %v2963_v0 = vsel %vm2703_vm5, %v2941_v57, 0.0  ;;  %v3078_v42 = vsel %vm2703_vm5, %v3056_v41, 0.0 }
0x15cd   : > { %2964 = vadd.xlane.f32.xlu0 %v2963_v0  ;;  %v2750_v1 = vrot.slane %v2730_v24, %v5304_v33 }
0x15cf   : > { %2834 = vadd.xlane.f32.xlu1 %v2833_v45 }
0x15d1   : > { %2831 = vadd.xlane.f32.xlu0 %v2830_v23 }
0x15d3   : > { %2837 = vadd.xlane.f32.xlu1 %v2836_v10 }
0x15d5   : > { %3061 = vadd.xlane.f32.xlu0 %v3060_v6 }
0x15d7   : > { %2840 = vadd.xlane.f32.xlu1 %v2839_v14 }
0x15d9   : > { %3064 = vadd.xlane.f32.xlu0 %v3063_v11 }
0x15db   : > { %2843 = vadd.xlane.f32.xlu1 %v2842_v4 }
0x15dd   : > { %3067 = vadd.xlane.f32.xlu0 %v3066_v32 }
0x15df   : > { %2846 = vadd.xlane.f32.xlu1 %v2845_v18 }
0x15e1   : > { %3070 = vadd.xlane.f32.xlu0 %v3069_v5 }
0x15e3   : > { %2849 = vadd.xlane.f32.xlu1 %v2848_v39 }
0x15e5   : > { %3073 = vadd.xlane.f32.xlu0 %v3072_v37 }
0x15e9   : > { %3076 = vadd.xlane.f32.xlu0 %v3075_v40 }
0x15ed   : > { %3079 = vadd.xlane.f32.xlu0 %v3078_v42 }
0x1607   : > { %v2709_v55 = vpop.xlane.xlu1 %2708 }
0x1608   : > { %v2731_v22 = vadd.f32 %v2729_v34, %v2709_v55 }
0x160a   : > { %v2754_v7 = vrot.slane %v2731_v22, %v5304_v33 }
0x160b   : > { %v2712_v57 = vpop.xlane.xlu1 %2711 }
0x160c   : > { %v2732_v43 = vadd.f32 %v2729_v34, %v2712_v57  ;;  %v2779_v18 = vsel %vm1213_vm13, %v2754_v7, %v2750_v1 }
0x160e   : > { %v2758_v12 = vrot.slane %v2732_v43, %v5304_v33 }
0x160f   : > { %v2715_v59 = vpop.xlane.xlu1 %2714 }
0x1610   : > { %v2733_v45 = vadd.f32 %v2729_v34, %v2715_v59  ;;  %v2781_v40 = vsel %vm2780_vm6, %v2758_v12, %v2779_v18 }
0x1612   : > { %v2762_v2 = vrot.slane %v2733_v45, %v5304_v33 }
0x1613   : > { %v2718_v0 = vpop.xlane.xlu1 %2717 }
0x1614   : > { %v2734_v6 = vadd.f32 %v2729_v34, %v2718_v0 }
0x1616   : > { %v2766_v15 = vrot.slane %v2734_v6, %v5304_v33 }
0x163e   : > { %v2944_v56 = vpop.xlane.xlu0 %2943  ;;  %v2721_v63 = vpop.xlane.xlu1 %2720 }
0x163f   : > { %v2735_v10 = vadd.f32 %v2729_v34, %v2721_v63  ;;  %v2968_v11 = vadd.f32 %v2967_v26, %v2944_v56  ;;  %v2783_v56 = vsel %vm2782_vm7, %v2762_v2, %v2781_v40 }
0x1641   : > { %v2770_v38 = vrot.slane %v2735_v10, %v5304_v33  ;;  %v2987_v39 = vrot.slane %v2968_v11, %v5304_v33 }
0x1642   : > { %v2947_v53 = vpop.xlane.xlu0 %2946 }
0x1643   : > { %v2969_v8 = vadd.f32 %v2967_v26, %v2947_v53  ;;  %v2724_v14 = vpop.xlane.xlu1 %2723 }
0x1644   : > { %v2736_v5 = vadd.f32 %v2729_v34, %v2724_v14 }
0x1645   : > { %v2991_v37 = vrot.slane %v2969_v8, %v5304_v33 }
0x1646   : > { %v2950_v60 = vpop.xlane.xlu0 %2949  ;;  %v2774_v42 = vrot.slane %v2736_v5, %v5304_v33 }
0x1647   : > { %v2970_v13 = vadd.f32 %v2967_v26, %v2950_v60  ;;  %v2785_v60 = vsel %vm2784_vm8, %v2766_v15, %v2783_v56 }
0x1648   : > { %v2787_v22 = vsel %vm2786_vm9, %v2770_v38, %v2785_v60 }
0x1649   : > { %v2995_v41 = vrot.slane %v2970_v13, %v5304_v33  ;;  %v2727_v44 = vpop.xlane.xlu1 %2726 }
0x164a   : > { %v2953_v21 = vpop.xlane.xlu0 %2952  ;;  %v2737_v53 = vadd.f32 %v2729_v34, %v2727_v44  ;;  %v2789_v34 = vsel %vm2788_vm10, %v2774_v42, %v2787_v22 }
0x164b   : > { %v2971_v4 = vadd.f32 %v2967_v26, %v2953_v21  ;;  %v3016_v21 = vsel %vm1213_vm13, %v2991_v37, %v2987_v39 }
0x164c   : > { %v2778_v63 = vrot.slane %v2737_v53, %v5304_v33 }
0x164d   : > { %v2999_v57 = vrot.slane %v2971_v4, %v5304_v33  ;;  %v2829_v45 = vpop.xlane.xlu1 %2828 }
0x164e   : > { %v2956_v23 = vpop.xlane.xlu0 %2955  ;;  %v2791_v8 = vsel %vm2790_vm15, %v2778_v63, %v2789_v34 }
0x164f   : > { %v2972_v16 = vadd.f32 %v2967_v26, %v2956_v23  ;;  %v3017_v23 = vsel %vm2780_vm6, %v2995_v41, %v3016_v21  ;;  %v2793_v12 = vsel %vm2738_vm14, -1e+30, %v2791_v8 }
0x1650   : > { %v3018_v7 = vsel %vm2782_vm7, %v2999_v57, %v3017_v23  ;;  %v2795_v14 = vsel %vm2794_vm1, %v2793_v12, -inf }
0x1651   : > { %v3003_v0 = vrot.slane %v2972_v16, %v5304_v33  ;;  %v2796_v1 = vrot.slane %v2795_v14, 4 }
0x1652   : > { %v2959_v32 = vpop.xlane.xlu0 %2958 }
0x1653   : > { %v2973_v25 = vadd.f32 %v2967_v26, %v2959_v32  ;;  %v3019_v11 = vsel %vm2784_vm8, %v3003_v0, %v3018_v7  ;;  %v2797_v16 = vmax.f32 %v2795_v14, %v2796_v1 }
0x1655   : > { %v3007_v43 = vrot.slane %v2973_v25, %v5304_v33  ;;  %v2798_v37 = vrot.slane %v2797_v16, 2 }
0x1656   : > { %v2962_v55 = vpop.xlane.xlu0 %2961 }
0x1657   : > { %v2974_v59 = vadd.f32 %v2967_v26, %v2962_v55  ;;  %v3020_v13 = vsel %vm2786_vm9, %v3007_v43, %v3019_v11  ;;  %v2799_v40 = vmax.f32 %v2797_v16, %v2798_v37  ;;  %v2852_v43 = vstv %s4267_s30 }
0x1658   : > { %v3059_v4 = vpop.xlane.xlu1 %3058  ;;  %v2853_v8 = vadd.f32 %v2852_v43, %v2829_v45 }
0x1659   : > { %v3011_v24 = vrot.slane %v2974_v59, %v5304_v33  ;;  %v2800_v42 = vrot.slane %v2799_v40, 1 }
0x165a   : > { %v2965_v6 = vpop.xlane.xlu0 %2964 }
0x165b   : > { %v2975_v10 = vadd.f32 %v2967_v26, %v2965_v6  ;;  %v3021_v2 = vsel %vm2788_vm10, %v3011_v24, %v3020_v13  ;;  %v2801_v57 = vmax.f32 %v2799_v40, %v2800_v42 }
0x165c   : > { %v2835_v25 = vpop.xlane.xlu1 %2834 }
0x165d   : > { %v3015_v32 = vrot.slane %v2975_v10, %v5304_v33  ;;  %v2802_v59 = vsub.f32 %v2793_v12, %v2801_v57  ;;  %v2855_v24 = vadd.f32 %v2852_v43, %v2835_v25  ;;  %v3082_v10 = vstv %s4271_s8 }
0x165e   : > { %v2832_v5 = vpop.xlane.xlu0 %2831 }
0x165f   : > { %v3022_v15 = vsel %vm2790_vm15, %v3015_v32, %v3021_v2  ;;  %v2803_v22 = vmul.f32 1.442695, %v2802_v59  ;;  %v2854_v23 = vadd.f32 %v2852_v43, %v2832_v5  ;;  %v3083_v2 = vadd.f32 %v3082_v10, %v3059_v4 }
0x1660   : > { %v3024_v26 = vsel %vm2738_vm14, -1e+30, %v3022_v15  ;;  %v2838_v55 = vpop.xlane.xlu1 %2837  ;;  %v2880_v15 = vrot.slane %v2855_v24, %v5304_v33 }
0x1661   : > { %v3025_v18 = vsel %vm2794_vm1, %v3024_v26, -inf  ;;  %4846 = vpow2.f32 %v2803_v22  ;;  %v2856_v11 = vadd.f32 %v2852_v43, %v2838_v55  ;;  %v2876_v12 = vrot.slane %v2854_v23, %v5304_v33 }
0x1662   : > { %v3026_v38 = vrot.slane %v3025_v18, 4  ;;  %v3062_v39 = vpop.xlane.xlu0 %3061 }
0x1663   : > { %v3084_v14 = vadd.f32 %v3082_v10, %v3062_v39  ;;  %v2884_v37 = vrot.slane %v2856_v11, %v5304_v33 }
0x1664   : > { %v3027_v41 = vmax.f32 %v3025_v18, %v3026_v38  ;;  %v2841_v0 = vpop.xlane.xlu1 %2840 }
0x1665   : > { %v2857_v32 = vadd.f32 %v2852_v43, %v2841_v0  ;;  %v3106_v25 = vrot.slane %v3084_v14, %v5304_v33 }
0x1666   : > { %v3028_v44 = vrot.slane %v3027_v41, 2  ;;  %v3065_v56 = vpop.xlane.xlu0 %3064 }
0x1667   : > { %v3085_v16 = vadd.f32 %v3082_v10, %v3065_v56  ;;  %v2888_v39 = vrot.slane %v2857_v32, %v5304_v33 }
0x1668   : > { %v3029_v53 = vmax.f32 %v3027_v41, %v3028_v44  ;;  %v2844_v6 = vpop.xlane.xlu1 %2843  ;;  %v3102_v44 = vrot.slane %v3083_v2, %v5304_v33 }
0x1669   : > { %v2858_v1 = vadd.f32 %v2852_v43, %v2844_v6  ;;  %v3110_v56 = vrot.slane %v3085_v16, %v5304_v33 }
0x166a   : > { %v3030_v60 = vrot.slane %v3029_v53, 1  ;;  %v3068_v21 = vpop.xlane.xlu0 %3067  ;;  %v3131_v23 = vsel %vm1213_vm13, %v3106_v25, %v3102_v44 }
0x166b   : > { %v3086_v45 = vadd.f32 %v3082_v10, %v3068_v21  ;;  %v2892_v4 = vrot.slane %v2858_v1, %v5304_v33  ;;  %v3132_v14 = vsel %vm2780_vm6, %v3110_v56, %v3131_v23 }
0x166c   : > { %v3031_v63 = vmax.f32 %v3029_v53, %v3030_v60  ;;  %v2847_v5 = vpop.xlane.xlu1 %2846 }
0x166d   : > { %v2859_v38 = vadd.f32 %v2852_v43, %v2847_v5  ;;  %v3114_v0 = vrot.slane %v3086_v45, %v5304_v33 }
0x166e   : > { %v3032_v34 = vsub.f32 %v3024_v26, %v3031_v63  ;;  %v3071_v7 = vpop.xlane.xlu0 %3070  ;;  %v2872_v26 = vrot.slane %v2853_v8, %v5304_v33  ;;  %v4847_v63 = vpop.eup %4846 }
0x166f   : > { %v3087_v40 = vadd.f32 %v3082_v10, %v3071_v7  ;;  %v2896_v57 = vrot.slane %v2859_v38, %v5304_v33  ;;  %v2805_v6 = vsel %vm2794_vm1, %v4847_v63, 0.0  ;;  %v3133_v1 = vsel %vm2782_vm7, %v3114_v0, %v3132_v14 }
0x1670   : > { %v3033_v13 = vmul.f32 1.442695, %v3032_v34  ;;  %v2901_v41 = vsel %vm1213_vm13, %v2876_v12, %v2872_v26  ;;  %v2850_v53 = vpop.xlane.xlu1 %2849  ;;  %vm3321_vm13 = vcmask 523264  }
0x1671   : > { %v2902_v55 = vsel %vm2780_vm6, %v2880_v15, %v2901_v41  ;;  %v2860_v21 = vadd.f32 %v2852_v43, %v2850_v53  ;;  %v3118_v24 = vrot.slane %v3087_v40, %v5304_v33  ;;  %vm3774_vm6 = vcmask 39936  }
0x1672   : > { %4848 = vpow2.f32 %v3033_v13  ;;  %v3074_v18 = vpop.xlane.xlu0 %3073  ;;  %v2903_v60 = vsel %vm2782_vm7, %v2884_v37, %v2902_v55  ;;  %v2806_v13 = vrot.slane %v2805_v6, 4 }
0x1673   : > { %v3088_v42 = vadd.f32 %v3082_v10, %v3074_v18  ;;  %v2904_v34 = vsel %vm2784_vm8, %v2888_v39, %v2903_v60  ;;  %v2900_v11 = vrot.slane %v2860_v21, %v5304_v33  ;;  %v3134_v18 = vsel %vm2784_vm8, %v3118_v24, %v3133_v1 }
0x1674   : > { %v2905_v7 = vsel %vm2786_vm9, %v2892_v4, %v2904_v34  ;;  %v2807_v5 = vadd.f32 %v2806_v13, %v2805_v6  ;;  %vm3998_vm8 = vcmask 105472  }
0x1675   : > { %v3122_v8 = vrot.slane %v3088_v42, %v5304_v33  ;;  %v2906_v43 = vsel %vm2788_vm10, %v2896_v57, %v2905_v7 }
0x1676   : > { %v3077_v59 = vpop.xlane.xlu0 %3076  ;;  %v2907_v2 = vsel %vm2790_vm15, %v2900_v11, %v2906_v43  ;;  %v2808_v39 = vrot.slane %v2807_v5, 2 }
0x1677   : > { %v3089_v22 = vadd.f32 %v3082_v10, %v3077_v59  ;;  %v2909_v26 = vsel %vm2738_vm14, -1e+30, %v2907_v2  ;;  %v3135_v45 = vsel %vm2786_vm9, %v3122_v8, %v3134_v18  ;;  %v6037_v18 = vsub.s32 2, %v5227_v29 }
0x1678   : > { %v2910_v38 = vsel %vm2794_vm1, %v2909_v26, -inf  ;;  %v2809_v42 = vadd.f32 %v2808_v39, %v2807_v5  ;;  %vm4000_vm9 = vcmask 171008  }
0x1679   : > { %v3126_v32 = vrot.slane %v3089_v22, %v5304_v33  ;;  %v2911_v41 = vrot.slane %v2910_v38, 4 }
0x167a   : > { %v3080_v12 = vpop.xlane.xlu0 %3079  ;;  %v2810_v53 = vrot.slane %v2809_v42, 1 }
0x167b   : > { %v3090_v15 = vadd.f32 %v3082_v10, %v3080_v12  ;;  %v3136_v10 = vsel %vm2788_vm10, %v3126_v32, %v3135_v45  ;;  %v2912_v55 = vmax.f32 %v2910_v38, %v2911_v41  ;;  %v6046_v38 = vsub.s32 3, %v5227_v29 }
0x167c   : > { %v4849_v16 = vpop.eup %4848  ;;  %vm4002_vm10 = vcmask 236544  }
0x167d   : > { %v3035_v37 = vsel %vm2794_vm1, %v4849_v16, 0.0  ;;  %v3130_v25 = vrot.slane %v3090_v15, %v5304_v33  ;;  %v2913_v60 = vrot.slane %v2912_v55, 2  ;;  %v2811_v33 = vadd.f32 %v2810_v53, %v2809_v42 }
0x167e   : > { %v3036_v40 = vrot.slane %v3035_v37, 4 }
0x167f   : > { %v3137_v4 = vsel %vm2790_vm15, %v3130_v25, %v3136_v10  ;;  %v2914_v22 = vmax.f32 %v2912_v55, %v2913_v60  ;;  %4850 = vrcp.f32 %v2811_v33  ;;  %v6054_v10 = vsub.s32 4, %v5227_v29 }
0x1680   : > { %v3037_v44 = vadd.f32 %v3036_v40, %v3035_v37  ;;  %v3139_v56 = vsel %vm2738_vm14, -1e+30, %v3137_v4  ;;  %vm4004_vm14 = vcmask 295936  }
0x1681   : > { %v3140_v57 = vsel %vm2794_vm1, %v3139_v56, -inf  ;;  %v2915_v24 = vrot.slane %v2914_v22, 1 }
0x1682   : > { %v3038_v59 = vrot.slane %v3037_v44, 2  ;;  %v3141_v0 = vrot.slane %v3140_v57, 4 }
0x1683   : > { %v2916_v8 = vmax.f32 %v2914_v22, %v2915_v24 }
0x1684   : > { %v3039_v21 = vadd.f32 %v3038_v59, %v3037_v44  ;;  %v3142_v23 = vmax.f32 %v3140_v57, %v3141_v0  ;;  %v3196_v59 = vsub.s32 5, %v5227_v29 }
0x1685   : > { %v2917_v46 = vsub.f32 %v2909_v26, %v2916_v8 }
0x1686   : > { %v3040_v34 = vrot.slane %v3039_v21, 1  ;;  %v3143_v6 = vrot.slane %v3142_v23, 2 }
0x1687   : > { %v2918_v14 = vmul.f32 1.442695, %v2917_v46  ;;  %v3210_v46 = vsub.s32 7, %v5227_v29 }
0x1688   : > { %v3041_v7 = vadd.f32 %v3040_v34, %v3039_v21  ;;  %v3144_v11 = vmax.f32 %v3142_v23, %v3143_v6  ;;  %v3203_v34 = vsub.s32 6, %v5227_v29 }
0x1689   : > { %v4851_v12 = vpop.eup %4850 }
0x168a   : > { %4852 = vrcp.f32 %v3041_v7  ;;  %v3145_v13 = vrot.slane %v3144_v11, 1  ;;  %v6030_v2 = vmul.f32 %v4851_v12, %v4847_v63 }
0x168b   : > { %4854 = vpow2.f32 %v2918_v14 }
0x168c   : > { %v3146_v43 = vmax.f32 %v3144_v11, %v3145_v13  ;;  %v3248_v15 = vrot.slane %v6030_v2, %v5316_v51  ;;  %v3241_v5 = vrot.slane %v6030_v2, %v5284_v9  ;;  %v3255_v45 = vrot.slane %v6030_v2, %v6037_v18 }
0x168d   : > { %v3269_v57 = vrot.slane %v6030_v2, %v6054_v10  ;;  %v3276_v22 = vrot.slane %v6030_v2, %v3196_v59  ;;  %v3283_v8 = vrot.slane %v6030_v2, %v3203_v34  ;;  %v3290_v14 = vrot.slane %v6030_v2, %v3210_v46 }
0x168e   : > { %v3147_v32 = vsub.f32 %v3139_v56, %v3146_v43  ;;  %3250 = vbcast.lane.b32.xlu0 %v3248_v15, 256  ;;  %3243 = vbcast.lane.b32.xlu1 %v3241_v5, 256 }
0x1690   : > { %v3148_v1 = vmul.f32 1.442695, %v3147_v32 }
0x1692   : > { %4856 = vpow2.f32 %v3148_v1  ;;  %3257 = vbcast.lane.b32.xlu0 %v3255_v45, 256 }
0x1694   : > { %v4853_v26 = vpop.eup %4852 }
0x1695   : > { %v6039_v37 = vmul.f32 %v4853_v26, %v4849_v16  ;;  %v4855_v25 = vpop.eup %4854  ;;  %v3262_v16 = vrot.slane %v6030_v2, %v6046_v38 }
0x1696   : > { %v2920_v39 = vsel %vm2794_vm1, %v4855_v25, 0.0 }
0x1697   : > { %v3405_v63 = vrot.slane %v6039_v37, %v5284_v9  ;;  %v2921_v40 = vrot.slane %v2920_v39, 4  ;;  %v3412_v41 = vrot.slane %v6039_v37, %v5316_v51  ;;  %3264 = vbcast.lane.b32.xlu0 %v3262_v16, 256  ;;  %v3419_v53 = vrot.slane %v6039_v37, %v6037_v18 }
0x1698   : > { %v3426_v23 = vrot.slane %v6039_v37, %v6046_v38  ;;  %v3433_v11 = vrot.slane %v6039_v37, %v6054_v10  ;;  %v3440_v43 = vrot.slane %v6039_v37, %v3196_v59  ;;  %v3447_v32 = vrot.slane %v6039_v37, %v3203_v34 }
0x1699   : > { %3407 = vbcast.lane.b32.xlu1 %v3405_v63, 256  ;;  %v2922_v42 = vadd.f32 %v2921_v40, %v2920_v39  ;;  %v3454_v15 = vrot.slane %v6039_v37, %v3210_v46 }
0x169b   : > { %v2923_v55 = vrot.slane %v2922_v42, 2  ;;  %3271 = vbcast.lane.b32.xlu0 %v3269_v57, 256 }
0x169c   : > { %v4857_v4 = vpop.eup %4856 }
0x169d   : > { %v3150_v44 = vsel %vm2794_vm1, %v4857_v4, 0.0  ;;  %3414 = vbcast.lane.b32.xlu1 %v3412_v41, 256  ;;  %v2924_v60 = vadd.f32 %v2923_v55, %v2922_v42 }
0x169e   : > { %v3151_v56 = vrot.slane %v3150_v44, 4 }
0x169f   : > { %v2925_v33 = vrot.slane %v2924_v60, 1  ;;  %3278 = vbcast.lane.b32.xlu0 %v3276_v22, 256 }
0x16a0   : > { %v3152_v0 = vadd.f32 %v3151_v56, %v3150_v44 }
0x16a1   : > { %3421 = vbcast.lane.b32.xlu1 %v3419_v53, 256  ;;  %v2926_v24 = vadd.f32 %v2925_v33, %v2924_v60 }
0x16a2   : > { %v3153_v21 = vrot.slane %v3152_v0, 2 }
0x16a3   : > { %4858 = vrcp.f32 %v2926_v24  ;;  %3285 = vbcast.lane.b32.xlu0 %v3283_v8, 256 }
0x16a4   : > { %v3154_v6 = vadd.f32 %v3153_v21, %v3152_v0 }
0x16a5   : > { %3428 = vbcast.lane.b32.xlu1 %v3426_v23, 256 }
0x16a6   : > { %v3155_v7 = vrot.slane %v3154_v6, 1 }
0x16a7   : > { %3292 = vbcast.lane.b32.xlu0 %v3290_v14, 256 }
0x16a8   : > { %v3156_v13 = vadd.f32 %v3155_v7, %v3154_v6 }
0x16a9   : > { %3435 = vbcast.lane.b32.xlu1 %v3433_v11, 256 }
0x16aa   : > { %4860 = vrcp.f32 %v3156_v13 }
0x16ad   : > { %3442 = vbcast.lane.b32.xlu1 %v3440_v43, 256  ;;  %v4859_v12 = vpop.eup %4858 }
0x16ae   : > { %v6073_v1 = vmul.f32 %v4859_v12, %v4855_v25 }
0x16b0   : > { %v3162_v29 = vrot.slane %v6073_v1, %v5284_v9  ;;  %v3169_v45 = vrot.slane %v6073_v1, %v5316_v51  ;;  %v3176_v39 = vrot.slane %v6073_v1, %v6037_v18  ;;  %v3183_v16 = vrot.slane %v6073_v1, %v6046_v38 }
0x16b1   : > { %3449 = vbcast.lane.b32.xlu1 %v3447_v32, 256  ;;  %v3190_v41 = vrot.slane %v6073_v1, %v6054_v10  ;;  %v3204_v42 = vrot.slane %v6073_v1, %v3203_v34  ;;  %v3211_v44 = vrot.slane %v6073_v1, %v3210_v46 }
0x16b2   : > { %3164 = vbcast.lane.b32.xlu0 %v3162_v29, 256 }
0x16b4   : > { %v4861_v5 = vpop.eup %4860 }
0x16b5   : > { %v6078_v26 = vmul.f32 %v4861_v5, %v4857_v4  ;;  %3456 = vbcast.lane.b32.xlu1 %v3454_v15, 256  ;;  %v3197_v4 = vrot.slane %v6073_v1, %v3196_v59 }
0x16b7   : > { %v3326_v63 = vrot.slane %v6078_v26, %v5284_v9  ;;  %v3333_v25 = vrot.slane %v6078_v26, %v5316_v51  ;;  %v3340_v40 = vrot.slane %v6078_v26, %v6037_v18  ;;  %v3347_v9 = vrot.slane %v6078_v26, %v6046_v38 }
0x16b8   : > { %v3354_v51 = vrot.slane %v6078_v26, %v6054_v10  ;;  %v3361_v18 = vrot.slane %v6078_v26, %v3196_v59  ;;  %v3368_v38 = vrot.slane %v6078_v26, %v3203_v34  ;;  %v3375_v55 = vrot.slane %v6078_v26, %v3210_v46 }
0x16b9   : > { %3171 = vbcast.lane.b32.xlu1 %v3169_v45, 256  ;;  %3328 = vbcast.lane.b32.xlu0 %v3326_v63, 256 }
0x16bd   : > { %3335 = vbcast.lane.b32.xlu1 %v3333_v25, 256  ;;  %3178 = vbcast.lane.b32.xlu0 %v3176_v39, 256 }
0x16c1   : > { %3342 = vbcast.lane.b32.xlu1 %v3340_v40, 256  ;;  %3185 = vbcast.lane.b32.xlu0 %v3183_v16, 256 }
0x16c5   : > { %3349 = vbcast.lane.b32.xlu1 %v3347_v9, 256  ;;  %3192 = vbcast.lane.b32.xlu0 %v3190_v41, 256 }
0x16c9   : > { %3356 = vbcast.lane.b32.xlu1 %v3354_v51, 256  ;;  %3199 = vbcast.lane.b32.xlu0 %v3197_v4, 256 }
0x16cd   : > { %3363 = vbcast.lane.b32.xlu1 %v3361_v18, 256  ;;  %3206 = vbcast.lane.b32.xlu0 %v3204_v42, 256 }
0x16d1   : > { %3370 = vbcast.lane.b32.xlu1 %v3368_v38, 256  ;;  %3213 = vbcast.lane.b32.xlu0 %v3211_v44, 256 }
0x16d5   : > { %3377 = vbcast.lane.b32.xlu1 %v3375_v55, 256 }
0x1700   : > { %v3244_v10 = vpop.permute.xlu1 %3243  ;;  %v3251_v56 = vpop.permute.xlu0 %3250 }
0x1701   : > { %v3294_v59 = vmul.f32 %v3244_v10, %v5822_v54  ;;  %v3295_v33 = vmul.f32 %v3251_v56, %v5833_v36 }
0x1703   : > { %v3302_v34 = vsel %vm2703_vm5, %v3294_v59, 0.0  ;;  %v3303_v24 = vsel %vm2703_vm5, %v3295_v33, 0.0 }
0x1704   : > { %v3258_v53 = vpop.permute.xlu0 %3257  ;;  %v3304_v11 = vadd.f32 %v3303_v24, %v3302_v34  ;;  %v4828_v34 = vld [vmem:[%s6282_s22 + $0x40] sm:$0xff]  }
0x1705   : > { %v3296_v21 = vmul.f32 %v3258_v53, %v5845_v48  ;;  %v4829_v24 = vld [vmem:[%s6282_s22] sm:$0xff]   ;;  %4392 = vmatprep.subr.bf16.mxu0 %v4828_v34 }
0x1706   : > { %4393 = vmatpush3.bf16.msra.mxu0 %v4829_v24 }
0x1707   : > { %v3305_v7 = vsel %vm2703_vm5, %v3296_v21, 0.0 }
0x1708   : > { %v3306_v12 = vadd.f32 %v3305_v7, %v3304_v11 }
0x1709   : > { %v3265_v0 = vpop.permute.xlu0 %3264 }
0x170a   : > { %v3297_v6 = vmul.f32 %v3265_v0, %v5857_v61 }
0x170b   : > { %v3408_v57 = vpop.permute.xlu1 %3407 }
0x170c   : > { %v3307_v43 = vsel %vm2703_vm5, %v3297_v6, 0.0  ;;  %v3458_v15 = vmul.f32 %v3408_v57, %v5825_v3  ;;  %v4830_v6 = vld [vmem:[%s6282_s22 + $0x48] sm:$0xff]  }
0x170d   : > { %v3272_v23 = vpop.permute.xlu0 %3271  ;;  %v3308_v45 = vadd.f32 %v3307_v43, %v3306_v12  ;;  %4394 = vmatprep.subr.bf16.mxu0 %v4830_v6  ;;  %v4840_v12 = vld [vmem:[%s6282_s22 + $0x80] sm:$0xff]  }
0x170e   : > { %v3298_v8 = vmul.f32 %v3272_v23, %v5869_v47  ;;  %v3466_v51 = vsel %vm2703_vm5, %v3458_v15, 0.0  ;;  %4556 = vmatpush3.bf16.msra.mxu1 %v4840_v12 }
0x170f   : > { %v3415_v60 = vpop.permute.xlu1 %3414  ;;  %4557 = vmatprep.subr.bf16.mxu1 %v4992_v17 }
0x1710   : > { %v3459_v14 = vmul.f32 %v3415_v60, %v5836_v35  ;;  %v3309_v5 = vsel %vm2703_vm5, %v3298_v8, 0.0 }
0x1711   : > { %v3279_v13 = vpop.permute.xlu0 %3278  ;;  %v3310_v41 = vadd.f32 %v3309_v5, %v3308_v45  ;;  %v4833_v45 = vld [vmem:[%s6282_s22 + $0x10] sm:$0xff]  }
0x1712   : > { %v3299_v32 = vmul.f32 %v3279_v13, %v5881_v27  ;;  %v3467_v39 = vsel %vm2703_vm5, %v3459_v14, 0.0  ;;  %v4831_v13 = vld [vmem:[%s6282_s22 + $0x8] sm:$0xff]  }
0x1713   : > { %v3422_v22 = vpop.permute.xlu1 %3421  ;;  %v3468_v38 = vadd.f32 %v3467_v39, %v3466_v51  ;;  %4395 = vmatpush3.bf16.msra.mxu0 %v4831_v13  ;;  %v4835_v39 = vld [vmem:[%s6282_s22 + $0x18] sm:$0xff]   ;;  %v4841_v51 = vld [vmem:[%s6282_s22 + $0x70] sm:$0xff]  }
0x1714   : > { %v3460_v29 = vmul.f32 %v3422_v22, %v5848_v49  ;;  %v3311_v16 = vsel %vm2703_vm5, %v3299_v32, 0.0  ;;  %v4832_v32 = vld [vmem:[%s6282_s22 + $0x50] sm:$0xff]  }
0x1715   : > { %v3286_v25 = vpop.permute.xlu0 %3285  ;;  %v3312_v44 = vadd.f32 %v3311_v16, %v3310_v41  ;;  %4396 = vmatprep.subr.bf16.mxu0 %v4832_v32  ;;  %v4837_v16 = vld [vmem:[%s6282_s22 + $0x20] sm:$0xff]   ;;  %v4839_v41 = vld [vmem:[%s6282_s22 + $0x28] sm:$0xff]  }
0x1716   : > { %v3300_v9 = vmul.f32 %v3286_v25, %v5893_v19  ;;  %v3469_v4 = vsel %vm2703_vm5, %v3460_v29, 0.0  ;;  %v4834_v25 = vld [vmem:[%s6282_s22 + $0x58] sm:$0xff]  }
0x1717   : > { %v3429_v46 = vpop.permute.xlu1 %3428  ;;  %v3470_v60 = vadd.f32 %v3469_v4, %v3468_v38  ;;  %4397 = vmatpush3.bf16.msra.mxu0 %v4833_v45  ;;  %v4842_v4 = vld [vmem:[%s6282_s22 + $0x30] sm:$0xff]  }
0x1718   : > { %v3461_v40 = vmul.f32 %v3429_v46, %v5860_v62  ;;  %v3313_v42 = vsel %vm2703_vm5, %v3300_v9, 0.0  ;;  %4398 = vmatprep.subr.bf16.mxu0 %v4834_v25  ;;  %v4838_v9 = vld [vmem:[%s6282_s22 + $0x68] sm:$0xff]  }
0x1719   : > { %v3293_v10 = vpop.permute.xlu0 %3292  ;;  %v3314_v0 = vadd.f32 %v3313_v42, %v3312_v44 }
0x171a   : > { %v3471_v56 = vsel %vm2703_vm5, %v3461_v40, 0.0  ;;  %v3301_v53 = vmul.f32 %v3293_v10, %v5905_v50  ;;  %v4836_v40 = vld [vmem:[%s6282_s22 + $0x60] sm:$0xff]  }
0x171b   : > { %v3436_v63 = vpop.permute.xlu1 %3435  ;;  %v3472_v21 = vadd.f32 %v3471_v56, %v3470_v60  ;;  %4399 = vmatpush3.bf16.msra.mxu0 %v4835_v39 }
0x171c   : > { %v3462_v18 = vmul.f32 %v3436_v63, %v5872_v58  ;;  %v3315_v33 = vsel %vm2703_vm5, %v3301_v53, 0.0  ;;  %4400 = vmatprep.subr.bf16.mxu0 %v4836_v40 }
0x171d   : > { %v3316_v23 = vadd.f32 %v3315_v33, %v3314_v0 }
0x171e   : > { %v3473_v59 = vsel %vm2703_vm5, %v3462_v18, 0.0 }
0x171f   : > { %v3443_v55 = vpop.permute.xlu1 %3442  ;;  %v3474_v11 = vadd.f32 %v3473_v59, %v3472_v21  ;;  %3318 = vrot.lane.b32.xlu0 %v3316_v23, %s6309_s13  ;;  %4401 = vmatpush3.bf16.msra.mxu0 %v4837_v16 }
0x1720   : > { %v3463_v57 = vmul.f32 %v3443_v55, %v5884_v28  ;;  %4402 = vmatprep.subr.bf16.mxu0 %v4838_v9 }
0x1722   : > { %v3475_v7 = vsel %vm2703_vm5, %v3463_v57, 0.0 }
0x1723   : > { %v3450_v22 = vpop.permute.xlu1 %3449  ;;  %v3476_v14 = vadd.f32 %v3475_v7, %v3474_v11  ;;  %4403 = vmatpush3.bf16.msra.mxu0 %v4839_v41 }
0x1724   : > { %v3464_v8 = vmul.f32 %v3450_v22, %v5896_v20  ;;  %4404 = vmatprep.subr.bf16.mxu0 %v4841_v51  ;;  %v3165_v18 = vpop.permute.xlu0 %3164 }
0x1725   : > { %v3215_v33 = vmul.f32 %v3165_v18, %v5822_v54  ;;  %v4843_v18 = vld [vmem:[%s6282_s22 + $0x88] sm:$0xff]  }
0x1726   : > { %v3477_v46 = vsel %vm2703_vm5, %v3464_v8, 0.0  ;;  %4558 = vmatpush3.bf16.msra.mxu1 %v4843_v18 }
0x1727   : > { %v3457_v43 = vpop.permute.xlu1 %3456  ;;  %v3478_v29 = vadd.f32 %v3477_v46, %v3476_v14  ;;  %4405 = vmatpush3.bf16.msra.mxu0 %v4842_v4  ;;  %v3223_v6 = vsel %vm2703_vm5, %v3215_v33, 0.0  ;;  %4563 = vmatprep.subr.mxu1 %v4992_v17 }
0x1728   : > { %v3465_v15 = vmul.f32 %v3457_v43, %v5908_v52 }
0x172a   : > { %v3479_v5 = vsel %vm2703_vm5, %v3465_v15, 0.0 }
0x172b   : > { %v3480_v63 = vadd.f32 %v3479_v5, %v3478_v29  ;;  %v3329_v42 = vpop.permute.xlu0 %3328  ;;  %v3172_v38 = vpop.permute.xlu1 %3171 }
0x172c   : > { %v3216_v59 = vmul.f32 %v3172_v38, %v5833_v36  ;;  %v3379_v14 = vmul.f32 %v3329_v42, %v5825_v3 }
0x172d   : > { %3482 = vrot.lane.b32.xlu1 %v3480_v63, %s6309_s13 }
0x172e   : > { %v3224_v23 = vsel %vm2703_vm5, %v3216_v59, 0.0  ;;  %v3387_v45 = vsel %vm2703_vm5, %v3379_v14, 0.0 }
0x172f   : > { %v3179_v44 = vpop.permute.xlu0 %3178  ;;  %v3336_v55 = vpop.permute.xlu1 %3335  ;;  %v3225_v11 = vadd.f32 %v3224_v23, %v3223_v6 }
0x1730   : > { %v3217_v21 = vmul.f32 %v3179_v44, %v5845_v48  ;;  %v3380_v46 = vmul.f32 %v3336_v55, %v5836_v35  ;;  %v4844_v44 = vld [vmem:[%s6282_s22 + $0x78] sm:$0xff]  }
0x1731   : > { %4406 = vmatprep.subr.bf16.mxu0 %v4844_v44 }
0x1732   : > { %v3226_v7 = vsel %vm2703_vm5, %v3217_v21, 0.0 }
0x1733   : > { %v3186_v10 = vpop.permute.xlu0 %3185  ;;  %v3343_v56 = vpop.permute.xlu1 %3342  ;;  %v3227_v48 = vadd.f32 %v3226_v7, %v3225_v11 }
0x1734   : > { %v3218_v34 = vmul.f32 %v3186_v10, %v5857_v61  ;;  %v3381_v61 = vmul.f32 %v3343_v56, %v5848_v49 }
0x1736   : > { %v3228_v36 = vsel %vm2703_vm5, %v3218_v34, 0.0  ;;  %v3390_v3 = vsel %vm2703_vm5, %v3381_v61, 0.0 }
0x1737   : > { %v3193_v57 = vpop.permute.xlu0 %3192  ;;  %v3350_v53 = vpop.permute.xlu1 %3349  ;;  %v3229_v12 = vadd.f32 %v3228_v36, %v3227_v48  ;;  %v4272_v48 = vld [vmem:[%s6283_s23] ss:$0 sm:$0xff] }
0x1738   : > { %v3219_v8 = vmul.f32 %v3193_v57, %v5869_v47  ;;  %v3388_v47 = vsel %vm2703_vm5, %v3380_v46, 0.0  ;;  %v3382_v35 = vmul.f32 %v3350_v53, %v5860_v62 }
0x173a   : > { %v3230_v43 = vsel %vm2703_vm5, %v3219_v8, 0.0  ;;  %v3392_v39 = vsel %vm2703_vm5, %v3382_v35, 0.0 }
0x173b   : > { %v3200_v60 = vpop.permute.xlu0 %3199  ;;  %v3357_v0 = vpop.permute.xlu1 %3356  ;;  %v3231_v5 = vadd.f32 %v3230_v43, %v3229_v12 }
0x173c   : > { %v3220_v54 = vmul.f32 %v3200_v60, %v5881_v27  ;;  %v3383_v49 = vmul.f32 %v3357_v0, %v5872_v58 }
0x173e   : > { %v3232_v29 = vsel %vm2703_vm5, %v3220_v54, 0.0  ;;  %v3394_v41 = vsel %vm2703_vm5, %v3383_v49, 0.0 }
0x173f   : > { %v3207_v22 = vpop.permute.xlu0 %3206  ;;  %v3364_v24 = vpop.permute.xlu1 %3363  ;;  %v3233_v25 = vadd.f32 %v3232_v29, %v3231_v5 }
0x1740   : > { %v3221_v32 = vmul.f32 %v3207_v22, %v5893_v19  ;;  %v3389_v19 = vadd.f32 %v3388_v47, %v3387_v45  ;;  %v3384_v40 = vmul.f32 %v3364_v24, %v5884_v28 }
0x1742   : > { %v3234_v63 = vsel %vm2703_vm5, %v3221_v32, 0.0  ;;  %v3391_v16 = vadd.f32 %v3390_v3, %v3389_v19  ;;  %v3396_v42 = vsel %vm2703_vm5, %v3384_v40, 0.0 }
0x1743   : > { %v3214_v13 = vpop.permute.xlu0 %3213  ;;  %v3371_v15 = vpop.permute.xlu1 %3370  ;;  %v3235_v9 = vadd.f32 %v3234_v63, %v3233_v25 }
0x1744   : > { %v3222_v27 = vmul.f32 %v3214_v13, %v5905_v50  ;;  %v3385_v51 = vmul.f32 %v3371_v15, %v5896_v20  ;;  %v3393_v4 = vadd.f32 %v3392_v39, %v3391_v16  ;;  %v4845_v20 = vld [vmem:[%s6282_s22 + $0x38] sm:$0xff]  }
0x1745   : > { %4407 = vmatpush3.bf16.msra.mxu0 %v4845_v20 }
0x1746   : > { %v3236_v62 = vsel %vm2703_vm5, %v3222_v27, 0.0  ;;  %v3395_v55 = vadd.f32 %v3394_v41, %v3393_v4  ;;  %v3398_v56 = vsel %vm2703_vm5, %v3385_v51, 0.0 }
0x1747   : > { %v3378_v50 = vpop.permute.xlu1 %3377  ;;  %v3237_v58 = vadd.f32 %v3236_v62, %v3235_v9  ;;  %v3773_v9 = vld [vmem:[%s6310_s6] sm:$0x1f] }
0x1748   : > { %v3386_v28 = vmul.f32 %v3378_v50, %v5908_v52  ;;  %v3397_v52 = vadd.f32 %v3396_v42, %v3395_v55 }
0x174a   : > { %v3400_v57 = vsel %vm2703_vm5, %v3386_v28, 0.0  ;;  %v3399_v53 = vadd.f32 %v3398_v56, %v3397_v52 }
0x174c   : > { %v3401_v60 = vadd.f32 %v3400_v57, %v3399_v53 }
0x1791   : > { %v3319_v38 = vpop.permute.xlu0 %3318 }
0x1792   : > { %v3322_v10 = vsel %vm3321_vm13, %v3237_v58, %v3319_v38 }
0x1793   : > { %3486 = vst [vmem:[#allocation5] sm:$0x3] %v3322_v10 }
0x179f   : > { %v3483_v0 = vpop.permute.xlu1 %3482 }
0x17a0   : > { %v3485_v59 = vsel %vm3321_vm13, %v3401_v60, %v3483_v0 }
0x17a1   : > { %3487 = vst [vmem:[#allocation6] sm:$0x3] %v3485_v59  ;;  %v4823_v33 = vpack.i.bf16 %v3485_v59, %v3322_v10 }
0x17a3   : > { %4824 = vrot.lane.b32.xlu0 %v4823_v33, %s4996_s3 }
0x1815   : > { %v4825_v21 = vpop.permute.xlu0 %4824 }
0x1816   : > { %v4827_v22 = vunpack.i.h.bf16 %v4825_v21  ;;  %v4826_v23 = vunpack.i.l.bf16 %v4825_v21 }
0x1818   : > { %v3500_v34 = vpack.c.bf16 %v4827_v22, %v4827_v22  ;;  %v3496_v24 = vsel %vm991_vm12, %v5438_v31, %v4826_v23  ;;  %v3497_v6 = vsel %vm991_vm12, %v4826_v23, %v4827_v22 }
0x1819   : > { %v3499_v7 = vpack.c.bf16 %v3497_v6, %v3497_v6  ;;  %v3498_v8 = vpack.c.bf16 %v3496_v24, %v3496_v24 }
0x181a   : > { %4560 = vmatmul.mubr.msk.bf16.vlgmr.msra.gmra.mrb[0].mxu1 %vm991_vm12, %v3500_v34  ;;  %vm3735_vm12 = vcmask 33792  }
0x181b   : > { %3687 = vmatprep.mubr.bf16.mxu0 %v3499_v7  ;;  %4565 = vmatprep.mubr.msk.f32.mxu1 %vm4993_vm11, %v4992_v17  ;;  %vm3747_vm11 = vcmp.ge.s32.totalorder %v5300_v30, 1 }
0x181c   : > { %3688 = vmatmul.mubr.bf16.vlgmr.msra.gmra.mrb[0].mxu0 %v3498_v8  ;;  %4564 = vmatpush3.msk.msra.mxu1 %vm3778_vm4, %v3773_v9 }
0x18ed   : > { %v3729_v11 = vpop.f32.mrb[0].mxu1 }
0x18ee   : > { %v4561_v46 = vpop.f32.mrb[1].mxu1 }
0x18ef   : > { %v4408_v36 = vpop.f32.mrb[0].mxu0  ;;  %v3732_v54 = vpop.f32.mrb[2].mxu1 }
0x18f0   : > { %v4409_v31 = vpop.f32.mrb[1].mxu0  ;;  %v4562_v13 = vpop.f32.mrb[3].mxu1 }
0x18f1   : > { %v4410_v14 = vadd.f32 %v4409_v31, %v4408_v36  ;;  %v4411_v61 = vpop.f32.mrb[2].mxu0 }
0x18f2   : > { %v4412_v43 = vpop.f32.mrb[3].mxu0 }
0x18f3   : > { %v3690_v32 = vadd.f32 %v4410_v14, %v4272_v48 }
0x18f5   : > { %v3730_v12 = vadd.f32 %v3729_v11, %v3690_v32 }
0x18f7   : > { %v3736_v15 = vsel %vm3735_vm12, %v3730_v12, -inf }
0x18f8   : > { %3737 = vmax.xlane.f32.xlu1 %v3736_v15 }
0x1985   : > { %v3738_v47 = vpop.xlane.xlu1 %3737 }
0x1986   : > { %v3739_v35 = vsub.f32 %v3730_v12, %v3738_v47 }
0x1988   : > { %v3740_v29 = vmul.f32 1.442695, %v3739_v35 }
0x198a   : > { %4862 = vpow2.f32 %v3740_v29 }
0x1994   : > { %v4863_v27 = vpop.eup %4862 }
0x1995   : > { %v3742_v5 = vsel %vm3735_vm12, %v4863_v27, 0.0 }
0x1996   : > { %3743 = vadd.xlane.f32.xlu0 %v3742_v5 }
0x1a23   : > { %v3744_v45 = vpop.xlane.xlu0 %3743 }
0x1a24   : > { %4864 = vrcp.f32 %v3744_v45 }
0x1a2e   : > { %v4865_v3 = vpop.eup %4864 }
0x1a2f   : > { %v3746_v49 = vmul.f32 %v4865_v3, %v4863_v27 }
0x1a31   : > { %v3748_v63 = vsel %vm3747_vm11, %v3746_v49, -1.0 }
0x1a32   : > { %v3749_v19 = vsel %vm3735_vm12, %v3748_v63, -inf }
0x1a33   : > { %3750 = vmax.xlane.f32.xlu0 %v3749_v19 }
0x1ac0   : > { %v3751_v25 = vpop.xlane.xlu0 %3750 }
0x1ac1   : > { %vm3752_vm2 = vcmp.ge.f32.partialorder %v3748_v63, %v3751_v25 }
0x1ac2   : > { %vm3753_vm3 = vmand %vm3752_vm2, %vm3747_vm11 }
0x1ac3   : > { %v3754_v39 = vsel %vm3753_vm3, %v5300_v30, 5 }
0x1ac4   : > { %v3755_v40 = vsel %vm3735_vm12, %v3754_v39, 2147483647 }
0x1ac5   : > { %v3757_v62 = vshra.s32 %v3755_v40, 16  ;;  %v3756_v50 = vand.u32 65535, %v3755_v40 }
0x1ac7   : > { %v3759_v16 = vcvt.s32.f32 %v3757_v62  ;;  %v3758_v51 = vcvt.s32.f32 %v3756_v50 }
0x1ac9   : > { %3760 = vmin.xlane.f32.xlu1 %v3759_v16 }
0x1afc   : > { %3853 = vxpose.xlu1.b32.start.end [1/1] (short) (narrow) %v6030_v2, 8 }
0x1b00   : > { %3949 = vxpose.xlu1.b32.start.end [1/1] (short) (narrow) %v6078_v26, 8 }
0x1b56   : > { %v3761_v41 = vpop.xlane.xlu1 %3760 }
0x1b57   : > { %vm3762_vm5 = vcmp.eq.f32.partialorder %v3759_v16, %v3761_v41  ;;  %v3767_v2 = vcvt.f32.s32 %v3761_v41 }
0x1b58   : > { %v3763_v4 = vsel %vm3762_vm5, %v3758_v51, inf }
0x1b59   : > { %3764 = vmin.xlane.f32.xlu0 %v3763_v4  ;;  %v3768_v18 = vshll.u32 %v3767_v2, 16 }
0x1b7c   : > { %v3869_v58 = vpop.trf.xlu1 }
0x1b86   : > { %3885 = vxpose.xlu0.b32.start.end [1/1] (short) (narrow) %v6073_v1, 8 }
0x1b8a   : > { %3917 = vxpose.xlu0.b32.start.end [1/1] (short) (narrow) %v6039_v37, 8  ;;  %v3965_v37 = vpop.trf.xlu1 }
0x1bb3   : > { %3982 = vrot.lane.b32.xlu0 %v3869_v58, %s5015_s25 }
0x1be6   : > { %v3765_v26 = vpop.xlane.xlu0 %3764 }
0x1be7   : > { %v3766_v42 = vcvt.f32.s32 %v3765_v26 }
0x1be9   : > { %v3769_v28 = vadd.s32 %v3768_v18, %v3766_v42 }
0x1beb   : > { %vm3770_vm7 = vcmp.eq.s32.totalorder %v5300_v30, %v3769_v28 }
0x1bec   : > { %v4292_v38 = vsel %vm3770_vm7, 1.0, %v4992_v17 }
0x1bed   : > { %4566 = vmatmul.mubr.msk.f32.vlgmr.msra.gmra.mrb[4].mxu1 %vm3774_vm6, %v4292_v38 }
0x1c06   : > { %v3901_v44 = vpop.trf.xlu0 }
0x1c07   : > { %3986 = vrot.lane.b32.xlu1 %v3901_v44, %s5016_s1 }
0x1c0a   : > { %v3933_v1 = vpop.trf.xlu0 }
0x1c0b   : > { %3990 = vrot.lane.b32.xlu1 %v3933_v1, %s5017_s29 }
0x1c0f   : > { %3994 = vrot.lane.b32.xlu1 %v3965_v37, %s5018_s2 }
0x1c25   : > { %v3983_v10 = vpop.permute.xlu0 %3982 }
0x1c26   : > { %v3997_v30 = vsel %vm3774_vm6, %v3746_v49, %v3983_v10 }
0x1c79   : > { %v3987_v55 = vpop.permute.xlu1 %3986 }
0x1c7a   : > { %v3999_v17 = vsel %vm3998_vm8, %v3997_v30, %v3987_v55 }
0x1c7d   : > { %v3991_v20 = vpop.permute.xlu1 %3990 }
0x1c7e   : > { %v4001_v56 = vsel %vm4000_vm9, %v3999_v17, %v3991_v20 }
0x1c81   : > { %v3995_v52 = vpop.permute.xlu1 %3994 }
0x1c82   : > { %v4003_v57 = vsel %vm4002_vm10, %v4001_v56, %v3995_v52 }
0x1c83   : > { %4005 = vst.msk [vmem:[%s5181_s4] sm:$0x3] %vm4004_vm14, %v4003_v57 }
0x1cc0   : > { %v3848_v53 = vpop.f32.mrb[4].mxu1 }
0x1cc1   : > { %3852 = vst.msk [vmem:[#allocation7] sm:$0x3] %vm1655_vm0, %v3848_v53  ;;  %v4567_v60 = vpop.f32.mrb[5].mxu1 }
0x1cc2 PF: > { %s36_s27 = sadd.s32 1, %s4939_s27  }
0x1cc3   : > { %p33_p6 = scmp.ge.s32.totalorder %s36_s27, 5  }
0x1cc5   :  { %35 = sbr.rel (!%p33_p6) target bundleno = 12 (0xc), region = 247 }
0x1ccc   :  { %4025 = vsyncpa [#allocation14], 1 }
0x1ccd   :  { %4027 = vsyncpa [#allocation14 + $0x1], 1 }

</bundles_post_ra>
